<compile_context>
chip_gen: v7x
topology: tpu7x:2x2x1
jax: 0.10.0
libtpu: 0.0.40
codegen_flags: <defaults>
</compile_context>

<pallas_src>
import functools
import math

import jax
import jax.numpy as jnp
from jax.experimental import pallas as pl
from jax.experimental.pallas import tpu as pltpu

LOWER = 0.125
UPPER = 1.0 / 3.0
SLOPE = 0.5 * (LOWER + UPPER)   # RReLU eval-mode negative slope
EPS = 1e-5                      # BatchNorm3d default eps


def _round_up(v, m):
    return (v + m - 1) // m * m


def _cdiv(a, b):
    return -(-a // b)


def outconv_kernel(info_ref, x_cur_ref, x_halo_ref, scale_ref, shift_ref,
                   w_ref, b_ref, o_ref, a_scr, patch_scr, *,
                   tile, halo, chunk, plane, wp, dsz, hsz, wsz):
    """One (batch, spatial-tile) pair per grid step.

    info_ref:  (num_tiles+1, 2) SMEM   per-tile [row//plane, row%plane]
    x_cur_ref: (Cin, tile)             raw rows [t*tile, (t+1)*tile)
    x_halo_ref:(Cin, halo)             raw rows [(t+1)*tile, (t+1)*tile+halo)
    scale_ref: (Cin, 1)                gamma / sqrt(running_var + eps)
    shift_ref: (Cin, 1)                beta - running_mean * scale
    w_ref:     (Cout, 27*Cin)          conv taps, column = k*Cin + ci
    b_ref:     (Cout, 1)
    o_ref:     (Cout, tile)            conv output for rows [t*tile, (t+1)*tile)
    a_scr:     (Cin, tile+halo)        activated window (VMEM scratch)
    patch_scr: (27*Cin, chunk)         im2col slab (VMEM scratch)
    """
    t = pl.program_id(1)
    cin = x_cur_ref.shape[0]

    def valid_mask(d0, rem0, width):
        # (1, width) mask: True where padded-grid row (d0*plane + rem0 + i) is
        # a real voxel.  rem0 < plane and width <= tile + halo, so the f32
        # floor/reciprocal decomposition stays far below the 2^21 exactness
        # bound for any realistic (H+2)*(W+2); no vector integer division.
        local = jax.lax.broadcasted_iota(jnp.int32, (1, width), 1)
        rel = (rem0 + local).astype(jnp.float32)
        dd = jnp.floor((rel + 0.5) * (1.0 / plane))
        rem = rel - dd * plane
        hh = jnp.floor((rem + 0.5) * (1.0 / wp))
        ww = rem - hh * wp
        d = d0.astype(jnp.float32) + dd
        return ((d >= 1.0) & (d <= dsz) & (hh >= 1.0) & (hh <= hsz)
                & (ww >= 1.0) & (ww <= wsz))

    def activate(x_raw, vmask):
        a = x_raw * scale_ref[...] + shift_ref[...]   # BatchNorm (eval, folded)
        a = jnp.where(a >= 0.0, a, a * SLOPE)         # RReLU (eval slope)
        return jnp.where(vmask, a, 0.0)               # re-zero padding voxels

    # Activation window = tile rows + halo rows; each HBM row is DMA'd ~once.
    a_scr[:, pl.ds(0, tile)] = activate(
        x_cur_ref[...], valid_mask(info_ref[t, 0], info_ref[t, 1], tile))
    a_scr[:, pl.ds(tile, halo)] = activate(
        x_halo_ref[...], valid_mask(info_ref[t + 1, 0], info_ref[t + 1, 1], halo))

    # Conv3d: per chunk, gather the 27 shifted windows into an im2col slab and
    # issue ONE MXU dot with K = 27*Cin (instead of 27 nearly-empty matmuls).
    # Chunking keeps the live output block at (Cout, chunk) so vregs stay
    # bounded even with large DMA tiles.
    for c in range(tile // chunk):
        base = c * chunk
        k = 0
        for kd in range(3):
            for kh in range(3):
                for kw in range(3):
                    off = kd * plane + kh * wp + kw
                    patch_scr[pl.ds(k * cin, cin), :] = (
                        a_scr[:, pl.ds(base + off, chunk)])
                    k += 1
        out = jnp.dot(w_ref[...], patch_scr[...],
                      preferred_element_type=jnp.float32)
        o_ref[:, pl.ds(base, chunk)] = out + b_ref[...]


def outconv_forward(x, gamma, beta, running_mean, running_var, w, b,
                    *, tile_rows=2048, chunk=512):
    """x: (N, Cin, D, H, W) float32 (PyTorch NCDHW). Returns (N, Cout, D, H, W)."""
    N, Cin, D, H, W = x.shape
    Cout = w.shape[0]
    Dp, Hp, Wp = D + 2, H + 2, W + 2
    plane = Hp * Wp
    mpp = Dp * plane                               # rows of the padded grid
    max_off = 2 * plane + 2 * Wp + 2               # largest conv tap offset
    halo = _round_up(max_off, 128)
    step = (halo * chunk) // math.gcd(halo, chunk)  # tile % halo == tile % chunk == 0
    tile = _round_up(max(tile_rows, step), step)
    num_tiles = _cdiv(mpp, tile)
    need = num_tiles * tile + halo                 # rows the BlockSpecs may touch
    d_extra = _cdiv(need - mpp, plane)             # extra zero planes (tail + halo)
    total = (Dp + d_extra) * plane

    # ONE fused pad: spatial zero-padding (1 voxel per side) plus d_extra extra
    # zero planes covering the tile tail and the last halo block, then flatten
    # (D,H,W) into the lane axis.  No transposes, single HBM copy.
    x_flat = jnp.pad(
        x.astype(jnp.float32),
        ((0, 0), (0, 0), (1, 1 + d_extra), (1, 1), (1, 1)),
    ).reshape(N, Cin, total)

    # Eval-mode BatchNorm folded into per-channel scale / shift.
    inv_std = jax.lax.rsqrt(running_var.astype(jnp.float32) + EPS)
    g32 = gamma.astype(jnp.float32)
    scale = (g32 * inv_std).reshape(Cin, 1)
    shift = (beta.astype(jnp.float32)
             - running_mean.astype(jnp.float32) * g32 * inv_std).reshape(Cin, 1)

    # Conv weights (Cout, Cin, 3,3,3) -> (Cout, 27*Cin); column = k*Cin + ci
    # with tap k = kd*9 + kh*3 + kw, matching the in-kernel im2col row order.
    w2 = jnp.transpose(w.astype(jnp.float32), (0, 2, 3, 4, 1)).reshape(Cout, 27 * Cin)
    b2 = b.astype(jnp.float32).reshape(Cout, 1)

    # Per-tile scalar decomposition of the window base row, scalar-prefetched
    # into SMEM (no in-kernel integer division, no large-row f32 hazard).
    starts = jnp.arange(num_tiles + 1, dtype=jnp.int32) * tile
    info = jnp.stack([starts // plane, starts % plane], axis=1)

    kernel = functools.partial(
        outconv_kernel, tile=tile, halo=halo, chunk=chunk, plane=plane, wp=Wp,
        dsz=D, hsz=H, wsz=W)

    out_flat = pl.pallas_call(
        kernel,
        out_shape=jax.ShapeDtypeStruct((N, Cout, num_tiles * tile), jnp.float32),
        grid_spec=pltpu.PrefetchScalarGridSpec(
            num_scalar_prefetch=1,
            grid=(N, num_tiles),
            in_specs=[
                pl.BlockSpec((None, Cin, tile),
                             lambda n, t, info: (n, 0, t)),                    # x tile
                pl.BlockSpec((None, Cin, halo),
                             lambda n, t, info: (n, 0, (t + 1) * (tile // halo))),  # x halo
                pl.BlockSpec((Cin, 1), lambda n, t, info: (0, 0)),             # BN scale
                pl.BlockSpec((Cin, 1), lambda n, t, info: (0, 0)),             # BN shift
                pl.BlockSpec((Cout, 27 * Cin), lambda n, t, info: (0, 0)),     # conv W
                pl.BlockSpec((Cout, 1), lambda n, t, info: (0, 0)),            # conv b
            ],
            out_specs=pl.BlockSpec((None, Cout, tile),
                                   lambda n, t, info: (n, 0, t)),
            scratch_shapes=[
                pltpu.VMEM((Cin, tile + halo), jnp.float32),   # activation window
                pltpu.VMEM((27 * Cin, chunk), jnp.float32),    # im2col slab
            ],
        ),
        compiler_params=pltpu.CompilerParams(
            dimension_semantics=("parallel", "parallel")),
    )(info, x_flat, x_flat, scale, shift, w2, b2)

    # Crop the padded-grid output back to (N, Cout, D, H, W) (already NCDHW).
    out = out_flat[:, :, :mpp].reshape(N, Cout, Dp, Hp, Wp)
    return out[:, :, :D, :H, :W]


def reference_forward(x, gamma, beta, running_mean, running_var, w, b):
    """Pure-JAX reference for the eval-mode forward pass."""
    bshape = (1, -1, 1, 1, 1)
    act = (x - running_mean.reshape(bshape)) / jnp.sqrt(
        running_var.reshape(bshape) + EPS)
    act = act * gamma.reshape(bshape) + beta.reshape(bshape)
    act = jnp.where(act >= 0.0, act, act * SLOPE)
    out = jax.lax.conv_general_dilated(
        act, w, window_strides=(1, 1, 1), padding=[(1, 1)] * 3,
        dimension_numbers=("NCDHW", "OIDHW", "NCDHW"))
    return out + b.reshape(1, -1, 1, 1, 1)


if __name__ == "__main__":
    N, Cin, Cout, D, H, W = 2, 4, 2, 8, 8, 8

    key = jax.random.PRNGKey(0)
    ks = jax.random.split(key, 7)
    x = jax.random.normal(ks[0], (N, Cin, D, H, W), jnp.float32)
    gamma = 0.5 + jax.random.uniform(ks[1], (Cin,), jnp.float32)
    beta = 0.1 * jax.random.normal(ks[2], (Cin,), jnp.float32)
    running_mean = 0.1 * jax.random.normal(ks[3], (Cin,), jnp.float32)
    running_var = 0.5 + jax.random.uniform(ks[4], (Cin,), jnp.float32)
    w = 0.1 * jax.random.normal(ks[5], (Cout, Cin, 3, 3, 3), jnp.float32)
    b = 0.1 * jax.random.normal(ks[6], (Cout,), jnp.float32)

    out = outconv_forward(x, gamma, beta, running_mean, running_var, w, b)
    out = jax.block_until_ready(out)

    ref = reference_forward(x, gamma, beta, running_mean, running_var, w, b)
    assert out.shape == (N, Cout, D, H, W), out.shape
    assert jnp.allclose(out, ref, rtol=2e-3, atol=2e-3), (
        float(jnp.max(jnp.abs(out - ref))))

    print("KERNEL_OK")
</pallas_src>

<mosaic_0001>
module attributes {stable_mosaic.version = 11 : i64} {
  func.func @outconv_kernel(%arg0: i32, %arg1: i32, %arg2: memref<2x2xi32, #tpu.memory_space<smem>>, %arg3: memref<1x4x2048xf32, #tpu.memory_space<vmem>>, %arg4: memref<1x4x256xf32, #tpu.memory_space<vmem>>, %arg5: memref<4x1xf32, #tpu.memory_space<vmem>>, %arg6: memref<4x1xf32, #tpu.memory_space<vmem>>, %arg7: memref<2x108xf32, #tpu.memory_space<vmem>>, %arg8: memref<2x1xf32, #tpu.memory_space<vmem>>, %arg9: memref<1x2x2048xf32, #tpu.memory_space<vmem>>, %arg10: memref<4x2304xf32, #tpu.memory_space<vmem>>, %arg11: memref<108x512xf32, #tpu.memory_space<vmem>>) attributes {dimension_semantics = [#tpu.dimension_semantics<parallel>, #tpu.dimension_semantics<parallel>], iteration_bounds = array<i64: 2, 1>, scalar_prefetch = 1 : i64, scratch_operands = 2 : i64, tpu.core_type = #tpu.core_type<tc>, window_params = [{transform_indices = @transform_0, window_bounds = array<i64: 1, 4, 2048>}, {transform_indices = @transform_1, window_bounds = array<i64: 1, 4, 256>}, {pipeline_mode = #tpu.pipeline_mode<synchronous>, transform_indices = @transform_2, window_bounds = array<i64: 4, 1>}, {pipeline_mode = #tpu.pipeline_mode<synchronous>, transform_indices = @transform_3, window_bounds = array<i64: 4, 1>}, {pipeline_mode = #tpu.pipeline_mode<synchronous>, transform_indices = @transform_4, window_bounds = array<i64: 2, 108>}, {pipeline_mode = #tpu.pipeline_mode<synchronous>, transform_indices = @transform_5, window_bounds = array<i64: 2, 1>}, {transform_indices = @transform_6, window_bounds = array<i64: 1, 2, 2048>}]} {
    %c0 = arith.constant 0 : index
    %c0_0 = arith.constant 0 : index
    %c0_1 = arith.constant 0 : index
    %0 = vector.load %arg3[%c0, %c0_0, %c0_1] : memref<1x4x2048xf32, #tpu.memory_space<vmem>>, vector<1x4x2048xf32>
    %1 = vector.shape_cast %0 : vector<1x4x2048xf32> to vector<4x2048xf32>
    %2 = arith.index_cast %arg1 : i32 to index
    %c0_2 = arith.constant 0 : index
    %3 = memref.load %arg2[%2, %c0_2] : memref<2x2xi32, #tpu.memory_space<smem>>
    %4 = arith.index_cast %arg1 : i32 to index
    %c1 = arith.constant 1 : index
    %5 = memref.load %arg2[%4, %c1] : memref<2x2xi32, #tpu.memory_space<smem>>
    %6 = tpu.iota {dimensions = array<i32: 1>} : vector<1x2048xi32>
    %7 = vector.broadcast %5 : i32 to vector<1x2048xi32>
    %8 = arith.addi %7, %6 : vector<1x2048xi32>
    %9 = arith.sitofp %8 : vector<1x2048xi32> to vector<1x2048xf32>
    %cst = arith.constant 5.000000e-01 : f32
    %10 = vector.broadcast %cst : f32 to vector<1x2048xf32>
    %11 = arith.addf %9, %10 : vector<1x2048xf32>
    %cst_3 = arith.constant 0.00999999977 : f32
    %12 = vector.broadcast %cst_3 : f32 to vector<1x2048xf32>
    %13 = arith.mulf %11, %12 : vector<1x2048xf32>
    %14 = math.floor %13 : vector<1x2048xf32>
    %cst_4 = arith.constant 1.000000e+02 : f32
    %15 = vector.broadcast %cst_4 : f32 to vector<1x2048xf32>
    %16 = arith.mulf %14, %15 : vector<1x2048xf32>
    %17 = arith.subf %9, %16 : vector<1x2048xf32>
    %cst_5 = arith.constant 5.000000e-01 : f32
    %18 = vector.broadcast %cst_5 : f32 to vector<1x2048xf32>
    %19 = arith.addf %17, %18 : vector<1x2048xf32>
    %cst_6 = arith.constant 1.000000e-01 : f32
    %20 = vector.broadcast %cst_6 : f32 to vector<1x2048xf32>
    %21 = arith.mulf %19, %20 : vector<1x2048xf32>
    %22 = math.floor %21 : vector<1x2048xf32>
    %cst_7 = arith.constant 1.000000e+01 : f32
    %23 = vector.broadcast %cst_7 : f32 to vector<1x2048xf32>
    %24 = arith.mulf %22, %23 : vector<1x2048xf32>
    %25 = arith.subf %17, %24 : vector<1x2048xf32>
    %26 = arith.sitofp %3 : i32 to f32
    %27 = vector.broadcast %26 : f32 to vector<1x2048xf32>
    %28 = arith.addf %27, %14 : vector<1x2048xf32>
    %cst_8 = arith.constant 1.000000e+00 : f32
    %29 = vector.broadcast %cst_8 : f32 to vector<1x2048xf32>
    %30 = arith.cmpf oge, %28, %29 : vector<1x2048xf32>
    %cst_9 = arith.constant 8.000000e+00 : f32
    %31 = vector.broadcast %cst_9 : f32 to vector<1x2048xf32>
    %32 = arith.cmpf ole, %28, %31 : vector<1x2048xf32>
    %33 = arith.andi %30, %32 : vector<1x2048xi1>
    %cst_10 = arith.constant 1.000000e+00 : f32
    %34 = vector.broadcast %cst_10 : f32 to vector<1x2048xf32>
    %35 = arith.cmpf oge, %22, %34 : vector<1x2048xf32>
    %36 = arith.andi %33, %35 : vector<1x2048xi1>
    %cst_11 = arith.constant 8.000000e+00 : f32
    %37 = vector.broadcast %cst_11 : f32 to vector<1x2048xf32>
    %38 = arith.cmpf ole, %22, %37 : vector<1x2048xf32>
    %39 = arith.andi %36, %38 : vector<1x2048xi1>
    %cst_12 = arith.constant 1.000000e+00 : f32
    %40 = vector.broadcast %cst_12 : f32 to vector<1x2048xf32>
    %41 = arith.cmpf oge, %25, %40 : vector<1x2048xf32>
    %42 = arith.andi %39, %41 : vector<1x2048xi1>
    %cst_13 = arith.constant 8.000000e+00 : f32
    %43 = vector.broadcast %cst_13 : f32 to vector<1x2048xf32>
    %44 = arith.cmpf ole, %25, %43 : vector<1x2048xf32>
    %45 = arith.andi %42, %44 : vector<1x2048xi1>
    %c0_14 = arith.constant 0 : index
    %c0_15 = arith.constant 0 : index
    %46 = vector.load %arg5[%c0_14, %c0_15] : memref<4x1xf32, #tpu.memory_space<vmem>>, vector<4x1xf32>
    %47 = vector.broadcast %46 : vector<4x1xf32> to vector<4x2048xf32>
    %48 = arith.mulf %1, %47 : vector<4x2048xf32>
    %c0_16 = arith.constant 0 : index
    %c0_17 = arith.constant 0 : index
    %49 = vector.load %arg6[%c0_16, %c0_17] : memref<4x1xf32, #tpu.memory_space<vmem>>, vector<4x1xf32>
    %50 = vector.broadcast %49 : vector<4x1xf32> to vector<4x2048xf32>
    %51 = arith.addf %48, %50 : vector<4x2048xf32>
    %cst_18 = arith.constant 0.000000e+00 : f32
    %52 = vector.broadcast %cst_18 : f32 to vector<4x2048xf32>
    %53 = arith.cmpf oge, %51, %52 : vector<4x2048xf32>
    %cst_19 = arith.constant 0.229166672 : f32
    %54 = vector.broadcast %cst_19 : f32 to vector<4x2048xf32>
    %55 = arith.mulf %51, %54 : vector<4x2048xf32>
    %56 = arith.select %53, %51, %55 : vector<4x2048xi1>, vector<4x2048xf32>
    %cst_20 = arith.constant 0.000000e+00 : f32
    %57 = vector.shape_cast %45 : vector<1x2048xi1> to vector<1x2048xi1>
    %58 = vector.broadcast %57 : vector<1x2048xi1> to vector<4x2048xi1>
    %59 = vector.broadcast %cst_20 : f32 to vector<4x2048xf32>
    %60 = arith.select %58, %56, %59 : vector<4x2048xi1>, vector<4x2048xf32>
    %c0_21 = arith.constant 0 : index
    %c0_22 = arith.constant 0 : index
    %61 = vector.load %arg10[%c0_21, %c0_22] : memref<4x2304xf32, #tpu.memory_space<vmem>>, vector<4x2048xf32>
    tpu.vector_store %arg10[%c0_21, %c0_22], %60 {strides = array<i32>} : memref<4x2304xf32, #tpu.memory_space<vmem>>, vector<4x2048xf32>,
    %c0_23 = arith.constant 0 : index
    %c0_24 = arith.constant 0 : index
    %c0_25 = arith.constant 0 : index
    %62 = vector.load %arg4[%c0_23, %c0_24, %c0_25] : memref<1x4x256xf32, #tpu.memory_space<vmem>>, vector<1x4x256xf32>
    %63 = vector.shape_cast %62 : vector<1x4x256xf32> to vector<4x256xf32>
    %c1_i32 = arith.constant 1 : i32
    %64 = arith.addi %arg1, %c1_i32 : i32
    %65 = arith.index_cast %64 : i32 to index
    %c0_26 = arith.constant 0 : index
    %66 = memref.load %arg2[%65, %c0_26] : memref<2x2xi32, #tpu.memory_space<smem>>
    %c1_i32_27 = arith.constant 1 : i32
    %67 = arith.addi %arg1, %c1_i32_27 : i32
    %68 = arith.index_cast %67 : i32 to index
    %c1_28 = arith.constant 1 : index
    %69 = memref.load %arg2[%68, %c1_28] : memref<2x2xi32, #tpu.memory_space<smem>>
    %70 = tpu.iota {dimensions = array<i32: 1>} : vector<1x256xi32>
    %71 = vector.broadcast %69 : i32 to vector<1x256xi32>
    %72 = arith.addi %71, %70 : vector<1x256xi32>
    %73 = arith.sitofp %72 : vector<1x256xi32> to vector<1x256xf32>
    %cst_29 = arith.constant 5.000000e-01 : f32
    %74 = vector.broadcast %cst_29 : f32 to vector<1x256xf32>
    %75 = arith.addf %73, %74 : vector<1x256xf32>
    %cst_30 = arith.constant 0.00999999977 : f32
    %76 = vector.broadcast %cst_30 : f32 to vector<1x256xf32>
    %77 = arith.mulf %75, %76 : vector<1x256xf32>
    %78 = math.floor %77 : vector<1x256xf32>
    %cst_31 = arith.constant 1.000000e+02 : f32
    %79 = vector.broadcast %cst_31 : f32 to vector<1x256xf32>
    %80 = arith.mulf %78, %79 : vector<1x256xf32>
    %81 = arith.subf %73, %80 : vector<1x256xf32>
    %cst_32 = arith.constant 5.000000e-01 : f32
    %82 = vector.broadcast %cst_32 : f32 to vector<1x256xf32>
    %83 = arith.addf %81, %82 : vector<1x256xf32>
    %cst_33 = arith.constant 1.000000e-01 : f32
    %84 = vector.broadcast %cst_33 : f32 to vector<1x256xf32>
    %85 = arith.mulf %83, %84 : vector<1x256xf32>
    %86 = math.floor %85 : vector<1x256xf32>
    %cst_34 = arith.constant 1.000000e+01 : f32
    %87 = vector.broadcast %cst_34 : f32 to vector<1x256xf32>
    %88 = arith.mulf %86, %87 : vector<1x256xf32>
    %89 = arith.subf %81, %88 : vector<1x256xf32>
    %90 = arith.sitofp %66 : i32 to f32
    %91 = vector.broadcast %90 : f32 to vector<1x256xf32>
    %92 = arith.addf %91, %78 : vector<1x256xf32>
    %cst_35 = arith.constant 1.000000e+00 : f32
    %93 = vector.broadcast %cst_35 : f32 to vector<1x256xf32>
    %94 = arith.cmpf oge, %92, %93 : vector<1x256xf32>
    %cst_36 = arith.constant 8.000000e+00 : f32
    %95 = vector.broadcast %cst_36 : f32 to vector<1x256xf32>
    %96 = arith.cmpf ole, %92, %95 : vector<1x256xf32>
    %97 = arith.andi %94, %96 : vector<1x256xi1>
    %cst_37 = arith.constant 1.000000e+00 : f32
    %98 = vector.broadcast %cst_37 : f32 to vector<1x256xf32>
    %99 = arith.cmpf oge, %86, %98 : vector<1x256xf32>
    %100 = arith.andi %97, %99 : vector<1x256xi1>
    %cst_38 = arith.constant 8.000000e+00 : f32
    %101 = vector.broadcast %cst_38 : f32 to vector<1x256xf32>
    %102 = arith.cmpf ole, %86, %101 : vector<1x256xf32>
    %103 = arith.andi %100, %102 : vector<1x256xi1>
    %cst_39 = arith.constant 1.000000e+00 : f32
    %104 = vector.broadcast %cst_39 : f32 to vector<1x256xf32>
    %105 = arith.cmpf oge, %89, %104 : vector<1x256xf32>
    %106 = arith.andi %103, %105 : vector<1x256xi1>
    %cst_40 = arith.constant 8.000000e+00 : f32
    %107 = vector.broadcast %cst_40 : f32 to vector<1x256xf32>
    %108 = arith.cmpf ole, %89, %107 : vector<1x256xf32>
    %109 = arith.andi %106, %108 : vector<1x256xi1>
    %c0_41 = arith.constant 0 : index
    %c0_42 = arith.constant 0 : index
    %110 = vector.load %arg5[%c0_41, %c0_42] : memref<4x1xf32, #tpu.memory_space<vmem>>, vector<4x1xf32>
    %111 = vector.broadcast %110 : vector<4x1xf32> to vector<4x256xf32>
    %112 = arith.mulf %63, %111 : vector<4x256xf32>
    %c0_43 = arith.constant 0 : index
    %c0_44 = arith.constant 0 : index
    %113 = vector.load %arg6[%c0_43, %c0_44] : memref<4x1xf32, #tpu.memory_space<vmem>>, vector<4x1xf32>
    %114 = vector.broadcast %113 : vector<4x1xf32> to vector<4x256xf32>
    %115 = arith.addf %112, %114 : vector<4x256xf32>
    %cst_45 = arith.constant 0.000000e+00 : f32
    %116 = vector.broadcast %cst_45 : f32 to vector<4x256xf32>
    %117 = arith.cmpf oge, %115, %116 : vector<4x256xf32>
    %cst_46 = arith.constant 0.229166672 : f32
    %118 = vector.broadcast %cst_46 : f32 to vector<4x256xf32>
    %119 = arith.mulf %115, %118 : vector<4x256xf32>
    %120 = arith.select %117, %115, %119 : vector<4x256xi1>, vector<4x256xf32>
    %cst_47 = arith.constant 0.000000e+00 : f32
    %121 = vector.shape_cast %109 : vector<1x256xi1> to vector<1x256xi1>
    %122 = vector.broadcast %121 : vector<1x256xi1> to vector<4x256xi1>
    %123 = vector.broadcast %cst_47 : f32 to vector<4x256xf32>
    %124 = arith.select %122, %120, %123 : vector<4x256xi1>, vector<4x256xf32>
    %c0_48 = arith.constant 0 : index
    %c2048 = arith.constant 2048 : index
    %125 = vector.load %arg10[%c0_48, %c2048] : memref<4x2304xf32, #tpu.memory_space<vmem>>, vector<4x256xf32>
    tpu.vector_store %arg10[%c0_48, %c2048], %124 {strides = array<i32>} : memref<4x2304xf32, #tpu.memory_space<vmem>>, vector<4x256xf32>,
    %c0_49 = arith.constant 0 : index
    %c0_50 = arith.constant 0 : index
    %126 = vector.load %arg10[%c0_49, %c0_50] : memref<4x2304xf32, #tpu.memory_space<vmem>>, vector<4x512xf32>
    %c0_51 = arith.constant 0 : index
    %c0_52 = arith.constant 0 : index
    %127 = vector.load %arg11[%c0_51, %c0_52] : memref<108x512xf32, #tpu.memory_space<vmem>>, vector<4x512xf32>
    tpu.vector_store %arg11[%c0_51, %c0_52], %126 {strides = array<i32>} : memref<108x512xf32, #tpu.memory_space<vmem>>, vector<4x512xf32>,
    %c0_53 = arith.constant 0 : index
    %c1_54 = arith.constant 1 : index
    %128 = vector.load %arg10[%c0_53, %c1_54] : memref<4x2304xf32, #tpu.memory_space<vmem>>, vector<4x512xf32>
    %c4 = arith.constant 4 : index
    %c0_55 = arith.constant 0 : index
    %129 = vector.load %arg11[%c4, %c0_55] : memref<108x512xf32, #tpu.memory_space<vmem>>, vector<4x512xf32>
    tpu.vector_store %arg11[%c4, %c0_55], %128 {strides = array<i32>} : memref<108x512xf32, #tpu.memory_space<vmem>>, vector<4x512xf32>,
    %c0_56 = arith.constant 0 : index
    %c2 = arith.constant 2 : index
    %130 = vector.load %arg10[%c0_56, %c2] : memref<4x2304xf32, #tpu.memory_space<vmem>>, vector<4x512xf32>
    %c8 = arith.constant 8 : index
    %c0_57 = arith.constant 0 : index
    %131 = vector.load %arg11[%c8, %c0_57] : memref<108x512xf32, #tpu.memory_space<vmem>>, vector<4x512xf32>
    tpu.vector_store %arg11[%c8, %c0_57], %130 {strides = array<i32>} : memref<108x512xf32, #tpu.memory_space<vmem>>, vector<4x512xf32>,
    %c0_58 = arith.constant 0 : index
    %c10 = arith.constant 10 : index
    %132 = vector.load %arg10[%c0_58, %c10] : memref<4x2304xf32, #tpu.memory_space<vmem>>, vector<4x512xf32>
    %c12 = arith.constant 12 : index
    %c0_59 = arith.constant 0 : index
    %133 = vector.load %arg11[%c12, %c0_59] : memref<108x512xf32, #tpu.memory_space<vmem>>, vector<4x512xf32>
    tpu.vector_store %arg11[%c12, %c0_59], %132 {strides = array<i32>} : memref<108x512xf32, #tpu.memory_space<vmem>>, vector<4x512xf32>,
    %c0_60 = arith.constant 0 : index
    %c11 = arith.constant 11 : index
    %134 = vector.load %arg10[%c0_60, %c11] : memref<4x2304xf32, #tpu.memory_space<vmem>>, vector<4x512xf32>
    %c16 = arith.constant 16 : index
    %c0_61 = arith.constant 0 : index
    %135 = vector.load %arg11[%c16, %c0_61] : memref<108x512xf32, #tpu.memory_space<vmem>>, vector<4x512xf32>
    tpu.vector_store %arg11[%c16, %c0_61], %134 {strides = array<i32>} : memref<108x512xf32, #tpu.memory_space<vmem>>, vector<4x512xf32>,
    %c0_62 = arith.constant 0 : index
    %c12_63 = arith.constant 12 : index
    %136 = vector.load %arg10[%c0_62, %c12_63] : memref<4x2304xf32, #tpu.memory_space<vmem>>, vector<4x512xf32>
    %c20 = arith.constant 20 : index
    %c0_64 = arith.constant 0 : index
    %137 = vector.load %arg11[%c20, %c0_64] : memref<108x512xf32, #tpu.memory_space<vmem>>, vector<4x512xf32>
    tpu.vector_store %arg11[%c20, %c0_64], %136 {strides = array<i32>} : memref<108x512xf32, #tpu.memory_space<vmem>>, vector<4x512xf32>,
    %c0_65 = arith.constant 0 : index
    %c20_66 = arith.constant 20 : index
    %138 = vector.load %arg10[%c0_65, %c20_66] : memref<4x2304xf32, #tpu.memory_space<vmem>>, vector<4x512xf32>
    %c24 = arith.constant 24 : index
    %c0_67 = arith.constant 0 : index
    %139 = vector.load %arg11[%c24, %c0_67] : memref<108x512xf32, #tpu.memory_space<vmem>>, vector<4x512xf32>
    tpu.vector_store %arg11[%c24, %c0_67], %138 {strides = array<i32>} : memref<108x512xf32, #tpu.memory_space<vmem>>, vector<4x512xf32>,
    %c0_68 = arith.constant 0 : index
    %c21 = arith.constant 21 : index
    %140 = vector.load %arg10[%c0_68, %c21] : memref<4x2304xf32, #tpu.memory_space<vmem>>, vector<4x512xf32>
    %c28 = arith.constant 28 : index
    %c0_69 = arith.constant 0 : index
    %141 = vector.load %arg11[%c28, %c0_69] : memref<108x512xf32, #tpu.memory_space<vmem>>, vector<4x512xf32>
    tpu.vector_store %arg11[%c28, %c0_69], %140 {strides = array<i32>} : memref<108x512xf32, #tpu.memory_space<vmem>>, vector<4x512xf32>,
    %c0_70 = arith.constant 0 : index
    %c22 = arith.constant 22 : index
    %142 = vector.load %arg10[%c0_70, %c22] : memref<4x2304xf32, #tpu.memory_space<vmem>>, vector<4x512xf32>
    %c32 = arith.constant 32 : index
    %c0_71 = arith.constant 0 : index
    %143 = vector.load %arg11[%c32, %c0_71] : memref<108x512xf32, #tpu.memory_space<vmem>>, vector<4x512xf32>
    tpu.vector_store %arg11[%c32, %c0_71], %142 {strides = array<i32>} : memref<108x512xf32, #tpu.memory_space<vmem>>, vector<4x512xf32>,
    %c0_72 = arith.constant 0 : index
    %c100 = arith.constant 100 : index
    %144 = vector.load %arg10[%c0_72, %c100] : memref<4x2304xf32, #tpu.memory_space<vmem>>, vector<4x512xf32>
    %c36 = arith.constant 36 : index
    %c0_73 = arith.constant 0 : index
    %145 = vector.load %arg11[%c36, %c0_73] : memref<108x512xf32, #tpu.memory_space<vmem>>, vector<4x512xf32>
    tpu.vector_store %arg11[%c36, %c0_73], %144 {strides = array<i32>} : memref<108x512xf32, #tpu.memory_space<vmem>>, vector<4x512xf32>,
    %c0_74 = arith.constant 0 : index
    %c101 = arith.constant 101 : index
    %146 = vector.load %arg10[%c0_74, %c101] : memref<4x2304xf32, #tpu.memory_space<vmem>>, vector<4x512xf32>
    %c40 = arith.constant 40 : index
    %c0_75 = arith.constant 0 : index
    %147 = vector.load %arg11[%c40, %c0_75] : memref<108x512xf32, #tpu.memory_space<vmem>>, vector<4x512xf32>
    tpu.vector_store %arg11[%c40, %c0_75], %146 {strides = array<i32>} : memref<108x512xf32, #tpu.memory_space<vmem>>, vector<4x512xf32>,
    %c0_76 = arith.constant 0 : index
    %c102 = arith.constant 102 : index
    %148 = vector.load %arg10[%c0_76, %c102] : memref<4x2304xf32, #tpu.memory_space<vmem>>, vector<4x512xf32>
    %c44 = arith.constant 44 : index
    %c0_77 = arith.constant 0 : index
    %149 = vector.load %arg11[%c44, %c0_77] : memref<108x512xf32, #tpu.memory_space<vmem>>, vector<4x512xf32>
    tpu.vector_store %arg11[%c44, %c0_77], %148 {strides = array<i32>} : memref<108x512xf32, #tpu.memory_space<vmem>>, vector<4x512xf32>,
    %c0_78 = arith.constant 0 : index
    %c110 = arith.constant 110 : index
    %150 = vector.load %arg10[%c0_78, %c110] : memref<4x2304xf32, #tpu.memory_space<vmem>>, vector<4x512xf32>
    %c48 = arith.constant 48 : index
    %c0_79 = arith.constant 0 : index
    %151 = vector.load %arg11[%c48, %c0_79] : memref<108x512xf32, #tpu.memory_space<vmem>>, vector<4x512xf32>
    tpu.vector_store %arg11[%c48, %c0_79], %150 {strides = array<i32>} : memref<108x512xf32, #tpu.memory_space<vmem>>, vector<4x512xf32>,
    %c0_80 = arith.constant 0 : index
    %c111 = arith.constant 111 : index
    %152 = vector.load %arg10[%c0_80, %c111] : memref<4x2304xf32, #tpu.memory_space<vmem>>, vector<4x512xf32>
    %c52 = arith.constant 52 : index
    %c0_81 = arith.constant 0 : index
    %153 = vector.load %arg11[%c52, %c0_81] : memref<108x512xf32, #tpu.memory_space<vmem>>, vector<4x512xf32>
    tpu.vector_store %arg11[%c52, %c0_81], %152 {strides = array<i32>} : memref<108x512xf32, #tpu.memory_space<vmem>>, vector<4x512xf32>,
    %c0_82 = arith.constant 0 : index
    %c112 = arith.constant 112 : index
    %154 = vector.load %arg10[%c0_82, %c112] : memref<4x2304xf32, #tpu.memory_space<vmem>>, vector<4x512xf32>
    %c56 = arith.constant 56 : index
    %c0_83 = arith.constant 0 : index
    %155 = vector.load %arg11[%c56, %c0_83] : memref<108x512xf32, #tpu.memory_space<vmem>>, vector<4x512xf32>
    tpu.vector_store %arg11[%c56, %c0_83], %154 {strides = array<i32>} : memref<108x512xf32, #tpu.memory_space<vmem>>, vector<4x512xf32>,
    %c0_84 = arith.constant 0 : index
    %c120 = arith.constant 120 : index
    %156 = vector.load %arg10[%c0_84, %c120] : memref<4x2304xf32, #tpu.memory_space<vmem>>, vector<4x512xf32>
    %c60 = arith.constant 60 : index
    %c0_85 = arith.constant 0 : index
    %157 = vector.load %arg11[%c60, %c0_85] : memref<108x512xf32, #tpu.memory_space<vmem>>, vector<4x512xf32>
    tpu.vector_store %arg11[%c60, %c0_85], %156 {strides = array<i32>} : memref<108x512xf32, #tpu.memory_space<vmem>>, vector<4x512xf32>,
    %c0_86 = arith.constant 0 : index
    %c121 = arith.constant 121 : index
    %158 = vector.load %arg10[%c0_86, %c121] : memref<4x2304xf32, #tpu.memory_space<vmem>>, vector<4x512xf32>
    %c64 = arith.constant 64 : index
    %c0_87 = arith.constant 0 : index
    %159 = vector.load %arg11[%c64, %c0_87] : memref<108x512xf32, #tpu.memory_space<vmem>>, vector<4x512xf32>
    tpu.vector_store %arg11[%c64, %c0_87], %158 {strides = array<i32>} : memref<108x512xf32, #tpu.memory_space<vmem>>, vector<4x512xf32>,
    %c0_88 = arith.constant 0 : index
    %c122 = arith.constant 122 : index
    %160 = vector.load %arg10[%c0_88, %c122] : memref<4x2304xf32, #tpu.memory_space<vmem>>, vector<4x512xf32>
    %c68 = arith.constant 68 : index
    %c0_89 = arith.constant 0 : index
    %161 = vector.load %arg11[%c68, %c0_89] : memref<108x512xf32, #tpu.memory_space<vmem>>, vector<4x512xf32>
    tpu.vector_store %arg11[%c68, %c0_89], %160 {strides = array<i32>} : memref<108x512xf32, #tpu.memory_space<vmem>>, vector<4x512xf32>,
    %c0_90 = arith.constant 0 : index
    %c200 = arith.constant 200 : index
    %162 = vector.load %arg10[%c0_90, %c200] : memref<4x2304xf32, #tpu.memory_space<vmem>>, vector<4x512xf32>
    %c72 = arith.constant 72 : index
    %c0_91 = arith.constant 0 : index
    %163 = vector.load %arg11[%c72, %c0_91] : memref<108x512xf32, #tpu.memory_space<vmem>>, vector<4x512xf32>
    tpu.vector_store %arg11[%c72, %c0_91], %162 {strides = array<i32>} : memref<108x512xf32, #tpu.memory_space<vmem>>, vector<4x512xf32>,
    %c0_92 = arith.constant 0 : index
    %c201 = arith.constant 201 : index
    %164 = vector.load %arg10[%c0_92, %c201] : memref<4x2304xf32, #tpu.memory_space<vmem>>, vector<4x512xf32>
    %c76 = arith.constant 76 : index
    %c0_93 = arith.constant 0 : index
    %165 = vector.load %arg11[%c76, %c0_93] : memref<108x512xf32, #tpu.memory_space<vmem>>, vector<4x512xf32>
    tpu.vector_store %arg11[%c76, %c0_93], %164 {strides = array<i32>} : memref<108x512xf32, #tpu.memory_space<vmem>>, vector<4x512xf32>,
    %c0_94 = arith.constant 0 : index
    %c202 = arith.constant 202 : index
    %166 = vector.load %arg10[%c0_94, %c202] : memref<4x2304xf32, #tpu.memory_space<vmem>>, vector<4x512xf32>
    %c80 = arith.constant 80 : index
    %c0_95 = arith.constant 0 : index
    %167 = vector.load %arg11[%c80, %c0_95] : memref<108x512xf32, #tpu.memory_space<vmem>>, vector<4x512xf32>
    tpu.vector_store %arg11[%c80, %c0_95], %166 {strides = array<i32>} : memref<108x512xf32, #tpu.memory_space<vmem>>, vector<4x512xf32>,
    %c0_96 = arith.constant 0 : index
    %c210 = arith.constant 210 : index
    %168 = vector.load %arg10[%c0_96, %c210] : memref<4x2304xf32, #tpu.memory_space<vmem>>, vector<4x512xf32>
    %c84 = arith.constant 84 : index
    %c0_97 = arith.constant 0 : index
    %169 = vector.load %arg11[%c84, %c0_97] : memref<108x512xf32, #tpu.memory_space<vmem>>, vector<4x512xf32>
    tpu.vector_store %arg11[%c84, %c0_97], %168 {strides = array<i32>} : memref<108x512xf32, #tpu.memory_space<vmem>>, vector<4x512xf32>,
    %c0_98 = arith.constant 0 : index
    %c211 = arith.constant 211 : index
    %170 = vector.load %arg10[%c0_98, %c211] : memref<4x2304xf32, #tpu.memory_space<vmem>>, vector<4x512xf32>
    %c88 = arith.constant 88 : index
    %c0_99 = arith.constant 0 : index
    %171 = vector.load %arg11[%c88, %c0_99] : memref<108x512xf32, #tpu.memory_space<vmem>>, vector<4x512xf32>
    tpu.vector_store %arg11[%c88, %c0_99], %170 {strides = array<i32>} : memref<108x512xf32, #tpu.memory_space<vmem>>, vector<4x512xf32>,
    %c0_100 = arith.constant 0 : index
    %c212 = arith.constant 212 : index
    %172 = vector.load %arg10[%c0_100, %c212] : memref<4x2304xf32, #tpu.memory_space<vmem>>, vector<4x512xf32>
    %c92 = arith.constant 92 : index
    %c0_101 = arith.constant 0 : index
    %173 = vector.load %arg11[%c92, %c0_101] : memref<108x512xf32, #tpu.memory_space<vmem>>, vector<4x512xf32>
    tpu.vector_store %arg11[%c92, %c0_101], %172 {strides = array<i32>} : memref<108x512xf32, #tpu.memory_space<vmem>>, vector<4x512xf32>,
    %c0_102 = arith.constant 0 : index
    %c220 = arith.constant 220 : index
    %174 = vector.load %arg10[%c0_102, %c220] : memref<4x2304xf32, #tpu.memory_space<vmem>>, vector<4x512xf32>
    %c96 = arith.constant 96 : index
    %c0_103 = arith.constant 0 : index
    %175 = vector.load %arg11[%c96, %c0_103] : memref<108x512xf32, #tpu.memory_space<vmem>>, vector<4x512xf32>
    tpu.vector_store %arg11[%c96, %c0_103], %174 {strides = array<i32>} : memref<108x512xf32, #tpu.memory_space<vmem>>, vector<4x512xf32>,
    %c0_104 = arith.constant 0 : index
    %c221 = arith.constant 221 : index
    %176 = vector.load %arg10[%c0_104, %c221] : memref<4x2304xf32, #tpu.memory_space<vmem>>, vector<4x512xf32>
    %c100_105 = arith.constant 100 : index
    %c0_106 = arith.constant 0 : index
    %177 = vector.load %arg11[%c100_105, %c0_106] : memref<108x512xf32, #tpu.memory_space<vmem>>, vector<4x512xf32>
    tpu.vector_store %arg11[%c100_105, %c0_106], %176 {strides = array<i32>} : memref<108x512xf32, #tpu.memory_space<vmem>>, vector<4x512xf32>,
    %c0_107 = arith.constant 0 : index
    %c222 = arith.constant 222 : index
    %178 = vector.load %arg10[%c0_107, %c222] : memref<4x2304xf32, #tpu.memory_space<vmem>>, vector<4x512xf32>
    %c104 = arith.constant 104 : index
    %c0_108 = arith.constant 0 : index
    %179 = vector.load %arg11[%c104, %c0_108] : memref<108x512xf32, #tpu.memory_space<vmem>>, vector<4x512xf32>
    tpu.vector_store %arg11[%c104, %c0_108], %178 {strides = array<i32>} : memref<108x512xf32, #tpu.memory_space<vmem>>, vector<4x512xf32>,
    %c0_109 = arith.constant 0 : index
    %c0_110 = arith.constant 0 : index
    %180 = vector.load %arg7[%c0_109, %c0_110] : memref<2x108xf32, #tpu.memory_space<vmem>>, vector<2x108xf32>
    %c0_111 = arith.constant 0 : index
    %c0_112 = arith.constant 0 : index
    %181 = vector.load %arg11[%c0_111, %c0_112] : memref<108x512xf32, #tpu.memory_space<vmem>>, vector<108x512xf32>
    %cst_113 = arith.constant dense<0.000000e+00> : vector<2x512xf32>
    %182 = tpu.matmul %180, %181, %cst_113 {dimension_numbers = #tpu.dot_dimension_numbers<[1], [0], [0], [1], [0, 0, 1, 1], [], []>} : vector<2x108xf32>, vector<108x512xf32>, vector<2x512xf32> -> vector<2x512xf32>
    %c0_114 = arith.constant 0 : index
    %c0_115 = arith.constant 0 : index
    %183 = vector.load %arg8[%c0_114, %c0_115] : memref<2x1xf32, #tpu.memory_space<vmem>>, vector<2x1xf32>
    %184 = vector.broadcast %183 : vector<2x1xf32> to vector<2x512xf32>
    %185 = arith.addf %182, %184 : vector<2x512xf32>
    %c0_116 = arith.constant 0 : index
    %c0_117 = arith.constant 0 : index
    %c0_118 = arith.constant 0 : index
    %186 = vector.load %arg9[%c0_116, %c0_117, %c0_118] : memref<1x2x2048xf32, #tpu.memory_space<vmem>>, vector<1x2x512xf32>
    %187 = vector.shape_cast %186 : vector<1x2x512xf32> to vector<2x512xf32>
    %188 = vector.shape_cast %185 : vector<2x512xf32> to vector<1x2x512xf32>
    tpu.vector_store %arg9[%c0_116, %c0_117, %c0_118], %188 {strides = array<i32>} : memref<1x2x2048xf32, #tpu.memory_space<vmem>>, vector<1x2x512xf32>,
    %c0_119 = arith.constant 0 : index
    %c512 = arith.constant 512 : index
    %189 = vector.load %arg10[%c0_119, %c512] : memref<4x2304xf32, #tpu.memory_space<vmem>>, vector<4x512xf32>
    %c0_120 = arith.constant 0 : index
    %c0_121 = arith.constant 0 : index
    %190 = vector.load %arg11[%c0_120, %c0_121] : memref<108x512xf32, #tpu.memory_space<vmem>>, vector<4x512xf32>
    tpu.vector_store %arg11[%c0_120, %c0_121], %189 {strides = array<i32>} : memref<108x512xf32, #tpu.memory_space<vmem>>, vector<4x512xf32>,
    %c0_122 = arith.constant 0 : index
    %c513 = arith.constant 513 : index
    %191 = vector.load %arg10[%c0_122, %c513] : memref<4x2304xf32, #tpu.memory_space<vmem>>, vector<4x512xf32>
    %c4_123 = arith.constant 4 : index
    %c0_124 = arith.constant 0 : index
    %192 = vector.load %arg11[%c4_123, %c0_124] : memref<108x512xf32, #tpu.memory_space<vmem>>, vector<4x512xf32>
    tpu.vector_store %arg11[%c4_123, %c0_124], %191 {strides = array<i32>} : memref<108x512xf32, #tpu.memory_space<vmem>>, vector<4x512xf32>,
    %c0_125 = arith.constant 0 : index
    %c514 = arith.constant 514 : index
    %193 = vector.load %arg10[%c0_125, %c514] : memref<4x2304xf32, #tpu.memory_space<vmem>>, vector<4x512xf32>
    %c8_126 = arith.constant 8 : index
    %c0_127 = arith.constant 0 : index
    %194 = vector.load %arg11[%c8_126, %c0_127] : memref<108x512xf32, #tpu.memory_space<vmem>>, vector<4x512xf32>
    tpu.vector_store %arg11[%c8_126, %c0_127], %193 {strides = array<i32>} : memref<108x512xf32, #tpu.memory_space<vmem>>, vector<4x512xf32>,
    %c0_128 = arith.constant 0 : index
    %c522 = arith.constant 522 : index
    %195 = vector.load %arg10[%c0_128, %c522] : memref<4x2304xf32, #tpu.memory_space<vmem>>, vector<4x512xf32>
    %c12_129 = arith.constant 12 : index
    %c0_130 = arith.constant 0 : index
    %196 = vector.load %arg11[%c12_129, %c0_130] : memref<108x512xf32, #tpu.memory_space<vmem>>, vector<4x512xf32>
    tpu.vector_store %arg11[%c12_129, %c0_130], %195 {strides = array<i32>} : memref<108x512xf32, #tpu.memory_space<vmem>>, vector<4x512xf32>,
    %c0_131 = arith.constant 0 : index
    %c523 = arith.constant 523 : index
    %197 = vector.load %arg10[%c0_131, %c523] : memref<4x2304xf32, #tpu.memory_space<vmem>>, vector<4x512xf32>
    %c16_132 = arith.constant 16 : index
    %c0_133 = arith.constant 0 : index
    %198 = vector.load %arg11[%c16_132, %c0_133] : memref<108x512xf32, #tpu.memory_space<vmem>>, vector<4x512xf32>
    tpu.vector_store %arg11[%c16_132, %c0_133], %197 {strides = array<i32>} : memref<108x512xf32, #tpu.memory_space<vmem>>, vector<4x512xf32>,
    %c0_134 = arith.constant 0 : index
    %c524 = arith.constant 524 : index
    %199 = vector.load %arg10[%c0_134, %c524] : memref<4x2304xf32, #tpu.memory_space<vmem>>, vector<4x512xf32>
    %c20_135 = arith.constant 20 : index
    %c0_136 = arith.constant 0 : index
    %200 = vector.load %arg11[%c20_135, %c0_136] : memref<108x512xf32, #tpu.memory_space<vmem>>, vector<4x512xf32>
    tpu.vector_store %arg11[%c20_135, %c0_136], %199 {strides = array<i32>} : memref<108x512xf32, #tpu.memory_space<vmem>>, vector<4x512xf32>,
    %c0_137 = arith.constant 0 : index
    %c532 = arith.constant 532 : index
    %201 = vector.load %arg10[%c0_137, %c532] : memref<4x2304xf32, #tpu.memory_space<vmem>>, vector<4x512xf32>
    %c24_138 = arith.constant 24 : index
    %c0_139 = arith.constant 0 : index
    %202 = vector.load %arg11[%c24_138, %c0_139] : memref<108x512xf32, #tpu.memory_space<vmem>>, vector<4x512xf32>
    tpu.vector_store %arg11[%c24_138, %c0_139], %201 {strides = array<i32>} : memref<108x512xf32, #tpu.memory_space<vmem>>, vector<4x512xf32>,
    %c0_140 = arith.constant 0 : index
    %c533 = arith.constant 533 : index
    %203 = vector.load %arg10[%c0_140, %c533] : memref<4x2304xf32, #tpu.memory_space<vmem>>, vector<4x512xf32>
    %c28_141 = arith.constant 28 : index
    %c0_142 = arith.constant 0 : index
    %204 = vector.load %arg11[%c28_141, %c0_142] : memref<108x512xf32, #tpu.memory_space<vmem>>, vector<4x512xf32>
    tpu.vector_store %arg11[%c28_141, %c0_142], %203 {strides = array<i32>} : memref<108x512xf32, #tpu.memory_space<vmem>>, vector<4x512xf32>,
    %c0_143 = arith.constant 0 : index
    %c534 = arith.constant 534 : index
    %205 = vector.load %arg10[%c0_143, %c534] : memref<4x2304xf32, #tpu.memory_space<vmem>>, vector<4x512xf32>
    %c32_144 = arith.constant 32 : index
    %c0_145 = arith.constant 0 : index
    %206 = vector.load %arg11[%c32_144, %c0_145] : memref<108x512xf32, #tpu.memory_space<vmem>>, vector<4x512xf32>
    tpu.vector_store %arg11[%c32_144, %c0_145], %205 {strides = array<i32>} : memref<108x512xf32, #tpu.memory_space<vmem>>, vector<4x512xf32>,
    %c0_146 = arith.constant 0 : index
    %c612 = arith.constant 612 : index
    %207 = vector.load %arg10[%c0_146, %c612] : memref<4x2304xf32, #tpu.memory_space<vmem>>, vector<4x512xf32>
    %c36_147 = arith.constant 36 : index
    %c0_148 = arith.constant 0 : index
    %208 = vector.load %arg11[%c36_147, %c0_148] : memref<108x512xf32, #tpu.memory_space<vmem>>, vector<4x512xf32>
    tpu.vector_store %arg11[%c36_147, %c0_148], %207 {strides = array<i32>} : memref<108x512xf32, #tpu.memory_space<vmem>>, vector<4x512xf32>,
    %c0_149 = arith.constant 0 : index
    %c613 = arith.constant 613 : index
    %209 = vector.load %arg10[%c0_149, %c613] : memref<4x2304xf32, #tpu.memory_space<vmem>>, vector<4x512xf32>
    %c40_150 = arith.constant 40 : index
    %c0_151 = arith.constant 0 : index
    %210 = vector.load %arg11[%c40_150, %c0_151] : memref<108x512xf32, #tpu.memory_space<vmem>>, vector<4x512xf32>
    tpu.vector_store %arg11[%c40_150, %c0_151], %209 {strides = array<i32>} : memref<108x512xf32, #tpu.memory_space<vmem>>, vector<4x512xf32>,
    %c0_152 = arith.constant 0 : index
    %c614 = arith.constant 614 : index
    %211 = vector.load %arg10[%c0_152, %c614] : memref<4x2304xf32, #tpu.memory_space<vmem>>, vector<4x512xf32>
    %c44_153 = arith.constant 44 : index
    %c0_154 = arith.constant 0 : index
    %212 = vector.load %arg11[%c44_153, %c0_154] : memref<108x512xf32, #tpu.memory_space<vmem>>, vector<4x512xf32>
    tpu.vector_store %arg11[%c44_153, %c0_154], %211 {strides = array<i32>} : memref<108x512xf32, #tpu.memory_space<vmem>>, vector<4x512xf32>,
    %c0_155 = arith.constant 0 : index
    %c622 = arith.constant 622 : index
    %213 = vector.load %arg10[%c0_155, %c622] : memref<4x2304xf32, #tpu.memory_space<vmem>>, vector<4x512xf32>
    %c48_156 = arith.constant 48 : index
    %c0_157 = arith.constant 0 : index
    %214 = vector.load %arg11[%c48_156, %c0_157] : memref<108x512xf32, #tpu.memory_space<vmem>>, vector<4x512xf32>
    tpu.vector_store %arg11[%c48_156, %c0_157], %213 {strides = array<i32>} : memref<108x512xf32, #tpu.memory_space<vmem>>, vector<4x512xf32>,
    %c0_158 = arith.constant 0 : index
    %c623 = arith.constant 623 : index
    %215 = vector.load %arg10[%c0_158, %c623] : memref<4x2304xf32, #tpu.memory_space<vmem>>, vector<4x512xf32>
    %c52_159 = arith.constant 52 : index
    %c0_160 = arith.constant 0 : index
    %216 = vector.load %arg11[%c52_159, %c0_160] : memref<108x512xf32, #tpu.memory_space<vmem>>, vector<4x512xf32>
    tpu.vector_store %arg11[%c52_159, %c0_160], %215 {strides = array<i32>} : memref<108x512xf32, #tpu.memory_space<vmem>>, vector<4x512xf32>,
    %c0_161 = arith.constant 0 : index
    %c624 = arith.constant 624 : index
    %217 = vector.load %arg10[%c0_161, %c624] : memref<4x2304xf32, #tpu.memory_space<vmem>>, vector<4x512xf32>
    %c56_162 = arith.constant 56 : index
    %c0_163 = arith.constant 0 : index
    %218 = vector.load %arg11[%c56_162, %c0_163] : memref<108x512xf32, #tpu.memory_space<vmem>>, vector<4x512xf32>
    tpu.vector_store %arg11[%c56_162, %c0_163], %217 {strides = array<i32>} : memref<108x512xf32, #tpu.memory_space<vmem>>, vector<4x512xf32>,
    %c0_164 = arith.constant 0 : index
    %c632 = arith.constant 632 : index
    %219 = vector.load %arg10[%c0_164, %c632] : memref<4x2304xf32, #tpu.memory_space<vmem>>, vector<4x512xf32>
    %c60_165 = arith.constant 60 : index
    %c0_166 = arith.constant 0 : index
    %220 = vector.load %arg11[%c60_165, %c0_166] : memref<108x512xf32, #tpu.memory_space<vmem>>, vector<4x512xf32>
    tpu.vector_store %arg11[%c60_165, %c0_166], %219 {strides = array<i32>} : memref<108x512xf32, #tpu.memory_space<vmem>>, vector<4x512xf32>,
    %c0_167 = arith.constant 0 : index
    %c633 = arith.constant 633 : index
    %221 = vector.load %arg10[%c0_167, %c633] : memref<4x2304xf32, #tpu.memory_space<vmem>>, vector<4x512xf32>
    %c64_168 = arith.constant 64 : index
    %c0_169 = arith.constant 0 : index
    %222 = vector.load %arg11[%c64_168, %c0_169] : memref<108x512xf32, #tpu.memory_space<vmem>>, vector<4x512xf32>
    tpu.vector_store %arg11[%c64_168, %c0_169], %221 {strides = array<i32>} : memref<108x512xf32, #tpu.memory_space<vmem>>, vector<4x512xf32>,
    %c0_170 = arith.constant 0 : index
    %c634 = arith.constant 634 : index
    %223 = vector.load %arg10[%c0_170, %c634] : memref<4x2304xf32, #tpu.memory_space<vmem>>, vector<4x512xf32>
    %c68_171 = arith.constant 68 : index
    %c0_172 = arith.constant 0 : index
    %224 = vector.load %arg11[%c68_171, %c0_172] : memref<108x512xf32, #tpu.memory_space<vmem>>, vector<4x512xf32>
    tpu.vector_store %arg11[%c68_171, %c0_172], %223 {strides = array<i32>} : memref<108x512xf32, #tpu.memory_space<vmem>>, vector<4x512xf32>,
    %c0_173 = arith.constant 0 : index
    %c712 = arith.constant 712 : index
    %225 = vector.load %arg10[%c0_173, %c712] : memref<4x2304xf32, #tpu.memory_space<vmem>>, vector<4x512xf32>
    %c72_174 = arith.constant 72 : index
    %c0_175 = arith.constant 0 : index
    %226 = vector.load %arg11[%c72_174, %c0_175] : memref<108x512xf32, #tpu.memory_space<vmem>>, vector<4x512xf32>
    tpu.vector_store %arg11[%c72_174, %c0_175], %225 {strides = array<i32>} : memref<108x512xf32, #tpu.memory_space<vmem>>, vector<4x512xf32>,
    %c0_176 = arith.constant 0 : index
    %c713 = arith.constant 713 : index
    %227 = vector.load %arg10[%c0_176, %c713] : memref<4x2304xf32, #tpu.memory_space<vmem>>, vector<4x512xf32>
    %c76_177 = arith.constant 76 : index
    %c0_178 = arith.constant 0 : index
    %228 = vector.load %arg11[%c76_177, %c0_178] : memref<108x512xf32, #tpu.memory_space<vmem>>, vector<4x512xf32>
    tpu.vector_store %arg11[%c76_177, %c0_178], %227 {strides = array<i32>} : memref<108x512xf32, #tpu.memory_space<vmem>>, vector<4x512xf32>,
    %c0_179 = arith.constant 0 : index
    %c714 = arith.constant 714 : index
    %229 = vector.load %arg10[%c0_179, %c714] : memref<4x2304xf32, #tpu.memory_space<vmem>>, vector<4x512xf32>
    %c80_180 = arith.constant 80 : index
    %c0_181 = arith.constant 0 : index
    %230 = vector.load %arg11[%c80_180, %c0_181] : memref<108x512xf32, #tpu.memory_space<vmem>>, vector<4x512xf32>
    tpu.vector_store %arg11[%c80_180, %c0_181], %229 {strides = array<i32>} : memref<108x512xf32, #tpu.memory_space<vmem>>, vector<4x512xf32>,
    %c0_182 = arith.constant 0 : index
    %c722 = arith.constant 722 : index
    %231 = vector.load %arg10[%c0_182, %c722] : memref<4x2304xf32, #tpu.memory_space<vmem>>, vector<4x512xf32>
    %c84_183 = arith.constant 84 : index
    %c0_184 = arith.constant 0 : index
    %232 = vector.load %arg11[%c84_183, %c0_184] : memref<108x512xf32, #tpu.memory_space<vmem>>, vector<4x512xf32>
    tpu.vector_store %arg11[%c84_183, %c0_184], %231 {strides = array<i32>} : memref<108x512xf32, #tpu.memory_space<vmem>>, vector<4x512xf32>,
    %c0_185 = arith.constant 0 : index
    %c723 = arith.constant 723 : index
    %233 = vector.load %arg10[%c0_185, %c723] : memref<4x2304xf32, #tpu.memory_space<vmem>>, vector<4x512xf32>
    %c88_186 = arith.constant 88 : index
    %c0_187 = arith.constant 0 : index
    %234 = vector.load %arg11[%c88_186, %c0_187] : memref<108x512xf32, #tpu.memory_space<vmem>>, vector<4x512xf32>
    tpu.vector_store %arg11[%c88_186, %c0_187], %233 {strides = array<i32>} : memref<108x512xf32, #tpu.memory_space<vmem>>, vector<4x512xf32>,
    %c0_188 = arith.constant 0 : index
    %c724 = arith.constant 724 : index
    %235 = vector.load %arg10[%c0_188, %c724] : memref<4x2304xf32, #tpu.memory_space<vmem>>, vector<4x512xf32>
    %c92_189 = arith.constant 92 : index
    %c0_190 = arith.constant 0 : index
    %236 = vector.load %arg11[%c92_189, %c0_190] : memref<108x512xf32, #tpu.memory_space<vmem>>, vector<4x512xf32>
    tpu.vector_store %arg11[%c92_189, %c0_190], %235 {strides = array<i32>} : memref<108x512xf32, #tpu.memory_space<vmem>>, vector<4x512xf32>,
    %c0_191 = arith.constant 0 : index
    %c732 = arith.constant 732 : index
    %237 = vector.load %arg10[%c0_191, %c732] : memref<4x2304xf32, #tpu.memory_space<vmem>>, vector<4x512xf32>
    %c96_192 = arith.constant 96 : index
    %c0_193 = arith.constant 0 : index
    %238 = vector.load %arg11[%c96_192, %c0_193] : memref<108x512xf32, #tpu.memory_space<vmem>>, vector<4x512xf32>
    tpu.vector_store %arg11[%c96_192, %c0_193], %237 {strides = array<i32>} : memref<108x512xf32, #tpu.memory_space<vmem>>, vector<4x512xf32>,
    %c0_194 = arith.constant 0 : index
    %c733 = arith.constant 733 : index
    %239 = vector.load %arg10[%c0_194, %c733] : memref<4x2304xf32, #tpu.memory_space<vmem>>, vector<4x512xf32>
    %c100_195 = arith.constant 100 : index
    %c0_196 = arith.constant 0 : index
    %240 = vector.load %arg11[%c100_195, %c0_196] : memref<108x512xf32, #tpu.memory_space<vmem>>, vector<4x512xf32>
    tpu.vector_store %arg11[%c100_195, %c0_196], %239 {strides = array<i32>} : memref<108x512xf32, #tpu.memory_space<vmem>>, vector<4x512xf32>,
    %c0_197 = arith.constant 0 : index
    %c734 = arith.constant 734 : index
    %241 = vector.load %arg10[%c0_197, %c734] : memref<4x2304xf32, #tpu.memory_space<vmem>>, vector<4x512xf32>
    %c104_198 = arith.constant 104 : index
    %c0_199 = arith.constant 0 : index
    %242 = vector.load %arg11[%c104_198, %c0_199] : memref<108x512xf32, #tpu.memory_space<vmem>>, vector<4x512xf32>
    tpu.vector_store %arg11[%c104_198, %c0_199], %241 {strides = array<i32>} : memref<108x512xf32, #tpu.memory_space<vmem>>, vector<4x512xf32>,
    %c0_200 = arith.constant 0 : index
    %c0_201 = arith.constant 0 : index
    %243 = vector.load %arg7[%c0_200, %c0_201] : memref<2x108xf32, #tpu.memory_space<vmem>>, vector<2x108xf32>
    %c0_202 = arith.constant 0 : index
    %c0_203 = arith.constant 0 : index
    %244 = vector.load %arg11[%c0_202, %c0_203] : memref<108x512xf32, #tpu.memory_space<vmem>>, vector<108x512xf32>
    %cst_204 = arith.constant dense<0.000000e+00> : vector<2x512xf32>
    %245 = tpu.matmul %243, %244, %cst_204 {dimension_numbers = #tpu.dot_dimension_numbers<[1], [0], [0], [1], [0, 0, 1, 1], [], []>} : vector<2x108xf32>, vector<108x512xf32>, vector<2x512xf32> -> vector<2x512xf32>
    %c0_205 = arith.constant 0 : index
    %c0_206 = arith.constant 0 : index
    %246 = vector.load %arg8[%c0_205, %c0_206] : memref<2x1xf32, #tpu.memory_space<vmem>>, vector<2x1xf32>
    %247 = vector.broadcast %246 : vector<2x1xf32> to vector<2x512xf32>
    %248 = arith.addf %245, %247 : vector<2x512xf32>
    %c0_207 = arith.constant 0 : index
    %c0_208 = arith.constant 0 : index
    %c512_209 = arith.constant 512 : index
    %249 = vector.load %arg9[%c0_207, %c0_208, %c512_209] : memref<1x2x2048xf32, #tpu.memory_space<vmem>>, vector<1x2x512xf32>
    %250 = vector.shape_cast %249 : vector<1x2x512xf32> to vector<2x512xf32>
    %251 = vector.shape_cast %248 : vector<2x512xf32> to vector<1x2x512xf32>
    tpu.vector_store %arg9[%c0_207, %c0_208, %c512_209], %251 {strides = array<i32>} : memref<1x2x2048xf32, #tpu.memory_space<vmem>>, vector<1x2x512xf32>,
    %c0_210 = arith.constant 0 : index
    %c1024 = arith.constant 1024 : index
    %252 = vector.load %arg10[%c0_210, %c1024] : memref<4x2304xf32, #tpu.memory_space<vmem>>, vector<4x512xf32>
    %c0_211 = arith.constant 0 : index
    %c0_212 = arith.constant 0 : index
    %253 = vector.load %arg11[%c0_211, %c0_212] : memref<108x512xf32, #tpu.memory_space<vmem>>, vector<4x512xf32>
    tpu.vector_store %arg11[%c0_211, %c0_212], %252 {strides = array<i32>} : memref<108x512xf32, #tpu.memory_space<vmem>>, vector<4x512xf32>,
    %c0_213 = arith.constant 0 : index
    %c1025 = arith.constant 1025 : index
    %254 = vector.load %arg10[%c0_213, %c1025] : memref<4x2304xf32, #tpu.memory_space<vmem>>, vector<4x512xf32>
    %c4_214 = arith.constant 4 : index
    %c0_215 = arith.constant 0 : index
    %255 = vector.load %arg11[%c4_214, %c0_215] : memref<108x512xf32, #tpu.memory_space<vmem>>, vector<4x512xf32>
    tpu.vector_store %arg11[%c4_214, %c0_215], %254 {strides = array<i32>} : memref<108x512xf32, #tpu.memory_space<vmem>>, vector<4x512xf32>,
    %c0_216 = arith.constant 0 : index
    %c1026 = arith.constant 1026 : index
    %256 = vector.load %arg10[%c0_216, %c1026] : memref<4x2304xf32, #tpu.memory_space<vmem>>, vector<4x512xf32>
    %c8_217 = arith.constant 8 : index
    %c0_218 = arith.constant 0 : index
    %257 = vector.load %arg11[%c8_217, %c0_218] : memref<108x512xf32, #tpu.memory_space<vmem>>, vector<4x512xf32>
    tpu.vector_store %arg11[%c8_217, %c0_218], %256 {strides = array<i32>} : memref<108x512xf32, #tpu.memory_space<vmem>>, vector<4x512xf32>,
    %c0_219 = arith.constant 0 : index
    %c1034 = arith.constant 1034 : index
    %258 = vector.load %arg10[%c0_219, %c1034] : memref<4x2304xf32, #tpu.memory_space<vmem>>, vector<4x512xf32>
    %c12_220 = arith.constant 12 : index
    %c0_221 = arith.constant 0 : index
    %259 = vector.load %arg11[%c12_220, %c0_221] : memref<108x512xf32, #tpu.memory_space<vmem>>, vector<4x512xf32>
    tpu.vector_store %arg11[%c12_220, %c0_221], %258 {strides = array<i32>} : memref<108x512xf32, #tpu.memory_space<vmem>>, vector<4x512xf32>,
    %c0_222 = arith.constant 0 : index
    %c1035 = arith.constant 1035 : index
    %260 = vector.load %arg10[%c0_222, %c1035] : memref<4x2304xf32, #tpu.memory_space<vmem>>, vector<4x512xf32>
    %c16_223 = arith.constant 16 : index
    %c0_224 = arith.constant 0 : index
    %261 = vector.load %arg11[%c16_223, %c0_224] : memref<108x512xf32, #tpu.memory_space<vmem>>, vector<4x512xf32>
    tpu.vector_store %arg11[%c16_223, %c0_224], %260 {strides = array<i32>} : memref<108x512xf32, #tpu.memory_space<vmem>>, vector<4x512xf32>,
    %c0_225 = arith.constant 0 : index
    %c1036 = arith.constant 1036 : index
    %262 = vector.load %arg10[%c0_225, %c1036] : memref<4x2304xf32, #tpu.memory_space<vmem>>, vector<4x512xf32>
    %c20_226 = arith.constant 20 : index
    %c0_227 = arith.constant 0 : index
    %263 = vector.load %arg11[%c20_226, %c0_227] : memref<108x512xf32, #tpu.memory_space<vmem>>, vector<4x512xf32>
    tpu.vector_store %arg11[%c20_226, %c0_227], %262 {strides = array<i32>} : memref<108x512xf32, #tpu.memory_space<vmem>>, vector<4x512xf32>,
    %c0_228 = arith.constant 0 : index
    %c1044 = arith.constant 1044 : index
    %264 = vector.load %arg10[%c0_228, %c1044] : memref<4x2304xf32, #tpu.memory_space<vmem>>, vector<4x512xf32>
    %c24_229 = arith.constant 24 : index
    %c0_230 = arith.constant 0 : index
    %265 = vector.load %arg11[%c24_229, %c0_230] : memref<108x512xf32, #tpu.memory_space<vmem>>, vector<4x512xf32>
    tpu.vector_store %arg11[%c24_229, %c0_230], %264 {strides = array<i32>} : memref<108x512xf32, #tpu.memory_space<vmem>>, vector<4x512xf32>,
    %c0_231 = arith.constant 0 : index
    %c1045 = arith.constant 1045 : index
    %266 = vector.load %arg10[%c0_231, %c1045] : memref<4x2304xf32, #tpu.memory_space<vmem>>, vector<4x512xf32>
    %c28_232 = arith.constant 28 : index
    %c0_233 = arith.constant 0 : index
    %267 = vector.load %arg11[%c28_232, %c0_233] : memref<108x512xf32, #tpu.memory_space<vmem>>, vector<4x512xf32>
    tpu.vector_store %arg11[%c28_232, %c0_233], %266 {strides = array<i32>} : memref<108x512xf32, #tpu.memory_space<vmem>>, vector<4x512xf32>,
    %c0_234 = arith.constant 0 : index
    %c1046 = arith.constant 1046 : index
    %268 = vector.load %arg10[%c0_234, %c1046] : memref<4x2304xf32, #tpu.memory_space<vmem>>, vector<4x512xf32>
    %c32_235 = arith.constant 32 : index
    %c0_236 = arith.constant 0 : index
    %269 = vector.load %arg11[%c32_235, %c0_236] : memref<108x512xf32, #tpu.memory_space<vmem>>, vector<4x512xf32>
    tpu.vector_store %arg11[%c32_235, %c0_236], %268 {strides = array<i32>} : memref<108x512xf32, #tpu.memory_space<vmem>>, vector<4x512xf32>,
    %c0_237 = arith.constant 0 : index
    %c1124 = arith.constant 1124 : index
    %270 = vector.load %arg10[%c0_237, %c1124] : memref<4x2304xf32, #tpu.memory_space<vmem>>, vector<4x512xf32>
    %c36_238 = arith.constant 36 : index
    %c0_239 = arith.constant 0 : index
    %271 = vector.load %arg11[%c36_238, %c0_239] : memref<108x512xf32, #tpu.memory_space<vmem>>, vector<4x512xf32>
    tpu.vector_store %arg11[%c36_238, %c0_239], %270 {strides = array<i32>} : memref<108x512xf32, #tpu.memory_space<vmem>>, vector<4x512xf32>,
    %c0_240 = arith.constant 0 : index
    %c1125 = arith.constant 1125 : index
    %272 = vector.load %arg10[%c0_240, %c1125] : memref<4x2304xf32, #tpu.memory_space<vmem>>, vector<4x512xf32>
    %c40_241 = arith.constant 40 : index
    %c0_242 = arith.constant 0 : index
    %273 = vector.load %arg11[%c40_241, %c0_242] : memref<108x512xf32, #tpu.memory_space<vmem>>, vector<4x512xf32>
    tpu.vector_store %arg11[%c40_241, %c0_242], %272 {strides = array<i32>} : memref<108x512xf32, #tpu.memory_space<vmem>>, vector<4x512xf32>,
    %c0_243 = arith.constant 0 : index
    %c1126 = arith.constant 1126 : index
    %274 = vector.load %arg10[%c0_243, %c1126] : memref<4x2304xf32, #tpu.memory_space<vmem>>, vector<4x512xf32>
    %c44_244 = arith.constant 44 : index
    %c0_245 = arith.constant 0 : index
    %275 = vector.load %arg11[%c44_244, %c0_245] : memref<108x512xf32, #tpu.memory_space<vmem>>, vector<4x512xf32>
    tpu.vector_store %arg11[%c44_244, %c0_245], %274 {strides = array<i32>} : memref<108x512xf32, #tpu.memory_space<vmem>>, vector<4x512xf32>,
    %c0_246 = arith.constant 0 : index
    %c1134 = arith.constant 1134 : index
    %276 = vector.load %arg10[%c0_246, %c1134] : memref<4x2304xf32, #tpu.memory_space<vmem>>, vector<4x512xf32>
    %c48_247 = arith.constant 48 : index
    %c0_248 = arith.constant 0 : index
    %277 = vector.load %arg11[%c48_247, %c0_248] : memref<108x512xf32, #tpu.memory_space<vmem>>, vector<4x512xf32>
    tpu.vector_store %arg11[%c48_247, %c0_248], %276 {strides = array<i32>} : memref<108x512xf32, #tpu.memory_space<vmem>>, vector<4x512xf32>,
    %c0_249 = arith.constant 0 : index
    %c1135 = arith.constant 1135 : index
    %278 = vector.load %arg10[%c0_249, %c1135] : memref<4x2304xf32, #tpu.memory_space<vmem>>, vector<4x512xf32>
    %c52_250 = arith.constant 52 : index
    %c0_251 = arith.constant 0 : index
    %279 = vector.load %arg11[%c52_250, %c0_251] : memref<108x512xf32, #tpu.memory_space<vmem>>, vector<4x512xf32>
    tpu.vector_store %arg11[%c52_250, %c0_251], %278 {strides = array<i32>} : memref<108x512xf32, #tpu.memory_space<vmem>>, vector<4x512xf32>,
    %c0_252 = arith.constant 0 : index
    %c1136 = arith.constant 1136 : index
    %280 = vector.load %arg10[%c0_252, %c1136] : memref<4x2304xf32, #tpu.memory_space<vmem>>, vector<4x512xf32>
    %c56_253 = arith.constant 56 : index
    %c0_254 = arith.constant 0 : index
    %281 = vector.load %arg11[%c56_253, %c0_254] : memref<108x512xf32, #tpu.memory_space<vmem>>, vector<4x512xf32>
    tpu.vector_store %arg11[%c56_253, %c0_254], %280 {strides = array<i32>} : memref<108x512xf32, #tpu.memory_space<vmem>>, vector<4x512xf32>,
    %c0_255 = arith.constant 0 : index
    %c1144 = arith.constant 1144 : index
    %282 = vector.load %arg10[%c0_255, %c1144] : memref<4x2304xf32, #tpu.memory_space<vmem>>, vector<4x512xf32>
    %c60_256 = arith.constant 60 : index
    %c0_257 = arith.constant 0 : index
    %283 = vector.load %arg11[%c60_256, %c0_257] : memref<108x512xf32, #tpu.memory_space<vmem>>, vector<4x512xf32>
    tpu.vector_store %arg11[%c60_256, %c0_257], %282 {strides = array<i32>} : memref<108x512xf32, #tpu.memory_space<vmem>>, vector<4x512xf32>,
    %c0_258 = arith.constant 0 : index
    %c1145 = arith.constant 1145 : index
    %284 = vector.load %arg10[%c0_258, %c1145] : memref<4x2304xf32, #tpu.memory_space<vmem>>, vector<4x512xf32>
    %c64_259 = arith.constant 64 : index
    %c0_260 = arith.constant 0 : index
    %285 = vector.load %arg11[%c64_259, %c0_260] : memref<108x512xf32, #tpu.memory_space<vmem>>, vector<4x512xf32>
    tpu.vector_store %arg11[%c64_259, %c0_260], %284 {strides = array<i32>} : memref<108x512xf32, #tpu.memory_space<vmem>>, vector<4x512xf32>,
    %c0_261 = arith.constant 0 : index
    %c1146 = arith.constant 1146 : index
    %286 = vector.load %arg10[%c0_261, %c1146] : memref<4x2304xf32, #tpu.memory_space<vmem>>, vector<4x512xf32>
    %c68_262 = arith.constant 68 : index
    %c0_263 = arith.constant 0 : index
    %287 = vector.load %arg11[%c68_262, %c0_263] : memref<108x512xf32, #tpu.memory_space<vmem>>, vector<4x512xf32>
    tpu.vector_store %arg11[%c68_262, %c0_263], %286 {strides = array<i32>} : memref<108x512xf32, #tpu.memory_space<vmem>>, vector<4x512xf32>,
    %c0_264 = arith.constant 0 : index
    %c1224 = arith.constant 1224 : index
    %288 = vector.load %arg10[%c0_264, %c1224] : memref<4x2304xf32, #tpu.memory_space<vmem>>, vector<4x512xf32>
    %c72_265 = arith.constant 72 : index
    %c0_266 = arith.constant 0 : index
    %289 = vector.load %arg11[%c72_265, %c0_266] : memref<108x512xf32, #tpu.memory_space<vmem>>, vector<4x512xf32>
    tpu.vector_store %arg11[%c72_265, %c0_266], %288 {strides = array<i32>} : memref<108x512xf32, #tpu.memory_space<vmem>>, vector<4x512xf32>,
    %c0_267 = arith.constant 0 : index
    %c1225 = arith.constant 1225 : index
    %290 = vector.load %arg10[%c0_267, %c1225] : memref<4x2304xf32, #tpu.memory_space<vmem>>, vector<4x512xf32>
    %c76_268 = arith.constant 76 : index
    %c0_269 = arith.constant 0 : index
    %291 = vector.load %arg11[%c76_268, %c0_269] : memref<108x512xf32, #tpu.memory_space<vmem>>, vector<4x512xf32>
    tpu.vector_store %arg11[%c76_268, %c0_269], %290 {strides = array<i32>} : memref<108x512xf32, #tpu.memory_space<vmem>>, vector<4x512xf32>,
    %c0_270 = arith.constant 0 : index
    %c1226 = arith.constant 1226 : index
    %292 = vector.load %arg10[%c0_270, %c1226] : memref<4x2304xf32, #tpu.memory_space<vmem>>, vector<4x512xf32>
    %c80_271 = arith.constant 80 : index
    %c0_272 = arith.constant 0 : index
    %293 = vector.load %arg11[%c80_271, %c0_272] : memref<108x512xf32, #tpu.memory_space<vmem>>, vector<4x512xf32>
    tpu.vector_store %arg11[%c80_271, %c0_272], %292 {strides = array<i32>} : memref<108x512xf32, #tpu.memory_space<vmem>>, vector<4x512xf32>,
    %c0_273 = arith.constant 0 : index
    %c1234 = arith.constant 1234 : index
    %294 = vector.load %arg10[%c0_273, %c1234] : memref<4x2304xf32, #tpu.memory_space<vmem>>, vector<4x512xf32>
    %c84_274 = arith.constant 84 : index
    %c0_275 = arith.constant 0 : index
    %295 = vector.load %arg11[%c84_274, %c0_275] : memref<108x512xf32, #tpu.memory_space<vmem>>, vector<4x512xf32>
    tpu.vector_store %arg11[%c84_274, %c0_275], %294 {strides = array<i32>} : memref<108x512xf32, #tpu.memory_space<vmem>>, vector<4x512xf32>,
    %c0_276 = arith.constant 0 : index
    %c1235 = arith.constant 1235 : index
    %296 = vector.load %arg10[%c0_276, %c1235] : memref<4x2304xf32, #tpu.memory_space<vmem>>, vector<4x512xf32>
    %c88_277 = arith.constant 88 : index
    %c0_278 = arith.constant 0 : index
    %297 = vector.load %arg11[%c88_277, %c0_278] : memref<108x512xf32, #tpu.memory_space<vmem>>, vector<4x512xf32>
    tpu.vector_store %arg11[%c88_277, %c0_278], %296 {strides = array<i32>} : memref<108x512xf32, #tpu.memory_space<vmem>>, vector<4x512xf32>,
    %c0_279 = arith.constant 0 : index
    %c1236 = arith.constant 1236 : index
    %298 = vector.load %arg10[%c0_279, %c1236] : memref<4x2304xf32, #tpu.memory_space<vmem>>, vector<4x512xf32>
    %c92_280 = arith.constant 92 : index
    %c0_281 = arith.constant 0 : index
    %299 = vector.load %arg11[%c92_280, %c0_281] : memref<108x512xf32, #tpu.memory_space<vmem>>, vector<4x512xf32>
    tpu.vector_store %arg11[%c92_280, %c0_281], %298 {strides = array<i32>} : memref<108x512xf32, #tpu.memory_space<vmem>>, vector<4x512xf32>,
    %c0_282 = arith.constant 0 : index
    %c1244 = arith.constant 1244 : index
    %300 = vector.load %arg10[%c0_282, %c1244] : memref<4x2304xf32, #tpu.memory_space<vmem>>, vector<4x512xf32>
    %c96_283 = arith.constant 96 : index
    %c0_284 = arith.constant 0 : index
    %301 = vector.load %arg11[%c96_283, %c0_284] : memref<108x512xf32, #tpu.memory_space<vmem>>, vector<4x512xf32>
    tpu.vector_store %arg11[%c96_283, %c0_284], %300 {strides = array<i32>} : memref<108x512xf32, #tpu.memory_space<vmem>>, vector<4x512xf32>,
    %c0_285 = arith.constant 0 : index
    %c1245 = arith.constant 1245 : index
    %302 = vector.load %arg10[%c0_285, %c1245] : memref<4x2304xf32, #tpu.memory_space<vmem>>, vector<4x512xf32>
    %c100_286 = arith.constant 100 : index
    %c0_287 = arith.constant 0 : index
    %303 = vector.load %arg11[%c100_286, %c0_287] : memref<108x512xf32, #tpu.memory_space<vmem>>, vector<4x512xf32>
    tpu.vector_store %arg11[%c100_286, %c0_287], %302 {strides = array<i32>} : memref<108x512xf32, #tpu.memory_space<vmem>>, vector<4x512xf32>,
    %c0_288 = arith.constant 0 : index
    %c1246 = arith.constant 1246 : index
    %304 = vector.load %arg10[%c0_288, %c1246] : memref<4x2304xf32, #tpu.memory_space<vmem>>, vector<4x512xf32>
    %c104_289 = arith.constant 104 : index
    %c0_290 = arith.constant 0 : index
    %305 = vector.load %arg11[%c104_289, %c0_290] : memref<108x512xf32, #tpu.memory_space<vmem>>, vector<4x512xf32>
    tpu.vector_store %arg11[%c104_289, %c0_290], %304 {strides = array<i32>} : memref<108x512xf32, #tpu.memory_space<vmem>>, vector<4x512xf32>,
    %c0_291 = arith.constant 0 : index
    %c0_292 = arith.constant 0 : index
    %306 = vector.load %arg7[%c0_291, %c0_292] : memref<2x108xf32, #tpu.memory_space<vmem>>, vector<2x108xf32>
    %c0_293 = arith.constant 0 : index
    %c0_294 = arith.constant 0 : index
    %307 = vector.load %arg11[%c0_293, %c0_294] : memref<108x512xf32, #tpu.memory_space<vmem>>, vector<108x512xf32>
    %cst_295 = arith.constant dense<0.000000e+00> : vector<2x512xf32>
    %308 = tpu.matmul %306, %307, %cst_295 {dimension_numbers = #tpu.dot_dimension_numbers<[1], [0], [0], [1], [0, 0, 1, 1], [], []>} : vector<2x108xf32>, vector<108x512xf32>, vector<2x512xf32> -> vector<2x512xf32>
    %c0_296 = arith.constant 0 : index
    %c0_297 = arith.constant 0 : index
    %309 = vector.load %arg8[%c0_296, %c0_297] : memref<2x1xf32, #tpu.memory_space<vmem>>, vector<2x1xf32>
    %310 = vector.broadcast %309 : vector<2x1xf32> to vector<2x512xf32>
    %311 = arith.addf %308, %310 : vector<2x512xf32>
    %c0_298 = arith.constant 0 : index
    %c0_299 = arith.constant 0 : index
    %c1024_300 = arith.constant 1024 : index
    %312 = vector.load %arg9[%c0_298, %c0_299, %c1024_300] : memref<1x2x2048xf32, #tpu.memory_space<vmem>>, vector<1x2x512xf32>
    %313 = vector.shape_cast %312 : vector<1x2x512xf32> to vector<2x512xf32>
    %314 = vector.shape_cast %311 : vector<2x512xf32> to vector<1x2x512xf32>
    tpu.vector_store %arg9[%c0_298, %c0_299, %c1024_300], %314 {strides = array<i32>} : memref<1x2x2048xf32, #tpu.memory_space<vmem>>, vector<1x2x512xf32>,
    %c0_301 = arith.constant 0 : index
    %c1536 = arith.constant 1536 : index
    %315 = vector.load %arg10[%c0_301, %c1536] : memref<4x2304xf32, #tpu.memory_space<vmem>>, vector<4x512xf32>
    %c0_302 = arith.constant 0 : index
    %c0_303 = arith.constant 0 : index
    %316 = vector.load %arg11[%c0_302, %c0_303] : memref<108x512xf32, #tpu.memory_space<vmem>>, vector<4x512xf32>
    tpu.vector_store %arg11[%c0_302, %c0_303], %315 {strides = array<i32>} : memref<108x512xf32, #tpu.memory_space<vmem>>, vector<4x512xf32>,
    %c0_304 = arith.constant 0 : index
    %c1537 = arith.constant 1537 : index
    %317 = vector.load %arg10[%c0_304, %c1537] : memref<4x2304xf32, #tpu.memory_space<vmem>>, vector<4x512xf32>
    %c4_305 = arith.constant 4 : index
    %c0_306 = arith.constant 0 : index
    %318 = vector.load %arg11[%c4_305, %c0_306] : memref<108x512xf32, #tpu.memory_space<vmem>>, vector<4x512xf32>
    tpu.vector_store %arg11[%c4_305, %c0_306], %317 {strides = array<i32>} : memref<108x512xf32, #tpu.memory_space<vmem>>, vector<4x512xf32>,
    %c0_307 = arith.constant 0 : index
    %c1538 = arith.constant 1538 : index
    %319 = vector.load %arg10[%c0_307, %c1538] : memref<4x2304xf32, #tpu.memory_space<vmem>>, vector<4x512xf32>
    %c8_308 = arith.constant 8 : index
    %c0_309 = arith.constant 0 : index
    %320 = vector.load %arg11[%c8_308, %c0_309] : memref<108x512xf32, #tpu.memory_space<vmem>>, vector<4x512xf32>
    tpu.vector_store %arg11[%c8_308, %c0_309], %319 {strides = array<i32>} : memref<108x512xf32, #tpu.memory_space<vmem>>, vector<4x512xf32>,
    %c0_310 = arith.constant 0 : index
    %c1546 = arith.constant 1546 : index
    %321 = vector.load %arg10[%c0_310, %c1546] : memref<4x2304xf32, #tpu.memory_space<vmem>>, vector<4x512xf32>
    %c12_311 = arith.constant 12 : index
    %c0_312 = arith.constant 0 : index
    %322 = vector.load %arg11[%c12_311, %c0_312] : memref<108x512xf32, #tpu.memory_space<vmem>>, vector<4x512xf32>
    tpu.vector_store %arg11[%c12_311, %c0_312], %321 {strides = array<i32>} : memref<108x512xf32, #tpu.memory_space<vmem>>, vector<4x512xf32>,
    %c0_313 = arith.constant 0 : index
    %c1547 = arith.constant 1547 : index
    %323 = vector.load %arg10[%c0_313, %c1547] : memref<4x2304xf32, #tpu.memory_space<vmem>>, vector<4x512xf32>
    %c16_314 = arith.constant 16 : index
    %c0_315 = arith.constant 0 : index
    %324 = vector.load %arg11[%c16_314, %c0_315] : memref<108x512xf32, #tpu.memory_space<vmem>>, vector<4x512xf32>
    tpu.vector_store %arg11[%c16_314, %c0_315], %323 {strides = array<i32>} : memref<108x512xf32, #tpu.memory_space<vmem>>, vector<4x512xf32>,
    %c0_316 = arith.constant 0 : index
    %c1548 = arith.constant 1548 : index
    %325 = vector.load %arg10[%c0_316, %c1548] : memref<4x2304xf32, #tpu.memory_space<vmem>>, vector<4x512xf32>
    %c20_317 = arith.constant 20 : index
    %c0_318 = arith.constant 0 : index
    %326 = vector.load %arg11[%c20_317, %c0_318] : memref<108x512xf32, #tpu.memory_space<vmem>>, vector<4x512xf32>
    tpu.vector_store %arg11[%c20_317, %c0_318], %325 {strides = array<i32>} : memref<108x512xf32, #tpu.memory_space<vmem>>, vector<4x512xf32>,
    %c0_319 = arith.constant 0 : index
    %c1556 = arith.constant 1556 : index
    %327 = vector.load %arg10[%c0_319, %c1556] : memref<4x2304xf32, #tpu.memory_space<vmem>>, vector<4x512xf32>
    %c24_320 = arith.constant 24 : index
    %c0_321 = arith.constant 0 : index
    %328 = vector.load %arg11[%c24_320, %c0_321] : memref<108x512xf32, #tpu.memory_space<vmem>>, vector<4x512xf32>
    tpu.vector_store %arg11[%c24_320, %c0_321], %327 {strides = array<i32>} : memref<108x512xf32, #tpu.memory_space<vmem>>, vector<4x512xf32>,
    %c0_322 = arith.constant 0 : index
    %c1557 = arith.constant 1557 : index
    %329 = vector.load %arg10[%c0_322, %c1557] : memref<4x2304xf32, #tpu.memory_space<vmem>>, vector<4x512xf32>
    %c28_323 = arith.constant 28 : index
    %c0_324 = arith.constant 0 : index
    %330 = vector.load %arg11[%c28_323, %c0_324] : memref<108x512xf32, #tpu.memory_space<vmem>>, vector<4x512xf32>
    tpu.vector_store %arg11[%c28_323, %c0_324], %329 {strides = array<i32>} : memref<108x512xf32, #tpu.memory_space<vmem>>, vector<4x512xf32>,
    %c0_325 = arith.constant 0 : index
    %c1558 = arith.constant 1558 : index
    %331 = vector.load %arg10[%c0_325, %c1558] : memref<4x2304xf32, #tpu.memory_space<vmem>>, vector<4x512xf32>
    %c32_326 = arith.constant 32 : index
    %c0_327 = arith.constant 0 : index
    %332 = vector.load %arg11[%c32_326, %c0_327] : memref<108x512xf32, #tpu.memory_space<vmem>>, vector<4x512xf32>
    tpu.vector_store %arg11[%c32_326, %c0_327], %331 {strides = array<i32>} : memref<108x512xf32, #tpu.memory_space<vmem>>, vector<4x512xf32>,
    %c0_328 = arith.constant 0 : index
    %c1636 = arith.constant 1636 : index
    %333 = vector.load %arg10[%c0_328, %c1636] : memref<4x2304xf32, #tpu.memory_space<vmem>>, vector<4x512xf32>
    %c36_329 = arith.constant 36 : index
    %c0_330 = arith.constant 0 : index
    %334 = vector.load %arg11[%c36_329, %c0_330] : memref<108x512xf32, #tpu.memory_space<vmem>>, vector<4x512xf32>
    tpu.vector_store %arg11[%c36_329, %c0_330], %333 {strides = array<i32>} : memref<108x512xf32, #tpu.memory_space<vmem>>, vector<4x512xf32>,
    %c0_331 = arith.constant 0 : index
    %c1637 = arith.constant 1637 : index
    %335 = vector.load %arg10[%c0_331, %c1637] : memref<4x2304xf32, #tpu.memory_space<vmem>>, vector<4x512xf32>
    %c40_332 = arith.constant 40 : index
    %c0_333 = arith.constant 0 : index
    %336 = vector.load %arg11[%c40_332, %c0_333] : memref<108x512xf32, #tpu.memory_space<vmem>>, vector<4x512xf32>
    tpu.vector_store %arg11[%c40_332, %c0_333], %335 {strides = array<i32>} : memref<108x512xf32, #tpu.memory_space<vmem>>, vector<4x512xf32>,
    %c0_334 = arith.constant 0 : index
    %c1638 = arith.constant 1638 : index
    %337 = vector.load %arg10[%c0_334, %c1638] : memref<4x2304xf32, #tpu.memory_space<vmem>>, vector<4x512xf32>
    %c44_335 = arith.constant 44 : index
    %c0_336 = arith.constant 0 : index
    %338 = vector.load %arg11[%c44_335, %c0_336] : memref<108x512xf32, #tpu.memory_space<vmem>>, vector<4x512xf32>
    tpu.vector_store %arg11[%c44_335, %c0_336], %337 {strides = array<i32>} : memref<108x512xf32, #tpu.memory_space<vmem>>, vector<4x512xf32>,
    %c0_337 = arith.constant 0 : index
    %c1646 = arith.constant 1646 : index
    %339 = vector.load %arg10[%c0_337, %c1646] : memref<4x2304xf32, #tpu.memory_space<vmem>>, vector<4x512xf32>
    %c48_338 = arith.constant 48 : index
    %c0_339 = arith.constant 0 : index
    %340 = vector.load %arg11[%c48_338, %c0_339] : memref<108x512xf32, #tpu.memory_space<vmem>>, vector<4x512xf32>
    tpu.vector_store %arg11[%c48_338, %c0_339], %339 {strides = array<i32>} : memref<108x512xf32, #tpu.memory_space<vmem>>, vector<4x512xf32>,
    %c0_340 = arith.constant 0 : index
    %c1647 = arith.constant 1647 : index
    %341 = vector.load %arg10[%c0_340, %c1647] : memref<4x2304xf32, #tpu.memory_space<vmem>>, vector<4x512xf32>
    %c52_341 = arith.constant 52 : index
    %c0_342 = arith.constant 0 : index
    %342 = vector.load %arg11[%c52_341, %c0_342] : memref<108x512xf32, #tpu.memory_space<vmem>>, vector<4x512xf32>
    tpu.vector_store %arg11[%c52_341, %c0_342], %341 {strides = array<i32>} : memref<108x512xf32, #tpu.memory_space<vmem>>, vector<4x512xf32>,
    %c0_343 = arith.constant 0 : index
    %c1648 = arith.constant 1648 : index
    %343 = vector.load %arg10[%c0_343, %c1648] : memref<4x2304xf32, #tpu.memory_space<vmem>>, vector<4x512xf32>
    %c56_344 = arith.constant 56 : index
    %c0_345 = arith.constant 0 : index
    %344 = vector.load %arg11[%c56_344, %c0_345] : memref<108x512xf32, #tpu.memory_space<vmem>>, vector<4x512xf32>
    tpu.vector_store %arg11[%c56_344, %c0_345], %343 {strides = array<i32>} : memref<108x512xf32, #tpu.memory_space<vmem>>, vector<4x512xf32>,
    %c0_346 = arith.constant 0 : index
    %c1656 = arith.constant 1656 : index
    %345 = vector.load %arg10[%c0_346, %c1656] : memref<4x2304xf32, #tpu.memory_space<vmem>>, vector<4x512xf32>
    %c60_347 = arith.constant 60 : index
    %c0_348 = arith.constant 0 : index
    %346 = vector.load %arg11[%c60_347, %c0_348] : memref<108x512xf32, #tpu.memory_space<vmem>>, vector<4x512xf32>
    tpu.vector_store %arg11[%c60_347, %c0_348], %345 {strides = array<i32>} : memref<108x512xf32, #tpu.memory_space<vmem>>, vector<4x512xf32>,
    %c0_349 = arith.constant 0 : index
    %c1657 = arith.constant 1657 : index
    %347 = vector.load %arg10[%c0_349, %c1657] : memref<4x2304xf32, #tpu.memory_space<vmem>>, vector<4x512xf32>
    %c64_350 = arith.constant 64 : index
    %c0_351 = arith.constant 0 : index
    %348 = vector.load %arg11[%c64_350, %c0_351] : memref<108x512xf32, #tpu.memory_space<vmem>>, vector<4x512xf32>
    tpu.vector_store %arg11[%c64_350, %c0_351], %347 {strides = array<i32>} : memref<108x512xf32, #tpu.memory_space<vmem>>, vector<4x512xf32>,
    %c0_352 = arith.constant 0 : index
    %c1658 = arith.constant 1658 : index
    %349 = vector.load %arg10[%c0_352, %c1658] : memref<4x2304xf32, #tpu.memory_space<vmem>>, vector<4x512xf32>
    %c68_353 = arith.constant 68 : index
    %c0_354 = arith.constant 0 : index
    %350 = vector.load %arg11[%c68_353, %c0_354] : memref<108x512xf32, #tpu.memory_space<vmem>>, vector<4x512xf32>
    tpu.vector_store %arg11[%c68_353, %c0_354], %349 {strides = array<i32>} : memref<108x512xf32, #tpu.memory_space<vmem>>, vector<4x512xf32>,
    %c0_355 = arith.constant 0 : index
    %c1736 = arith.constant 1736 : index
    %351 = vector.load %arg10[%c0_355, %c1736] : memref<4x2304xf32, #tpu.memory_space<vmem>>, vector<4x512xf32>
    %c72_356 = arith.constant 72 : index
    %c0_357 = arith.constant 0 : index
    %352 = vector.load %arg11[%c72_356, %c0_357] : memref<108x512xf32, #tpu.memory_space<vmem>>, vector<4x512xf32>
    tpu.vector_store %arg11[%c72_356, %c0_357], %351 {strides = array<i32>} : memref<108x512xf32, #tpu.memory_space<vmem>>, vector<4x512xf32>,
    %c0_358 = arith.constant 0 : index
    %c1737 = arith.constant 1737 : index
    %353 = vector.load %arg10[%c0_358, %c1737] : memref<4x2304xf32, #tpu.memory_space<vmem>>, vector<4x512xf32>
    %c76_359 = arith.constant 76 : index
    %c0_360 = arith.constant 0 : index
    %354 = vector.load %arg11[%c76_359, %c0_360] : memref<108x512xf32, #tpu.memory_space<vmem>>, vector<4x512xf32>
    tpu.vector_store %arg11[%c76_359, %c0_360], %353 {strides = array<i32>} : memref<108x512xf32, #tpu.memory_space<vmem>>, vector<4x512xf32>,
    %c0_361 = arith.constant 0 : index
    %c1738 = arith.constant 1738 : index
    %355 = vector.load %arg10[%c0_361, %c1738] : memref<4x2304xf32, #tpu.memory_space<vmem>>, vector<4x512xf32>
    %c80_362 = arith.constant 80 : index
    %c0_363 = arith.constant 0 : index
    %356 = vector.load %arg11[%c80_362, %c0_363] : memref<108x512xf32, #tpu.memory_space<vmem>>, vector<4x512xf32>
    tpu.vector_store %arg11[%c80_362, %c0_363], %355 {strides = array<i32>} : memref<108x512xf32, #tpu.memory_space<vmem>>, vector<4x512xf32>,
    %c0_364 = arith.constant 0 : index
    %c1746 = arith.constant 1746 : index
    %357 = vector.load %arg10[%c0_364, %c1746] : memref<4x2304xf32, #tpu.memory_space<vmem>>, vector<4x512xf32>
    %c84_365 = arith.constant 84 : index
    %c0_366 = arith.constant 0 : index
    %358 = vector.load %arg11[%c84_365, %c0_366] : memref<108x512xf32, #tpu.memory_space<vmem>>, vector<4x512xf32>
    tpu.vector_store %arg11[%c84_365, %c0_366], %357 {strides = array<i32>} : memref<108x512xf32, #tpu.memory_space<vmem>>, vector<4x512xf32>,
    %c0_367 = arith.constant 0 : index
    %c1747 = arith.constant 1747 : index
    %359 = vector.load %arg10[%c0_367, %c1747] : memref<4x2304xf32, #tpu.memory_space<vmem>>, vector<4x512xf32>
    %c88_368 = arith.constant 88 : index
    %c0_369 = arith.constant 0 : index
    %360 = vector.load %arg11[%c88_368, %c0_369] : memref<108x512xf32, #tpu.memory_space<vmem>>, vector<4x512xf32>
    tpu.vector_store %arg11[%c88_368, %c0_369], %359 {strides = array<i32>} : memref<108x512xf32, #tpu.memory_space<vmem>>, vector<4x512xf32>,
    %c0_370 = arith.constant 0 : index
    %c1748 = arith.constant 1748 : index
    %361 = vector.load %arg10[%c0_370, %c1748] : memref<4x2304xf32, #tpu.memory_space<vmem>>, vector<4x512xf32>
    %c92_371 = arith.constant 92 : index
    %c0_372 = arith.constant 0 : index
    %362 = vector.load %arg11[%c92_371, %c0_372] : memref<108x512xf32, #tpu.memory_space<vmem>>, vector<4x512xf32>
    tpu.vector_store %arg11[%c92_371, %c0_372], %361 {strides = array<i32>} : memref<108x512xf32, #tpu.memory_space<vmem>>, vector<4x512xf32>,
    %c0_373 = arith.constant 0 : index
    %c1756 = arith.constant 1756 : index
    %363 = vector.load %arg10[%c0_373, %c1756] : memref<4x2304xf32, #tpu.memory_space<vmem>>, vector<4x512xf32>
    %c96_374 = arith.constant 96 : index
    %c0_375 = arith.constant 0 : index
    %364 = vector.load %arg11[%c96_374, %c0_375] : memref<108x512xf32, #tpu.memory_space<vmem>>, vector<4x512xf32>
    tpu.vector_store %arg11[%c96_374, %c0_375], %363 {strides = array<i32>} : memref<108x512xf32, #tpu.memory_space<vmem>>, vector<4x512xf32>,
    %c0_376 = arith.constant 0 : index
    %c1757 = arith.constant 1757 : index
    %365 = vector.load %arg10[%c0_376, %c1757] : memref<4x2304xf32, #tpu.memory_space<vmem>>, vector<4x512xf32>
    %c100_377 = arith.constant 100 : index
    %c0_378 = arith.constant 0 : index
    %366 = vector.load %arg11[%c100_377, %c0_378] : memref<108x512xf32, #tpu.memory_space<vmem>>, vector<4x512xf32>
    tpu.vector_store %arg11[%c100_377, %c0_378], %365 {strides = array<i32>} : memref<108x512xf32, #tpu.memory_space<vmem>>, vector<4x512xf32>,
    %c0_379 = arith.constant 0 : index
    %c1758 = arith.constant 1758 : index
    %367 = vector.load %arg10[%c0_379, %c1758] : memref<4x2304xf32, #tpu.memory_space<vmem>>, vector<4x512xf32>
    %c104_380 = arith.constant 104 : index
    %c0_381 = arith.constant 0 : index
    %368 = vector.load %arg11[%c104_380, %c0_381] : memref<108x512xf32, #tpu.memory_space<vmem>>, vector<4x512xf32>
    tpu.vector_store %arg11[%c104_380, %c0_381], %367 {strides = array<i32>} : memref<108x512xf32, #tpu.memory_space<vmem>>, vector<4x512xf32>,
    %c0_382 = arith.constant 0 : index
    %c0_383 = arith.constant 0 : index
    %369 = vector.load %arg7[%c0_382, %c0_383] : memref<2x108xf32, #tpu.memory_space<vmem>>, vector<2x108xf32>
    %c0_384 = arith.constant 0 : index
    %c0_385 = arith.constant 0 : index
    %370 = vector.load %arg11[%c0_384, %c0_385] : memref<108x512xf32, #tpu.memory_space<vmem>>, vector<108x512xf32>
    %cst_386 = arith.constant dense<0.000000e+00> : vector<2x512xf32>
    %371 = tpu.matmul %369, %370, %cst_386 {dimension_numbers = #tpu.dot_dimension_numbers<[1], [0], [0], [1], [0, 0, 1, 1], [], []>} : vector<2x108xf32>, vector<108x512xf32>, vector<2x512xf32> -> vector<2x512xf32>
    %c0_387 = arith.constant 0 : index
    %c0_388 = arith.constant 0 : index
    %372 = vector.load %arg8[%c0_387, %c0_388] : memref<2x1xf32, #tpu.memory_space<vmem>>, vector<2x1xf32>
    %373 = vector.broadcast %372 : vector<2x1xf32> to vector<2x512xf32>
    %374 = arith.addf %371, %373 : vector<2x512xf32>
    %c0_389 = arith.constant 0 : index
    %c0_390 = arith.constant 0 : index
    %c1536_391 = arith.constant 1536 : index
    %375 = vector.load %arg9[%c0_389, %c0_390, %c1536_391] : memref<1x2x2048xf32, #tpu.memory_space<vmem>>, vector<1x2x512xf32>
    %376 = vector.shape_cast %375 : vector<1x2x512xf32> to vector<2x512xf32>
    %377 = vector.shape_cast %374 : vector<2x512xf32> to vector<1x2x512xf32>
    tpu.vector_store %arg9[%c0_389, %c0_390, %c1536_391], %377 {strides = array<i32>} : memref<1x2x2048xf32, #tpu.memory_space<vmem>>, vector<1x2x512xf32>,
    return
  }
  func.func @transform_0(%arg0: i32, %arg1: i32, %arg2: memref<2x2xi32, #tpu.memory_space<smem>>) -> (i32, i32, i32) {
    %c0_i32 = arith.constant 0 : i32
    %c0_i32_0 = arith.constant 0 : i32
    return %arg0, %c0_i32, %arg1 : i32, i32, i32
  }
  func.func @transform_1(%arg0: i32, %arg1: i32, %arg2: memref<2x2xi32, #tpu.memory_space<smem>>) -> (i32, i32, i32) {
    %c1_i32 = arith.constant 1 : i32
    %0 = arith.addi %arg1, %c1_i32 : i32
    %c8_i32 = arith.constant 8 : i32
    %1 = arith.muli %0, %c8_i32 : i32
    %c0_i32 = arith.constant 0 : i32
    %c0_i32_0 = arith.constant 0 : i32
    return %arg0, %c0_i32, %1 : i32, i32, i32
  }
  func.func @transform_2(%arg0: i32, %arg1: i32, %arg2: memref<2x2xi32, #tpu.memory_space<smem>>) -> (i32, i32) {
    %c0_i32 = arith.constant 0 : i32
    %c0_i32_0 = arith.constant 0 : i32
    %c0_i32_1 = arith.constant 0 : i32
    return %c0_i32, %c0_i32_0 : i32, i32
  }
  func.func @transform_3(%arg0: i32, %arg1: i32, %arg2: memref<2x2xi32, #tpu.memory_space<smem>>) -> (i32, i32) {
    %c0_i32 = arith.constant 0 : i32
    %c0_i32_0 = arith.constant 0 : i32
    %c0_i32_1 = arith.constant 0 : i32
    return %c0_i32, %c0_i32_0 : i32, i32
  }
  func.func @transform_4(%arg0: i32, %arg1: i32, %arg2: memref<2x2xi32, #tpu.memory_space<smem>>) -> (i32, i32) {
    %c0_i32 = arith.constant 0 : i32
    %c0_i32_0 = arith.constant 0 : i32
    %c0_i32_1 = arith.constant 0 : i32
    return %c0_i32, %c0_i32_0 : i32, i32
  }
  func.func @transform_5(%arg0: i32, %arg1: i32, %arg2: memref<2x2xi32, #tpu.memory_space<smem>>) -> (i32, i32) {
    %c0_i32 = arith.constant 0 : i32
    %c0_i32_0 = arith.constant 0 : i32
    %c0_i32_1 = arith.constant 0 : i32
    return %c0_i32, %c0_i32_0 : i32, i32
  }
  func.func @transform_6(%arg0: i32, %arg1: i32, %arg2: memref<2x2xi32, #tpu.memory_space<smem>>) -> (i32, i32, i32) {
    %c0_i32 = arith.constant 0 : i32
    %c0_i32_0 = arith.constant 0 : i32
    return %arg0, %c0_i32, %arg1 : i32, i32, i32
  }
}

</mosaic_0001>

<bundles_post_ra>
// kernel: tpu_custom_call.1
= control target key start
LH: loop header
LB: loop body
LE: loop exit
PB: predicated region body
PF: predicated region fallthrough
CT: control target
= control target key end

     0   :  { %s9434_s0 = inlined_call_operand.vmem [shape: s32[2,2], index: 0, kind: input, shape index: {}]   ;;  %s9435_s1 = inlined_call_operand.hbm [shape: f32[2,4,2400], index: 1, kind: input, shape index: {}]   ;;  %s9436_s2 = inlined_call_operand.hbm [shape: f32[2,4,2400], index: 2, kind: input, shape index: {}]   ;;  %s9437_s3 = inlined_call_operand.vmem [shape: f32[4,1], index: 3, kind: input, shape index: {}]   ;;  %s9438_s4 = inlined_call_operand.vmem [shape: f32[4,1], index: 4, kind: input, shape index: {}]   ;;  %s9439_s5 = inlined_call_operand.vmem [shape: f32[2,108], index: 5, kind: input, shape index: {}]   ;;  %s9440_s6 = inlined_call_operand.vmem [shape: f32[2,1], index: 6, kind: input, shape index: {}]   ;;  %s9441_s7 = inlined_call_operand.hbm [shape: f32[2,2,2048], index: 7, kind: output, shape index: {}]  }
   0x1   :  { %9536 = sst [smem:[#allocation27_spill]] %s9435_s1  ;;  %s12_s26 = sshll.u32 %s9434_s0, 4  ;;  %s13_s26 = int_to_ptr.vmem [resolvable:$true] %s12_s26 }
   0x2   :  { %9537 = sst [smem:[#allocation28_spill]] %s9436_s2  ;;  %s5890_s27 = scalar_lea.vmem %s13_s26, 32 }
   0x3   :  { %9538 = sst [smem:[#allocation29_spill]] %s9437_s3  ;;  %p5891_p0 = scmp.ne.s32.totalorder %s13_s26, %s5890_s27 }
   0x4   :  { %9539 = sst [smem:[#allocation30_spill]] %s9438_s4  ;;  %p5895_p1 = scmp.lt.s32.totalorder %s13_s26, %s13_s26 }
   0x5   :  { %9540 = sst [smem:[#allocation31_spill]] %s9441_s7  ;;  %p5896_p2 = scmp.lt.s32.totalorder %s5890_s27, %s5890_s27 }
   0x7   :  { %p5897_p3 = por %p5896_p2, %p5895_p1 }
   0x9   :  { %p5898_p4 = pnand %p5897_p3, %p5891_p0 }
   0xb   :  { %5901 = shalt.err (!%p5898_p4)  }
   0xc   :  { %s6053_s28 = smov [#allocation5]  }
   0xd   :  { %15 = dma.vmem_to_smem %s13_s26, 32, %s6053_s28, [#allocation4] }
   0xe   :  { %6015 = dma.done.wait [#allocation4], 32 }
   0xf   :  { %6016 = vsyncadd [#allocation4], 4294967264 }
  0x10   :  { %17 = sfence }
  0x11   :  { %18 = vsyncpa [#allocation7], 0 }
  0x12   :  { %20 = vsyncpa [#allocation7 + $0x1], 0 }
  0x13   :  { %21 = vsyncpa [#allocation10], 0 }
  0x14   :  { %23 = vsyncpa [#allocation10 + $0x1], 0 }
  0x15   :  { %24 = vsyncpa [#allocation8], 0 }
  0x16   :  { %26 = vsyncpa [#allocation8 + $0x1], 0  ;;  %s6131_s0 = smov 0   ;;  %s6133_s29 = smov 0  }
  0x17   :  { %s6135_s30 = smov 0   ;;  %s6137_s8 = smov 0  }
  0x18   :  { %s6139_s9 = smov 0   ;;  %s6141_s10 = smov 0  }
  0x19 LB: > { %9541 = sst [smem:[#allocation16_spill]] %s6031_s0  ;;  %s5409_s11 = sadd.s32 4294967295, %s6051_s10   ;;  %s6051_s10 = sphi %s6141_s10, %s32_s10   ;;  %s6047_s9 = sphi %s6139_s9, %s10067_s9   ;;  %s6043_s8 = sphi %s6137_s8, %s10066_s8   ;;  %s6039_s30 = sphi %s6135_s30, %s10065_s30   ;;  %s6035_s29 = sphi %s6133_s29, %s10064_s29   ;;  %s6031_s0 = sphi %s6131_s0, %s10063_s0  }
  0x1a   : > { %9542 = sst [smem:[#allocation17_spill]] %s6035_s29  ;;  %s5410_s12 = sadd.s32 4294967294, %s6051_s10  }
  0x1b   : > { %9543 = sst [smem:[#allocation18_spill]] %s6039_s30  ;;  %s44_s13 = sadd.s32 1, %s6047_s9 }
  0x1c   : > { %9544 = sst [smem:[#allocation19_spill]] %s6047_s9  ;;  %s53_s14 = sadd.s32 1, %s6039_s30 }
  0x1d   : > { %9545 = sst [smem:[#allocation20_spill]] %s6051_s10  ;;  %p46_p5 = scmp.ge.s32.totalorder %s44_s13, 2 }
  0x1e   : > { %p60_p6 = scmp.ne.s32.totalorder %s6039_s30, %s6035_s29  ;;  %p61_p7 = scmp.eq.s32.totalorder %s6051_s10, 0 }
  0x1f   : > { %p66_p8 = scmp.ne.s32.totalorder %s6035_s29, %s6031_s0  ;;  %s10069_s13 = smov (%p46_p5, %s44_s13), 0 }
  0x20   : > { %9546 = sst [smem:[#allocation21_spill]] %s10069_s13  ;;  %p6172_p9 = por %p61_p7, %p60_p6 }
  0x21   : > { %p67_p10 = scmp.eq.s32.totalorder %s5409_s11, 0  ;;  %s48_s16 = ssub.s32 %s6047_s9, %s10069_s13 }
  0x22   : > { %p208_p11 = scmp.eq.s32.totalorder %s5409_s11, 1  ;;  %p51_p12 = scmp.eq.s32.totalorder %s48_s16, 0 }
  0x23   : > { %p6178_p13 = por %p67_p10, %p66_p8  ;;  %p214_p1 = scmp.eq.s32.totalorder %s5410_s12, 1 }
  0x24   : > { %p6182_p0 = por %p208_p11, %p60_p6  ;;  %p5712_p4 = scmp.lt.s32.totalorder %s6051_s10, 2 }
  0x25   : > { %s9548_s17 = scalar_select %p6178_p13, 1, 0 }
  0x26   : > { %s9549_s18 = scalar_select %p6182_p0, 1, 0 }
  0x27   : > { %s6187_s19 = scalar_select %p51_p12, %s6039_s30, %s53_s14  }
  0x28   : > { %9550 = sst [smem:[#allocation22_spill]] %s9549_s18  ;;  %p6189_p2 = por %p214_p1, %p66_p8 }
  0x29   : > { %9551 = sst [smem:[#allocation23_spill]] %s6187_s19  ;;  %s6196_s21 = sand.u32 1, %s6039_s30  }
  0x2a   : > { %s9552_s20 = scalar_select %p6189_p2, 1, 0 }
  0x2b   : > { %s5413_s22 = sshll.u32 %s6196_s21, 6  ;;  %s5694_s23 = smul.u32 1216, %s6047_s9 }
  0x2c   : > { %9553 = sst [smem:[#allocation24_spill]] %s9552_s20  ;;  %s250_s24 = scalar_lea.vmem [#allocation6], %s5413_s22 }
  0x2d   : > { %s266_s25 = sshll.u32 %s250_s24, 4  ;;  %p6202_p5 = pnand %p5712_p4, %p6172_p9  ;;  %s6213_s25 = int_to_ptr.vmem [resolvable:$true] %s266_s25 }
  0x2e   : > { %s9555_s1 = sld [smem:[#allocation27_spill]]  ;;  %s247_s12 = scalar_lea.sflag [#allocation7], %s6196_s21 }
  0x2f   : > { %p5904_p8 = pneg %p6202_p5 }
  0x34   : > { %s6211_s11 = scalar_lea.hbm %s9555_s1, %s5694_s23  ;;  %s5907_s22 = scalar_lea.hbm %s9555_s1, 2432 }
  0x35   : > { %s5902_s14 = scalar_lea.hbm %s6211_s11, 1024  ;;  %p5908_p11 = scmp.lt.u32.totalorder %s6211_s11, %s9555_s1 }
  0x36   : > { %p5903_p7 = scmp.ne.s32.totalorder %s6211_s11, %s5902_s14  ;;  %p5909_p12 = scmp.lt.u32.totalorder %s5907_s22, %s5902_s14 }
  0x37   : > { %p5911_p4 = scmp.lt.u32.totalorder %s5902_s14, %s6211_s11 }
  0x38   : > { %p5905_p9 = pnand %p5904_p8, %p5903_p7  ;;  %p5910_p1 = por %p5909_p12, %p5908_p11 }
  0x3a   : > { %p5906_p10 = pneg %p5905_p9  ;;  %p5912_p3 = por %p5911_p4, %p5910_p1 }
  0x3c   : > { %p5913_p6 = pnand %p5912_p3, %p5906_p10 }
  0x3e   : > { %5916 = shalt.err (!%p5913_p6)
}
  0x3f   : > { %s5917_s28 = scalar_lea.vmem %s6213_s25, 1024  ;;  %s6054_s15 = smov [#allocation6]  }
  0x40   : > { %p5918_p7 = scmp.ne.s32.totalorder %s6213_s25, %s5917_s28  ;;  %s5922_s16 = sshll.u32 %s6054_s15, 4  ;;  %s5923_s16 = int_to_ptr.vmem [resolvable:$false] %s5922_s16 }
  0x41   : > { %s5924_s24 = scalar_lea.vmem %s5923_s16, 2048  ;;  %p5925_p0 = scmp.lt.s32.totalorder %s6213_s25, %s5923_s16 }
  0x42   : > { %p5920_p9 = pnand %p5918_p7, %p5904_p8  ;;  %p5926_p11 = scmp.lt.s32.totalorder %s5924_s24, %s5917_s28 }
  0x44   : > { %p5921_p2 = pneg %p5920_p9  ;;  %p5927_p12 = por %p5926_p11, %p5925_p0 }
  0x46   : > { %p5928_p1 = pnand %p5927_p12, %p5921_p2 }
  0x48   : > { %5931 = shalt.err (!%p5928_p1)
}
  0x49   : > { %5704 = dma.hbm_to_vmem [thread:$0]  (!%p6202_p5), %s6211_s11, 1024, %s6213_s25, %s247_s12  }
  0x4a   : > { %p300_p3 = scmp.lt.s32.totalorder %s6051_s10, 3  ;;  %s5415_s14 = sshll.u32 %s6196_s21, 3 }
  0x4b   : > { %s9556_s2 = sld [smem:[#allocation28_spill]]  ;;  %p9557_p0 = scmp.ge.s32.totalorder %s6051_s10, 1 }
  0x4c   : > { %s277_s24 = scalar_lea.vmem [#allocation9], %s5415_s14  ;;  %s274_s25 = scalar_lea.sflag [#allocation10], %s6196_s21 }
  0x4d   : > { %p6251_p2 = pnand %p9557_p0, %p300_p3  ;;  %s295_s1 = sshll.u32 %s277_s24, 4  ;;  %s296_s1 = int_to_ptr.vmem [resolvable:$true] %s295_s1 }
  0x4f   : > { %s9558_s15 = scalar_select %p6251_p2, 1, 0 }
  0x51   : > { %s5340_s28 = scalar_lea.hbm %s9556_s2, %s5694_s23  ;;  %s5937_s22 = scalar_lea.hbm %s9556_s2, 2432 }
  0x52   : > { %s6255_s16 = scalar_lea.hbm %s5340_s28, 1024  ;;  %s5962_s11 = scalar_lea.hbm %s5340_s28, 1152 }
  0x53   : > { %p5933_p6 = scmp.ne.s32.totalorder %s6255_s16, %s5962_s11  ;;  %p5938_p7 = scmp.lt.u32.totalorder %s6255_s16, %s9556_s2 }
  0x54   : > { %p5939_p9 = scmp.lt.u32.totalorder %s5937_s22, %s5962_s11  ;;  %p5941_p12 = scmp.lt.u32.totalorder %s5962_s11, %s6255_s16 }
  0x55   : > { %p5935_p10 = pnand %p5933_p6, %p5904_p8 }
  0x56   : > { %p5940_p11 = por %p5939_p9, %p5938_p7 }
  0x57   : > { %p5936_p4 = pneg %p5935_p10 }
  0x58   : > { %p5942_p1 = por %p5941_p12, %p5940_p11 }
  0x5a   : > { %p5943_p3 = pnand %p5942_p1, %p5936_p4 }
  0x5c   : > { %5946 = shalt.err (!%p5943_p3)
}
  0x5d   : > { %s5947_s21 = scalar_lea.vmem %s296_s1, 128  ;;  %s6055_s14 = smov [#allocation9]  }
  0x5e   : > { %p5948_p0 = scmp.ne.s32.totalorder %s296_s1, %s5947_s21  ;;  %s5952_s28 = sshll.u32 %s6055_s14, 4  ;;  %s5953_s28 = int_to_ptr.vmem [resolvable:$false] %s5952_s28 }
  0x5f   : > { %s5954_s24 = scalar_lea.vmem %s5953_s28, 256  ;;  %p5955_p13 = scmp.lt.s32.totalorder %s296_s1, %s5953_s28 }
  0x60   : > { %p5950_p6 = pnand %p5948_p0, %p5904_p8  ;;  %p5956_p2 = scmp.lt.s32.totalorder %s5954_s24, %s5947_s21 }
  0x62   : > { %p5951_p10 = pneg %p5950_p6  ;;  %p5957_p7 = por %p5956_p2, %p5955_p13 }
  0x64   : > { %p5958_p9 = pnand %p5957_p7, %p5951_p10 }
  0x66   : > { %5961 = shalt.err (!%p5958_p9)
}
  0x67   : > { %5707 = dma.hbm_to_vmem [thread:$0]  (!%p6202_p5), %s6255_s16, 128, %s296_s1, %s274_s25  }
  0x68   : > { %p9559_p4 = scmp.ne.s32.totalorder %s9558_s15, 0 }
  0x6a   : > { %304 = sbr.rel (%p9559_p4) target bundleno = 1702 (0x6a6), region = 44 }
  0x71   : > { %s6279_s13 = sand.u32 1, %s6035_s29   ;;  %p9561_p13 = scmp.ne.s32.totalorder %s9548_s17, 0 }
  0x72   : > { %9560 = sst [smem:[#allocation25_spill]] %s6279_s13  ;;  %s5418_s11 = sshll.u32 %s6279_s13, 6 }
  0x73   : > { %s307_s23 = scalar_lea.sflag [#allocation7], %s6279_s13  ;;  %s6283_s12 = scalar_lea.vmem [#allocation6], %s5418_s11 }
  0x74   : > { %6018 = dma.done.wait (%p9561_p13), %s307_s23, 1024  }
  0x75   : > { %6020 = vsyncadd (%p9561_p13), %s307_s23, 4294966272  ;;  %s5419_s1 = sshll.u32 %s6279_s13, 3  ;;  %s316_s26 = scalar_lea.sflag [#allocation10], %s6279_s13 }
  0x76   : > { %s6291_s15 = scalar_lea.vmem [#allocation9], %s5419_s1 }
  0x77   : > { %6022 = dma.done.wait (%p9561_p13), %s316_s26, 128  }
  0x78   : > { %6024 = vsyncadd (%p9561_p13), %s316_s26, 4294967168  ;;  %v9445_v0 = vmov 0   ;;  %s9562_s3 = sld [smem:[#allocation29_spill]]  ;;  %s9563_s4 = sld [smem:[#allocation30_spill]]  ;;  %v9447_v5 = vlaneseq }
  0x79   : > { %5795 = vset.pattern.permute.xlu1 %v9445_v0  ;;  %5794 = vset.pattern.permute.xlu0 %v9445_v0  ;;  %s5423_s24 = sld [smem:[#allocation5 + $0x81]]  ;;  %s6375_s23 = sld [smem:[#allocation5]] }
  0x7a   : > { %s5421_s11 = sld [smem:[#allocation5 + $0x1]]  ;;  %v6312_v6 = vand.u32 127, %v9447_v5  ;;  %s6380_s1 = sld [smem:[#allocation5 + $0x80]] }
  0x7b   : > { %s9515_s25 = smov 118   ;;  %s9513_s22 = smov 117  }
  0x7c   : > { %v380_v7 = vadd.s32 128, %v6312_v6  ;;  %v385_v19 = vadd.s32 768, %v6312_v6  ;;  %v386_v20 = vadd.s32 896, %v6312_v6  ;;  %v387_v23 = vadd.s32 1024, %v6312_v6  ;;  %s9511_s27 = smov 116   ;;  %s9509_s21 = smov 108  }
  0x7d   : > { %v388_v24 = vadd.s32 1152, %v6312_v6  ;;  %v389_v25 = vadd.s32 1280, %v6312_v6  ;;  %v390_v26 = vadd.s32 1408, %v6312_v6  ;;  %v391_v27 = vadd.s32 1536, %v6312_v6  ;;  %s9507_s14 = smov 107   ;;  %s9505_s17 = smov 106  }
  0x7e   : > { %v1017_v1 = vld [vmem:[%s9562_s3] sm:$0xf]  ;;  %v392_v28 = vadd.s32 1664, %v6312_v6  ;;  %v393_v29 = vadd.s32 1792, %v6312_v6  ;;  %v394_v31 = vadd.s32 1920, %v6312_v6  ;;  %s9503_s28 = smov 28  }
  0x7f   : > { %v782_v2 = vld [vmem:[%s9562_s3] sm:$0xf]  ;;  %1020 = vperm.xlu1 %5795, %v1017_v1   ;;  %v966_v8 = vstv %s5423_s24  ;;  %s588_s26 = scvt.s32.f32 %s6375_s23  ;;  %s9501_s24 = smov 27  }
  0x80   : > { %785 = vperm.xlu0 %5794, %v782_v2   ;;  %v1031_v3 = vld [vmem:[%s9563_s4] sm:$0xf]  ;;  %v6315_v9 = vstv %s5421_s11  ;;  %v967_v11 = vadd.s32 %v966_v8, %v6312_v6  ;;  %v968_v12 = vadd.s32 %v966_v8, %v380_v7  ;;  %s991_s16 = scvt.s32.f32 %s6380_s1  ;;  %s9497_s11 = smov 26  }
  0x81   : > { %v803_v4 = vld [vmem:[%s9563_s4] sm:$0xf]  ;;  %v397_v10 = vadd.s32 %v6315_v9, %v380_v7  ;;  %v6336_v32 = vadd.s32 %v6315_v9, %v385_v19  ;;  %v6339_v33 = vadd.s32 %v6315_v9, %v386_v20  ;;  %v6344_v36 = vadd.s32 %v6315_v9, %v387_v23  ;;  %s9499_s23 = smov 18   ;;  %s9482_s1 = smov 17  }
  0x82   : > { %v969_v14 = vcvt.s32.f32 %v967_v11  ;;  %v970_v15 = vcvt.s32.f32 %v968_v12  ;;  %v6347_v37 = vadd.s32 %v6315_v9, %v388_v24  ;;  %v6350_v38 = vadd.s32 %v6315_v9, %v389_v25  ;;  %s9876_s2 = smov 127   ;;  %s9890_s3 = smov 117  }
  0x83   : > { %1034 = vperm.xlu1 %5795, %v1031_v3   ;;  %v413_v13 = vcvt.s32.f32 %v397_v10  ;;  %v6353_v39 = vadd.s32 %v6315_v9, %v390_v26  ;;  %v6356_v40 = vadd.s32 %v6315_v9, %v391_v27  ;;  %v6359_v41 = vadd.s32 %v6315_v9, %v392_v28  ;;  %s9896_s4 = smov 116   ;;  %s9900_s9 = smov 108  }
  0x84   : > { %806 = vperm.xlu0 %5794, %v803_v4   ;;  %v971_v17 = vadd.f32 0.5, %v969_v14  ;;  %v972_v18 = vadd.f32 0.5, %v970_v15  ;;  %v6362_v42 = vadd.s32 %v6315_v9, %v393_v29  ;;  %v6366_v44 = vadd.s32 %v6315_v9, %v394_v31  ;;  %s9906_s19 = smov 107   ;;  %s9910_s30 = smov 106  }
  0x85   : > { %v429_v16 = vadd.f32 0.5, %v413_v13  ;;  %v418_v45 = vcvt.s32.f32 %v6336_v32  ;;  %v419_v46 = vcvt.s32.f32 %v6339_v33  ;;  %v420_v49 = vcvt.s32.f32 %v6344_v36  ;;  %s5420_s29 = sshll.u32 %s6279_s13, 5  ;;  %s9916_s10 = smov 28  }
  0x86   : > { %v6323_v22 = vmul.f32 0.01, %v971_v17  ;;  %v6332_v30 = vmul.f32 0.01, %v972_v18  ;;  %v421_v50 = vcvt.s32.f32 %v6347_v37  ;;  %v422_v51 = vcvt.s32.f32 %v6350_v38  ;;  %s8554_s20 = scalar_lea.vmem [#allocation11], %s5420_s29  ;;  %s9920_s0 = smov 27  }
  0x87   : > { %v6321_v21 = vmul.f32 0.01, %v429_v16  ;;  %v423_v52 = vcvt.s32.f32 %v6353_v39  ;;  %v424_v53 = vcvt.s32.f32 %v6356_v40  ;;  %v425_v54 = vcvt.s32.f32 %v6359_v41  ;;  %s9926_s29 = smov 26   ;;  %s9930_s7 = smov 18  }
  0x88   : > { %v975_v35 = vfloor.f32 %v6323_v22  ;;  %v976_v43 = vfloor.f32 %v6332_v30  ;;  %v426_v55 = vcvt.s32.f32 %v6362_v42  ;;  %v427_v57 = vcvt.s32.f32 %v6366_v44  ;;  %s9941_s18 = smov 34   ;;  %s10054_s13 = sld [smem:[#allocation25_spill]] }
  0x89   : > { %v461_v34 = vfloor.f32 %v6321_v21  ;;  %v434_v58 = vadd.f32 0.5, %v418_v45  ;;  %v435_v59 = vadd.f32 0.5, %v419_v46  ;;  %v436_v62 = vadd.f32 0.5, %v420_v49 }
  0x8a   : > { %v977_v48 = vmul.f32 100.0, %v975_v35  ;;  %v978_v56 = vmul.f32 100.0, %v976_v43  ;;  %v437_v63 = vadd.f32 0.5, %v421_v50  ;;  %v438_v1 = vadd.f32 0.5, %v422_v51 }
  0x8b   : > { %v477_v47 = vmul.f32 100.0, %v461_v34  ;;  %v439_v2 = vadd.f32 0.5, %v423_v52  ;;  %v440_v3 = vadd.f32 0.5, %v424_v53  ;;  %v441_v4 = vadd.f32 0.5, %v425_v54 }
  0x8c   : > { %v6394_v61 = vsub.f32 %v969_v14, %v977_v48  ;;  %v442_v7 = vadd.f32 0.5, %v426_v55  ;;  %v6410_v8 = vsub.f32 %v970_v15, %v978_v56  ;;  %v443_v10 = vadd.f32 0.5, %v427_v57 }
  0x8d   : > { %v6392_v60 = vsub.f32 %v413_v13, %v477_v47  ;;  %v6414_v11 = vmul.f32 0.01, %v434_v58  ;;  %v6416_v12 = vmul.f32 0.01, %v435_v59  ;;  %v6420_v16 = vmul.f32 0.01, %v436_v62 }
  0x8e   : > { %v981_v14 = vadd.f32 0.5, %v6394_v61  ;;  %v6423_v17 = vmul.f32 0.01, %v437_v63  ;;  %v6425_v18 = vmul.f32 0.01, %v438_v1  ;;  %v982_v24 = vadd.f32 0.5, %v6410_v8 }
  0x8f   : > { %v509_v13 = vadd.f32 0.5, %v6392_v60  ;;  %v6427_v15 = vmul.f32 0.01, %v439_v2  ;;  %v6430_v19 = vmul.f32 0.01, %v440_v3  ;;  %v466_v26 = vfloor.f32 %v6414_v11 }
  0x90   : > { %v6432_v20 = vmul.f32 0.01, %v441_v4  ;;  %v6434_v23 = vmul.f32 0.01, %v442_v7  ;;  %v6437_v25 = vmul.f32 0.01, %v443_v10  ;;  %v467_v27 = vfloor.f32 %v6416_v12 }
  0x91   : > { %v525_v28 = vmul.f32 0.1, %v509_v13  ;;  %v983_v29 = vmul.f32 0.1, %v981_v14  ;;  %v468_v31 = vfloor.f32 %v6420_v16  ;;  %v6442_v47 = vstv %s588_s26  ;;  %s9458_s26 = smov 16  }
  0x92   : > { %v9448_v48 = vfloor.f32 %v6423_v17  ;;  %v9449_v56 = vfloor.f32 %v6425_v18  ;;  %v9450_v58 = vfloor.f32 %v6427_v15  ;;  %v992_v59 = vstv %s991_s16  ;;  %s9460_s16 = smov 8  }
  0x93   : > { %v472_v62 = vfloor.f32 %v6430_v19  ;;  %v473_v63 = vfloor.f32 %v6432_v20  ;;  %v474_v1 = vfloor.f32 %v6434_v23  ;;  %v984_v2 = vmul.f32 0.1, %v982_v24 }
  0x94   : > { %v475_v3 = vfloor.f32 %v6437_v25  ;;  %v482_v4 = vmul.f32 100.0, %v466_v26  ;;  %v483_v7 = vmul.f32 100.0, %v467_v27  ;;  %v6455_v10 = vfloor.f32 %v525_v28 }
  0x95   : > { %v6460_v13 = vadd.f32 %v6442_v47, %v461_v34  ;;  %v6462_v14 = vfloor.f32 %v983_v29  ;;  %v484_v24 = vmul.f32 100.0, %v468_v31  ;;  %v6468_v0 = vadd.f32 %v992_v59, %v975_v35 }
  0x96   : > { %v485_v5 = vmul.f32 100.0, %v9448_v48  ;;  %v486_v28 = vmul.f32 100.0, %v9449_v56  ;;  %v487_v21 = vmul.f32 100.0, %v9450_v58  ;;  %v6478_v34 = vadd.f32 %v992_v59, %v976_v43 }
  0x97   : > { %v488_v29 = vmul.f32 100.0, %v472_v62  ;;  %v489_v22 = vmul.f32 100.0, %v473_v63  ;;  %v490_v35 = vmul.f32 100.0, %v474_v1  ;;  %v6486_v48 = vfloor.f32 %v984_v2 }
  0x98   : > { %v491_v56 = vmul.f32 100.0, %v475_v3  ;;  %v6492_v58 = vsub.f32 %v418_v45, %v482_v4  ;;  %v6496_v30 = vsub.f32 %v419_v46, %v483_v7  ;;  %v557_v43 = vmul.f32 10.0, %v6455_v10 }
  0x99   : > { %vm607_vm0 = vcmp.ge.f32.partialorder %v6460_v13, 1.0  ;;  %vm623_vm1 = vcmp.le.f32.partialorder %v6460_v13, 8.0  ;;  %v987_v59 = vmul.f32 10.0, %v6462_v14  ;;  %v6504_v2 = vsub.f32 %v420_v49, %v484_v24 }
  0x9a   : > { %vm995_vm2 = vcmp.ge.f32.partialorder %v6468_v0, 1.0  ;;  %vm997_vm3 = vcmp.le.f32.partialorder %v6468_v0, 8.0  ;;  %v6510_v32 = vsub.f32 %v421_v50, %v485_v5  ;;  %v6514_v33 = vsub.f32 %v422_v51, %v486_v28  ;;  %vm6606_vm7 = vmand %vm607_vm0, %vm623_vm1 }
  0x9b   : > { %v6518_v45 = vsub.f32 %v423_v52, %v487_v21  ;;  %vm996_vm4 = vcmp.ge.f32.partialorder %v6478_v34, 1.0  ;;  %vm998_vm5 = vcmp.le.f32.partialorder %v6478_v34, 8.0  ;;  %v6524_v36 = vsub.f32 %v424_v53, %v488_v29  ;;  %vm6622_vm12 = vmand %vm995_vm2, %vm997_vm3 }
  0x9c   : > { %v6528_v5 = vsub.f32 %v425_v54, %v489_v22  ;;  %v6532_v37 = vsub.f32 %v426_v55, %v490_v35  ;;  %v6536_v38 = vadd.s32 %v6315_v9, %v6312_v6  ;;  %v6539_v39 = vmul.f32 10.0, %v6486_v48  ;;  %vm6633_vm15 = vmand %vm996_vm4, %vm998_vm5 }
  0x9d   : > { %v6543_v40 = vsub.f32 %v427_v57, %v491_v56  ;;  %v514_v46 = vadd.f32 0.5, %v6492_v58  ;;  %v515_v41 = vadd.f32 0.5, %v6496_v30  ;;  %v6548_v49 = vsub.f32 %v6392_v60, %v557_v43 }
  0x9e   : > { %v6551_v42 = vsub.f32 %v6394_v61, %v987_v59  ;;  %v516_v50 = vadd.f32 0.5, %v6504_v2  ;;  %v381_v51 = vadd.s32 256, %v6312_v6  ;;  %v517_v52 = vadd.f32 0.5, %v6510_v32 }
  0x9f   : > { %v518_v44 = vadd.f32 0.5, %v6514_v33  ;;  %v519_v53 = vadd.f32 0.5, %v6518_v45  ;;  %v382_v54 = vadd.s32 384, %v6312_v6  ;;  %v520_v55 = vadd.f32 0.5, %v6524_v36 }
  0xa0   : > { %v6561_v57 = vadd.f32 0.5, %v6528_v5  ;;  %v6564_v60 = vadd.f32 0.5, %v6532_v37  ;;  %v6567_v61 = vadd.s32 %v6315_v9, %v381_v51  ;;  %v6570_v56 = vadd.f32 0.5, %v6543_v40 }
  0xa1   : > { %v530_v4 = vmul.f32 0.1, %v514_v46  ;;  %v531_v7 = vmul.f32 0.1, %v515_v41  ;;  %v596_v24 = vadd.f32 %v6442_v47, %v466_v26  ;;  %v6575_v28 = vmul.f32 0.1, %v516_v50 }
  0xa2   : > { %v597_v21 = vadd.f32 %v6442_v47, %v467_v27  ;;  %v412_v29 = vcvt.s32.f32 %v6536_v38  ;;  %v6582_v22 = vadd.s32 %v6315_v9, %v382_v54  ;;  %v6584_v35 = vmul.f32 0.1, %v517_v52 }
  0xa3   : > { %v6586_v43 = vmul.f32 0.1, %v518_v44  ;;  %v6588_v59 = vmul.f32 0.1, %v519_v53  ;;  %v598_v11 = vadd.f32 %v6442_v47, %v468_v31  ;;  %v9564_v12 = vfloor.f32 %v6423_v17 }
  0xa4   : > { %v9565_v27 = vfloor.f32 %v6425_v18  ;;  %v414_v41 = vcvt.s32.f32 %v6567_v61  ;;  %v383_v50 = vadd.s32 512, %v6312_v6  ;;  %v9568_v17 = vfloor.f32 %v6427_v15 }
  0xa5   : > { %v599_v26 = vadd.f32 %v6442_v47, %v9564_v12  ;;  %v602_v31 = vadd.f32 %v6442_v47, %v472_v62  ;;  %vm612_vm10 = vcmp.ge.f32.partialorder %v596_v24, 1.0  ;;  %vm628_vm11 = vcmp.le.f32.partialorder %v596_v24, 8.0 }
  0xa6   : > { %v600_v46 = vadd.f32 %v6442_v47, %v9565_v27  ;;  %v601_v18 = vadd.f32 %v6442_v47, %v9568_v17  ;;  %vm613_vm13 = vcmp.ge.f32.partialorder %v597_v21, 1.0  ;;  %vm629_vm14 = vcmp.le.f32.partialorder %v597_v21, 8.0  ;;  %vm6643_vm9 = vmand %vm612_vm10, %vm628_vm11 }
  0xa7   : > { %v428_v15 = vadd.f32 0.5, %v412_v29  ;;  %v9456_v51 = vcvt.s32.f32 %v6582_v22  ;;  %v603_v0 = vadd.f32 %v6442_v47, %v473_v63  ;;  %v604_v62 = vadd.f32 %v6442_v47, %v474_v1  ;;  %vm6657_vm8 = vmand %vm613_vm13, %vm629_vm14 }
  0xa8   : > { %vm614_vm0 = vcmp.ge.f32.partialorder %v598_v11, 1.0  ;;  %vm630_vm1 = vcmp.le.f32.partialorder %v598_v11, 8.0  ;;  %vm615_vm2 = vcmp.ge.f32.partialorder %v599_v26, 1.0  ;;  %vm631_vm3 = vcmp.le.f32.partialorder %v599_v26, 8.0 }
  0xa9   : > { %v430_v34 = vadd.f32 0.5, %v414_v41  ;;  %v6650_v44 = vadd.s32 %v6315_v9, %v383_v50  ;;  %v605_v20 = vadd.f32 %v6442_v47, %v475_v3  ;;  %vm632_vm5 = vcmp.le.f32.partialorder %v600_v46, 8.0  ;;  %vm6662_vm6 = vmand %vm614_vm0, %vm630_vm1 }
  0xaa   : > { %v9575_v23 = vmov 0  ;;  %v384_v63 = vadd.s32 640, %v6312_v6  ;;  %v9577_v1 = vmov 0  ;;  %v6666_v53 = vmul.f32 0.01, %v428_v15  ;;  %vm6674_vm4 = vmand %vm615_vm2, %vm631_vm3 }
  0xab   : > { %v9576_v23 = vsel %vm6657_vm8, 4294967295, %v9575_v23  ;;  %v9578_v1 = vsel %vm6662_vm6, 4294967295, %v9577_v1  ;;  %v431_v25 = vadd.f32 0.5, %v9456_v51  ;;  %v536_v3 = vmul.f32 0.1, %v520_v55 }
  0xac   : > { %v6670_v54 = vfloor.f32 %v530_v4  ;;  %vm634_vm14 = vcmp.le.f32.partialorder %v602_v31, 8.0  ;;  %vm9581_vm10 = vcmp.ge.f32.partialorder %v600_v46, 1.0  ;;  %v6684_v21 = vmul.f32 0.01, %v430_v34 }
  0xad   : > { %vm6680_vm11 = vmand %vm9581_vm10, %vm632_vm5  ;;  %v9454_v55 = vcvt.s32.f32 %v6650_v44  ;;  %v6687_v4 = vfloor.f32 %v531_v7  ;;  %vm9584_vm2 = vcmp.le.f32.partialorder %v601_v18, 8.0  ;;  %vm9585_vm3 = vcmp.ge.f32.partialorder %v601_v18, 1.0 }
  0xae   : > { %vm6691_vm8 = vmand %vm9585_vm3, %vm9584_vm2  ;;  %v6696_v12 = vadd.s32 %v6315_v9, %v384_v63  ;;  %vm9589_vm0 = vcmp.ge.f32.partialorder %v602_v31, 1.0  ;;  %v9452_v7 = vfloor.f32 %v6666_v53  ;;  %v6704_v27 = vmul.f32 0.01, %v431_v25 }
  0xaf   : > { %vm6699_vm1 = vmand %vm9589_vm0, %vm634_vm14  ;;  %vm9592_vm13 = vcmp.ge.f32.partialorder %v6462_v14, 1.0  ;;  %v537_v9 = vmul.f32 0.1, %v6561_v57  ;;  %v538_v50 = vmul.f32 0.1, %v6564_v60  ;;  %v6718_v17 = vfloor.f32 %v6575_v28 }
  0xb0   : > { %9588 = vst [vmem:[#allocation26_spill] sm:$0xff] %v6696_v12  ;;  %vm6710_vm2 = vmand %vm6622_vm12, %vm9592_vm13  ;;  %vm9595_vm14 = vcmp.le.f32.partialorder %v603_v0, 8.0  ;;  %vm9596_vm0 = vcmp.ge.f32.partialorder %v603_v0, 1.0  ;;  %vm9599_vm13 = vcmp.ge.f32.partialorder %v6455_v10, 1.0  ;;  %vm9602_vm6 = vcmp.ge.f32.partialorder %v6486_v48, 1.0 }
  0xb1   : > { %vm6722_vm5 = vmand %vm9596_vm0, %vm9595_vm14  ;;  %v9603_v57 = vmov 0  ;;  %v6746_v60 = vfloor.f32 %v6584_v35  ;;  %vm9605_vm12 = vcmp.le.f32.partialorder %v604_v62, 8.0  ;;  %v9451_v16 = vfloor.f32 %v6684_v21 }
  0xb2   : > { %vm6731_vm3 = vmand %vm6606_vm7, %vm9599_vm13  ;;  %vm9606_vm7 = vcmp.ge.f32.partialorder %v604_v62, 1.0  ;;  %v432_v13 = vadd.f32 0.5, %v9454_v55  ;;  %v539_v15 = vmul.f32 0.1, %v6570_v56  ;;  %v6760_v19 = vfloor.f32 %v6586_v43 }
  0xb3   : > { %vm6740_vm14 = vmand %vm6633_vm15, %vm9602_vm6  ;;  %vm9609_vm6 = vcmp.le.f32.partialorder %v605_v20, 8.0  ;;  %vm9610_vm15 = vcmp.ge.f32.partialorder %v605_v20, 1.0  ;;  %v9611_v35 = vmov 0  ;;  %v9453_v0 = vcvt.s32.f32 %v6696_v12 }
  0xb4   : > { %v9604_v57 = vsel %vm6740_vm14, 4294967295, %v9603_v57  ;;  %vm6750_vm13 = vmand %vm9606_vm7, %vm9605_vm12  ;;  %vm662_vm12 = vcmp.ge.f32.partialorder %v6718_v17, 1.0  ;;  %v6771_v62 = vfloor.f32 %v6588_v59  ;;  %vm9613_vm10 = vcmp.ge.f32.partialorder %v6670_v54, 1.0 }
  0xb5   : > { %vm6764_vm0 = vmand %vm9610_vm15, %vm9609_vm6  ;;  %v9614_v56 = vmov 0  ;;  %v476_v43 = vmul.f32 100.0, %v9452_v7  ;;  %v9455_v34 = vfloor.f32 %v6704_v27  ;;  %v6787_v20 = vsub.f32 %v6410_v8, %v6539_v39 }
  0xb6   : > { %v9612_v35 = vsel %vm6764_vm0, 4294967295, %v9611_v35  ;;  %vm6778_vm14 = vmand %vm6643_vm9, %vm9613_vm10  ;;  %v6789_v59 = vfloor.f32 %v536_v3  ;;  %v6791_v63 = vfloor.f32 %v537_v9  ;;  %vm664_vm6 = vcmp.ge.f32.partialorder %v6760_v19, 1.0 }
  0xb7   : > { %v9615_v56 = vsel %vm6778_vm14, 4294967295, %v9614_v56  ;;  %vm9616_vm9 = vcmp.ge.f32.partialorder %v6687_v4, 1.0  ;;  %vm9617_vm10 = vnez %v9576_v23  ;;  %v6802_v25 = vfloor.f32 %v538_v50 }
  0xb8   : > { %vm6798_vm15 = vmand %vm9617_vm10, %vm9616_vm9  ;;  %vm9620_vm14 = vnez %v9578_v1  ;;  %v478_v39 = vmul.f32 100.0, %v9451_v16  ;;  %v6813_v3 = vmul.f32 0.01, %v432_v13  ;;  %v6815_v23 = vfloor.f32 %v539_v15 }
  0xb9   : > { %vm6807_vm0 = vmand %vm9620_vm14, %vm662_vm12  ;;  %v562_v9 = vmul.f32 10.0, %v6670_v54  ;;  %vm666_vm9 = vcmp.ge.f32.partialorder %v6789_v59, 1.0  ;;  %vm9623_vm10 = vcmp.ge.f32.partialorder %v6746_v60, 1.0  ;;  %v433_v50 = vadd.f32 0.5, %v9453_v0 }
  0xba   : > { %vm6823_vm7 = vmand %vm6674_vm4, %vm9623_vm10  ;;  %v563_v13 = vmul.f32 10.0, %v6687_v4  ;;  %v6839_v6 = vsub.f32 %v412_v29, %v476_v43  ;;  %v479_v16 = vmul.f32 100.0, %v9455_v34  ;;  %v564_v7 = vmul.f32 10.0, %v6718_v17 }
  0xbb   : > { %vm6833_vm12 = vmand %vm6680_vm11, %vm664_vm6  ;;  %v565_v0 = vmul.f32 10.0, %v6746_v60  ;;  %v566_v55 = vmul.f32 10.0, %v6760_v19  ;;  %vm9628_vm11 = vcmp.ge.f32.partialorder %v6771_v62, 1.0  ;;  %v567_v38 = vmul.f32 10.0, %v6771_v62 }
  0xbc   : > { %vm6851_vm6 = vmand %vm6691_vm8, %vm9628_vm11  ;;  %v6867_v43 = vsub.f32 %v414_v41, %v478_v39  ;;  %v464_v11 = vfloor.f32 %v6813_v3  ;;  %v568_v34 = vmul.f32 10.0, %v6789_v59  ;;  %v569_v51 = vmul.f32 10.0, %v6791_v63  ;;  %v373_v3 = vld [vmem:[%s6283_s12 + $0x38] sm:$0xff] }
  0xbd   : > { %vm6861_vm14 = vmand %vm6699_vm1, %vm666_vm9  ;;  %vm9633_vm8 = vcmp.ge.f32.partialorder %v6791_v63, 1.0  ;;  %v6881_v12 = vmul.f32 0.01, %v433_v50  ;;  %vm9636_vm9 = vcmp.le.f32.partialorder %v6462_v14, 8.0  ;;  %v9637_v61 = vmov 0 }
  0xbe   : > { %vm6876_vm11 = vmand %vm6722_vm5, %vm9633_vm8  ;;  %v570_v41 = vmul.f32 10.0, %v6802_v25  ;;  %vm9639_vm5 = vcmp.ge.f32.partialorder %v6802_v25, 1.0  ;;  %v508_v14 = vadd.f32 0.5, %v6839_v6  ;;  %v9642_v46 = vcvt.s32.f32 %v6582_v22 }
  0xbf   : > { %vm6887_vm10 = vmand %vm6710_vm2, %vm9636_vm9  ;;  %vm9643_vm2 = vcmp.le.f32.partialorder %v6455_v10, 8.0  ;;  %v9644_v50 = vmov 0  ;;  %vm9647_vm4 = vnez %v9604_v57  ;;  %v9648_v28 = vmov 0 }
  0xc0   : > { %v9638_v61 = vsel %vm6887_vm10, 4294967295, %v9637_v61  ;;  %vm6897_vm8 = vmand %vm6750_vm13, %vm9639_vm5  ;;  %v6905_v39 = vsub.f32 %v9642_v46, %v479_v16  ;;  %vm9646_vm5 = vcmp.le.f32.partialorder %v6486_v48, 8.0  ;;  %v571_v10 = vmul.f32 10.0, %v6815_v23 }
  0xc1   : > { %vm6911_vm9 = vmand %vm6731_vm3, %vm9643_vm2  ;;  %v6927_v22 = vsub.f32 %v6492_v58, %v562_v9  ;;  %v6930_v31 = vsub.f32 %v6496_v30, %v563_v13  ;;  %vm9650_vm3 = vcmp.ge.f32.partialorder %v6815_v23, 1.0  ;;  %vm9651_vm2 = vnez %v9612_v35 }
  0xc2   : > { %v9645_v50 = vsel %vm6911_vm9, 4294967295, %v9644_v50  ;;  %vm6920_vm1 = vmand %vm9647_vm4, %vm9646_vm5  ;;  %vm694_vm4 = vcmp.le.f32.partialorder %v6718_v17, 8.0  ;;  %v6942_v57 = vsub.f32 %v6504_v2, %v564_v7  ;;  %vm9654_vm10 = vcmp.le.f32.partialorder %v6670_v54, 8.0 }
  0xc3   : > { %v9649_v28 = vsel %vm6920_vm1, 4294967295, %v9648_v28  ;;  %vm6936_vm13 = vmand %vm9651_vm2, %vm9650_vm3  ;;  %vm9655_vm1 = vnez %v9615_v56  ;;  %v510_v30 = vadd.f32 0.5, %v6867_v43  ;;  %v480_v16 = vmul.f32 100.0, %v464_v11 }
  0xc4   : > { %vm6949_vm9 = vmand %vm9655_vm1, %vm9654_vm10  ;;  %v6957_v17 = vsub.f32 %v6510_v32, %v565_v0  ;;  %v6960_v2 = vsub.f32 %v6514_v33, %v566_v55  ;;  %vm696_vm3 = vcmp.le.f32.partialorder %v6760_v19, 8.0  ;;  %vm9658_vm2 = vcmp.le.f32.partialorder %v6687_v4, 8.0 }
  0xc5   : > { %vm6967_vm10 = vmand %vm6798_vm15, %vm9658_vm2  ;;  %v465_v7 = vfloor.f32 %v6881_v12  ;;  %v6973_v35 = vsub.f32 %v6518_v45, %v567_v38  ;;  %v9661_v32 = vmov 0  ;;  %v524_v33 = vmul.f32 0.1, %v508_v14  ;;  %v9688_v38 = vld [vmem:[#allocation26_spill] sm:$0xff] }
  0xc6   : > { %vm6978_vm5 = vmand %vm6807_vm0, %vm694_vm4  ;;  %v511_v55 = vadd.f32 0.5, %v6905_v39  ;;  %v6984_v4 = vsub.f32 %v6524_v36, %v568_v34  ;;  %v6987_v0 = vsub.f32 %v6528_v5, %v569_v51  ;;  %v6990_v45 = vsub.f32 %v6532_v37, %v570_v41 }
  0xc7   : > { %v9662_v32 = vsel %vm6978_vm5, 4294967295, %v9661_v32  ;;  %vm698_vm15 = vcmp.le.f32.partialorder %v6789_v59, 8.0  ;;  %vm9663_vm2 = vcmp.le.f32.partialorder %v6746_v60, 8.0  ;;  %v9664_v56 = vmov 0  ;;  %vm7009_vm1 = vmand %vm6833_vm12, %vm696_vm3 }
  0xc8   : > { %vm6997_vm0 = vmand %vm6823_vm7, %vm9663_vm2  ;;  %v7002_v52 = vsub.f32 %v6543_v40, %v571_v10  ;;  %vm699_vm4 = vcmp.le.f32.partialorder %v6791_v63, 8.0  ;;  %v526_v5 = vmul.f32 0.1, %v510_v30  ;;  %v9668_v37 = vcvt.s32.f32 %v6650_v44  ;;  %v367_v10 = vld [vmem:[%s6283_s12 + $0x8] sm:$0xff] }
  0xc9   : > { %v9665_v56 = vsel %vm6997_vm0, 4294967295, %v9664_v56  ;;  %vm700_vm7 = vcmp.le.f32.partialorder %v6802_v25, 8.0  ;;  %vm9669_vm0 = vcmp.le.f32.partialorder %v6771_v62, 8.0  ;;  %v9672_v60 = vfloor.f32 %v6666_v53  ;;  %vm7034_vm12 = vmand %vm6861_vm14, %vm698_vm15 }
  0xca   : > { %v7015_v51 = vsub.f32 %v9668_v37, %v480_v16  ;;  %vm7023_vm5 = vmand %vm6851_vm6, %vm9669_vm0  ;;  %v481_v44 = vmul.f32 100.0, %v465_v7  ;;  %v7040_v62 = vfloor.f32 %v524_v33  ;;  %v527_v59 = vmul.f32 0.1, %v511_v55 }
  0xcb   : > { %v590_v19 = vadd.f32 %v6442_v47, %v9672_v60  ;;  %vm7044_vm0 = vmand %vm6876_vm11, %vm699_vm4  ;;  %v9677_v63 = vfloor.f32 %v6684_v21  ;;  %v7064_v1 = vfloor.f32 %v526_v5  ;;  %vm9680_vm15 = vcmp.ge.f32.partialorder %v6551_v42, 1.0  ;;  %v371_v5 = vld [vmem:[%s6283_s12 + $0x28] sm:$0xff] }
  0xcc   : > { %vm7058_vm6 = vmand %vm6897_vm8, %vm700_vm7  ;;  %v512_v13 = vadd.f32 0.5, %v7015_v51  ;;  %vm9681_vm14 = vnez %v9638_v61  ;;  %v9682_v21 = vmov 0  ;;  %vm9684_vm8 = vcmp.le.f32.partialorder %v6815_v23, 8.0 }
  0xcd   : > { %v592_v8 = vadd.f32 %v6442_v47, %v9677_v63  ;;  %vm7071_vm2 = vmand %vm9681_vm14, %vm9680_vm15  ;;  %v9685_v25 = vmov 0  ;;  %v9687_v15 = vfloor.f32 %v6704_v27  ;;  %v9689_v29 = vcvt.s32.f32 %v9688_v38 }
  0xce   : > { %v9683_v21 = vsel %vm7071_vm2, 4294967295, %v9682_v21  ;;  %vm7079_vm7 = vmand %vm6936_vm13, %vm9684_vm8  ;;  %vm9690_vm14 = vcmp.ge.f32.partialorder %v6548_v49, 1.0  ;;  %vm9691_vm15 = vnez %v9645_v50  ;;  %v9692_v23 = vmov 0 }
  0xcf   : > { %v9686_v25 = vsel %vm7079_vm7, 4294967295, %v9685_v25  ;;  %v593_v24 = vadd.f32 %v6442_v47, %v9687_v15  ;;  %v7088_v26 = vsub.f32 %v9689_v29, %v481_v44  ;;  %vm7094_vm3 = vmand %vm9691_vm15, %vm9690_vm14  ;;  %vm9694_vm13 = vcmp.ge.f32.partialorder %v6787_v20, 1.0 }
  0xd0   : > { %v9693_v23 = vsel %vm7094_vm3, 4294967295, %v9692_v23  ;;  %vm9695_vm8 = vnez %v9649_v28  ;;  %v9696_v27 = vmov 0  ;;  %vm9698_vm7 = vcmp.ge.f32.partialorder %v6927_v22, 1.0 }
  0xd1   : > { %vm7102_vm4 = vmand %vm9695_vm8, %vm9694_vm13  ;;  %v9699_v61 = vmov 0  ;;  %v556_v41 = vmul.f32 10.0, %v7040_v62  ;;  %v7117_v18 = vfloor.f32 %v527_v59  ;;  %vm9701_vm13 = vcmp.ge.f32.partialorder %v6930_v31, 1.0 }
  0xd2   : > { %v9697_v27 = vsel %vm7102_vm4, 4294967295, %v9696_v27  ;;  %vm7112_vm14 = vmand %vm6949_vm9, %vm9698_vm7  ;;  %vm9704_vm2 = vcmp.ge.f32.partialorder %v6942_v57, 1.0  ;;  %vm9705_vm9 = vnez %v9662_v32  ;;  %vm9708_vm15 = vcmp.ge.f32.partialorder %v6957_v17, 1.0 }
  0xd3   : > { %v9700_v61 = vsel %vm7112_vm14, 4294967295, %v9699_v61  ;;  %vm7124_vm8 = vmand %vm6967_vm10, %vm9701_vm13  ;;  %vm9709_vm4 = vnez %v9665_v56  ;;  %vm9712_vm10 = vcmp.ge.f32.partialorder %v6960_v2, 1.0  ;;  %v9713_v28 = vmov 0 }
  0xd4   : > { %vm7132_vm7 = vmand %vm9705_vm9, %vm9704_vm2  ;;  %vm9715_vm2 = vcmp.le.f32.partialorder %v590_v19, 8.0  ;;  %vm9716_vm9 = vcmp.ge.f32.partialorder %v590_v19, 1.0  ;;  %v558_v48 = vmul.f32 10.0, %v7064_v1  ;;  %v528_v58 = vmul.f32 0.1, %v512_v13 }
  0xd5   : > { %vm7140_vm3 = vmand %vm9709_vm4, %vm9708_vm15  ;;  %vm9719_vm4 = vcmp.ge.f32.partialorder %v6973_v35, 1.0  ;;  %v9720_v30 = vmov 0  ;;  %v9723_v16 = vmov 0  ;;  %v9726_v54 = vmov 0 }
  0xd6   : > { %vm7148_vm13 = vmand %vm7009_vm1, %vm9712_vm10  ;;  %vm9722_vm1 = vcmp.ge.f32.partialorder %v6984_v4, 1.0  ;;  %v9729_v32 = vmov 0  ;;  %v513_v33 = vadd.f32 0.5, %v7088_v26  ;;  %vm9731_vm14 = vcmp.ge.f32.partialorder %v7002_v52, 1.0 }
  0xd7   : > { %v9714_v28 = vsel %vm7148_vm13, 4294967295, %v9713_v28  ;;  %vm7154_vm11 = vmand %vm9716_vm9, %vm9715_vm2  ;;  %vm9725_vm2 = vcmp.ge.f32.partialorder %v6987_v0, 1.0  ;;  %v9733_v55 = vmov 0  ;;  %v7202_v56 = vsub.f32 %v6839_v6, %v556_v41 }
  0xd8   : > { %vm7164_vm15 = vmand %vm7023_vm5, %vm9719_vm4  ;;  %vm9728_vm5 = vcmp.ge.f32.partialorder %v6990_v45, 1.0  ;;  %v559_v36 = vmul.f32 10.0, %v7117_v18  ;;  %v7218_v6 = vsub.f32 %v6867_v43, %v558_v48  ;;  %v544_v37 = vfloor.f32 %v528_v58 }
  0xd9   : > { %v9721_v30 = vsel %vm7164_vm15, 4294967295, %v9720_v30  ;;  %vm7172_vm10 = vmand %vm7034_vm12, %vm9722_vm1  ;;  %vm625_vm1 = vcmp.le.f32.partialorder %v593_v24, 8.0  ;;  %vm656_vm12 = vcmp.ge.f32.partialorder %v7064_v1, 1.0  ;;  %v529_v60 = vmul.f32 0.1, %v513_v33 }
  0xda   : > { %v9724_v16 = vsel %vm7172_vm10, 4294967295, %v9723_v16  ;;  %vm7180_vm9 = vmand %vm7044_vm0, %vm9725_vm2  ;;  %vm9732_vm10 = vnez %v9686_v25  ;;  %vm9736_vm2 = vcmp.ge.f32.partialorder %v592_v8, 1.0  ;;  %v594_v43 = vadd.f32 %v6442_v47, %v464_v11 }
  0xdb   : > { %v9727_v54 = vsel %vm7180_vm9, 4294967295, %v9726_v54  ;;  %vm7188_vm4 = vmand %vm7058_vm6, %vm9728_vm5  ;;  %vm9735_vm6 = vcmp.le.f32.partialorder %v592_v8, 8.0  ;;  %v7243_v44 = vsub.f32 %v6905_v39, %v559_v36  ;;  %v9749_v11 = vmov 0 }
  0xdc   : > { %v9730_v32 = vsel %vm7188_vm4, 4294967295, %v9729_v32  ;;  %vm7197_vm0 = vmand %vm9732_vm10, %vm9731_vm14  ;;  %vm9737_vm14 = vcmp.ge.f32.partialorder %v7040_v62, 1.0  ;;  %vm657_vm4 = vcmp.ge.f32.partialorder %v7117_v18, 1.0  ;;  %v560_v34 = vmul.f32 10.0, %v544_v37 }
  0xdd   : > { %v9734_v55 = vsel %vm7197_vm0, 4294967295, %v9733_v55  ;;  %vm640_vm5 = vmand %vm9736_vm2, %vm9735_vm6  ;;  %vm686_vm0 = vcmp.le.f32.partialorder %v7040_v62, 8.0  ;;  %vm9738_vm6 = vcmp.ge.f32.partialorder %v593_v24, 1.0  ;;  %v9759_v59 = vmov 0 }
  0xde   : > { %vm670_vm10 = vmand %vm7154_vm11, %vm9737_vm14  ;;  %vm688_vm11 = vcmp.le.f32.partialorder %v7064_v1, 8.0  ;;  %v545_v12 = vfloor.f32 %v529_v60  ;;  %v9772_v53 = vmov 0  ;;  %v9782_v63 = vmov 0 }
  0xdf   : > { %vm7221_vm2 = vmand %vm9738_vm6, %vm625_vm1  ;;  %vm9748_vm1 = vnez %v9683_v21  ;;  %v9793_v8 = vmov 0  ;;  %v576_v9 = vsub.f32 %v7015_v51, %v560_v34  ;;  %v9815_v13 = vlaneseq }
  0xe0   : > { %vm7227_vm9 = vmand %vm640_vm5, %vm656_vm12  ;;  %vm9761_vm5 = vcmp.le.f32.partialorder %v6927_v22, 8.0  ;;  %v9769_v22 = vmov 0  ;;  %v561_v51 = vmul.f32 10.0, %v545_v12  ;;  %v9821_v29 = vmov 0  }
  0xe1   : > { %vm7237_vm6 = vmand %vm670_vm10, %vm686_vm0  ;;  %vm9747_vm10 = vcmp.le.f32.partialorder %v6551_v42, 8.0  ;;  %v595_v42 = vadd.f32 %v6442_v47, %v465_v7  ;;  %vm9762_vm0 = vnez %v9700_v61  ;;  %v9763_v47 = vmov 0  ;;  %v960_v61 = vld [vmem:[%s6291_s15] sm:$0xff]  ;;  %s9517_s15 = smov 126  }
  0xe2   : > { %vm7252_vm14 = vmand %vm7221_vm2, %vm657_vm4  ;;  %vm9774_vm2 = vcmp.le.f32.partialorder %v7117_v18, 8.0  ;;  %v7422_v21 = vshrl.u32 %v9815_v13, 7  ;;  %v577_v15 = vsub.f32 %v7088_v26, %v561_v51 }
  0xe3   : > { %vm7261_vm12 = vmand %vm9748_vm1, %vm9747_vm10  ;;  %vm9753_vm1 = vcmp.le.f32.partialorder %v6548_v49, 8.0  ;;  %vm9754_vm10 = vnez %v9693_v23 }
  0xe4   : > { %v9750_v11 = vsel %vm7261_vm12, 4294967295, %v9749_v11  ;;  %vm7270_vm4 = vmand %vm7227_vm9, %vm688_vm11  ;;  %vm9757_vm9 = vcmp.le.f32.partialorder %v6787_v20, 8.0  ;;  %vm9758_vm11 = vnez %v9697_v27  ;;  %v6057_v20 = vmov 839922192  }
  0xe5   : > { %vm7282_vm13 = vmand %vm9754_vm10, %vm9753_vm1  ;;  %vm9765_vm1 = vcmp.ge.f32.partialorder %v7202_v56, 1.0  ;;  %v788_v7 = vunpack.c.l.s4 %v6057_v20 }
  0xe6   : > { %vm7290_vm15 = vmand %vm9758_vm11, %vm9757_vm9  ;;  %vm9781_vm9 = vnez %v9714_v28  ;;  %v7452_v26 = vsel %vm7282_vm13, 1, %v9821_v29  ;;  %v366_v28 = vld [vmem:[%s6283_s12] sm:$0xff] }
  0xe7   : > { %v9760_v59 = vsel %vm7290_vm15, 4294967295, %v9759_v59  ;;  %vm7299_vm12 = vmand %vm9762_vm0, %vm9761_vm5  ;;  %vm9768_vm5 = vcmp.le.f32.partialorder %v6930_v31, 8.0  ;;  %v789_v1 = vunpack.c.0.s8 %v788_v7  ;;  %vm722_vm15 = vcmp.ge.f32.partialorder %v576_v9, 1.0 }
  0xe8   : > { %v9764_v47 = vsel %vm7299_vm12, 4294967295, %v9763_v47  ;;  %vm7307_vm10 = vmand %vm7237_vm6, %vm9765_vm1  ;;  %vm9771_vm6 = vcmp.le.f32.partialorder %v6942_v57, 8.0  ;;  %v9778_v57 = vmov 0 }
  0xe9   : > { %vm7316_vm0 = vmand %vm7124_vm8, %vm9768_vm5  ;;  %vm9777_vm5 = vcmp.le.f32.partialorder %v6957_v17, 8.0  ;;  %vm9788_vm8 = vnez %v9721_v30  ;;  %v792_v24 = vsub.s32 %v789_v1, %v7422_v21 }
  0xea   : > { %v9770_v22 = vsel %vm7316_vm0, 4294967295, %v9769_v22  ;;  %vm7324_vm1 = vmand %vm7132_vm7, %vm9771_vm6  ;;  %vm9780_vm6 = vcmp.le.f32.partialorder %v6960_v2, 8.0  ;;  %v9789_v2 = vmov 0  ;;  %vm9804_vm0 = vcmp.ge.f32.partialorder %v594_v43, 1.0 }
  0xeb   : > { %v9773_v53 = vsel %vm7324_vm1, 4294967295, %v9772_v53  ;;  %vm7333_vm11 = vmand %vm7252_vm14, %vm9774_vm2  ;;  %vm9784_vm14 = vcmp.ge.f32.partialorder %v7218_v6, 1.0  ;;  %vm9830_vm13 = vnez %v9770_v22 }
  0xec   : > { %vm7342_vm7 = vmand %vm7140_vm3, %vm9777_vm5  ;;  %vm9787_vm5 = vcmp.le.f32.partialorder %v6973_v35, 8.0  ;;  %v9797_v35 = vmov 0  ;;  %v7475_v48 = vsel %vm9830_vm13, 1, %v9821_v29 }
  0xed   : > { %v9779_v57 = vsel %vm7342_vm7, 4294967295, %v9778_v57  ;;  %vm7350_vm1 = vmand %vm9781_vm9, %vm9780_vm6  ;;  %vm9791_vm9 = vcmp.le.f32.partialorder %v6984_v4, 8.0  ;;  %vm9792_vm6 = vnez %v9724_v16  ;;  %v9801_v4 = vmov 0 }
  0xee   : > { %v9783_v63 = vsel %vm7350_vm1, 4294967295, %v9782_v63  ;;  %vm7358_vm2 = vmand %vm7270_vm4, %vm9784_vm14  ;;  %vm9795_vm4 = vcmp.le.f32.partialorder %v6987_v0, 8.0  ;;  %vm9796_vm14 = vnez %v9727_v54  ;;  %v9807_v0 = vmov 0  ;;  %v368_v54 = vld [vmem:[%s6283_s12 + $0x10] sm:$0xff] }
  0xef   : > { %vm7366_vm7 = vmand %vm9788_vm8, %vm9787_vm5  ;;  %vm9799_vm8 = vcmp.le.f32.partialorder %v6990_v45, 8.0  ;;  %vm9800_vm5 = vnez %v9730_v32  ;;  %v9810_v45 = vmov 0  ;;  %v369_v32 = vld [vmem:[%s6283_s12 + $0x18] sm:$0xff] }
  0xf0   : > { %v9790_v2 = vsel %vm7366_vm7, 4294967295, %v9789_v2  ;;  %vm7374_vm1 = vmand %vm9792_vm6, %vm9791_vm9  ;;  %vm611_vm9 = vcmp.ge.f32.partialorder %v595_v42, 1.0  ;;  %vm627_vm6 = vcmp.le.f32.partialorder %v595_v42, 8.0 }
  0xf1   : > { %v9794_v8 = vsel %vm7374_vm1, 4294967295, %v9793_v8  ;;  %vm7382_vm3 = vmand %vm9796_vm14, %vm9795_vm4  ;;  %vm9803_vm1 = vcmp.le.f32.partialorder %v594_v43, 8.0  ;;  %vm9805_vm4 = vcmp.le.f32.partialorder %v7002_v52, 8.0  ;;  %vm9806_vm14 = vnez %v9734_v55 }
  0xf2   : > { %v9798_v35 = vsel %vm7382_vm3, 4294967295, %v9797_v35  ;;  %vm7390_vm7 = vmand %vm9800_vm5, %vm9799_vm8  ;;  %vm9809_vm8 = vcmp.le.f32.partialorder %v7202_v56, 8.0  ;;  %v9813_v52 = vmov 0 }
  0xf3   : > { %v9802_v4 = vsel %vm7390_vm7, 4294967295, %v9801_v4  ;;  %vm642_vm12 = vmand %vm9804_vm0, %vm9803_vm1  ;;  %vm9812_vm7 = vcmp.ge.f32.partialorder %v7243_v44, 1.0  ;;  %vm690_vm1 = vcmp.le.f32.partialorder %v544_v37, 8.0 }
  0xf4   : > { %vm7401_vm3 = vmand %vm9806_vm14, %vm9805_vm4  ;;  %vm9816_vm4 = vcmp.ge.f32.partialorder %v544_v37, 1.0 }
  0xf5   : > { %v9808_v0 = vsel %vm7401_vm3, 4294967295, %v9807_v0  ;;  %vm7409_vm5 = vmand %vm7307_vm10, %vm9809_vm8  ;;  %vm752_vm10 = vcmp.le.f32.partialorder %v7218_v6, 8.0  ;;  %v370_v6 = vld [vmem:[%s6283_s12 + $0x20] sm:$0xff] }
  0xf6   : > { %v9811_v45 = vsel %vm7409_vm5, 4294967295, %v9810_v45  ;;  %vm7417_vm0 = vmand %vm7333_vm11, %vm9812_vm7  ;;  %vm659_vm5 = vcmp.ge.f32.partialorder %v545_v12, 1.0  ;;  %vm753_vm11 = vcmp.le.f32.partialorder %v7243_v44, 8.0  ;;  %v372_v44 = vld [vmem:[%s6283_s12 + $0x30] sm:$0xff]  ;;  %vm9842_vm13 = vnez %v9808_v0  ;;  %s9519_s12 = smov 127  }
  0xf7   : > { %v9814_v52 = vsel %vm7417_vm0, 4294967295, %v9813_v52  ;;  %vm674_vm14 = vmand %vm642_vm12, %vm9816_vm4  ;;  %vm691_vm12 = vcmp.le.f32.partialorder %v545_v12, 8.0 }
  0xf8   : > { %vm643_vm8 = vmand %vm611_vm9, %vm627_vm6  ;;  %vm9822_vm9 = vnez %v9750_v11  ;;  %v7537_v11 = vsel %vm9842_vm13, 1, %v9821_v29 }
  0xf9   : > { %vm706_vm3 = vmand %vm674_vm14, %vm690_vm1  ;;  %v7442_v23 = vsel %vm9822_vm9, 1, %v9821_v29  ;;  %vm723_vm14 = vcmp.ge.f32.partialorder %v577_v15, 1.0  ;;  %vm9834_vm9 = vnez %v9779_v57 }
  0xfa   : > { %vm7429_vm7 = vmand %vm7358_vm2, %vm752_vm10  ;;  %vm754_vm2 = vcmp.le.f32.partialorder %v576_v9, 8.0  ;;  %vm9831_vm10 = vnez %v9773_v53  ;;  %v7495_v55 = vsel %vm9834_vm9, 1, %v9821_v29 }
  0xfb   : > { %vm7435_vm0 = vmand %vm643_vm8, %vm659_vm5  ;;  %vm9825_vm5 = vnez %v9760_v59  ;;  %v7480_v58 = vsel %vm9831_vm10, 1, %v9821_v29  ;;  %vm755_vm8 = vcmp.le.f32.partialorder %v577_v15, 8.0  ;;  %vm9843_vm10 = vnez %v9811_v45 }
  0xfc   : > { %vm7444_vm6 = vmand %vm706_vm3, %vm722_vm15  ;;  %v7457_v41 = vsel %vm9825_vm5, 1, %v9821_v29  ;;  %vm9826_vm15 = vnez %v9764_v47  ;;  %vm9827_vm3 = vnez %v9814_v52  ;;  %vm9838_vm5 = vnez %v9790_v2 }
  0xfd   : > { %v7462_v18 = vsel %vm9826_vm15, 1, %v9821_v29  ;;  %vm7466_vm1 = vmand %vm9827_vm3, %vm753_vm11  ;;  %vm1050_vm11 = vcmp.eq.s32.totalorder %v7442_v23, 1  ;;  %v7514_v37 = vsel %vm9838_vm5, 1, %v9821_v29  ;;  %vm9839_vm15 = vnez %v9794_v8 }
  0xfe   : > { %v1021_v46 = vpop.permute.xlu1 %1020  ;;  %vm7485_vm4 = vmand %vm7435_vm0, %vm691_vm12  ;;  %vm9835_vm0 = vnez %v9783_v63  ;;  %v7519_v40 = vsel %vm9839_vm15, 1, %v9821_v29  ;;  %vm9840_vm3 = vnez %v9798_v35  ;;  %v7542_v39 = vsel %vm9843_vm10, 1, %v9821_v29 }
  0xff   : > { %v786_v50 = vpop.permute.xlu0 %785  ;;  %v1028_v16 = vrot.slane %v1021_v46, %v792_v24  ;;  %v7500_v56 = vsel %vm9835_vm0, 1, %v9821_v29  ;;  %vm7505_vm12 = vmand %vm7444_vm6, %vm754_vm2  ;;  %v7524_v60 = vsel %vm9840_vm3, 1, %v9821_v29  ;;  %vm9841_vm6 = vnez %v9802_v4 }
 0x100   : > { %v793_v33 = vrot.slane %v786_v50, %v792_v24  ;;  %v7529_v43 = vsel %vm9841_vm6, 1, %v9821_v29  ;;  %vm1051_vm2 = vcmp.eq.s32.totalorder %v7457_v41, 1  ;;  %v7547_v34 = vsel %vm7429_vm7, 1, %v9821_v29  ;;  %vm7552_vm9 = vmand %vm7485_vm4, %vm723_vm14 }
 0x101   : > { %v1030_v19 = vmul.f32 %v1028_v16, %v960_v61  ;;  %v7559_v12 = vsel %vm7466_vm1, 1, %v9821_v29  ;;  %v7564_v20 = vsel %vm7505_vm12, 1, %v9821_v29  ;;  %vm7569_vm7 = vmand %vm7552_vm9, %vm755_vm8  ;;  %vm870_vm1 = vcmp.eq.s32.totalorder %v7462_v18, 1 }
 0x102   : > { %v795_v62 = vmul.f32 %v793_v33, %v366_v28  ;;  %v796_v59 = vmul.f32 %v793_v33, %v367_v10  ;;  %v1035_v47 = vpop.permute.xlu1 %1034  ;;  %v797_v7 = vmul.f32 %v793_v33, %v368_v54  ;;  %v798_v22 = vmul.f32 %v793_v33, %v369_v32 }
 0x103   : > { %v807_v49 = vpop.permute.xlu0 %806  ;;  %v1042_v53 = vrot.slane %v1035_v47, %v792_v24  ;;  %v799_v57 = vmul.f32 %v793_v33, %v370_v6  ;;  %v800_v63 = vmul.f32 %v793_v33, %v371_v5  ;;  %v801_v17 = vmul.f32 %v793_v33, %v372_v44 }
 0x104   : > { %v814_v31 = vrot.slane %v807_v49, %v792_v24  ;;  %v802_v2 = vmul.f32 %v793_v33, %v373_v3  ;;  %vm877_vm3 = vcmp.eq.s32.totalorder %v7524_v60, 1  ;;  %v7588_v15 = vsel %vm7569_vm7, 1, %v9821_v29 }
 0x105   : > { %v1044_v35 = vadd.f32 %v1042_v53, %v1030_v19  ;;  %vm868_vm7 = vcmp.eq.s32.totalorder %v7564_v20, 1  ;;  %vm869_vm13 = vcmp.eq.s32.totalorder %v7588_v15, 1  ;;  %vm865_vm6 = vcmp.eq.s32.totalorder %v7452_v26, 1 }
 0x106   : > { %v816_v4 = vadd.f32 %v814_v31, %v795_v62  ;;  %v7573_v9 = vadd.f32 %v814_v31, %v796_v59  ;;  %v818_v0 = vadd.f32 %v814_v31, %v797_v7  ;;  %v819_v45 = vadd.f32 %v814_v31, %v798_v22 }
 0x107   : > { %v820_v52 = vadd.f32 %v814_v31, %v799_v57  ;;  %v821_v51 = vadd.f32 %v814_v31, %v800_v63  ;;  %v822_v1 = vadd.f32 %v814_v31, %v801_v17  ;;  %vm1045_vm5 = vcmp.ge.f32.partialorder %v1044_v35, 0.0 }
 0x108   : > { %v1046_v13 = vmul.f32 0.22916667, %v1044_v35  ;;  %v823_v25 = vadd.f32 %v814_v31, %v802_v2  ;;  %vm824_vm10 = vcmp.ge.f32.partialorder %v816_v4, 0.0  ;;  %vm826_vm9 = vcmp.ge.f32.partialorder %v818_v0, 0.0 }
 0x109   : > { %vm827_vm0 = vcmp.ge.f32.partialorder %v819_v45, 0.0  ;;  %vm828_vm12 = vcmp.ge.f32.partialorder %v820_v52, 0.0  ;;  %vm825_vm8 = vcmp.ge.f32.partialorder %v7573_v9, 0.0  ;;  %vm829_vm14 = vcmp.ge.f32.partialorder %v821_v51, 0.0 }
 0x10a   : > { %v1047_v24 = vsel %vm1045_vm5, %v1044_v35, %v1046_v13  ;;  %vm830_vm15 = vcmp.ge.f32.partialorder %v822_v1, 0.0  ;;  %vm831_vm4 = vcmp.ge.f32.partialorder %v823_v25, 0.0  ;;  %v832_v61 = vmul.f32 0.22916667, %v816_v4 }
 0x10b   : > { %v1053_v38 = vcombine.high %v1047_v24, %v1047_v24  ;;  %v1055_v27 = vsel %vm1050_vm11, %v1047_v24, 0.0  ;;  %v833_v14 = vmul.f32 0.22916667, %v7573_v9  ;;  %v834_v29 = vmul.f32 0.22916667, %v818_v0 }
 0x10c   : > { %v835_v46 = vmul.f32 0.22916667, %v819_v45  ;;  %v836_v50 = vmul.f32 0.22916667, %v820_v52  ;;  %vm864_vm5 = vcmp.eq.s32.totalorder %v7542_v39, 1  ;;  %v840_v30 = vsel %vm824_vm10, %v816_v4, %v832_v61 }
 0x10d   : > { %v1056_v28 = vsel %vm1051_vm2, %v1053_v38, 0.0  ;;  %v837_v10 = vmul.f32 0.22916667, %v821_v51  ;;  %v838_v23 = vmul.f32 0.22916667, %v822_v1  ;;  %vm866_vm11 = vcmp.eq.s32.totalorder %v7547_v34, 1 }
 0x10e   : > { %v1059_v16 = vcombine.low %v1055_v27, %v1056_v28  ;;  %v839_v54 = vmul.f32 0.22916667, %v823_v25  ;;  %v842_v32 = vsel %vm826_vm9, %v818_v0, %v834_v29  ;;  %v843_v33 = vsel %vm827_vm0, %v819_v45, %v835_v46 }
 0x10f   : > { %v844_v36 = vsel %vm828_vm12, %v820_v52, %v836_v50  ;;  %v845_v6 = vsel %vm829_vm14, %v821_v51, %v837_v10  ;;  %v846_v5 = vsel %vm830_vm15, %v822_v1, %v838_v23  ;;  %v890_v41 = vcombine.high %v842_v32, %v842_v32 }
 0x110   : > { %1061 = vst [vmem:[#allocation2 + $0x40] sm:$0xff] %v1059_v16  ;;  %v847_v19 = vsel %vm831_vm4, %v823_v25, %v839_v54  ;;  %v891_v44 = vcombine.high %v843_v33, %v843_v33  ;;  %v892_v3 = vcombine.high %v844_v36, %v844_v36  ;;  %v893_v42 = vcombine.high %v845_v6, %v845_v6 }
 0x111   : > { %v894_v62 = vcombine.high %v846_v5, %v846_v5  ;;  %v895_v59 = vcombine.high %v847_v19, %v847_v19  ;;  %v910_v47 = vsel %vm870_vm1, %v843_v33, 0.0  ;;  %vm9848_vm2 = vcmp.eq.s32.totalorder %v7480_v58, 1 }
 0x112   : > { %v912_v49 = vsel %vm9848_vm2, %v844_v36, 0.0  ;;  %vm9849_vm0 = vcmp.eq.s32.totalorder %v7475_v48, 1  ;;  %vm9850_vm14 = vcmp.eq.s32.totalorder %v7495_v55, 1  ;;  %vm9851_vm4 = vcmp.eq.s32.totalorder %v7500_v56, 1 }
 0x113   : > { %v7614_v7 = vsel %vm9849_vm0, %v891_v44, 0.0  ;;  %v913_v22 = vsel %vm9850_vm14, %v892_v3, 0.0  ;;  %v914_v53 = vsel %vm9851_vm4, %v845_v6, 0.0  ;;  %vm9852_vm12 = vcmp.eq.s32.totalorder %v7514_v37, 1 }
 0x114   : > { %v915_v31 = vsel %vm9852_vm12, %v893_v42, 0.0  ;;  %vm9853_vm15 = vcmp.eq.s32.totalorder %v7519_v40, 1  ;;  %v917_v58 = vsel %vm877_vm3, %v894_v62, 0.0  ;;  %vm9854_vm1 = vcmp.eq.s32.totalorder %v7529_v43, 1 }
 0x115   : > { %v916_v18 = vsel %vm9853_vm15, %v846_v5, 0.0  ;;  %v918_v48 = vsel %vm9854_vm1, %v847_v19, 0.0  ;;  %vm9855_vm10 = vcmp.eq.s32.totalorder %v7537_v11, 1  ;;  %v7631_v55 = vcombine.low %v910_v47, %v7614_v7 }
 0x116   : > { %v919_v57 = vsel %vm9855_vm10, %v895_v59, 0.0  ;;  %v940_v56 = vcombine.low %v912_v49, %v913_v22  ;;  %v941_v63 = vcombine.low %v914_v53, %v915_v31  ;;  %v942_v17 = vcombine.low %v916_v18, %v917_v58 }
 0x117   : > { %v943_v37 = vcombine.low %v918_v48, %v919_v57  ;;  %v888_v2 = vcombine.high %v840_v30, %v840_v30  ;;  %v841_v40 = vsel %vm825_vm8, %v7573_v9, %v833_v14  ;;  %vm867_vm3 = vcmp.eq.s32.totalorder %v7559_v12, 1  ;;  %955 = vst [vmem:[#allocation2 + $0x18] sm:$0xff] %v7631_v55 }
 0x118   : > { %957 = vst [vmem:[#allocation2 + $0x28] sm:$0xff] %v941_v63  ;;  %956 = vst [vmem:[#allocation2 + $0x20] sm:$0xff] %v940_v56  ;;  %v889_v60 = vcombine.high %v841_v40, %v841_v40  ;;  %v908_v43 = vsel %vm868_vm7, %v842_v32, 0.0  ;;  %v7642_v11 = vsel %vm869_vm13, %v890_v41, 0.0  ;;  %v904_v8 = vsel %vm864_vm5, %v840_v30, 0.0 }
 0x119   : > { %958 = vst [vmem:[#allocation2 + $0x30] sm:$0xff] %v942_v17  ;;  %959 = vst [vmem:[#allocation2 + $0x38] sm:$0xff] %v943_v37  ;;  %v905_v12 = vsel %vm865_vm6, %v888_v2, 0.0  ;;  %v7649_v35 = vcombine.low %v908_v43, %v7642_v11  ;;  %v906_v20 = vsel %vm866_vm11, %v841_v40, 0.0  ;;  %v7661_v26 = vcombine.low %v904_v8, %v904_v8 }
 0x11a   : > { %v7651_v4 = vcombine.low %v904_v8, %v905_v12  ;;  %v907_v9 = vsel %vm867_vm3, %v889_v60, 0.0  ;;  %v7663_v39 = vcombine.low %v905_v12, %v905_v12  ;;  %v7674_v45 = vcombine.low %v906_v20, %v906_v20 }
 0x11b   : > { %v7655_v0 = vcombine.low %v906_v20, %v907_v9  ;;  %954 = vst [vmem:[#allocation2 + $0x10] sm:$0xff] %v7649_v35  ;;  %v7667_v34 = vcombine.low %v907_v9, %v907_v9  ;;  %1083 = vrot.lane.b32.xlu0 %v7661_v26, %s9519_s12  ;;  %vm1093_vm8 = vcmask 1039360   ;;  %vm1124_vm6 = vcmask 1031168  }
 0x11c   : > { %952 = vst [vmem:[#allocation2] sm:$0xff] %v7651_v4  ;;  %1085 = vrot.lane.b32.xlu1 %v7651_v4, %s9519_s12  ;;  %1070 = vst [vmem:[#allocation3] sm:$0xf] %v7651_v4  ;;  %v5888_v19 = vcombine.low %v7642_v11, %v7642_v11  ;;  %v5889_v49 = vcombine.low %v7614_v7, %v7614_v7  ;;  %vm1156_vm13 = vcmask 965632   ;;  %vm1187_vm9 = vcmask 957440  }
 0x11d   : > { %953 = vst [vmem:[#allocation2 + $0x8] sm:$0xff] %v7655_v0  ;;  %1072 = vst [vmem:[#allocation3 + $0x10] sm:$0xf] %v7655_v0  ;;  %vm1219_vm7 = vcmask 949248   ;;  %vm1250_vm5 = vcmask 883712   ;;  %vm1282_vm11 = vcmask 875520  }
 0x11e   : > { %1071 = vst [vmem:[#allocation3 + $0x8] sm:$0xf] %v7663_v39  ;;  %1073 = vst [vmem:[#allocation3 + $0x18] sm:$0xf] %v7667_v34  ;;  %vm1313_vm2 = vcmask 867328   ;;  %vm1345_vm0 = vcmask 228352  }
 0x11f   : > { %1087 = vrot.lane.b32.xlu0 %v7674_v45, %s9519_s12  ;;  %vm1376_vm14 = vcmask 220160   ;;  %vm9522_vm4 = vcmask 211968   ;;  %vm9521_vm12 = vcmask 146432   ;;  %vm9496_vm15 = vcmask 138240  }
 0x120   : > { %1089 = vrot.lane.b32.xlu1 %v7655_v0, %s9519_s12  ;;  %vm9495_vm1 = vcmask 130048   ;;  %vm9484_vm10 = vcmask 64512   ;;  %vm9485_vm3 = vcmask 56320  }
 0x122   : > { %v5796_v52 = vld [vmem:[#allocation2 + $0x10] ss:$0 sps:$4 sm:$0xff]  }
 0x123   : > { %1091 = vrot.lane.b32.xlu0 %v5796_v52, %s9519_s12  ;;  %v1108_v51 = vld [vmem:[#allocation2 + $0x10] sm:$0xf] }
 0x124   : > { %1114 = vrot.lane.b32.xlu1 %v7651_v4, %s9517_s15  ;;  %v5797_v1 = vld [vmem:[#allocation2 + $0x10] ss:$0 sps:$4 sm:$0xff]  }
 0x125   : > { %v1171_v13 = vld [vmem:[#allocation2 + $0x10] sm:$0xf] }
 0x126   : > { %v5798_v25 = vld [vmem:[#allocation2 + $0x10] ss:$0 sps:$4 sm:$0xff]  }
 0x127   : > { %1116 = vrot.lane.b32.xlu0 %v7663_v39, %s9517_s15  ;;  %v1234_v15 = vld [vmem:[#allocation2 + $0x10] sm:$0xf] }
 0x128   : > { %1118 = vrot.lane.b32.xlu1 %v7655_v0, %s9517_s15  ;;  %v5799_v24 = vld [vmem:[#allocation2 + $0x10] ss:$0 sps:$4 sm:$0xff]  }
 0x129   : > { %v1297_v38 = vld [vmem:[#allocation2 + $0x10] sm:$0xf] }
 0x12a   : > { %v5800_v27 = vld [vmem:[#allocation2 + $0x10] ss:$0 sps:$4 sm:$0xff]  }
 0x12b   : > { %1120 = vrot.lane.b32.xlu0 %v7667_v34, %s9517_s15  ;;  %v1360_v61 = vld [vmem:[#allocation2 + $0x10] sm:$0xf] }
 0x12c   : > { %1122 = vrot.lane.b32.xlu1 %v1108_v51, %s9517_s15  ;;  %v5801_v14 = vld [vmem:[#allocation2 + $0x10] ss:$0 sps:$4 sm:$0xff]  }
 0x12d   : > { %v1423_v46 = vld [vmem:[#allocation2 + $0x10] sm:$0xf] }
 0x12e   : > { %v5802_v41 = vld [vmem:[#allocation2 + $0x10] ss:$0 sps:$4 sm:$0xff]  }
 0x12f   : > { %1146 = vrot.lane.b32.xlu0 %v7661_v26, %s9515_s25  ;;  %v1486_v58 = vld [vmem:[#allocation2 + $0x10] sm:$0xf] }
 0x130   : > { %1148 = vrot.lane.b32.xlu1 %v7651_v4, %s9515_s25  ;;  %v5803_v43 = vld [vmem:[#allocation2 + $0x10] ss:$0 sps:$4 sm:$0xff]  }
 0x133   : > { %1150 = vrot.lane.b32.xlu0 %v7674_v45, %s9515_s25 }
 0x134   : > { %1152 = vrot.lane.b32.xlu1 %v7655_v0, %s9515_s25 }
 0x137   : > { %1154 = vrot.lane.b32.xlu0 %v5797_v1, %s9515_s25 }
 0x138   : > { %1177 = vrot.lane.b32.xlu1 %v7651_v4, %s9513_s22 }
 0x13b   : > { %1179 = vrot.lane.b32.xlu0 %v7663_v39, %s9513_s22 }
 0x13c   : > { %1181 = vrot.lane.b32.xlu1 %v7655_v0, %s9513_s22 }
 0x13f   : > { %1183 = vrot.lane.b32.xlu0 %v7667_v34, %s9513_s22 }
 0x140   : > { %1185 = vrot.lane.b32.xlu1 %v1171_v13, %s9513_s22 }
 0x143   : > { %1209 = vrot.lane.b32.xlu0 %v7661_v26, %s9511_s27 }
 0x144   : > { %1211 = vrot.lane.b32.xlu1 %v7651_v4, %s9511_s27 }
 0x147   : > { %1213 = vrot.lane.b32.xlu0 %v7674_v45, %s9511_s27 }
 0x148   : > { %1215 = vrot.lane.b32.xlu1 %v7655_v0, %s9511_s27 }
 0x14b   : > { %1217 = vrot.lane.b32.xlu0 %v5798_v25, %s9511_s27 }
 0x14c   : > { %1240 = vrot.lane.b32.xlu1 %v7651_v4, %s9509_s21 }
 0x14f   : > { %1242 = vrot.lane.b32.xlu0 %v7663_v39, %s9509_s21 }
 0x150   : > { %1244 = vrot.lane.b32.xlu1 %v7655_v0, %s9509_s21 }
 0x153   : > { %1246 = vrot.lane.b32.xlu0 %v7667_v34, %s9509_s21 }
 0x154   : > { %1248 = vrot.lane.b32.xlu1 %v1234_v15, %s9509_s21 }
 0x157   : > { %1272 = vrot.lane.b32.xlu0 %v7661_v26, %s9507_s14 }
 0x158   : > { %1274 = vrot.lane.b32.xlu1 %v7651_v4, %s9507_s14 }
 0x15b   : > { %1276 = vrot.lane.b32.xlu0 %v7674_v45, %s9507_s14 }
 0x15c   : > { %1278 = vrot.lane.b32.xlu1 %v7655_v0, %s9507_s14 }
 0x15f   : > { %1280 = vrot.lane.b32.xlu0 %v5799_v24, %s9507_s14 }
 0x160   : > { %1303 = vrot.lane.b32.xlu1 %v7651_v4, %s9505_s17 }
 0x163   : > { %1305 = vrot.lane.b32.xlu0 %v7663_v39, %s9505_s17 }
 0x164   : > { %1307 = vrot.lane.b32.xlu1 %v7655_v0, %s9505_s17 }
 0x167   : > { %1309 = vrot.lane.b32.xlu0 %v7667_v34, %s9505_s17 }
 0x168   : > { %1311 = vrot.lane.b32.xlu1 %v1297_v38, %s9505_s17 }
 0x16b   : > { %1335 = vrot.lane.b32.xlu0 %v7661_v26, %s9503_s28 }
 0x16c   : > { %1337 = vrot.lane.b32.xlu1 %v7651_v4, %s9503_s28 }
 0x16f   : > { %1339 = vrot.lane.b32.xlu0 %v7674_v45, %s9503_s28 }
 0x170   : > { %1341 = vrot.lane.b32.xlu1 %v7655_v0, %s9503_s28 }
 0x173   : > { %1343 = vrot.lane.b32.xlu0 %v5800_v27, %s9503_s28  ;;  %v1549_v27 = vld [vmem:[#allocation2 + $0x10] sm:$0xf] }
 0x174   : > { %1366 = vrot.lane.b32.xlu1 %v7651_v4, %s9501_s24 }
 0x177   : > { %1368 = vrot.lane.b32.xlu0 %v7663_v39, %s9501_s24 }
 0x178   : > { %1370 = vrot.lane.b32.xlu1 %v7655_v0, %s9501_s24 }
 0x17b   : > { %1372 = vrot.lane.b32.xlu0 %v7667_v34, %s9501_s24 }
 0x17c   : > { %1374 = vrot.lane.b32.xlu1 %v1360_v61, %s9501_s24 }
 0x17f   : > { %1398 = vrot.lane.b32.xlu0 %v7661_v26, %s9497_s11 }
 0x180   : > { %1400 = vrot.lane.b32.xlu1 %v7651_v4, %s9497_s11 }
 0x183   : > { %1402 = vrot.lane.b32.xlu0 %v7674_v45, %s9497_s11 }
 0x184   : > { %1404 = vrot.lane.b32.xlu1 %v7655_v0, %s9497_s11 }
 0x187   : > { %1406 = vrot.lane.b32.xlu0 %v5801_v14, %s9497_s11 }
 0x188   : > { %1429 = vrot.lane.b32.xlu1 %v7651_v4, %s9499_s23 }
 0x18b   : > { %1431 = vrot.lane.b32.xlu0 %v7663_v39, %s9499_s23 }
 0x18c   : > { %1433 = vrot.lane.b32.xlu1 %v7655_v0, %s9499_s23 }
 0x18d   : > { %v1084_v50 = vpop.permute.xlu0 %1083 }
 0x18e   : > { %v1086_v29 = vpop.permute.xlu1 %1085 }
 0x18f   : > { %v1094_v28 = vsel %vm1093_vm8, %v1084_v50, %v1086_v29  ;;  %1435 = vrot.lane.b32.xlu0 %v7667_v34, %s9499_s23 }
 0x190   : > { %1437 = vrot.lane.b32.xlu1 %v1423_v46, %s9499_s23  ;;  %1102 = vst [vmem:[#allocation3] sm:$0xf0] %v1094_v28 }
 0x191   : > { %v1088_v23 = vpop.permute.xlu0 %1087 }
 0x192   : > { %v1090_v10 = vpop.permute.xlu1 %1089  ;;  %v1095_v30 = vsel %vm1093_vm8, %v1086_v29, %v1088_v23 }
 0x193   : > { %v1096_v16 = vsel %vm1093_vm8, %v1088_v23, %v1090_v10  ;;  %1103 = vst [vmem:[#allocation3 + $0x8] sm:$0xf0] %v1095_v30  ;;  %1461 = vrot.lane.b32.xlu0 %v7661_v26, %s9482_s1 }
 0x194   : > { %1463 = vrot.lane.b32.xlu1 %v7651_v4, %s9482_s1  ;;  %1104 = vst [vmem:[#allocation3 + $0x10] sm:$0xf0] %v1096_v16 }
 0x195   : > { %v1092_v32 = vpop.permute.xlu0 %1091 }
 0x196   : > { %v1115_v54 = vpop.permute.xlu1 %1114  ;;  %v1097_v33 = vsel %vm1093_vm8, %v1090_v10, %v1092_v32 }
 0x197   : > { %v7790_v36 = vld [vmem:[#allocation3] sm:$0xff]  ;;  %1105 = vst [vmem:[#allocation3 + $0x18] sm:$0xf0] %v1097_v33  ;;  %1465 = vrot.lane.b32.xlu0 %v7674_v45, %s9482_s1 }
 0x198   : > { %1467 = vrot.lane.b32.xlu1 %v7655_v0, %s9482_s1  ;;  %2145 = vst [vmem:[#allocation3] sm:$0xf] %v7649_v35  ;;  %v7863_v33 = vld [vmem:[#allocation2 + $0xc] sm:$0xff] }
 0x199   : > { %v1117_v5 = vpop.permute.xlu0 %1116 }
 0x19a   : > { %v1119_v6 = vpop.permute.xlu1 %1118  ;;  %v1125_v44 = vsel %vm1124_vm6, %v1115_v54, %v1117_v5  ;;  %v1895_v42 = vld [vmem:[#allocation3 + $0x8] sm:$0xff] }
 0x19b   : > { %v1126_v3 = vsel %vm1124_vm6, %v1117_v5, %v1119_v6  ;;  %v7801_v62 = vld [vmem:[#allocation3 + $0x10] sm:$0xff]  ;;  %1133 = vst [vmem:[#allocation3 + $0x20] sm:$0xf] %v1125_v44  ;;  %1469 = vrot.lane.b32.xlu0 %v5802_v41, %s9482_s1  ;;  %2146 = vst [vmem:[#allocation3 + $0x8] sm:$0xf] %v5888_v19  ;;  %v7877_v44 = vcombine.high %v7863_v33, %v7863_v33  ;;  %s9858_s1 = smov 17  }
 0x19c   : > { %1492 = vrot.lane.b32.xlu1 %v7651_v4, %s9458_s26  ;;  %1134 = vst [vmem:[#allocation3 + $0x28] sm:$0xf] %v1126_v3  ;;  %2147 = vst [vmem:[#allocation3 + $0x10] sm:$0xf] %v7631_v55  ;;  %v1612_v19 = vld [vmem:[#allocation2 + $0x14] sm:$0xf] }
 0x19d   : > { %v1121_v47 = vpop.permute.xlu0 %1120 }
 0x19e   : > { %v1123_v59 = vpop.permute.xlu1 %1122  ;;  %v1127_v22 = vsel %vm1124_vm6, %v1119_v6, %v1121_v47  ;;  %v1897_v31 = vld [vmem:[#allocation3 + $0x18] sm:$0xff] }
 0x19f   : > { %v1128_v53 = vsel %vm1124_vm6, %v1121_v47, %v1123_v59  ;;  %1135 = vst [vmem:[#allocation3 + $0x30] sm:$0xf] %v1127_v22  ;;  %1494 = vrot.lane.b32.xlu0 %v7663_v39, %s9458_s26  ;;  %2148 = vst [vmem:[#allocation3 + $0x18] sm:$0xf] %v5889_v49 }
 0x1a0   : > { %1496 = vrot.lane.b32.xlu1 %v7655_v0, %s9458_s26  ;;  %1136 = vst [vmem:[#allocation3 + $0x38] sm:$0xf] %v1128_v53 }
 0x1a1   : > { %v1147_v48 = vpop.permute.xlu0 %1146 }
 0x1a2   : > { %v1149_v18 = vpop.permute.xlu1 %1148 }
 0x1a3   : > { %v1157_v57 = vsel %vm1156_vm13, %v1147_v48, %v1149_v18  ;;  %1498 = vrot.lane.b32.xlu0 %v7667_v34, %s9458_s26 }
 0x1a4   : > { %1500 = vrot.lane.b32.xlu1 %v1486_v58, %s9458_s26  ;;  %1165 = vst [vmem:[#allocation3 + $0x20] sm:$0xf0] %v1157_v57  ;;  %s9462_s26 = smov 7  }
 0x1a5   : > { %v1151_v55 = vpop.permute.xlu0 %1150 }
 0x1a6   : > { %v1153_v7 = vpop.permute.xlu1 %1152  ;;  %v1158_v56 = vsel %vm1156_vm13, %v1149_v18, %v1151_v55 }
 0x1a7   : > { %v1159_v63 = vsel %vm1156_vm13, %v1151_v55, %v1153_v7  ;;  %1166 = vst [vmem:[#allocation3 + $0x28] sm:$0xf0] %v1158_v56  ;;  %1524 = vrot.lane.b32.xlu0 %v7661_v26, %s9460_s16 }
 0x1a8   : > { %1526 = vrot.lane.b32.xlu1 %v7651_v4, %s9460_s16  ;;  %1167 = vst [vmem:[#allocation3 + $0x30] sm:$0xf0] %v1159_v63 }
 0x1a9   : > { %v1155_v37 = vpop.permute.xlu0 %1154 }
 0x1aa   : > { %v1178_v17 = vpop.permute.xlu1 %1177  ;;  %v1160_v2 = vsel %vm1156_vm13, %v1153_v7, %v1155_v37  ;;  %v5809_v7 = vld [vmem:[#allocation2 + $0x14] ss:$0 sps:$4 sm:$0xff]  }
 0x1ab   : > { %1168 = vst [vmem:[#allocation3 + $0x38] sm:$0xf0] %v1160_v2  ;;  %1528 = vrot.lane.b32.xlu0 %v7674_v45, %s9460_s16  ;;  %v1898_v11 = vld [vmem:[#allocation3 + $0x20] sm:$0xff] }
 0x1ac   : > { %1530 = vrot.lane.b32.xlu1 %v7655_v0, %s9460_s16  ;;  %v5456_v52 = vpack.c.bf16 %v1898_v11, %v7790_v36 }
 0x1ad   : > { %v1180_v60 = vpop.permute.xlu0 %1179 }
 0x1ae   : > { %v1182_v40 = vpop.permute.xlu1 %1181  ;;  %v1188_v8 = vsel %vm1187_vm9, %v1178_v17, %v1180_v60  ;;  %v1899_v35 = vld [vmem:[#allocation3 + $0x28] sm:$0xff] }
 0x1af   : > { %v1189_v12 = vsel %vm1187_vm9, %v1180_v60, %v1182_v40  ;;  %1196 = vst [vmem:[#allocation3 + $0x40] sm:$0xf] %v1188_v8  ;;  %1532 = vrot.lane.b32.xlu0 %v5803_v43, %s9460_s16  ;;  %v5454_v9 = vpack.c.bf16 %v1899_v35, %v1895_v42  ;;  %v1900_v1 = vld [vmem:[#allocation3 + $0x30] sm:$0xff]  ;;  %s9464_s16 = smov 6  }
 0x1b0   : > { %1555 = vrot.lane.b32.xlu1 %v7651_v4, %s9462_s26  ;;  %1197 = vst [vmem:[#allocation3 + $0x48] sm:$0xf] %v1189_v12  ;;  %v5486_v61 = vpack.c.bf16 %v1900_v1, %v7801_v62 }
 0x1b1   : > { %v1184_v51 = vpop.permute.xlu0 %1183  ;;  %5455 = vmatprep.subr.bf16.mxu0 %v5454_v9 }
 0x1b2   : > { %v1186_v20 = vpop.permute.xlu1 %1185  ;;  %v1190_v13 = vsel %vm1187_vm9, %v1182_v40, %v1184_v51  ;;  %5457 = vmatpush1.bf16.msra.mxu0 %v5456_v52  ;;  %v1901_v15 = vld [vmem:[#allocation3 + $0x38] sm:$0xff] }
 0x1b3   : > { %v1191_v25 = vsel %vm1187_vm9, %v1184_v51, %v1186_v20  ;;  %1198 = vst [vmem:[#allocation3 + $0x50] sm:$0xf] %v1190_v13  ;;  %1557 = vrot.lane.b32.xlu0 %v7663_v39, %s9462_s26  ;;  %v5484_v38 = vpack.c.bf16 %v1901_v15, %v1897_v31  ;;  %v7895_v31 = vcombine.low %v7863_v33, %v7863_v33  ;;  %v1675_v13 = vld [vmem:[#allocation2 + $0x14] sm:$0xf] }
 0x1b4   : > { %1559 = vrot.lane.b32.xlu1 %v7655_v0, %s9462_s26  ;;  %1199 = vst [vmem:[#allocation3 + $0x58] sm:$0xf] %v1191_v25 }
 0x1b5   : > { %5485 = vmatprep.subr.bf16.mxu1 %v5484_v38  ;;  %v1210_v14 = vpop.permute.xlu0 %1209 }
 0x1b6   : > { %v1212_v24 = vpop.permute.xlu1 %1211  ;;  %5487 = vmatpush1.bf16.msra.mxu1 %v5486_v61 }
 0x1b7   : > { %v1220_v29 = vsel %vm1219_vm7, %v1210_v14, %v1212_v24  ;;  %1561 = vrot.lane.b32.xlu0 %v7667_v34, %s9462_s26 }
 0x1b8   : > { %1563 = vrot.lane.b32.xlu1 %v1549_v27, %s9462_s26  ;;  %1228 = vst [vmem:[#allocation3 + $0x40] sm:$0xf0] %v1220_v29  ;;  %s9466_s26 = smov 56  }
 0x1b9   : > { %v1214_v39 = vpop.permute.xlu0 %1213 }
 0x1ba   : > { %v1216_v46 = vpop.permute.xlu1 %1215  ;;  %v1221_v50 = vsel %vm1219_vm7, %v1212_v24, %v1214_v39 }
 0x1bb   : > { %v1222_v28 = vsel %vm1219_vm7, %v1214_v39, %v1216_v46  ;;  %1229 = vst [vmem:[#allocation3 + $0x48] sm:$0xf0] %v1221_v50  ;;  %1587 = vrot.lane.b32.xlu0 %v7661_v26, %s9464_s16  ;;  %v5805_v26 = vld [vmem:[#allocation2 + $0x10] ss:$0 sps:$4 sm:$0xff]  }
 0x1bc   : > { %1589 = vrot.lane.b32.xlu1 %v7651_v4, %s9464_s16  ;;  %1230 = vst [vmem:[#allocation3 + $0x50] sm:$0xf0] %v1222_v28  ;;  %v7856_v4 = vld [vmem:[#allocation2 + $0x4] sm:$0xff] }
 0x1bd   : > { %v1218_v23 = vpop.permute.xlu0 %1217  ;;  %v7885_v59 = vcombine.low %v7856_v4, %v7856_v4 }
 0x1be   : > { %v1241_v10 = vpop.permute.xlu1 %1240  ;;  %v1223_v34 = vsel %vm1219_vm7, %v1216_v46, %v1218_v23 }
 0x1bf   : > { %1231 = vst [vmem:[#allocation3 + $0x58] sm:$0xf0] %v1223_v34  ;;  %1591 = vrot.lane.b32.xlu0 %v7674_v45, %s9464_s16  ;;  %v7867_v45 = vcombine.high %v7856_v4, %v7856_v4  ;;  %v1902_v60 = vld [vmem:[#allocation3 + $0x40] sm:$0xff] }
 0x1c0   : > { %1593 = vrot.lane.b32.xlu1 %v7655_v0, %s9464_s16 }
 0x1c1   : > { %v1243_v16 = vpop.permute.xlu0 %1242 }
 0x1c2   : > { %v1245_v30 = vpop.permute.xlu1 %1244  ;;  %v1251_v54 = vsel %vm1250_vm5, %v1241_v10, %v1243_v16  ;;  %v1903_v17 = vld [vmem:[#allocation3 + $0x48] sm:$0xff] }
 0x1c3   : > { %v1252_v0 = vsel %vm1250_vm5, %v1243_v16, %v1245_v30  ;;  %1259 = vst [vmem:[#allocation3 + $0x60] sm:$0xf] %v1251_v54  ;;  %1595 = vrot.lane.b32.xlu0 %v5805_v26, %s9464_s16  ;;  %s9468_s16 = smov 55   ;;  %v1904_v1 = vld [vmem:[#allocation3 + $0x50] sm:$0xff]  ;;  %v5810_v10 = vld [vmem:[#allocation2 + $0x14] ss:$0 sps:$4 sm:$0xff]  }
 0x1c4   : > { %1618 = vrot.lane.b32.xlu1 %v7856_v4, %s9466_s26  ;;  %1260 = vst [vmem:[#allocation3 + $0x68] sm:$0xf] %v1252_v0 }
 0x1c5   : > { %v1247_v36 = vpop.permute.xlu0 %1246 }
 0x1c6   : > { %v1249_v32 = vpop.permute.xlu1 %1248  ;;  %v1253_v6 = vsel %vm1250_vm5, %v1245_v30, %v1247_v36  ;;  %v1905_v20 = vld [vmem:[#allocation3 + $0x58] sm:$0xff] }
 0x1c7   : > { %v1254_v5 = vsel %vm1250_vm5, %v1247_v36, %v1249_v32  ;;  %1261 = vst [vmem:[#allocation3 + $0x70] sm:$0xf] %v1253_v6  ;;  %1620 = vrot.lane.b32.xlu0 %v7867_v45, %s9466_s26  ;;  %v1738_v32 = vld [vmem:[#allocation2 + $0x14] sm:$0xf] }
 0x1c8   : > { %1622 = vrot.lane.b32.xlu1 %v7863_v33, %s9466_s26  ;;  %1262 = vst [vmem:[#allocation3 + $0x78] sm:$0xf] %v1254_v5 }
 0x1c9   : > { %v1273_v3 = vpop.permute.xlu0 %1272 }
 0x1ca   : > { %v1275_v41 = vpop.permute.xlu1 %1274 }
 0x1cb   : > { %v1283_v42 = vsel %vm1282_vm11, %v1273_v3, %v1275_v41  ;;  %1624 = vrot.lane.b32.xlu0 %v7877_v44, %s9466_s26 }
 0x1cc   : > { %1626 = vrot.lane.b32.xlu1 %v1612_v19, %s9466_s26  ;;  %1291 = vst [vmem:[#allocation3 + $0x60] sm:$0xf0] %v1283_v42  ;;  %s9470_s26 = smov 54  }
 0x1cd   : > { %v1277_v47 = vpop.permute.xlu0 %1276 }
 0x1ce   : > { %v1279_v62 = vpop.permute.xlu1 %1278  ;;  %v1284_v49 = vsel %vm1282_vm11, %v1275_v41, %v1277_v47 }
 0x1cf   : > { %v1285_v22 = vsel %vm1282_vm11, %v1277_v47, %v1279_v62  ;;  %1292 = vst [vmem:[#allocation3 + $0x68] sm:$0xf0] %v1284_v49  ;;  %1650 = vrot.lane.b32.xlu0 %v7885_v59, %s9468_s16 }
 0x1d0   : > { %1652 = vrot.lane.b32.xlu1 %v7856_v4, %s9468_s16  ;;  %1293 = vst [vmem:[#allocation3 + $0x70] sm:$0xf0] %v1285_v22 }
 0x1d1   : > { %v1281_v18 = vpop.permute.xlu0 %1280 }
 0x1d2   : > { %v1304_v53 = vpop.permute.xlu1 %1303  ;;  %v1286_v58 = vsel %vm1282_vm11, %v1279_v62, %v1281_v18 }
 0x1d3   : > { %1294 = vst [vmem:[#allocation3 + $0x78] sm:$0xf0] %v1286_v58  ;;  %1654 = vrot.lane.b32.xlu0 %v7895_v31, %s9468_s16  ;;  %v1906_v55 = vld [vmem:[#allocation3 + $0x60] sm:$0xff] }
 0x1d4   : > { %1656 = vrot.lane.b32.xlu1 %v7863_v33, %s9468_s16  ;;  %v5460_v43 = vpack.c.bf16 %v1906_v55, %v1902_v60 }
 0x1d5   : > { %v1306_v57 = vpop.permute.xlu0 %1305 }
 0x1d6   : > { %v1308_v48 = vpop.permute.xlu1 %1307  ;;  %v1314_v56 = vsel %vm1313_vm2, %v1304_v53, %v1306_v57  ;;  %v1907_v37 = vld [vmem:[#allocation3 + $0x68] sm:$0xff] }
 0x1d7   : > { %v1315_v63 = vsel %vm1313_vm2, %v1306_v57, %v1308_v48  ;;  %1322 = vst [vmem:[#allocation3 + $0x80] sm:$0xf] %v1314_v56  ;;  %1658 = vrot.lane.b32.xlu0 %v5809_v7, %s9468_s16  ;;  %v5458_v40 = vpack.c.bf16 %v1907_v37, %v1903_v17  ;;  %v1908_v8 = vld [vmem:[#allocation3 + $0x70] sm:$0xff]  ;;  %s9472_s16 = smov 46   ;;  %v5811_v53 = vld [vmem:[#allocation2 + $0x14] ss:$0 sps:$4 sm:$0xff]  }
 0x1d8   : > { %1681 = vrot.lane.b32.xlu1 %v7856_v4, %s9470_s26  ;;  %1323 = vst [vmem:[#allocation3 + $0x88] sm:$0xf] %v1315_v63  ;;  %v5490_v25 = vpack.c.bf16 %v1908_v8, %v1904_v1 }
 0x1d9   : > { %v1310_v11 = vpop.permute.xlu0 %1309  ;;  %5459 = vmatprep.subr.bf16.mxu0 %v5458_v40 }
 0x1da   : > { %v1312_v2 = vpop.permute.xlu1 %1311  ;;  %v1316_v12 = vsel %vm1313_vm2, %v1308_v48, %v1310_v11  ;;  %5461 = vmatpush1.bf16.msra.mxu0 %v5460_v43  ;;  %v1909_v9 = vld [vmem:[#allocation3 + $0x78] sm:$0xff] }
 0x1db   : > { %v1317_v35 = vsel %vm1313_vm2, %v1310_v11, %v1312_v2  ;;  %1324 = vst [vmem:[#allocation3 + $0x90] sm:$0xf] %v1316_v12  ;;  %1683 = vrot.lane.b32.xlu0 %v7867_v45, %s9470_s26  ;;  %v5488_v51 = vpack.c.bf16 %v1909_v9, %v1905_v20  ;;  %v1801_v20 = vld [vmem:[#allocation2 + $0x14] sm:$0xf] }
 0x1dc   : > { %1685 = vrot.lane.b32.xlu1 %v7863_v33, %s9470_s26  ;;  %1325 = vst [vmem:[#allocation3 + $0x98] sm:$0xf] %v1317_v35 }
 0x1dd   : > { %5489 = vmatprep.subr.bf16.mxu1 %v5488_v51  ;;  %v1336_v15 = vpop.permute.xlu0 %1335 }
 0x1de   : > { %v1338_v52 = vpop.permute.xlu1 %1337  ;;  %5491 = vmatpush1.bf16.msra.mxu1 %v5490_v25 }
 0x1df   : > { %v1346_v24 = vsel %vm1345_vm0, %v1336_v15, %v1338_v52  ;;  %1687 = vrot.lane.b32.xlu0 %v7877_v44, %s9470_s26 }
 0x1e0   : > { %1689 = vrot.lane.b32.xlu1 %v1675_v13, %s9470_s26  ;;  %1354 = vst [vmem:[#allocation3 + $0x80] sm:$0xf0] %v1346_v24  ;;  %s9474_s26 = smov 45  }
 0x1e1   : > { %v1340_v27 = vpop.permute.xlu0 %1339 }
 0x1e2   : > { %v1342_v38 = vpop.permute.xlu1 %1341  ;;  %v1347_v61 = vsel %vm1345_vm0, %v1338_v52, %v1340_v27 }
 0x1e3   : > { %v1348_v14 = vsel %vm1345_vm0, %v1340_v27, %v1342_v38  ;;  %1355 = vst [vmem:[#allocation3 + $0x88] sm:$0xf0] %v1347_v61  ;;  %1713 = vrot.lane.b32.xlu0 %v7885_v59, %s9472_s16 }
 0x1e4   : > { %1715 = vrot.lane.b32.xlu1 %v7856_v4, %s9472_s16  ;;  %1356 = vst [vmem:[#allocation3 + $0x90] sm:$0xf0] %v1348_v14 }
 0x1e5   : > { %v1344_v46 = vpop.permute.xlu0 %1343 }
 0x1e6   : > { %v1367_v29 = vpop.permute.xlu1 %1366  ;;  %v1349_v39 = vsel %vm1345_vm0, %v1342_v38, %v1344_v46 }
 0x1e7   : > { %1357 = vst [vmem:[#allocation3 + $0x98] sm:$0xf0] %v1349_v39  ;;  %1717 = vrot.lane.b32.xlu0 %v7895_v31, %s9472_s16  ;;  %v1910_v63 = vld [vmem:[#allocation3 + $0x80] sm:$0xff] }
 0x1e8   : > { %1719 = vrot.lane.b32.xlu1 %v7863_v33, %s9472_s16 }
 0x1e9   : > { %v1369_v28 = vpop.permute.xlu0 %1368 }
 0x1ea   : > { %v1371_v50 = vpop.permute.xlu1 %1370  ;;  %v1377_v23 = vsel %vm1376_vm14, %v1367_v29, %v1369_v28  ;;  %v1911_v57 = vld [vmem:[#allocation3 + $0x88] sm:$0xff] }
 0x1eb   : > { %v1378_v34 = vsel %vm1376_vm14, %v1369_v28, %v1371_v50  ;;  %1385 = vst [vmem:[#allocation3 + $0xa0] sm:$0xf] %v1377_v23  ;;  %1721 = vrot.lane.b32.xlu0 %v5810_v10, %s9472_s16  ;;  %s9476_s16 = smov 44   ;;  %v1912_v35 = vld [vmem:[#allocation3 + $0x90] sm:$0xff]  ;;  %v5812_v29 = vld [vmem:[#allocation2 + $0x14] ss:$0 sps:$4 sm:$0xff]  }
 0x1ec   : > { %1744 = vrot.lane.b32.xlu1 %v7856_v4, %s9474_s26  ;;  %1386 = vst [vmem:[#allocation3 + $0xa8] sm:$0xf] %v1378_v34  ;;  %v1864_v10 = vld [vmem:[#allocation2 + $0x14] sm:$0xf]  ;;  %v6084_v34 = vmov 0.0  }
 0x1ed   : > { %v1373_v16 = vpop.permute.xlu0 %1372  ;;  %v7991_v23 = vld [vmem:[#allocation2 + $0x10] sm:$0xff]  ;;  %2036 = vmatprep.mubr.f32.mxu0 %v6084_v34  ;;  %2107 = vmatprep.mubr.f32.mxu1 %v6084_v34 }
 0x1ee   : > { %v1375_v30 = vpop.permute.xlu1 %1374  ;;  %v1379_v26 = vsel %vm1376_vm14, %v1371_v50, %v1373_v16  ;;  %v1913_v43 = vld [vmem:[#allocation3 + $0x98] sm:$0xff] }
 0x1ef   : > { %v1380_v54 = vsel %vm1376_vm14, %v1373_v16, %v1375_v30  ;;  %1387 = vst [vmem:[#allocation3 + $0xb0] sm:$0xf] %v1379_v26  ;;  %1746 = vrot.lane.b32.xlu0 %v7867_v45, %s9474_s26  ;;  %v1950_v26 = vld [vmem:[%s9440_s6] sm:$0x3] }
 0x1f0   : > { %1748 = vrot.lane.b32.xlu1 %v7863_v33, %s9474_s26  ;;  %1388 = vst [vmem:[#allocation3 + $0xb8] sm:$0xf] %v1380_v54  ;;  %v8006_v54 = vld [vmem:[#allocation2 + $0x18] sm:$0xff] }
 0x1f1   : > { %v1399_v36 = vpop.permute.xlu0 %1398 }
 0x1f2   : > { %v1401_v0 = vpop.permute.xlu1 %1400 }
 0x1f3   : > { %v1409_v6 = vsel %vm9522_vm4, %v1399_v36, %v1401_v0  ;;  %1750 = vrot.lane.b32.xlu0 %v7877_v44, %s9474_s26 }
 0x1f4   : > { %1752 = vrot.lane.b32.xlu1 %v1738_v32, %s9474_s26  ;;  %1417 = vst [vmem:[#allocation3 + $0xa0] sm:$0xf0] %v1409_v6  ;;  %s9478_s26 = smov 36   ;;  %v8014_v6 = vcombine.low %v8006_v54, %v8006_v54 }
 0x1f5   : > { %v1403_v41 = vpop.permute.xlu0 %1402 }
 0x1f6   : > { %v1405_v5 = vpop.permute.xlu1 %1404  ;;  %v1410_v19 = vsel %vm9522_vm4, %v1401_v0, %v1403_v41 }
 0x1f7   : > { %v1411_v3 = vsel %vm9522_vm4, %v1403_v41, %v1405_v5  ;;  %1418 = vst [vmem:[#allocation3 + $0xa8] sm:$0xf0] %v1410_v19  ;;  %1776 = vrot.lane.b32.xlu0 %v7885_v59, %s9476_s16 }
 0x1f8   : > { %1778 = vrot.lane.b32.xlu1 %v7856_v4, %s9476_s16  ;;  %1419 = vst [vmem:[#allocation3 + $0xb0] sm:$0xf0] %v1411_v3  ;;  %v5815_v3 = vld [vmem:[#allocation2 + $0x20] ss:$0 sps:$4 sm:$0xff]  }
 0x1f9   : > { %v1407_v62 = vpop.permute.xlu0 %1406 }
 0x1fa   : > { %v1430_v42 = vpop.permute.xlu1 %1429  ;;  %v1412_v47 = vsel %vm9522_vm4, %v1405_v5, %v1407_v62 }
 0x1fb   : > { %1420 = vst [vmem:[#allocation3 + $0xb8] sm:$0xf0] %v1412_v47  ;;  %1780 = vrot.lane.b32.xlu0 %v7895_v31, %s9476_s16  ;;  %v1914_v18 = vld [vmem:[#allocation3 + $0xa0] sm:$0xff] }
 0x1fc   : > { %1782 = vrot.lane.b32.xlu1 %v7863_v33, %s9476_s16  ;;  %v5464_v17 = vpack.c.bf16 %v1914_v18, %v1910_v63 }
 0x1fd   : > { %v1432_v22 = vpop.permute.xlu0 %1431 }
 0x1fe   : > { %v1434_v49 = vpop.permute.xlu1 %1433  ;;  %v1440_v58 = vsel %vm9521_vm12, %v1430_v42, %v1432_v22  ;;  %v1915_v7 = vld [vmem:[#allocation3 + $0xa8] sm:$0xff] }
 0x1ff   : > { %v1441_v48 = vsel %vm9521_vm12, %v1432_v22, %v1434_v49  ;;  %1448 = vst [vmem:[#allocation3 + $0xc0] sm:$0xf] %v1440_v58  ;;  %1784 = vrot.lane.b32.xlu0 %v5811_v53, %s9476_s16  ;;  %v5462_v56 = vpack.c.bf16 %v1915_v7, %v1911_v57  ;;  %v1916_v2 = vld [vmem:[#allocation3 + $0xb0] sm:$0xff]  ;;  %s9480_s16 = smov 35   ;;  %v8028_v58 = vcombine.high %v7991_v23, %v7991_v23 }
 0x200   : > { %1807 = vrot.lane.b32.xlu1 %v7856_v4, %s9478_s26  ;;  %1449 = vst [vmem:[#allocation3 + $0xc8] sm:$0xf] %v1441_v48  ;;  %v5494_v9 = vpack.c.bf16 %v1916_v2, %v1912_v35 }
 0x201   : > { %v1436_v37 = vpop.permute.xlu0 %1435  ;;  %5463 = vmatprep.subr.bf16.mxu0 %v5462_v56 }
 0x202   : > { %v1438_v55 = vpop.permute.xlu1 %1437  ;;  %v1442_v40 = vsel %vm9521_vm12, %v1434_v49, %v1436_v37  ;;  %5465 = vmatpush1.bf16.msra.mxu0 %v5464_v17  ;;  %v1917_v11 = vld [vmem:[#allocation3 + $0xb8] sm:$0xff] }
 0x203   : > { %v1443_v60 = vsel %vm9521_vm12, %v1436_v37, %v1438_v55  ;;  %1450 = vst [vmem:[#allocation3 + $0xd0] sm:$0xf] %v1442_v40  ;;  %1809 = vrot.lane.b32.xlu0 %v7867_v45, %s9478_s26  ;;  %v5492_v12 = vpack.c.bf16 %v1917_v11, %v1913_v43 }
 0x204   : > { %1811 = vrot.lane.b32.xlu1 %v7863_v33, %s9478_s26  ;;  %1451 = vst [vmem:[#allocation3 + $0xd8] sm:$0xf] %v1443_v60  ;;  %v8038_v60 = vcombine.high %v8006_v54, %v8006_v54 }
 0x205   : > { %5493 = vmatprep.subr.bf16.mxu1 %v5492_v12  ;;  %v1462_v52 = vpop.permute.xlu0 %1461 }
 0x206   : > { %v1464_v8 = vpop.permute.xlu1 %1463  ;;  %5495 = vmatpush1.bf16.msra.mxu1 %v5494_v9 }
 0x207   : > { %v1472_v51 = vsel %vm9496_vm15, %v1462_v52, %v1464_v8  ;;  %1813 = vrot.lane.b32.xlu0 %v7877_v44, %s9478_s26 }
 0x208   : > { %1815 = vrot.lane.b32.xlu1 %v1801_v20, %s9478_s26  ;;  %1480 = vst [vmem:[#allocation3 + $0xc0] sm:$0xf0] %v1472_v51  ;;  %s9523_s26 = smov 34  }
 0x209   : > { %v1466_v13 = vpop.permute.xlu0 %1465 }
 0x20a   : > { %v1468_v1 = vpop.permute.xlu1 %1467  ;;  %v1473_v25 = vsel %vm9496_vm15, %v1464_v8, %v1466_v13 }
 0x20b   : > { %v1474_v15 = vsel %vm9496_vm15, %v1466_v13, %v1468_v1  ;;  %1481 = vst [vmem:[#allocation3 + $0xc8] sm:$0xf0] %v1473_v25  ;;  %1839 = vrot.lane.b32.xlu0 %v7885_v59, %s9480_s16 }
 0x20c   : > { %1841 = vrot.lane.b32.xlu1 %v7856_v4, %s9480_s16  ;;  %1482 = vst [vmem:[#allocation3 + $0xd0] sm:$0xf0] %v1474_v15 }
 0x20d   : > { %v1470_v38 = vpop.permute.xlu0 %1469 }
 0x20e   : > { %v1493_v24 = vpop.permute.xlu1 %1492  ;;  %v1475_v27 = vsel %vm9496_vm15, %v1468_v1, %v1470_v38  ;;  %v2182_v1 = vld [vmem:[#allocation2 + $0x20] sm:$0xf] }
 0x20f   : > { %1483 = vst [vmem:[#allocation3 + $0xd8] sm:$0xf0] %v1475_v27  ;;  %1843 = vrot.lane.b32.xlu0 %v7895_v31, %s9480_s16  ;;  %v1918_v57 = vld [vmem:[#allocation3 + $0xc0] sm:$0xff]  ;;  %v5818_v38 = vld [vmem:[#allocation2 + $0x20] ss:$0 sps:$4 sm:$0xff]  }
 0x210   : > { %1845 = vrot.lane.b32.xlu1 %v7863_v33, %s9480_s16 }
 0x211   : > { %v1495_v14 = vpop.permute.xlu0 %1494 }
 0x212   : > { %v1497_v61 = vpop.permute.xlu1 %1496  ;;  %v1503_v59 = vsel %vm9495_vm1, %v1493_v24, %v1495_v14  ;;  %v1919_v22 = vld [vmem:[#allocation3 + $0xc8] sm:$0xff] }
 0x213   : > { %v1504_v46 = vsel %vm9495_vm1, %v1495_v14, %v1497_v61  ;;  %1511 = vst [vmem:[#allocation3 + $0xe0] sm:$0xf] %v1503_v59  ;;  %1847 = vrot.lane.b32.xlu0 %v5812_v29, %s9480_s16  ;;  %v1920_v11 = vld [vmem:[#allocation3 + $0xd0] sm:$0xff]  ;;  %s9860_s16 = smov 8  }
 0x214   : > { %1870 = vrot.lane.b32.xlu1 %v7856_v4, %s9523_s26  ;;  %1512 = vst [vmem:[#allocation3 + $0xe8] sm:$0xf] %v1504_v46 }
 0x215   : > { %v1499_v31 = vpop.permute.xlu0 %1498 }
 0x216   : > { %v1501_v39 = vpop.permute.xlu1 %1500  ;;  %v1505_v50 = vsel %vm9495_vm1, %v1497_v61, %v1499_v31  ;;  %v1921_v37 = vld [vmem:[#allocation3 + $0xd8] sm:$0xff] }
 0x217   : > { %v1506_v28 = vsel %vm9495_vm1, %v1499_v31, %v1501_v39  ;;  %1513 = vst [vmem:[#allocation3 + $0xf0] sm:$0xf] %v1505_v50  ;;  %1872 = vrot.lane.b32.xlu0 %v7867_v45, %s9523_s26  ;;  %v8001_v45 = vcombine.low %v7991_v23, %v7991_v23  ;;  %vm6085_vm1 = vmmov 1  }
 0x218   : > { %1874 = vrot.lane.b32.xlu1 %v7863_v33, %s9523_s26  ;;  %1514 = vst [vmem:[#allocation3 + $0xf8] sm:$0xf] %v1506_v28 }
 0x219   : > { %v1525_v33 = vpop.permute.xlu0 %1524 }
 0x21a   : > { %v1527_v4 = vpop.permute.xlu1 %1526 }
 0x21b   : > { %v1535_v30 = vsel %vm9484_vm10, %v1525_v33, %v1527_v4  ;;  %1876 = vrot.lane.b32.xlu0 %v7877_v44, %s9523_s26 }
 0x21c   : > { %1878 = vrot.lane.b32.xlu1 %v1864_v10, %s9523_s26  ;;  %1543 = vst [vmem:[#allocation3 + $0xe0] sm:$0xf0] %v1535_v30 }
 0x21d   : > { %v1529_v0 = vpop.permute.xlu0 %1528 }
 0x21e   : > { %v1531_v16 = vpop.permute.xlu1 %1530  ;;  %v1536_v32 = vsel %vm9484_vm10, %v1527_v4, %v1529_v0 }
 0x21f   : > { %v1537_v36 = vsel %vm9484_vm10, %v1529_v0, %v1531_v16  ;;  %1544 = vst [vmem:[#allocation3 + $0xe8] sm:$0xf0] %v1536_v32  ;;  %1953 = vperm.xlu0 %5794, %v1950_v26  }
 0x220   : > { %2158 = vrot.lane.b32.xlu1 %v8001_v45, %s9519_s12  ;;  %1545 = vst [vmem:[#allocation3 + $0xf0] sm:$0xf0] %v1537_v36 }
 0x221   : > { %v1533_v5 = vpop.permute.xlu0 %1532 }
 0x222   : > { %v1556_v44 = vpop.permute.xlu1 %1555  ;;  %v1538_v41 = vsel %vm9484_vm10, %v1531_v16, %v1533_v5  ;;  %vm9486_vm10 = vcmask 48128   ;;  %v2243_v16 = vld [vmem:[#allocation2 + $0x20] sm:$0xf] }
 0x223   : > { %1546 = vst [vmem:[#allocation3 + $0xf8] sm:$0xf0] %v1538_v41  ;;  %2160 = vrot.lane.b32.xlu0 %v7991_v23, %s9519_s12  ;;  %v1922_v62 = vld [vmem:[#allocation3 + $0xe0] sm:$0xff] }
 0x224   : > { %2162 = vrot.lane.b32.xlu1 %v8014_v6, %s9519_s12  ;;  %v5468_v7 = vpack.c.bf16 %v1922_v62, %v1918_v57 }
 0x225   : > { %v1558_v42 = vpop.permute.xlu0 %1557 }
 0x226   : > { %v1560_v19 = vpop.permute.xlu1 %1559  ;;  %v1566_v47 = vsel %vm9485_vm3, %v1556_v44, %v1558_v42  ;;  %v1923_v53 = vld [vmem:[#allocation3 + $0xe8] sm:$0xff]  ;;  %v5819_v44 = vld [vmem:[#allocation2 + $0x20] ss:$0 sps:$4 sm:$0xff]  }
 0x227   : > { %v1567_v49 = vsel %vm9485_vm3, %v1558_v42, %v1560_v19  ;;  %1574 = vst [vmem:[#allocation3 + $0x100] sm:$0xf] %v1566_v47  ;;  %2164 = vrot.lane.b32.xlu0 %v8006_v54, %s9519_s12  ;;  %v5466_v48 = vpack.c.bf16 %v1923_v53, %v1919_v22  ;;  %v1924_v56 = vld [vmem:[#allocation3 + $0xf0] sm:$0xff] }
 0x228   : > { %2166 = vrot.lane.b32.xlu1 %v5815_v3, %s9519_s12  ;;  %1575 = vst [vmem:[#allocation3 + $0x108] sm:$0xf] %v1567_v49  ;;  %v5498_v8 = vpack.c.bf16 %v1924_v56, %v1920_v11  ;;  %s9880_s12 = smov 126  }
 0x229   : > { %v1562_v55 = vpop.permute.xlu0 %1561  ;;  %5467 = vmatprep.subr.bf16.mxu0 %v5466_v48 }
 0x22a   : > { %v1564_v18 = vpop.permute.xlu1 %1563  ;;  %v1568_v63 = vsel %vm9485_vm3, %v1560_v19, %v1562_v55  ;;  %5469 = vmatpush1.bf16.msra.mxu0 %v5468_v7  ;;  %v1925_v2 = vld [vmem:[#allocation3 + $0xf8] sm:$0xff] }
 0x22b   : > { %v1569_v17 = vsel %vm9485_vm3, %v1562_v55, %v1564_v18  ;;  %1576 = vst [vmem:[#allocation3 + $0x110] sm:$0xf] %v1568_v63  ;;  %2188 = vrot.lane.b32.xlu0 %v7991_v23, %s9517_s15  ;;  %v5496_v43 = vpack.c.bf16 %v1925_v2, %v1921_v37  ;;  %vm9487_vm3 = vcmask 457728  }
 0x22c   : > { %2190 = vrot.lane.b32.xlu1 %v8028_v58, %s9517_s15  ;;  %1577 = vst [vmem:[#allocation3 + $0x118] sm:$0xf] %v1569_v17 }
 0x22d   : > { %5497 = vmatprep.subr.bf16.mxu1 %v5496_v43  ;;  %v1588_v12 = vpop.permute.xlu0 %1587 }
 0x22e   : > { %v1590_v40 = vpop.permute.xlu1 %1589  ;;  %5499 = vmatpush1.bf16.msra.mxu1 %v5498_v8 }
 0x22f   : > { %v1598_v35 = vsel %vm9486_vm10, %v1588_v12, %v1590_v40  ;;  %2192 = vrot.lane.b32.xlu0 %v8006_v54, %s9517_s15 }
 0x230   : > { %2194 = vrot.lane.b32.xlu1 %v8038_v60, %s9517_s15  ;;  %1606 = vst [vmem:[#allocation3 + $0x100] sm:$0xf0] %v1598_v35 }
 0x231   : > { %v1592_v9 = vpop.permute.xlu0 %1591 }
 0x232   : > { %v1594_v20 = vpop.permute.xlu1 %1593  ;;  %v1599_v52 = vsel %vm9486_vm10, %v1590_v40, %v1592_v9 }
 0x233   : > { %v1600_v51 = vsel %vm9486_vm10, %v1592_v9, %v1594_v20  ;;  %1607 = vst [vmem:[#allocation3 + $0x108] sm:$0xf0] %v1599_v52  ;;  %2196 = vrot.lane.b32.xlu0 %v2182_v1, %s9517_s15  ;;  %s9870_s15 = smov 35  }
 0x234   : > { %2219 = vrot.lane.b32.xlu1 %v8001_v45, %s9515_s25  ;;  %1608 = vst [vmem:[#allocation3 + $0x110] sm:$0xf0] %v1600_v51 }
 0x235   : > { %v1596_v25 = vpop.permute.xlu0 %1595 }
 0x236   : > { %v1619_v13 = vpop.permute.xlu1 %1618  ;;  %v1601_v15 = vsel %vm9486_vm10, %v1594_v20, %v1596_v25  ;;  %vm9488_vm10 = vcmask 449536   ;;  %v2304_v20 = vld [vmem:[#allocation2 + $0x20] sm:$0xf] }
 0x237   : > { %1609 = vst [vmem:[#allocation3 + $0x118] sm:$0xf0] %v1601_v15  ;;  %2221 = vrot.lane.b32.xlu0 %v7991_v23, %s9515_s25  ;;  %v1926_v22 = vld [vmem:[#allocation3 + $0x100] sm:$0xff] }
 0x238   : > { %2223 = vrot.lane.b32.xlu1 %v8014_v6, %s9515_s25 }
 0x239   : > { %v1621_v27 = vpop.permute.xlu0 %1620 }
 0x23a   : > { %v1623_v24 = vpop.permute.xlu1 %1622  ;;  %v1629_v61 = vsel %vm9487_vm3, %v1619_v13, %v1621_v27  ;;  %v1927_v42 = vld [vmem:[#allocation3 + $0x108] sm:$0xff]  ;;  %v5820_v13 = vld [vmem:[#allocation2 + $0x20] ss:$0 sps:$4 sm:$0xff]  }
 0x23b   : > { %v1630_v14 = vsel %vm9487_vm3, %v1621_v27, %v1623_v24  ;;  %1637 = vst [vmem:[#allocation3 + $0x120] sm:$0xf] %v1629_v61  ;;  %2225 = vrot.lane.b32.xlu0 %v8006_v54, %s9515_s25  ;;  %v1928_v37 = vld [vmem:[#allocation3 + $0x110] sm:$0xff] }
 0x23c   : > { %2227 = vrot.lane.b32.xlu1 %v5818_v38, %s9515_s25  ;;  %1638 = vst [vmem:[#allocation3 + $0x128] sm:$0xf] %v1630_v14  ;;  %s9869_s25 = smov 36  }
 0x23d   : > { %v1625_v59 = vpop.permute.xlu0 %1624 }
 0x23e   : > { %v1627_v29 = vpop.permute.xlu1 %1626  ;;  %v1631_v46 = vsel %vm9487_vm3, %v1623_v24, %v1625_v59  ;;  %v1929_v55 = vld [vmem:[#allocation3 + $0x118] sm:$0xff] }
 0x23f   : > { %v1632_v39 = vsel %vm9487_vm3, %v1625_v59, %v1627_v29  ;;  %1639 = vst [vmem:[#allocation3 + $0x130] sm:$0xf] %v1631_v46  ;;  %2249 = vrot.lane.b32.xlu0 %v7991_v23, %s9513_s22  ;;  %vm9489_vm3 = vcmask 441344  }
 0x240   : > { %2251 = vrot.lane.b32.xlu1 %v8028_v58, %s9513_s22  ;;  %1640 = vst [vmem:[#allocation3 + $0x138] sm:$0xf] %v1632_v39 }
 0x241   : > { %v1651_v50 = vpop.permute.xlu0 %1650 }
 0x242   : > { %v1653_v31 = vpop.permute.xlu1 %1652 }
 0x243   : > { %v1661_v28 = vsel %vm9488_vm10, %v1651_v50, %v1653_v31  ;;  %2253 = vrot.lane.b32.xlu0 %v8006_v54, %s9513_s22 }
 0x244   : > { %2255 = vrot.lane.b32.xlu1 %v8038_v60, %s9513_s22  ;;  %1669 = vst [vmem:[#allocation3 + $0x120] sm:$0xf0] %v1661_v28 }
 0x245   : > { %v1655_v10 = vpop.permute.xlu0 %1654 }
 0x246   : > { %v1657_v4 = vpop.permute.xlu1 %1656  ;;  %v1662_v33 = vsel %vm9488_vm10, %v1653_v31, %v1655_v10 }
 0x247   : > { %v1663_v30 = vsel %vm9488_vm10, %v1655_v10, %v1657_v4  ;;  %1670 = vst [vmem:[#allocation3 + $0x128] sm:$0xf0] %v1662_v33  ;;  %2257 = vrot.lane.b32.xlu0 %v2243_v16, %s9513_s22  ;;  %s9868_s22 = smov 44  }
 0x248   : > { %2280 = vrot.lane.b32.xlu1 %v8001_v45, %s9511_s27  ;;  %1671 = vst [vmem:[#allocation3 + $0x130] sm:$0xf0] %v1663_v30 }
 0x249   : > { %v1659_v0 = vpop.permute.xlu0 %1658 }
 0x24a   : > { %v1682_v26 = vpop.permute.xlu1 %1681  ;;  %v1664_v32 = vsel %vm9488_vm10, %v1657_v4, %v1659_v0  ;;  %vm9490_vm10 = vcmask 375808   ;;  %v2365_v4 = vld [vmem:[#allocation2 + $0x20] sm:$0xf] }
 0x24b   : > { %1672 = vst [vmem:[#allocation3 + $0x138] sm:$0xf0] %v1664_v32  ;;  %2282 = vrot.lane.b32.xlu0 %v7991_v23, %s9511_s27  ;;  %v1930_v41 = vld [vmem:[#allocation3 + $0x120] sm:$0xff] }
 0x24c   : > { %2284 = vrot.lane.b32.xlu1 %v8014_v6, %s9511_s27  ;;  %v5472_v53 = vpack.c.bf16 %v1930_v41, %v1926_v22 }
 0x24d   : > { %v1684_v5 = vpop.permute.xlu0 %1683 }
 0x24e   : > { %v1686_v36 = vpop.permute.xlu1 %1685  ;;  %v1692_v19 = vsel %vm9489_vm3, %v1682_v26, %v1684_v5  ;;  %v1931_v62 = vld [vmem:[#allocation3 + $0x128] sm:$0xff]  ;;  %v5821_v26 = vld [vmem:[#allocation2 + $0x20] ss:$0 sps:$4 sm:$0xff]  }
 0x24f   : > { %v1693_v3 = vsel %vm9489_vm3, %v1684_v5, %v1686_v36  ;;  %1700 = vst [vmem:[#allocation3 + $0x140] sm:$0xf] %v1692_v19  ;;  %2286 = vrot.lane.b32.xlu0 %v8006_v54, %s9511_s27  ;;  %v5470_v49 = vpack.c.bf16 %v1931_v62, %v1927_v42  ;;  %v1932_v48 = vld [vmem:[#allocation3 + $0x130] sm:$0xff] }
 0x250   : > { %2288 = vrot.lane.b32.xlu1 %v5819_v44, %s9511_s27  ;;  %1701 = vst [vmem:[#allocation3 + $0x148] sm:$0xf] %v1693_v3  ;;  %v5502_v2 = vpack.c.bf16 %v1932_v48, %v1928_v37  ;;  %s9867_s27 = smov 45  }
 0x251   : > { %v1688_v18 = vpop.permute.xlu0 %1687  ;;  %5471 = vmatprep.subr.bf16.mxu0 %v5470_v49 }
 0x252   : > { %v1690_v47 = vpop.permute.xlu1 %1689  ;;  %v1694_v57 = vsel %vm9489_vm3, %v1686_v36, %v1688_v18  ;;  %5473 = vmatpush1.bf16.msra.mxu0 %v5472_v53  ;;  %v1933_v56 = vld [vmem:[#allocation3 + $0x138] sm:$0xff] }
 0x253   : > { %v1695_v7 = vsel %vm9489_vm3, %v1688_v18, %v1690_v47  ;;  %1702 = vst [vmem:[#allocation3 + $0x150] sm:$0xf] %v1694_v57  ;;  %2310 = vrot.lane.b32.xlu0 %v7991_v23, %s9509_s21  ;;  %v5500_v17 = vpack.c.bf16 %v1933_v56, %v1929_v55  ;;  %vm9491_vm3 = vcmask 367616  }
 0x254   : > { %2312 = vrot.lane.b32.xlu1 %v8028_v58, %s9509_s21  ;;  %1703 = vst [vmem:[#allocation3 + $0x158] sm:$0xf] %v1695_v7 }
 0x255   : > { %5501 = vmatprep.subr.bf16.mxu1 %v5500_v17  ;;  %v1714_v40 = vpop.permute.xlu0 %1713 }
 0x256   : > { %v1716_v63 = vpop.permute.xlu1 %1715  ;;  %5503 = vmatpush1.bf16.msra.mxu1 %v5502_v2 }
 0x257   : > { %v1724_v43 = vsel %vm9490_vm10, %v1714_v40, %v1716_v63  ;;  %2314 = vrot.lane.b32.xlu0 %v8006_v54, %s9509_s21 }
 0x258   : > { %2316 = vrot.lane.b32.xlu1 %v8038_v60, %s9509_s21  ;;  %1732 = vst [vmem:[#allocation3 + $0x140] sm:$0xf0] %v1724_v43 }
 0x259   : > { %v1718_v8 = vpop.permute.xlu0 %1717 }
 0x25a   : > { %v1720_v11 = vpop.permute.xlu1 %1719  ;;  %v1725_v12 = vsel %vm9490_vm10, %v1716_v63, %v1718_v8 }
 0x25b   : > { %v1726_v35 = vsel %vm9490_vm10, %v1718_v8, %v1720_v11  ;;  %1733 = vst [vmem:[#allocation3 + $0x148] sm:$0xf0] %v1725_v12  ;;  %2318 = vrot.lane.b32.xlu0 %v2304_v20, %s9509_s21  ;;  %s9866_s21 = smov 46  }
 0x25c   : > { %2341 = vrot.lane.b32.xlu1 %v8001_v45, %s9507_s14  ;;  %1734 = vst [vmem:[#allocation3 + $0x150] sm:$0xf0] %v1726_v35 }
 0x25d   : > { %v1722_v52 = vpop.permute.xlu0 %1721 }
 0x25e   : > { %v1745_v9 = vpop.permute.xlu1 %1744  ;;  %v1727_v51 = vsel %vm9490_vm10, %v1720_v11, %v1722_v52  ;;  %vm9492_vm10 = vcmask 359424   ;;  %v2426_v11 = vld [vmem:[#allocation2 + $0x20] sm:$0xf] }
 0x25f   : > { %1735 = vst [vmem:[#allocation3 + $0x158] sm:$0xf0] %v1727_v51  ;;  %2343 = vrot.lane.b32.xlu0 %v7991_v23, %s9507_s14  ;;  %v1934_v42 = vld [vmem:[#allocation3 + $0x140] sm:$0xff] }
 0x260   : > { %2345 = vrot.lane.b32.xlu1 %v8014_v6, %s9507_s14 }
 0x261   : > { %v1747_v25 = vpop.permute.xlu0 %1746 }
 0x262   : > { %v1749_v1 = vpop.permute.xlu1 %1748  ;;  %v1755_v15 = vsel %vm9491_vm3, %v1745_v9, %v1747_v25  ;;  %v1935_v5 = vld [vmem:[#allocation3 + $0x148] sm:$0xff]  ;;  %v5822_v9 = vld [vmem:[#allocation2 + $0x20] ss:$0 sps:$4 sm:$0xff]  }
 0x263   : > { %v1756_v24 = vsel %vm9491_vm3, %v1747_v25, %v1749_v1  ;;  %1763 = vst [vmem:[#allocation3 + $0x160] sm:$0xf] %v1755_v15  ;;  %2347 = vrot.lane.b32.xlu0 %v8006_v54, %s9507_s14  ;;  %v1936_v55 = vld [vmem:[#allocation3 + $0x150] sm:$0xff] }
 0x264   : > { %2349 = vrot.lane.b32.xlu1 %v5820_v13, %s9507_s14  ;;  %1764 = vst [vmem:[#allocation3 + $0x168] sm:$0xf] %v1756_v24  ;;  %s9865_s14 = smov 54  }
 0x265   : > { %v1751_v27 = vpop.permute.xlu0 %1750 }
 0x266   : > { %v1753_v38 = vpop.permute.xlu1 %1752  ;;  %v1757_v61 = vsel %vm9491_vm3, %v1749_v1, %v1751_v27  ;;  %v1937_v18 = vld [vmem:[#allocation3 + $0x158] sm:$0xff] }
 0x267   : > { %v1758_v14 = vsel %vm9491_vm3, %v1751_v27, %v1753_v38  ;;  %1765 = vst [vmem:[#allocation3 + $0x170] sm:$0xf] %v1757_v61  ;;  %2371 = vrot.lane.b32.xlu0 %v7991_v23, %s9505_s17  ;;  %vm9493_vm3 = vcmask 293888  }
 0x268   : > { %2373 = vrot.lane.b32.xlu1 %v8028_v58, %s9505_s17  ;;  %1766 = vst [vmem:[#allocation3 + $0x178] sm:$0xf] %v1758_v14 }
 0x269   : > { %v1777_v59 = vpop.permute.xlu0 %1776 }
 0x26a   : > { %v1779_v29 = vpop.permute.xlu1 %1778 }
 0x26b   : > { %v1787_v46 = vsel %vm9492_vm10, %v1777_v59, %v1779_v29  ;;  %2375 = vrot.lane.b32.xlu0 %v8006_v54, %s9505_s17 }
 0x26c   : > { %2377 = vrot.lane.b32.xlu1 %v8038_v60, %s9505_s17  ;;  %1795 = vst [vmem:[#allocation3 + $0x160] sm:$0xf0] %v1787_v46 }
 0x26d   : > { %v1781_v31 = vpop.permute.xlu0 %1780 }
 0x26e   : > { %v1783_v39 = vpop.permute.xlu1 %1782  ;;  %v1788_v50 = vsel %vm9492_vm10, %v1779_v29, %v1781_v31 }
 0x26f   : > { %v1789_v28 = vsel %vm9492_vm10, %v1781_v31, %v1783_v39  ;;  %1796 = vst [vmem:[#allocation3 + $0x168] sm:$0xf0] %v1788_v50  ;;  %2379 = vrot.lane.b32.xlu0 %v2365_v4, %s9505_s17  ;;  %v2487_v50 = vld [vmem:[#allocation2 + $0x20] sm:$0xf]  ;;  %s9864_s17 = smov 55  }
 0x270   : > { %2402 = vrot.lane.b32.xlu1 %v8001_v45, %s9503_s28  ;;  %1797 = vst [vmem:[#allocation3 + $0x170] sm:$0xf0] %v1789_v28  ;;  %v1893_v28 = vld [vmem:[%s9439_s5] sm:$0x3] }
 0x271   : > { %v1785_v33 = vpop.permute.xlu0 %1784 }
 0x272   : > { %v1808_v10 = vpop.permute.xlu1 %1807  ;;  %v1790_v30 = vsel %vm9492_vm10, %v1783_v39, %v1785_v33  ;;  %vm9494_vm10 = vcmask 285696  }
 0x273   : > { %1798 = vst [vmem:[#allocation3 + $0x178] sm:$0xf0] %v1790_v30  ;;  %2404 = vrot.lane.b32.xlu0 %v7991_v23, %s9503_s28  ;;  %v1938_v32 = vld [vmem:[#allocation3 + $0x160] sm:$0xff] }
 0x274   : > { %2406 = vrot.lane.b32.xlu1 %v8014_v6, %s9503_s28  ;;  %v5476_v62 = vpack.c.bf16 %v1938_v32, %v1934_v42 }
 0x275   : > { %v1810_v0 = vpop.permute.xlu0 %1809 }
 0x276   : > { %v1812_v16 = vpop.permute.xlu1 %1811  ;;  %v1818_v36 = vsel %vm9493_vm3, %v1808_v10, %v1810_v0  ;;  %v1939_v41 = vld [vmem:[#allocation3 + $0x168] sm:$0xff] }
 0x277   : > { %v1819_v44 = vsel %vm9493_vm3, %v1810_v0, %v1812_v16  ;;  %1826 = vst [vmem:[#allocation3 + $0x180] sm:$0xf] %v1818_v36  ;;  %2408 = vrot.lane.b32.xlu0 %v8006_v54, %s9503_s28  ;;  %v5474_v3 = vpack.c.bf16 %v1939_v41, %v1935_v5  ;;  %v1940_v49 = vld [vmem:[#allocation3 + $0x170] sm:$0xff]  ;;  %v5823_v36 = vld [vmem:[#allocation2 + $0x20] ss:$0 sps:$4 sm:$0xff]  }
 0x278   : > { %2410 = vrot.lane.b32.xlu1 %v5821_v26, %s9503_s28  ;;  %1827 = vst [vmem:[#allocation3 + $0x188] sm:$0xf] %v1819_v44  ;;  %v5506_v56 = vpack.c.bf16 %v1940_v49, %v1936_v55  ;;  %s9863_s28 = smov 56  }
 0x279   : > { %v1814_v47 = vpop.permute.xlu0 %1813  ;;  %5475 = vmatprep.subr.bf16.mxu0 %v5474_v3 }
 0x27a   : > { %v1816_v19 = vpop.permute.xlu1 %1815  ;;  %v1820_v22 = vsel %vm9493_vm3, %v1812_v16, %v1814_v47  ;;  %5477 = vmatpush1.bf16.msra.mxu0 %v5476_v62  ;;  %v1941_v48 = vld [vmem:[#allocation3 + $0x178] sm:$0xff] }
 0x27b   : > { %v1821_v53 = vsel %vm9493_vm3, %v1814_v47, %v1816_v19  ;;  %1828 = vst [vmem:[#allocation3 + $0x190] sm:$0xf] %v1820_v22  ;;  %2432 = vrot.lane.b32.xlu0 %v7991_v23, %s9501_s24  ;;  %v5504_v7 = vpack.c.bf16 %v1941_v48, %v1937_v18  ;;  %vm1880_vm3 = vcmask 277504   ;;  %v2548_v48 = vld [vmem:[#allocation2 + $0x20] sm:$0xf] }
 0x27c   : > { %2434 = vrot.lane.b32.xlu1 %v8028_v58, %s9501_s24  ;;  %1829 = vst [vmem:[#allocation3 + $0x198] sm:$0xf] %v1821_v53  ;;  %v8217_v53 = vld [vmem:[#allocation2 + $0x20] sm:$0xff] }
 0x27d   : > { %5505 = vmatprep.subr.bf16.mxu1 %v5504_v7  ;;  %v1840_v63 = vpop.permute.xlu0 %1839 }
 0x27e   : > { %v1842_v57 = vpop.permute.xlu1 %1841  ;;  %5507 = vmatpush1.bf16.msra.mxu1 %v5506_v56 }
 0x27f   : > { %v1850_v17 = vsel %vm9494_vm10, %v1840_v63, %v1842_v57  ;;  %2436 = vrot.lane.b32.xlu0 %v8006_v54, %s9501_s24 }
 0x280   : > { %2438 = vrot.lane.b32.xlu1 %v8038_v60, %s9501_s24  ;;  %1858 = vst [vmem:[#allocation3 + $0x180] sm:$0xf0] %v1850_v17  ;;  %v8227_v17 = vld [vmem:[#allocation2 + $0x28] sm:$0xff] }
 0x281   : > { %v1844_v2 = vpop.permute.xlu0 %1843 }
 0x282   : > { %v1846_v37 = vpop.permute.xlu1 %1845  ;;  %v1851_v40 = vsel %vm9494_vm10, %v1842_v57, %v1844_v2  ;;  %v8223_v57 = vcombine.high %v8217_v53, %v8217_v53 }
 0x283   : > { %v1852_v43 = vsel %vm9494_vm10, %v1844_v2, %v1846_v37  ;;  %1859 = vst [vmem:[#allocation3 + $0x188] sm:$0xf0] %v1851_v40  ;;  %2440 = vrot.lane.b32.xlu0 %v2426_v11, %s9501_s24  ;;  %v8235_v2 = vcombine.high %v8227_v17, %v8227_v17  ;;  %s9862_s24 = smov 6  }
 0x284   : > { %2463 = vrot.lane.b32.xlu1 %v8001_v45, %s9497_s11  ;;  %1860 = vst [vmem:[#allocation3 + $0x190] sm:$0xf0] %v1852_v43 }
 0x285   : > { %v1848_v12 = vpop.permute.xlu0 %1847 }
 0x286   : > { %v1871_v8 = vpop.permute.xlu1 %1870  ;;  %v1853_v35 = vsel %vm9494_vm10, %v1846_v37, %v1848_v12  ;;  %vm1959_vm10 = vcmask 1043456  }
 0x287   : > { %1861 = vst [vmem:[#allocation3 + $0x198] sm:$0xf0] %v1853_v35  ;;  %2465 = vrot.lane.b32.xlu0 %v7991_v23, %s9497_s11  ;;  %vm8172_vm15 = vmpackc.low %vm1959_vm10, %vm6085_vm1  ;;  %v1942_v61 = vld [vmem:[#allocation3 + $0x180] sm:$0xff]  ;;  %vm9871_vm1 = vcmask 138240  }
 0x288   : > { %2467 = vrot.lane.b32.xlu1 %v8014_v6, %s9497_s11  ;;  %vm9872_vm10 = vmmov %vm9871_vm1 }
 0x289   : > { %v1873_v52 = vpop.permute.xlu0 %1872 }
 0x28a   : > { %v1875_v20 = vpop.permute.xlu1 %1874  ;;  %v1881_v51 = vsel %vm1880_vm3, %v1871_v8, %v1873_v52  ;;  %v1943_v14 = vld [vmem:[#allocation3 + $0x188] sm:$0xff]  ;;  %v5824_v8 = vld [vmem:[#allocation2 + $0x20] ss:$0 sps:$4 sm:$0xff]  }
 0x28b   : > { %v1882_v1 = vsel %vm1880_vm3, %v1873_v52, %v1875_v20  ;;  %1889 = vst [vmem:[#allocation3 + $0x1a0] sm:$0xf] %v1881_v51  ;;  %2469 = vrot.lane.b32.xlu0 %v8006_v54, %s9497_s11  ;;  %v1944_v4 = vld [vmem:[#allocation3 + $0x190] sm:$0xff] }
 0x28c   : > { %2471 = vrot.lane.b32.xlu1 %v5822_v9, %s9497_s11  ;;  %1890 = vst [vmem:[#allocation3 + $0x1a8] sm:$0xf] %v1882_v1  ;;  %s9859_s11 = smov 16  }
 0x28d   : > { %v1877_v25 = vpop.permute.xlu0 %1876 }
 0x28e   : > { %v1879_v13 = vpop.permute.xlu1 %1878  ;;  %v1883_v15 = vsel %vm1880_vm3, %v1875_v20, %v1877_v25  ;;  %v1945_v10 = vld [vmem:[#allocation3 + $0x198] sm:$0xff] }
 0x28f   : > { %v1884_v24 = vsel %vm1880_vm3, %v1877_v25, %v1879_v13  ;;  %1891 = vst [vmem:[#allocation3 + $0x1b0] sm:$0xf] %v1883_v15  ;;  %2493 = vrot.lane.b32.xlu0 %v7991_v23, %s9499_s23 }
 0x290   : > { %2495 = vrot.lane.b32.xlu1 %v8028_v58, %s9499_s23  ;;  %1892 = vst [vmem:[#allocation3 + $0x1b8] sm:$0xf] %v1884_v24 }
 0x292   : > { %v2159_v38 = vpop.permute.xlu1 %2158  ;;  %v1946_v59 = vld [vmem:[#allocation3 + $0x1a0] sm:$0xf] }
 0x293   : > { %v1947_v29 = vld [vmem:[#allocation3 + $0x1a8] sm:$0xf]  ;;  %2497 = vrot.lane.b32.xlu0 %v8006_v54, %s9499_s23  ;;  %v5481_v31 = vpack.c.bf16 %v1946_v59, %v1942_v61 }
 0x294   : > { %2499 = vrot.lane.b32.xlu1 %v8038_v60, %s9499_s23  ;;  %v5478_v39 = vpack.c.bf16 %v1947_v29, %v1943_v14  ;;  %v2609_v14 = vld [vmem:[#allocation2 + $0x20] sm:$0xf] }
 0x296   : > { %v2163_v46 = vpop.permute.xlu1 %2162  ;;  %5480 = vmatprep.subr.msk.bf16.mxu0 %vm8172_vm15, %v5478_v39  ;;  %v1948_v30 = vld [vmem:[#allocation3 + $0x1b0] sm:$0xf] }
 0x297   : > { %5483 = vmatpush1.bf16.msk.msra.mxu0 %vm8172_vm15, %v5481_v31  ;;  %v1949_v33 = vld [vmem:[#allocation3 + $0x1b8] sm:$0xf]  ;;  %2501 = vrot.lane.b32.xlu0 %v2487_v50, %s9499_s23  ;;  %v5511_v0 = vpack.c.bf16 %v1948_v30, %v1944_v4  ;;  %s9861_s23 = smov 7  }
 0x298   : > { %2524 = vrot.lane.b32.xlu1 %v8001_v45, %s9858_s1  ;;  %v5508_v26 = vpack.c.bf16 %v1949_v33, %v1945_v10  ;;  %v5826_v10 = vld [vmem:[#allocation2 + $0x20] ss:$0 sps:$4 sm:$0xff]  }
 0x29a   : > { %v2167_v16 = vpop.permute.xlu1 %2166  ;;  %5426 = vmatmul.mubr.msk.f32.vlgmr.msra.gmra.mrb[0].mxu0 %vm1250_vm5, %v1893_v28  ;;  %5510 = vmatprep.subr.msk.bf16.mxu1 %vm8172_vm15, %v5508_v26 }
 0x29b   : > { %3084 = vmatprep.mubr.f32.mxu0 %v6084_v34  ;;  %5513 = vmatpush1.bf16.msk.msra.mxu1 %vm8172_vm15, %v5511_v0  ;;  %v8269_v0 = vld [vmem:[#allocation2 + $0x14] sm:$0xff] }
 0x29c   : > { %2528 = vrot.lane.b32.xlu1 %v8014_v6, %s9858_s1  ;;  %2526 = vrot.lane.b32.xlu0 %v7991_v23, %s9858_s1 }
 0x29e   : > { %v2191_v32 = vpop.permute.xlu1 %2190  ;;  %5429 = vmatmul.mubr.msk.f32.vlgmr.msra.gmra.mrb[0].mxu1 %vm1250_vm5, %v1893_v28  ;;  %v8200_v44 = vpop.permute.xlu0 %1953 }
 0x29f   : > { %3155 = vmatprep.mubr.f32.mxu1 %v6084_v34 }
 0x2a0   : > { %2532 = vrot.lane.b32.xlu1 %v5823_v36, %s9858_s1  ;;  %2530 = vrot.lane.b32.xlu0 %v8006_v54, %s9858_s1 }
 0x2a2   : > { %v2195_v5 = vpop.permute.xlu1 %2194  ;;  %v2161_v41 = vpop.permute.xlu0 %2160 }
 0x2a3   : > { %v2168_v19 = vsel %vm1093_vm8, %v2159_v38, %v2161_v41  ;;  %v2169_v3 = vsel %vm1093_vm8, %v2161_v41, %v2163_v46 }
 0x2a4   : > { %2556 = vrot.lane.b32.xlu1 %v8028_v58, %s9859_s11  ;;  %2554 = vrot.lane.b32.xlu0 %v7991_v23, %s9859_s11  ;;  %2176 = vst [vmem:[#allocation3] sm:$0xf0] %v2168_v19  ;;  %2177 = vst [vmem:[#allocation3 + $0x8] sm:$0xf0] %v2169_v3 }
 0x2a6   : > { %v2220_v42 = vpop.permute.xlu1 %2219  ;;  %v2165_v62 = vpop.permute.xlu0 %2164 }
 0x2a7   : > { %v2170_v47 = vsel %vm1093_vm8, %v2163_v46, %v2165_v62  ;;  %v2171_v49 = vsel %vm1093_vm8, %v2165_v62, %v2167_v16 }
 0x2a8   : > { %2560 = vrot.lane.b32.xlu1 %v8038_v60, %s9859_s11  ;;  %2558 = vrot.lane.b32.xlu0 %v8006_v54, %s9859_s11  ;;  %2178 = vst [vmem:[#allocation3 + $0x10] sm:$0xf0] %v2170_v47  ;;  %2179 = vst [vmem:[#allocation3 + $0x18] sm:$0xf0] %v2171_v49 }
 0x2aa   : > { %v2224_v22 = vpop.permute.xlu1 %2223  ;;  %v2189_v18 = vpop.permute.xlu0 %2188 }
 0x2ab   : > { %v2198_v7 = vsel %vm1124_vm6, %v2189_v18, %v2191_v32  ;;  %v2944_v56 = vld [vmem:[#allocation3 + $0x8] sm:$0xff]  ;;  %v2943_v63 = vld [vmem:[#allocation3] sm:$0xff]  ;;  %v8299_v18 = vcombine.low %v8269_v0, %v8269_v0 }
 0x2ac   : > { %2585 = vrot.lane.b32.xlu1 %v8001_v45, %s9860_s16  ;;  %2562 = vrot.lane.b32.xlu0 %v2548_v48, %s9859_s11  ;;  %2206 = vst [vmem:[#allocation3 + $0x20] sm:$0xf] %v2198_v7  ;;  %3194 = vst [vmem:[#allocation3 + $0x8] sm:$0xf] %v8223_v57  ;;  %v2670_v7 = vld [vmem:[#allocation2 + $0x24] sm:$0xf] }
 0x2ad   : > { %3193 = vst [vmem:[#allocation3] sm:$0xf] %v8217_v53 }
 0x2ae   : > { %v2228_v55 = vpop.permute.xlu1 %2227  ;;  %v2193_v37 = vpop.permute.xlu0 %2192 }
 0x2af   : > { %v2199_v40 = vsel %vm1124_vm6, %v2191_v32, %v2193_v37  ;;  %v2200_v43 = vsel %vm1124_vm6, %v2193_v37, %v2195_v5  ;;  %v2946_v12 = vld [vmem:[#allocation3 + $0x18] sm:$0xff]  ;;  %v2945_v35 = vld [vmem:[#allocation3 + $0x10] sm:$0xff] }
 0x2b0   : > { %2589 = vrot.lane.b32.xlu1 %v8014_v6, %s9860_s16  ;;  %2587 = vrot.lane.b32.xlu0 %v7991_v23, %s9860_s16  ;;  %2207 = vst [vmem:[#allocation3 + $0x28] sm:$0xf] %v2199_v40  ;;  %2208 = vst [vmem:[#allocation3 + $0x30] sm:$0xf] %v2200_v43 }
 0x2b1   : > { %3196 = vst [vmem:[#allocation3 + $0x18] sm:$0xf] %v8235_v2  ;;  %3195 = vst [vmem:[#allocation3 + $0x10] sm:$0xf] %v8227_v17 }
 0x2b2   : > { %v2252_v11 = vpop.permute.xlu1 %2251  ;;  %v2197_v20 = vpop.permute.xlu0 %2196 }
 0x2b3   : > { %v2201_v9 = vsel %vm1124_vm6, %v2195_v5, %v2197_v20  ;;  %v8279_v5 = vld [vmem:[#allocation2 + $0x1c] sm:$0xff] }
 0x2b4   : > { %2593 = vrot.lane.b32.xlu1 %v5824_v8, %s9860_s16  ;;  %2591 = vrot.lane.b32.xlu0 %v8006_v54, %s9860_s16  ;;  %2209 = vst [vmem:[#allocation3 + $0x38] sm:$0xf] %v2201_v9  ;;  %v5832_v8 = vld [vmem:[#allocation2 + $0x24] ss:$0 sps:$4 sm:$0xff]  }
 0x2b6   : > { %v2256_v52 = vpop.permute.xlu1 %2255  ;;  %v2222_v51 = vpop.permute.xlu0 %2221 }
 0x2b7   : > { %v2229_v1 = vsel %vm1156_vm13, %v2220_v42, %v2222_v51  ;;  %v2230_v13 = vsel %vm1156_vm13, %v2222_v51, %v2224_v22 }
 0x2b8   : > { %2617 = vrot.lane.b32.xlu1 %v8028_v58, %s9861_s23  ;;  %2615 = vrot.lane.b32.xlu0 %v7991_v23, %s9861_s23  ;;  %2237 = vst [vmem:[#allocation3 + $0x20] sm:$0xf0] %v2229_v1  ;;  %2238 = vst [vmem:[#allocation3 + $0x28] sm:$0xf0] %v2230_v13 }
 0x2ba   : > { %v2281_v25 = vpop.permute.xlu1 %2280  ;;  %v2226_v15 = vpop.permute.xlu0 %2225 }
 0x2bb   : > { %v2231_v24 = vsel %vm1156_vm13, %v2224_v22, %v2226_v15  ;;  %v2232_v38 = vsel %vm1156_vm13, %v2226_v15, %v2228_v55 }
 0x2bc   : > { %2621 = vrot.lane.b32.xlu1 %v8038_v60, %s9861_s23  ;;  %2619 = vrot.lane.b32.xlu0 %v8006_v54, %s9861_s23  ;;  %2239 = vst [vmem:[#allocation3 + $0x30] sm:$0xf0] %v2231_v24  ;;  %2240 = vst [vmem:[#allocation3 + $0x38] sm:$0xf0] %v2232_v38 }
 0x2be   : > { %v2285_v58 = vpop.permute.xlu1 %2284  ;;  %v2250_v61 = vpop.permute.xlu0 %2249 }
 0x2bf   : > { %v2259_v29 = vsel %vm1187_vm9, %v2250_v61, %v2252_v11  ;;  %v2948_v60 = vld [vmem:[#allocation3 + $0x28] sm:$0xff]  ;;  %v2947_v46 = vld [vmem:[#allocation3 + $0x20] sm:$0xff] }
 0x2c0   : > { %2646 = vrot.lane.b32.xlu1 %v8001_v45, %s9862_s24  ;;  %2623 = vrot.lane.b32.xlu0 %v2609_v14, %s9861_s23  ;;  %2267 = vst [vmem:[#allocation3 + $0x40] sm:$0xf] %v2259_v29  ;;  %v5514_v39 = vpack.c.bf16 %v2948_v60, %v2944_v56  ;;  %v5516_v31 = vpack.c.bf16 %v2947_v46, %v2943_v63 }
 0x2c1   : > { %v8307_v63 = vcombine.low %v8279_v5, %v8279_v5 }
 0x2c2   : > { %v2289_v59 = vpop.permute.xlu1 %2288  ;;  %v2254_v50 = vpop.permute.xlu0 %2253  ;;  %5515 = vmatprep.subr.bf16.mxu0 %v5514_v39 }
 0x2c3   : > { %v2260_v28 = vsel %vm1187_vm9, %v2252_v11, %v2254_v50  ;;  %v2261_v45 = vsel %vm1187_vm9, %v2254_v50, %v2256_v52  ;;  %5517 = vmatpush1.bf16.msra.mxu0 %v5516_v31  ;;  %v2950_v33 = vld [vmem:[#allocation3 + $0x38] sm:$0xff]  ;;  %v2949_v30 = vld [vmem:[#allocation3 + $0x30] sm:$0xff] }
 0x2c4   : > { %2650 = vrot.lane.b32.xlu1 %v8014_v6, %s9862_s24  ;;  %2648 = vrot.lane.b32.xlu0 %v7991_v23, %s9862_s24  ;;  %2268 = vst [vmem:[#allocation3 + $0x48] sm:$0xf] %v2260_v28  ;;  %2269 = vst [vmem:[#allocation3 + $0x50] sm:$0xf] %v2261_v45  ;;  %v5544_v16 = vpack.c.bf16 %v2950_v33, %v2946_v12  ;;  %v5546_v26 = vpack.c.bf16 %v2949_v30, %v2945_v35  ;;  %v5833_v28 = vld [vmem:[#allocation2 + $0x24] ss:$0 sps:$4 sm:$0xff]  }
 0x2c5   : > { %v8277_v23 = vcombine.high %v8269_v0, %v8269_v0 }
 0x2c6   : > { %v2313_v4 = vpop.permute.xlu1 %2312  ;;  %5545 = vmatprep.subr.bf16.mxu1 %v5544_v16  ;;  %v2258_v6 = vpop.permute.xlu0 %2257 }
 0x2c7   : > { %v2262_v32 = vsel %vm1187_vm9, %v2256_v52, %v2258_v6  ;;  %5547 = vmatpush1.bf16.msra.mxu1 %v5546_v26 }
 0x2c8   : > { %2654 = vrot.lane.b32.xlu1 %v5826_v10, %s9862_s24  ;;  %2652 = vrot.lane.b32.xlu0 %v8006_v54, %s9862_s24  ;;  %2270 = vst [vmem:[#allocation3 + $0x58] sm:$0xf] %v2262_v32  ;;  %v8289_v54 = vcombine.high %v8279_v5, %v8279_v5 }
 0x2ca   : > { %v2317_v36 = vpop.permute.xlu1 %2316  ;;  %v2283_v41 = vpop.permute.xlu0 %2282 }
 0x2cb   : > { %v2290_v19 = vsel %vm1219_vm7, %v2281_v25, %v2283_v41  ;;  %v2291_v3 = vsel %vm1219_vm7, %v2283_v41, %v2285_v58 }
 0x2cc   : > { %2678 = vrot.lane.b32.xlu1 %v8277_v23, %s9863_s28  ;;  %2676 = vrot.lane.b32.xlu0 %v8269_v0, %s9863_s28  ;;  %2298 = vst [vmem:[#allocation3 + $0x40] sm:$0xf0] %v2290_v19  ;;  %2299 = vst [vmem:[#allocation3 + $0x48] sm:$0xf0] %v2291_v3 }
 0x2ce   : > { %v2342_v42 = vpop.permute.xlu1 %2341  ;;  %v2287_v62 = vpop.permute.xlu0 %2286 }
 0x2cf   : > { %v2292_v47 = vsel %vm1219_vm7, %v2285_v58, %v2287_v62  ;;  %v2293_v49 = vsel %vm1219_vm7, %v2287_v62, %v2289_v59  ;;  %v2731_v58 = vld [vmem:[#allocation2 + $0x24] sm:$0xf] }
 0x2d0   : > { %2682 = vrot.lane.b32.xlu1 %v8289_v54, %s9863_s28  ;;  %2680 = vrot.lane.b32.xlu0 %v8279_v5, %s9863_s28  ;;  %2300 = vst [vmem:[#allocation3 + $0x50] sm:$0xf0] %v2292_v47  ;;  %2301 = vst [vmem:[#allocation3 + $0x58] sm:$0xf0] %v2293_v49 }
 0x2d2   : > { %v2346_v22 = vpop.permute.xlu1 %2345  ;;  %v2311_v48 = vpop.permute.xlu0 %2310 }
 0x2d3   : > { %v2320_v55 = vsel %vm1250_vm5, %v2311_v48, %v2313_v4  ;;  %v2952_v61 = vld [vmem:[#allocation3 + $0x48] sm:$0xff]  ;;  %v2951_v60 = vld [vmem:[#allocation3 + $0x40] sm:$0xff] }
 0x2d4   : > { %2707 = vrot.lane.b32.xlu1 %v8299_v18, %s9864_s17  ;;  %2684 = vrot.lane.b32.xlu0 %v2670_v7, %s9863_s28  ;;  %2328 = vst [vmem:[#allocation3 + $0x60] sm:$0xf] %v2320_v55 }
 0x2d6   : > { %v2350_v56 = vpop.permute.xlu1 %2349  ;;  %v2315_v37 = vpop.permute.xlu0 %2314 }
 0x2d7   : > { %v2321_v40 = vsel %vm1250_vm5, %v2313_v4, %v2315_v37  ;;  %v2322_v43 = vsel %vm1250_vm5, %v2315_v37, %v2317_v36  ;;  %v2954_v45 = vld [vmem:[#allocation3 + $0x58] sm:$0xff]  ;;  %v2953_v16 = vld [vmem:[#allocation3 + $0x50] sm:$0xff] }
 0x2d8   : > { %2711 = vrot.lane.b32.xlu1 %v8307_v63, %s9864_s17  ;;  %2709 = vrot.lane.b32.xlu0 %v8269_v0, %s9864_s17  ;;  %2329 = vst [vmem:[#allocation3 + $0x68] sm:$0xf] %v2321_v40  ;;  %2330 = vst [vmem:[#allocation3 + $0x70] sm:$0xf] %v2322_v43 }
 0x2da   : > { %v2374_v11 = vpop.permute.xlu1 %2373  ;;  %v2319_v12 = vpop.permute.xlu0 %2318 }
 0x2db   : > { %v2323_v35 = vsel %vm1250_vm5, %v2317_v36, %v2319_v12 }
 0x2dc   : > { %2715 = vrot.lane.b32.xlu1 %v5832_v8, %s9864_s17  ;;  %2713 = vrot.lane.b32.xlu0 %v8279_v5, %s9864_s17  ;;  %2331 = vst [vmem:[#allocation3 + $0x78] sm:$0xf] %v2323_v35  ;;  %v5834_v35 = vld [vmem:[#allocation2 + $0x24] ss:$0 sps:$4 sm:$0xff]  }
 0x2de   : > { %v2378_v20 = vpop.permute.xlu1 %2377  ;;  %v2344_v9 = vpop.permute.xlu0 %2343 }
 0x2df   : > { %v2351_v52 = vsel %vm1282_vm11, %v2342_v42, %v2344_v9  ;;  %v2352_v51 = vsel %vm1282_vm11, %v2344_v9, %v2346_v22 }
 0x2e0   : > { %2739 = vrot.lane.b32.xlu1 %v8277_v23, %s9865_s14  ;;  %2737 = vrot.lane.b32.xlu0 %v8269_v0, %s9865_s14  ;;  %2359 = vst [vmem:[#allocation3 + $0x60] sm:$0xf0] %v2351_v52  ;;  %2360 = vst [vmem:[#allocation3 + $0x68] sm:$0xf0] %v2352_v51 }
 0x2e2   : > { %v2403_v1 = vpop.permute.xlu1 %2402  ;;  %v2348_v13 = vpop.permute.xlu0 %2347 }
 0x2e3   : > { %v2353_v25 = vsel %vm1282_vm11, %v2346_v22, %v2348_v13  ;;  %v2354_v15 = vsel %vm1282_vm11, %v2348_v13, %v2350_v56  ;;  %v2792_v56 = vld [vmem:[#allocation2 + $0x24] sm:$0xf] }
 0x2e4   : > { %2743 = vrot.lane.b32.xlu1 %v8289_v54, %s9865_s14  ;;  %2741 = vrot.lane.b32.xlu0 %v8279_v5, %s9865_s14  ;;  %2361 = vst [vmem:[#allocation3 + $0x70] sm:$0xf0] %v2353_v25  ;;  %2362 = vst [vmem:[#allocation3 + $0x78] sm:$0xf0] %v2354_v15 }
 0x2e6   : > { %v2407_v24 = vpop.permute.xlu1 %2406  ;;  %v2372_v38 = vpop.permute.xlu0 %2371 }
 0x2e7   : > { %v2381_v14 = vsel %vm1313_vm2, %v2372_v38, %v2374_v11  ;;  %v2956_v59 = vld [vmem:[#allocation3 + $0x68] sm:$0xff]  ;;  %v2955_v46 = vld [vmem:[#allocation3 + $0x60] sm:$0xff] }
 0x2e8   : > { %2768 = vrot.lane.b32.xlu1 %v8299_v18, %s9866_s21  ;;  %2745 = vrot.lane.b32.xlu0 %v2731_v58, %s9865_s14  ;;  %2389 = vst [vmem:[#allocation3 + $0x80] sm:$0xf] %v2381_v14  ;;  %v5518_v39 = vpack.c.bf16 %v2956_v59, %v2952_v61  ;;  %v5520_v31 = vpack.c.bf16 %v2955_v46, %v2951_v60  ;;  %v2853_v14 = vld [vmem:[#allocation2 + $0x24] sm:$0xf] }
 0x2ea   : > { %v2411_v29 = vpop.permute.xlu1 %2410  ;;  %v2376_v50 = vpop.permute.xlu0 %2375  ;;  %5519 = vmatprep.subr.bf16.mxu0 %v5518_v39 }
 0x2eb   : > { %v2382_v4 = vsel %vm1313_vm2, %v2374_v11, %v2376_v50  ;;  %v2383_v10 = vsel %vm1313_vm2, %v2376_v50, %v2378_v20  ;;  %5521 = vmatpush1.bf16.msra.mxu0 %v5520_v31  ;;  %v2958_v30 = vld [vmem:[#allocation3 + $0x78] sm:$0xff]  ;;  %v2957_v26 = vld [vmem:[#allocation3 + $0x70] sm:$0xff] }
 0x2ec   : > { %2772 = vrot.lane.b32.xlu1 %v8307_v63, %s9866_s21  ;;  %2770 = vrot.lane.b32.xlu0 %v8269_v0, %s9866_s21  ;;  %2390 = vst [vmem:[#allocation3 + $0x88] sm:$0xf] %v2382_v4  ;;  %2391 = vst [vmem:[#allocation3 + $0x90] sm:$0xf] %v2383_v10  ;;  %v5548_v6 = vpack.c.bf16 %v2958_v30, %v2954_v45  ;;  %v5550_v32 = vpack.c.bf16 %v2957_v26, %v2953_v16 }
 0x2ee   : > { %v2435_v33 = vpop.permute.xlu1 %2434  ;;  %5549 = vmatprep.subr.bf16.mxu1 %v5548_v6  ;;  %v2380_v36 = vpop.permute.xlu0 %2379 }
 0x2ef   : > { %v2384_v41 = vsel %vm1313_vm2, %v2378_v20, %v2380_v36  ;;  %5551 = vmatpush1.bf16.msra.mxu1 %v5550_v32 }
 0x2f0   : > { %2776 = vrot.lane.b32.xlu1 %v5833_v28, %s9866_s21  ;;  %2774 = vrot.lane.b32.xlu0 %v8279_v5, %s9866_s21  ;;  %2392 = vst [vmem:[#allocation3 + $0x98] sm:$0xf] %v2384_v41 }
 0x2f2   : > { %v2439_v19 = vpop.permute.xlu1 %2438  ;;  %v2405_v3 = vpop.permute.xlu0 %2404 }
 0x2f3   : > { %v2412_v42 = vsel %vm1345_vm0, %v2403_v1, %v2405_v3  ;;  %v2413_v62 = vsel %vm1345_vm0, %v2405_v3, %v2407_v24 }
 0x2f4   : > { %2800 = vrot.lane.b32.xlu1 %v8277_v23, %s9867_s27  ;;  %2798 = vrot.lane.b32.xlu0 %v8269_v0, %s9867_s27  ;;  %2420 = vst [vmem:[#allocation3 + $0x80] sm:$0xf0] %v2412_v42  ;;  %2421 = vst [vmem:[#allocation3 + $0x88] sm:$0xf0] %v2413_v62 }
 0x2f6   : > { %v2464_v47 = vpop.permute.xlu1 %2463  ;;  %v2409_v49 = vpop.permute.xlu0 %2408 }
 0x2f7   : > { %v2414_v22 = vsel %vm1345_vm0, %v2407_v24, %v2409_v49  ;;  %v2415_v48 = vsel %vm1345_vm0, %v2409_v49, %v2411_v29 }
 0x2f8   : > { %2804 = vrot.lane.b32.xlu1 %v8289_v54, %s9867_s27  ;;  %2802 = vrot.lane.b32.xlu0 %v8279_v5, %s9867_s27  ;;  %2422 = vst [vmem:[#allocation3 + $0x90] sm:$0xf0] %v2414_v22  ;;  %2423 = vst [vmem:[#allocation3 + $0x98] sm:$0xf0] %v2415_v48  ;;  %v2999_v22 = vld [vmem:[%s9440_s6] sm:$0x3] }
 0x2fa   : > { %v2468_v7 = vpop.permute.xlu1 %2467  ;;  %v2433_v55 = vpop.permute.xlu0 %2432 }
 0x2fb   : > { %v2442_v37 = vsel %vm1376_vm14, %v2433_v55, %v2435_v33  ;;  %v2960_v29 = vld [vmem:[#allocation3 + $0x88] sm:$0xff]  ;;  %v2959_v39 = vld [vmem:[#allocation3 + $0x80] sm:$0xff]  ;;  %v2914_v55 = vld [vmem:[#allocation2 + $0x24] sm:$0xf] }
 0x2fc   : > { %2829 = vrot.lane.b32.xlu1 %v8299_v18, %s9868_s22  ;;  %2806 = vrot.lane.b32.xlu0 %v2792_v56, %s9867_s27  ;;  %2450 = vst [vmem:[#allocation3 + $0xa0] sm:$0xf] %v2442_v37  ;;  %v8416_v37 = vcombine.low %v8217_v53, %v8217_v53 }
 0x2fe   : > { %v2472_v40 = vpop.permute.xlu1 %2471  ;;  %v2437_v43 = vpop.permute.xlu0 %2436 }
 0x2ff   : > { %v2443_v11 = vsel %vm1376_vm14, %v2435_v33, %v2437_v43  ;;  %v2444_v8 = vsel %vm1376_vm14, %v2437_v43, %v2439_v19  ;;  %v2962_v4 = vld [vmem:[#allocation3 + $0x98] sm:$0xff]  ;;  %v2961_v26 = vld [vmem:[#allocation3 + $0x90] sm:$0xff] }
 0x300   : > { %2833 = vrot.lane.b32.xlu1 %v8307_v63, %s9868_s22  ;;  %2831 = vrot.lane.b32.xlu0 %v8269_v0, %s9868_s22  ;;  %2451 = vst [vmem:[#allocation3 + $0xa8] sm:$0xf] %v2443_v11  ;;  %2452 = vst [vmem:[#allocation3 + $0xb0] sm:$0xf] %v2444_v8  ;;  %v8426_v8 = vcombine.low %v8227_v17, %v8227_v17 }
 0x302   : > { %v2496_v12 = vpop.permute.xlu1 %2495  ;;  %v2441_v20 = vpop.permute.xlu0 %2440 }
 0x303   : > { %v2445_v9 = vsel %vm1376_vm14, %v2439_v19, %v2441_v20 }
 0x304   : > { %2837 = vrot.lane.b32.xlu1 %v5834_v35, %s9868_s22  ;;  %2835 = vrot.lane.b32.xlu0 %v8279_v5, %s9868_s22  ;;  %2453 = vst [vmem:[#allocation3 + $0xb8] sm:$0xf] %v2445_v9  ;;  %v5838_v9 = vld [vmem:[#allocation2 + $0x30] ss:$0 sps:$4 sm:$0xff]  }
 0x306   : > { %v2500_v52 = vpop.permute.xlu1 %2499  ;;  %v2466_v51 = vpop.permute.xlu0 %2465 }
 0x307   : > { %v2473_v1 = vsel %vm9522_vm4, %v2464_v47, %v2466_v51  ;;  %v2474_v13 = vsel %vm9522_vm4, %v2466_v51, %v2468_v7 }
 0x308   : > { %2861 = vrot.lane.b32.xlu1 %v8277_v23, %s9869_s25  ;;  %2859 = vrot.lane.b32.xlu0 %v8269_v0, %s9869_s25  ;;  %2481 = vst [vmem:[#allocation3 + $0xa0] sm:$0xf0] %v2473_v1  ;;  %2482 = vst [vmem:[#allocation3 + $0xa8] sm:$0xf0] %v2474_v13 }
 0x30a   : > { %v2525_v25 = vpop.permute.xlu1 %2524  ;;  %v2470_v15 = vpop.permute.xlu0 %2469 }
 0x30b   : > { %v2475_v24 = vsel %vm9522_vm4, %v2468_v7, %v2470_v15  ;;  %v2476_v38 = vsel %vm9522_vm4, %v2470_v15, %v2472_v40  ;;  %vm9874_vm4 = vmmov %vm9871_vm1 }
 0x30c   : > { %2865 = vrot.lane.b32.xlu1 %v8289_v54, %s9869_s25  ;;  %2863 = vrot.lane.b32.xlu0 %v8279_v5, %s9869_s25  ;;  %2483 = vst [vmem:[#allocation3 + $0xb0] sm:$0xf0] %v2475_v24  ;;  %2484 = vst [vmem:[#allocation3 + $0xb8] sm:$0xf0] %v2476_v38 }
 0x30e   : > { %v2529_v58 = vpop.permute.xlu1 %2528  ;;  %v2494_v61 = vpop.permute.xlu0 %2493 }
 0x30f   : > { %v2503_v59 = vsel %vm9521_vm12, %v2494_v61, %v2496_v12  ;;  %v2964_v46 = vld [vmem:[#allocation3 + $0xa8] sm:$0xff]  ;;  %v2963_v31 = vld [vmem:[#allocation3 + $0xa0] sm:$0xff] }
 0x310   : > { %2890 = vrot.lane.b32.xlu1 %v8299_v18, %s9870_s15  ;;  %2867 = vrot.lane.b32.xlu0 %v2853_v14, %s9869_s25  ;;  %2511 = vst [vmem:[#allocation3 + $0xc0] sm:$0xf] %v2503_v59  ;;  %v5522_v50 = vpack.c.bf16 %v2964_v46, %v2960_v29  ;;  %v5524_v28 = vpack.c.bf16 %v2963_v31, %v2959_v39  ;;  %v5835_v18 = vld [vmem:[#allocation2 + $0x24] ss:$0 sps:$4 sm:$0xff]  }
 0x312   : > { %v2533_v60 = vpop.permute.xlu1 %2532  ;;  %v2498_v45 = vpop.permute.xlu0 %2497  ;;  %5523 = vmatprep.subr.bf16.mxu0 %v5522_v50 }
 0x313   : > { %v2504_v10 = vsel %vm9521_vm12, %v2496_v12, %v2498_v45  ;;  %v2505_v33 = vsel %vm9521_vm12, %v2498_v45, %v2500_v52  ;;  %5525 = vmatpush1.bf16.msra.mxu0 %v5524_v28  ;;  %v2966_v16 = vld [vmem:[#allocation3 + $0xb8] sm:$0xff]  ;;  %v2965_v6 = vld [vmem:[#allocation3 + $0xb0] sm:$0xff] }
 0x314   : > { %2894 = vrot.lane.b32.xlu1 %v8307_v63, %s9870_s15  ;;  %2892 = vrot.lane.b32.xlu0 %v8269_v0, %s9870_s15  ;;  %2512 = vst [vmem:[#allocation3 + $0xc8] sm:$0xf] %v2504_v10  ;;  %2513 = vst [vmem:[#allocation3 + $0xd0] sm:$0xf] %v2505_v33  ;;  %v5552_v32 = vpack.c.bf16 %v2966_v16, %v2962_v4  ;;  %v5554_v63 = vpack.c.bf16 %v2965_v6, %v2961_v26 }
 0x316   : > { %v2557_v30 = vpop.permute.xlu1 %2556  ;;  %5553 = vmatprep.subr.bf16.mxu1 %v5552_v32  ;;  %v2502_v36 = vpop.permute.xlu0 %2501 }
 0x317   : > { %v2506_v41 = vsel %vm9521_vm12, %v2500_v52, %v2502_v36  ;;  %5555 = vmatpush1.bf16.msra.mxu1 %v5554_v63  ;;  %vm9873_vm12 = vmmov %vm9871_vm1 }
 0x318   : > { %2898 = vrot.lane.b32.xlu1 %v5835_v18, %s9870_s15  ;;  %2896 = vrot.lane.b32.xlu0 %v8279_v5, %s9870_s15  ;;  %2514 = vst [vmem:[#allocation3 + $0xd8] sm:$0xf] %v2506_v41  ;;  %v5839_v41 = vld [vmem:[#allocation2 + $0x30] ss:$0 sps:$4 sm:$0xff]  }
 0x31a   : > { %v2561_v19 = vpop.permute.xlu1 %2560  ;;  %v2527_v3 = vpop.permute.xlu0 %2526 }
 0x31b   : > { %v2534_v42 = vsel %vm9871_vm1, %v2525_v25, %v2527_v3  ;;  %v2535_v62 = vsel %vm9872_vm10, %v2527_v3, %v2529_v58  ;;  %vm9875_vm1 = vcmask 130048  }
 0x31c   : > { %2922 = vrot.lane.b32.xlu1 %v8277_v23, %s9523_s26  ;;  %2920 = vrot.lane.b32.xlu0 %v8269_v0, %s9523_s26  ;;  %2542 = vst [vmem:[#allocation3 + $0xc0] sm:$0xf0] %v2534_v42  ;;  %2543 = vst [vmem:[#allocation3 + $0xc8] sm:$0xf0] %v2535_v62 }
 0x31d   : > { %vm9879_vm10 = vmmov %vm9875_vm1 }
 0x31e   : > { %v2586_v47 = vpop.permute.xlu1 %2585  ;;  %v2531_v49 = vpop.permute.xlu0 %2530 }
 0x31f   : > { %v2536_v23 = vsel %vm9873_vm12, %v2529_v58, %v2531_v49  ;;  %v2537_v48 = vsel %vm9874_vm4, %v2531_v49, %v2533_v60  ;;  %vm9877_vm4 = vmmov %vm9875_vm1  ;;  %v3230_v58 = vld [vmem:[#allocation2 + $0x30] sm:$0xf] }
 0x320   : > { %2926 = vrot.lane.b32.xlu1 %v8289_v54, %s9523_s26  ;;  %2924 = vrot.lane.b32.xlu0 %v8279_v5, %s9523_s26  ;;  %2544 = vst [vmem:[#allocation3 + $0xd0] sm:$0xf0] %v2536_v23  ;;  %2545 = vst [vmem:[#allocation3 + $0xd8] sm:$0xf0] %v2537_v48  ;;  %v3291_v48 = vld [vmem:[#allocation2 + $0x30] sm:$0xf] }
 0x321   : > { %vm9878_vm12 = vmmov %vm9875_vm1 }
 0x322   : > { %v2590_v7 = vpop.permute.xlu1 %2589  ;;  %v2555_v0 = vpop.permute.xlu0 %2554 }
 0x323   : > { %v2564_v54 = vsel %vm9875_vm1, %v2555_v0, %v2557_v30  ;;  %vm9881_vm1 = vcmask 64512   ;;  %v2968_v14 = vld [vmem:[#allocation3 + $0xc8] sm:$0xff]  ;;  %v2967_v46 = vld [vmem:[#allocation3 + $0xc0] sm:$0xff] }
 0x324   : > { %3002 = vperm.xlu1 %5795, %v2999_v22   ;;  %2928 = vrot.lane.b32.xlu0 %v2914_v55, %s9523_s26  ;;  %2572 = vst [vmem:[#allocation3 + $0xe0] sm:$0xf] %v2564_v54  ;;  %s9886_s26 = smov 118  }
 0x326   : > { %v2594_v56 = vpop.permute.xlu1 %2593  ;;  %v2559_v40 = vpop.permute.xlu0 %2558 }
 0x327   : > { %v2565_v5 = vsel %vm9877_vm4, %v2557_v30, %v2559_v40  ;;  %v2566_v43 = vsel %vm9878_vm12, %v2559_v40, %v2561_v19  ;;  %vm9882_vm4 = vmmov %vm9881_vm1  ;;  %v2970_v45 = vld [vmem:[#allocation3 + $0xd8] sm:$0xff]  ;;  %v2969_v30 = vld [vmem:[#allocation3 + $0xd0] sm:$0xff] }
 0x328   : > { %3208 = vrot.lane.b32.xlu1 %v8217_v53, %s9876_s2  ;;  %3206 = vrot.lane.b32.xlu0 %v8416_v37, %s9876_s2  ;;  %2573 = vst [vmem:[#allocation3 + $0xe8] sm:$0xf] %v2565_v5  ;;  %2574 = vst [vmem:[#allocation3 + $0xf0] sm:$0xf] %v2566_v43 }
 0x329   : > { %vm9883_vm12 = vmmov %vm9881_vm1 }
 0x32a   : > { %v2618_v11 = vpop.permute.xlu1 %2617  ;;  %v2563_v12 = vpop.permute.xlu0 %2562 }
 0x32b   : > { %v2567_v35 = vsel %vm9879_vm10, %v2561_v19, %v2563_v12  ;;  %vm9884_vm10 = vmmov %vm9881_vm1 }
 0x32c   : > { %3212 = vrot.lane.b32.xlu1 %v8227_v17, %s9876_s2  ;;  %3210 = vrot.lane.b32.xlu0 %v8426_v8, %s9876_s2  ;;  %2575 = vst [vmem:[#allocation3 + $0xf8] sm:$0xf] %v2567_v35  ;;  %v5840_v35 = vld [vmem:[#allocation2 + $0x30] ss:$0 sps:$4 sm:$0xff]  }
 0x32e   : > { %v2622_v20 = vpop.permute.xlu1 %2621  ;;  %v2588_v52 = vpop.permute.xlu0 %2587 }
 0x32f   : > { %v2595_v51 = vsel %vm9881_vm1, %v2586_v47, %v2588_v52  ;;  %v2596_v1 = vsel %vm9882_vm4, %v2588_v52, %v2590_v7  ;;  %vm9885_vm1 = vcmask 56320  }
 0x330   : > { %3236 = vrot.lane.b32.xlu1 %v8217_v53, %s9880_s12  ;;  %3214 = vrot.lane.b32.xlu0 %v5838_v9, %s9876_s2  ;;  %2603 = vst [vmem:[#allocation3 + $0xe0] sm:$0xf0] %v2595_v51  ;;  %2604 = vst [vmem:[#allocation3 + $0xe8] sm:$0xf0] %v2596_v1 }
 0x331   : > { %vm9887_vm4 = vmmov %vm9885_vm1 }
 0x332   : > { %v2647_v13 = vpop.permute.xlu1 %2646  ;;  %v2592_v25 = vpop.permute.xlu0 %2591 }
 0x333   : > { %v2597_v15 = vsel %vm9883_vm12, %v2590_v7, %v2592_v25  ;;  %v2598_v24 = vsel %vm9884_vm10, %v2592_v25, %v2594_v56  ;;  %vm9888_vm12 = vmmov %vm9885_vm1 }
 0x334   : > { %3240 = vrot.lane.b32.xlu1 %v8227_v17, %s9880_s12  ;;  %3238 = vrot.lane.b32.xlu0 %v8223_v57, %s9880_s12  ;;  %2605 = vst [vmem:[#allocation3 + $0xf0] sm:$0xf0] %v2597_v15  ;;  %2606 = vst [vmem:[#allocation3 + $0xf8] sm:$0xf0] %v2598_v24  ;;  %v3352_v24 = vld [vmem:[#allocation2 + $0x30] sm:$0xf] }
 0x335   : > { %vm9889_vm10 = vmmov %vm9885_vm1 }
 0x336   : > { %v2651_v38 = vpop.permute.xlu1 %2650  ;;  %v2616_v61 = vpop.permute.xlu0 %2615 }
 0x337   : > { %v2625_v29 = vsel %vm9885_vm1, %v2616_v61, %v2618_v11  ;;  %v2972_v60 = vld [vmem:[#allocation3 + $0xe8] sm:$0xff]  ;;  %v2971_v39 = vld [vmem:[#allocation3 + $0xe0] sm:$0xff]  ;;  %vm9891_vm1 = vcmask 48128  }
 0x338   : > { %3244 = vrot.lane.b32.xlu1 %v3230_v58, %s9880_s12  ;;  %3242 = vrot.lane.b32.xlu0 %v8235_v2, %s9880_s12  ;;  %2633 = vst [vmem:[#allocation3 + $0x100] sm:$0xf] %v2625_v29  ;;  %v5526_v31 = vpack.c.bf16 %v2972_v60, %v2968_v14  ;;  %v5528_v50 = vpack.c.bf16 %v2971_v39, %v2967_v46 }
 0x33a   : > { %v2655_v59 = vpop.permute.xlu1 %2654  ;;  %v2620_v28 = vpop.permute.xlu0 %2619  ;;  %5527 = vmatprep.subr.bf16.mxu0 %v5526_v31 }
 0x33b   : > { %v2626_v18 = vsel %vm9887_vm4, %v2618_v11, %v2620_v28  ;;  %v2627_v4 = vsel %vm9888_vm12, %v2620_v28, %v2622_v20  ;;  %5529 = vmatpush1.bf16.msra.mxu0 %v5528_v50  ;;  %v2974_v33 = vld [vmem:[#allocation3 + $0xf8] sm:$0xff]  ;;  %v2973_v16 = vld [vmem:[#allocation3 + $0xf0] sm:$0xff]  ;;  %vm9892_vm4 = vmmov %vm9891_vm1 }
 0x33c   : > { %3269 = vrot.lane.b32.xlu1 %v8217_v53, %s9886_s26  ;;  %3267 = vrot.lane.b32.xlu0 %v8416_v37, %s9886_s26  ;;  %2634 = vst [vmem:[#allocation3 + $0x108] sm:$0xf] %v2626_v18  ;;  %2635 = vst [vmem:[#allocation3 + $0x110] sm:$0xf] %v2627_v4  ;;  %v5556_v26 = vpack.c.bf16 %v2974_v33, %v2970_v45  ;;  %v5558_v6 = vpack.c.bf16 %v2973_v16, %v2969_v30 }
 0x33d   : > { %vm9893_vm12 = vmmov %vm9891_vm1 }
 0x33e   : > { %v2679_v10 = vpop.permute.xlu1 %2678  ;;  %5557 = vmatprep.subr.bf16.mxu1 %v5556_v26  ;;  %v2624_v32 = vpop.permute.xlu0 %2623 }
 0x33f   : > { %v2628_v63 = vsel %vm9889_vm10, %v2622_v20, %v2624_v32  ;;  %5559 = vmatpush1.bf16.msra.mxu1 %v5558_v6  ;;  %vm9894_vm10 = vmmov %vm9891_vm1 }
 0x340   : > { %3273 = vrot.lane.b32.xlu1 %v8227_v17, %s9886_s26  ;;  %3271 = vrot.lane.b32.xlu0 %v8426_v8, %s9886_s26  ;;  %2636 = vst [vmem:[#allocation3 + $0x118] sm:$0xf] %v2628_v63 }
 0x342   : > { %v2683_v36 = vpop.permute.xlu1 %2682  ;;  %v2649_v19 = vpop.permute.xlu0 %2648 }
 0x343   : > { %v2656_v3 = vsel %vm9891_vm1, %v2647_v13, %v2649_v19  ;;  %v2657_v42 = vsel %vm9892_vm4, %v2649_v19, %v2651_v38  ;;  %vm9895_vm1 = vcmask 457728  }
 0x344   : > { %3297 = vrot.lane.b32.xlu1 %v8217_v53, %s9890_s3  ;;  %3275 = vrot.lane.b32.xlu0 %v5839_v41, %s9886_s26  ;;  %2664 = vst [vmem:[#allocation3 + $0x100] sm:$0xf0] %v2656_v3  ;;  %2665 = vst [vmem:[#allocation3 + $0x108] sm:$0xf0] %v2657_v42 }
 0x345   : > { %vm9897_vm4 = vmmov %vm9895_vm1 }
 0x346   : > { %v2708_v62 = vpop.permute.xlu1 %2707  ;;  %v2653_v47 = vpop.permute.xlu0 %2652 }
 0x347   : > { %v2658_v49 = vsel %vm9893_vm12, %v2651_v38, %v2653_v47  ;;  %v2659_v22 = vsel %vm9894_vm10, %v2653_v47, %v2655_v59  ;;  %vm9898_vm12 = vmmov %vm9895_vm1 }
 0x348   : > { %3301 = vrot.lane.b32.xlu1 %v8227_v17, %s9890_s3  ;;  %3299 = vrot.lane.b32.xlu0 %v8223_v57, %s9890_s3  ;;  %2666 = vst [vmem:[#allocation3 + $0x110] sm:$0xf0] %v2658_v49  ;;  %2667 = vst [vmem:[#allocation3 + $0x118] sm:$0xf0] %v2659_v22 }
 0x349   : > { %vm9899_vm10 = vmmov %vm9895_vm1 }
 0x34a   : > { %v2712_v23 = vpop.permute.xlu1 %2711  ;;  %v2677_v7 = vpop.permute.xlu0 %2676 }
 0x34b   : > { %v2686_v0 = vsel %vm9895_vm1, %v2677_v7, %v2679_v10  ;;  %vm9901_vm1 = vcmask 449536   ;;  %v2976_v58 = vld [vmem:[#allocation3 + $0x108] sm:$0xff]  ;;  %v2975_v59 = vld [vmem:[#allocation3 + $0x100] sm:$0xff] }
 0x34c   : > { %3305 = vrot.lane.b32.xlu1 %v3291_v48, %s9890_s3  ;;  %3303 = vrot.lane.b32.xlu0 %v8235_v2, %s9890_s3  ;;  %2694 = vst [vmem:[#allocation3 + $0x120] sm:$0xf] %v2686_v0 }
 0x34e   : > { %v2716_v55 = vpop.permute.xlu1 %2715  ;;  %v2681_v54 = vpop.permute.xlu0 %2680 }
 0x34f   : > { %v2687_v56 = vsel %vm9897_vm4, %v2679_v10, %v2681_v54  ;;  %v2688_v40 = vsel %vm9898_vm12, %v2681_v54, %v2683_v36  ;;  %vm9902_vm4 = vmmov %vm9901_vm1  ;;  %v2978_v50 = vld [vmem:[#allocation3 + $0x118] sm:$0xff]  ;;  %v2977_v10 = vld [vmem:[#allocation3 + $0x110] sm:$0xff] }
 0x350   : > { %3330 = vrot.lane.b32.xlu1 %v8217_v53, %s9896_s4  ;;  %3328 = vrot.lane.b32.xlu0 %v8416_v37, %s9896_s4  ;;  %2695 = vst [vmem:[#allocation3 + $0x128] sm:$0xf] %v2687_v56  ;;  %2696 = vst [vmem:[#allocation3 + $0x130] sm:$0xf] %v2688_v40  ;;  %v3413_v54 = vld [vmem:[#allocation2 + $0x30] sm:$0xf] }
 0x351   : > { %vm9903_vm12 = vmmov %vm9901_vm1 }
 0x352   : > { %v2740_v5 = vpop.permute.xlu1 %2739  ;;  %v2685_v43 = vpop.permute.xlu0 %2684 }
 0x353   : > { %v2689_v11 = vsel %vm9899_vm10, %v2683_v36, %v2685_v43  ;;  %vm9904_vm10 = vmmov %vm9901_vm1  ;;  %v6086_v36 = vmov 1983009808  }
 0x354   : > { %3334 = vrot.lane.b32.xlu1 %v8227_v17, %s9896_s4  ;;  %3332 = vrot.lane.b32.xlu0 %v8426_v8, %s9896_s4  ;;  %2697 = vst [vmem:[#allocation3 + $0x138] sm:$0xf] %v2689_v11  ;;  %v2121_v41 = vunpack.c.l.s4 %v6086_v36  ;;  %v8528_v11 = vld [vmem:[#allocation2 + $0x20] sm:$0xff] }
 0x356   : > { %v2744_v12 = vpop.permute.xlu1 %2743  ;;  %v2710_v20 = vpop.permute.xlu0 %2709 }
 0x357   : > { %v2717_v9 = vsel %vm9901_vm1, %v2708_v62, %v2710_v20  ;;  %v2718_v52 = vsel %vm9902_vm4, %v2710_v20, %v2712_v23  ;;  %vm9905_vm1 = vcmask 441344  }
 0x358   : > { %3358 = vrot.lane.b32.xlu1 %v8217_v53, %s9900_s9  ;;  %3336 = vrot.lane.b32.xlu0 %v5840_v35, %s9896_s4  ;;  %2725 = vst [vmem:[#allocation3 + $0x120] sm:$0xf0] %v2717_v9  ;;  %2726 = vst [vmem:[#allocation3 + $0x128] sm:$0xf0] %v2718_v52  ;;  %v8541_v52 = vcombine.low %v8528_v11, %v8528_v11 }
 0x359   : > { %vm9907_vm4 = vmmov %vm9905_vm1 }
 0x35a   : > { %v2769_v51 = vpop.permute.xlu1 %2768  ;;  %v2714_v1 = vpop.permute.xlu0 %2713 }
 0x35b   : > { %v2719_v13 = vsel %vm9903_vm12, %v2712_v23, %v2714_v1  ;;  %v2720_v25 = vsel %vm9904_vm10, %v2714_v1, %v2716_v55  ;;  %vm9908_vm12 = vmmov %vm9905_vm1  ;;  %v2122_v23 = vunpack.c.0.s8 %v2121_v41 }
 0x35c   : > { %3362 = vrot.lane.b32.xlu1 %v8227_v17, %s9900_s9  ;;  %3360 = vrot.lane.b32.xlu0 %v8223_v57, %s9900_s9  ;;  %2727 = vst [vmem:[#allocation3 + $0x130] sm:$0xf0] %v2719_v13  ;;  %2728 = vst [vmem:[#allocation3 + $0x138] sm:$0xf0] %v2720_v25 }
 0x35d   : > { %vm9909_vm10 = vmmov %vm9905_vm1 }
 0x35e   : > { %v2773_v15 = vpop.permute.xlu1 %2772  ;;  %v2738_v38 = vpop.permute.xlu0 %2737 }
 0x35f   : > { %v2747_v61 = vsel %vm9905_vm1, %v2738_v38, %v2740_v5  ;;  %v2980_v29 = vld [vmem:[#allocation3 + $0x128] sm:$0xff]  ;;  %v2979_v60 = vld [vmem:[#allocation3 + $0x120] sm:$0xff]  ;;  %vm9911_vm1 = vcmask 375808  }
 0x360   : > { %3366 = vrot.lane.b32.xlu1 %v3352_v24, %s9900_s9  ;;  %3364 = vrot.lane.b32.xlu0 %v8235_v2, %s9900_s9  ;;  %2755 = vst [vmem:[#allocation3 + $0x140] sm:$0xf] %v2747_v61  ;;  %v5530_v46 = vpack.c.bf16 %v2980_v29, %v2976_v58  ;;  %v5532_v39 = vpack.c.bf16 %v2979_v60, %v2975_v59  ;;  %v5844_v38 = vld [vmem:[#allocation2 + $0x30] ss:$0 sps:$4 sm:$0xff]   ;;  %v8565_v29 = vld [vmem:[#allocation2 + $0x28] sm:$0xff] }
 0x362   : > { %v2777_v14 = vpop.permute.xlu1 %2776  ;;  %v2742_v31 = vpop.permute.xlu0 %2741  ;;  %5531 = vmatprep.subr.bf16.mxu0 %v5530_v46 }
 0x363   : > { %v2748_v28 = vsel %vm9907_vm4, %v2740_v5, %v2742_v31  ;;  %v2749_v45 = vsel %vm9908_vm12, %v2742_v31, %v2744_v12  ;;  %5533 = vmatpush1.bf16.msra.mxu0 %v5532_v39  ;;  %v2982_v4 = vld [vmem:[#allocation3 + $0x138] sm:$0xff]  ;;  %v2981_v33 = vld [vmem:[#allocation3 + $0x130] sm:$0xff]  ;;  %vm9912_vm4 = vmmov %vm9911_vm1 }
 0x364   : > { %3391 = vrot.lane.b32.xlu1 %v8217_v53, %s9906_s19  ;;  %3389 = vrot.lane.b32.xlu0 %v8416_v37, %s9906_s19  ;;  %2756 = vst [vmem:[#allocation3 + $0x148] sm:$0xf] %v2748_v28  ;;  %2757 = vst [vmem:[#allocation3 + $0x150] sm:$0xf] %v2749_v45  ;;  %v5560_v30 = vpack.c.bf16 %v2982_v4, %v2978_v50  ;;  %v5562_v16 = vpack.c.bf16 %v2981_v33, %v2977_v10  ;;  %v5841_v37 = vld [vmem:[#allocation2 + $0x30] ss:$0 sps:$4 sm:$0xff]  }
 0x365   : > { %vm9913_vm12 = vmmov %vm9911_vm1  ;;  %v3474_v31 = vld [vmem:[#allocation2 + $0x30] sm:$0xf]  ;;  %v8579_v50 = vcombine.high %v8565_v29, %v8565_v29 }
 0x366   : > { %v8504_v18 = vpop.permute.xlu1 %2800  ;;  %5561 = vmatprep.subr.bf16.mxu1 %v5560_v30  ;;  %v2746_v26 = vpop.permute.xlu0 %2745 }
 0x367   : > { %v2750_v6 = vsel %vm9909_vm10, %v2744_v12, %v2746_v26  ;;  %5563 = vmatpush1.bf16.msra.mxu1 %v5562_v16  ;;  %vm9914_vm10 = vmmov %vm9911_vm1  ;;  %v8531_v12 = vsub.s32 %v2122_v23, %v7422_v21 }
 0x368   : > { %3395 = vrot.lane.b32.xlu1 %v8227_v17, %s9906_s19  ;;  %3393 = vrot.lane.b32.xlu0 %v8426_v8, %s9906_s19  ;;  %2758 = vst [vmem:[#allocation3 + $0x158] sm:$0xf] %v2750_v6 }
 0x36a   : > { %v2805_v32 = vpop.permute.xlu1 %2804  ;;  %v2771_v63 = vpop.permute.xlu0 %2770 }
 0x36b   : > { %v2778_v19 = vsel %vm9911_vm1, %v2769_v51, %v2771_v63  ;;  %v2779_v3 = vsel %vm9912_vm4, %v2771_v63, %v2773_v15  ;;  %vm9915_vm1 = vcmask 367616  }
 0x36c   : > { %3419 = vrot.lane.b32.xlu1 %v8217_v53, %s9910_s30  ;;  %3397 = vrot.lane.b32.xlu0 %v5841_v37, %s9906_s19  ;;  %2786 = vst [vmem:[#allocation3 + $0x140] sm:$0xf0] %v2778_v19  ;;  %2787 = vst [vmem:[#allocation3 + $0x148] sm:$0xf0] %v2779_v3 }
 0x36d   : > { %v2038_v62 = vpop.f32.mrb[0].mxu0  ;;  %vm9917_vm4 = vmmov %vm9915_vm1 }
 0x36e   : > { %v2830_v42 = vpop.permute.xlu1 %2829  ;;  %v2039_v47 = vadd.f32 %v2038_v62, %v8200_v44  ;;  %v2040_v53 = vpop.f32.mrb[1].mxu0  ;;  %v8593_v62 = vcombine.low %v8565_v29, %v8565_v29 }
 0x36f   : > { %v2041_v49 = vadd.f32 %v2040_v53, %v8200_v44  ;;  %v2775_v22 = vpop.permute.xlu0 %2774 }
 0x370   : > { %3423 = vrot.lane.b32.xlu1 %v8227_v17, %s9910_s30  ;;  %v2780_v48 = vsel %vm9913_vm12, %v2773_v15, %v2775_v22  ;;  %v2781_v7 = vsel %vm9914_vm10, %v2775_v22, %v2777_v14  ;;  %3421 = vrot.lane.b32.xlu0 %v8223_v57, %s9910_s30  ;;  %vm9918_vm12 = vmmov %vm9915_vm1  ;;  %v5847_v22 = vld [vmem:[#allocation2 + $0x30] ss:$0 sps:$4 sm:$0xff]  }
 0x371   : > { %v2118_v55 = vcombine.low %v2039_v47, %v2041_v49  ;;  %2788 = vst [vmem:[#allocation3 + $0x150] sm:$0xf0] %v2780_v48  ;;  %2789 = vst [vmem:[#allocation3 + $0x158] sm:$0xf0] %v2781_v7  ;;  %v2109_v56 = vpop.f32.mrb[0].mxu1 }
 0x372   : > { %v2834_v0 = vpop.permute.xlu1 %2833  ;;  %v2110_v40 = vadd.f32 %v2109_v56, %v8200_v44  ;;  %v2111_v5 = vpop.f32.mrb[1].mxu1  ;;  %vm9919_vm10 = vmmov %vm9915_vm1 }
 0x373   : > { %v2799_v43 = vpop.permute.xlu0 %2798  ;;  %v2112_v35 = vadd.f32 %v2111_v5, %v8200_v44  ;;  %v2126_v44 = vrot.slane %v2118_v55, %v8531_v12  ;;  %v2984_v45 = vld [vmem:[#allocation3 + $0x148] sm:$0xff]  ;;  %v2983_v10 = vld [vmem:[#allocation3 + $0x140] sm:$0xff] }
 0x374   : > { %3427 = vrot.lane.b32.xlu1 %v3413_v54, %s9910_s30  ;;  %v2808_v57 = vsel %vm9915_vm1, %v2799_v43, %v8504_v18  ;;  %3425 = vrot.lane.b32.xlu0 %v8235_v2, %s9910_s30  ;;  %vm9921_vm1 = vcmask 359424  }
 0x375   : > { %2816 = vst [vmem:[#allocation3 + $0x160] sm:$0xf] %v2808_v57  ;;  %v2119_v9 = vcombine.low %v2110_v40, %v2112_v35  ;;  %v3535_v40 = vld [vmem:[#allocation2 + $0x30] sm:$0xf] }
 0x376   : > { %v2838_v20 = vpop.permute.xlu1 %2837 }
 0x377   : > { %v2803_v21 = vpop.permute.xlu0 %2802  ;;  %v2133_v51 = vrot.slane %v2119_v9, %v8531_v12 }
 0x378   : > { %3452 = vrot.lane.b32.xlu1 %v8528_v11, %s9916_s10  ;;  %v2809_v1 = vsel %vm9917_vm4, %v8504_v18, %v2803_v21  ;;  %v2810_v2 = vsel %vm9918_vm12, %v2803_v21, %v2805_v32  ;;  %3450 = vrot.lane.b32.xlu0 %v8541_v52, %s9916_s10  ;;  %vm9922_vm4 = vmmov %vm9921_vm1  ;;  %v2985_v41 = vld [vmem:[#allocation3 + $0x150] sm:$0xff] }
 0x379   : > { %2817 = vst [vmem:[#allocation3 + $0x168] sm:$0xf] %v2809_v1  ;;  %2818 = vst [vmem:[#allocation3 + $0x170] sm:$0xf] %v2810_v2  ;;  %v2134_v25 = vcombine.low %v2126_v44, %v2133_v51  ;;  %v5848_v2 = vld [vmem:[#allocation2 + $0x30] ss:$0 sps:$4 sm:$0xff]  }
 0x37a   : > { %v2862_v13 = vpop.permute.xlu1 %2861  ;;  %vm9923_vm12 = vmmov %vm9921_vm1 }
 0x37b   : > { %v2807_v15 = vpop.permute.xlu0 %2806  ;;  %2136 = vst [vmem:[%s8554_s20] sm:$0xff] %v2134_v25 }
 0x37c   : > { %3456 = vrot.lane.b32.xlu1 %v8227_v17, %s9916_s10  ;;  %v2811_v24 = vsel %vm9919_vm10, %v2805_v32, %v2807_v15  ;;  %3454 = vrot.lane.b32.xlu0 %v8426_v8, %s9916_s10  ;;  %v8569_v8 = vcombine.high %v8528_v11, %v8528_v11  ;;  %vm9924_vm10 = vmmov %vm9921_vm1  ;;  %v2986_v32 = vld [vmem:[#allocation3 + $0x158] sm:$0xff] }
 0x37d   : > { %2819 = vst [vmem:[#allocation3 + $0x178] sm:$0xf] %v2811_v24 }
 0x37e   : > { %v2866_v58 = vpop.permute.xlu1 %2865 }
 0x37f   : > { %v2832_v61 = vpop.permute.xlu0 %2831 }
 0x380   : > { %3480 = vrot.lane.b32.xlu1 %v8528_v11, %s9920_s0  ;;  %v2839_v14 = vsel %vm9921_vm1, %v2830_v42, %v2832_v61  ;;  %v2840_v17 = vsel %vm9922_vm4, %v2832_v61, %v2834_v0  ;;  %3458 = vrot.lane.b32.xlu0 %v5844_v38, %s9916_s10  ;;  %vm9925_vm1 = vcmask 293888  }
 0x381   : > { %2847 = vst [vmem:[#allocation3 + $0x160] sm:$0xf0] %v2839_v14  ;;  %2848 = vst [vmem:[#allocation3 + $0x168] sm:$0xf0] %v2840_v17 }
 0x382   : > { %v2891_v39 = vpop.permute.xlu1 %2890  ;;  %vm9927_vm4 = vmmov %vm9925_vm1 }
 0x383   : > { %v2836_v59 = vpop.permute.xlu0 %2835 }
 0x384   : > { %3484 = vrot.lane.b32.xlu1 %v8565_v29, %s9920_s0  ;;  %v2841_v60 = vsel %vm9923_vm12, %v2834_v0, %v2836_v59  ;;  %v2842_v46 = vsel %vm9924_vm10, %v2836_v59, %v2838_v20  ;;  %3482 = vrot.lane.b32.xlu0 %v8569_v8, %s9920_s0  ;;  %vm9928_vm12 = vmmov %vm9925_vm1 }
 0x385   : > { %2849 = vst [vmem:[#allocation3 + $0x170] sm:$0xf0] %v2841_v60  ;;  %2850 = vst [vmem:[#allocation3 + $0x178] sm:$0xf0] %v2842_v46 }
 0x386   : > { %v2895_v26 = vpop.permute.xlu1 %2894  ;;  %vm9929_vm10 = vmmov %vm9925_vm1 }
 0x387   : > { %v2860_v28 = vpop.permute.xlu0 %2859 }
 0x388   : > { %3488 = vrot.lane.b32.xlu1 %v3474_v31, %s9920_s0  ;;  %v2869_v18 = vsel %vm9925_vm1, %v2860_v28, %v2862_v13  ;;  %3486 = vrot.lane.b32.xlu0 %v8579_v50, %s9920_s0  ;;  %v2988_v4 = vld [vmem:[#allocation3 + $0x168] sm:$0xff]  ;;  %v2987_v33 = vld [vmem:[#allocation3 + $0x160] sm:$0xff]  ;;  %vm9931_vm1 = vcmask 285696  }
 0x389   : > { %2877 = vst [vmem:[#allocation3 + $0x180] sm:$0xf] %v2869_v18  ;;  %v5534_v30 = vpack.c.bf16 %v2988_v4, %v2984_v45  ;;  %v5536_v16 = vpack.c.bf16 %v2987_v33, %v2983_v10  ;;  %v2942_v45 = vld [vmem:[%s9439_s5] sm:$0x3]  ;;  %v3596_v4 = vld [vmem:[#allocation2 + $0x30] sm:$0xf] }
 0x38a   : > { %v2899_v49 = vpop.permute.xlu1 %2898 }
 0x38b   : > { %v2864_v6 = vpop.permute.xlu0 %2863  ;;  %5535 = vmatprep.subr.bf16.mxu0 %v5534_v30 }
 0x38c   : > { %3513 = vrot.lane.b32.xlu1 %v8528_v11, %s9926_s29  ;;  %v2870_v37 = vsel %vm9927_vm4, %v2862_v13, %v2864_v6  ;;  %v2871_v63 = vsel %vm9928_vm12, %v2864_v6, %v2866_v58  ;;  %3511 = vrot.lane.b32.xlu0 %v8541_v52, %s9926_s29  ;;  %v2990_v36 = vld [vmem:[#allocation3 + $0x178] sm:$0xff]  ;;  %v2989_v19 = vld [vmem:[#allocation3 + $0x170] sm:$0xff]  ;;  %vm9932_vm4 = vmmov %vm9931_vm1 }
 0x38d   : > { %5537 = vmatpush1.bf16.msra.mxu0 %v5536_v16  ;;  %2878 = vst [vmem:[#allocation3 + $0x188] sm:$0xf] %v2870_v37  ;;  %2879 = vst [vmem:[#allocation3 + $0x190] sm:$0xf] %v2871_v63  ;;  %v5564_v3 = vpack.c.bf16 %v2990_v36, %v2986_v32  ;;  %v5566_v42 = vpack.c.bf16 %v2989_v19, %v2985_v41  ;;  %v8654_v6 = vld [vmem:[#allocation2 + $0x30] sm:$0xff] }
 0x38e   : > { %v2923_v0 = vpop.permute.xlu1 %2922  ;;  %vm9933_vm12 = vmmov %vm9931_vm1  ;;  %v8665_v36 = vcombine.high %v8654_v6, %v8654_v6 }
 0x38f   : > { %5565 = vmatprep.subr.bf16.mxu1 %v5564_v3  ;;  %v2868_v47 = vpop.permute.xlu0 %2867 }
 0x390   : > { %3517 = vrot.lane.b32.xlu1 %v8565_v29, %s9926_s29  ;;  %v2872_v53 = vsel %vm9929_vm10, %v2866_v58, %v2868_v47  ;;  %3515 = vrot.lane.b32.xlu0 %v8593_v62, %s9926_s29  ;;  %vm9934_vm10 = vmmov %vm9931_vm1 }
 0x391   : > { %5567 = vmatpush1.bf16.msra.mxu1 %v5566_v42  ;;  %2880 = vst [vmem:[#allocation3 + $0x198] sm:$0xf] %v2872_v53  ;;  %v8671_v42 = vld [vmem:[#allocation2 + $0x38] sm:$0xff] }
 0x392   : > { %v2927_v35 = vpop.permute.xlu1 %2926 }
 0x393   : > { %v2893_v23 = vpop.permute.xlu0 %2892 }
 0x394   : > { %3541 = vrot.lane.b32.xlu1 %v8528_v11, %s9930_s7  ;;  %v2900_v48 = vsel %vm9931_vm1, %v2891_v39, %v2893_v23  ;;  %v2901_v7 = vsel %vm9932_vm4, %v2893_v23, %v2895_v26  ;;  %3519 = vrot.lane.b32.xlu0 %v5847_v22, %s9926_s29  ;;  %v8682_v22 = vcombine.high %v8671_v42, %v8671_v42  ;;  %vm9935_vm1 = vcmask 211968  }
 0x395   : > { %2908 = vst [vmem:[#allocation3 + $0x180] sm:$0xf0] %v2900_v48  ;;  %2909 = vst [vmem:[#allocation3 + $0x188] sm:$0xf0] %v2901_v7 }
 0x396   : > { %vm9936_vm4 = vmmov %vm9935_vm1 }
 0x397   : > { %v2897_v55 = vpop.permute.xlu0 %2896 }
 0x398   : > { %3545 = vrot.lane.b32.xlu1 %v8565_v29, %s9930_s7  ;;  %v2902_v54 = vsel %vm9933_vm12, %v2895_v26, %v2897_v55  ;;  %v2903_v56 = vsel %vm9934_vm10, %v2897_v55, %v2899_v49  ;;  %3543 = vrot.lane.b32.xlu0 %v8569_v8, %s9930_s7  ;;  %v5849_v55 = vld [vmem:[#allocation2 + $0x30] ss:$0 sps:$4 sm:$0xff]   ;;  %vm9937_vm12 = vmmov %vm9935_vm1 }
 0x399   : > { %2910 = vst [vmem:[#allocation3 + $0x190] sm:$0xf0] %v2902_v54  ;;  %2911 = vst [vmem:[#allocation3 + $0x198] sm:$0xf0] %v2903_v56 }
 0x39a   : > { %vm9938_vm10 = vmmov %vm9935_vm1 }
 0x39b   : > { %v2921_v5 = vpop.permute.xlu0 %2920 }
 0x39c   : > { %3549 = vrot.lane.b32.xlu1 %v3535_v40, %s9930_s7  ;;  %v2930_v43 = vsel %vm1880_vm3, %v2921_v5, %v2923_v0  ;;  %3547 = vrot.lane.b32.xlu0 %v8579_v50, %s9930_s7  ;;  %v2992_v24 = vld [vmem:[#allocation3 + $0x188] sm:$0xff]  ;;  %v2991_v14 = vld [vmem:[#allocation3 + $0x180] sm:$0xff] }
 0x39d   : > { %2938 = vst [vmem:[#allocation3 + $0x1a0] sm:$0xf] %v2930_v43 }
 0x39f   : > { %v2925_v57 = vpop.permute.xlu0 %2924 }
 0x3a0   : > { %3574 = vrot.lane.b32.xlu1 %v8528_v11, %s9858_s1  ;;  %v2931_v20 = vsel %vm1880_vm3, %v2923_v0, %v2925_v57  ;;  %v2932_v9 = vsel %vm1880_vm3, %v2925_v57, %v2927_v35  ;;  %3572 = vrot.lane.b32.xlu0 %v8541_v52, %s9858_s1  ;;  %v2994_v31 = vld [vmem:[#allocation3 + $0x198] sm:$0xff]  ;;  %v2993_v33 = vld [vmem:[#allocation3 + $0x190] sm:$0xff] }
 0x3a1   : > { %2939 = vst [vmem:[#allocation3 + $0x1a8] sm:$0xf] %v2931_v20  ;;  %2940 = vst [vmem:[#allocation3 + $0x1b0] sm:$0xf] %v2932_v9  ;;  %v3657_v20 = vld [vmem:[#allocation2 + $0x30] sm:$0xf] }
 0x3a3   : > { %v8621_v21 = vpop.permute.xlu1 %3002  ;;  %v2929_v44 = vpop.permute.xlu0 %2928 }
 0x3a4   : > { %3578 = vrot.lane.b32.xlu1 %v8565_v29, %s9858_s1  ;;  %v2933_v51 = vsel %vm1880_vm3, %v2927_v35, %v2929_v44  ;;  %3576 = vrot.lane.b32.xlu0 %v8593_v62, %s9858_s1  ;;  %v2995_v25 = vld [vmem:[#allocation3 + $0x1a0] sm:$0xf] }
 0x3a5   : > { %2941 = vst [vmem:[#allocation3 + $0x1b8] sm:$0xf] %v2933_v51  ;;  %v5541_v17 = vpack.c.bf16 %v2995_v25, %v2991_v14 }
 0x3a7   : > { %v3209_v1 = vpop.permute.xlu1 %3208  ;;  %v3207_v13 = vpop.permute.xlu0 %3206 }
 0x3a8   : > { %3602 = vrot.lane.b32.xlu1 %v8528_v11, %s9859_s11  ;;  %v3216_v15 = vsel %vm1093_vm8, %v3207_v13, %v3209_v1  ;;  %3580 = vrot.lane.b32.xlu0 %v5848_v2, %s9858_s1  ;;  %v2996_v38 = vld [vmem:[#allocation3 + $0x1a8] sm:$0xf]  ;;  %v2997_v60 = vld [vmem:[#allocation3 + $0x1b0] sm:$0xf] }
 0x3a9   : > { %3224 = vst [vmem:[#allocation3] sm:$0xf0] %v3216_v15  ;;  %v5538_v61 = vpack.c.bf16 %v2996_v38, %v2992_v24  ;;  %v5571_v30 = vpack.c.bf16 %v2997_v60, %v2993_v33  ;;  %v3718_v33 = vld [vmem:[#allocation2 + $0x34] sm:$0xf] }
 0x3ab   : > { %v3213_v58 = vpop.permute.xlu1 %3212  ;;  %v3211_v59 = vpop.permute.xlu0 %3210  ;;  %5540 = vmatprep.subr.msk.bf16.mxu0 %vm8172_vm15, %v5538_v61 }
 0x3ac   : > { %3606 = vrot.lane.b32.xlu1 %v8565_v29, %s9859_s11  ;;  %v3217_v46 = vsel %vm1093_vm8, %v3209_v1, %v3211_v59  ;;  %v3218_v39 = vsel %vm1093_vm8, %v3211_v59, %v3213_v58  ;;  %3604 = vrot.lane.b32.xlu0 %v8569_v8, %s9859_s11  ;;  %v2998_v28 = vld [vmem:[#allocation3 + $0x1b8] sm:$0xf]  ;;  %v5853_v59 = vld [vmem:[#allocation2 + $0x30] ss:$0 sps:$4 sm:$0xff]  }
 0x3ad   : > { %5543 = vmatpush1.bf16.msk.msra.mxu0 %vm8172_vm15, %v5541_v17  ;;  %3225 = vst [vmem:[#allocation3 + $0x8] sm:$0xf0] %v3217_v46  ;;  %3226 = vst [vmem:[#allocation3 + $0x10] sm:$0xf0] %v3218_v39  ;;  %v5568_v10 = vpack.c.bf16 %v2998_v28, %v2994_v31  ;;  %v8716_v17 = vld [vmem:[#allocation2 + $0x24] sm:$0xff]  ;;  %v8723_v31 = vld [vmem:[#allocation2 + $0x2c] sm:$0xff] }
 0x3ae   : > { %v8727_v28 = vcombine.high %v8716_v17, %v8716_v17 }
 0x3af   : > { %v3237_v18 = vpop.permute.xlu1 %3236  ;;  %5570 = vmatprep.subr.msk.bf16.mxu1 %vm8172_vm15, %v5568_v10  ;;  %v3215_v16 = vpop.permute.xlu0 %3214 }
 0x3b0   : > { %3610 = vrot.lane.b32.xlu1 %v3596_v4, %s9859_s11  ;;  %5432 = vmatmul.mubr.msk.f32.vlgmr.msra.gmra.mrb[2].mxu0 %vm1250_vm5, %v2942_v45  ;;  %v3219_v26 = vsel %vm1093_vm8, %v3213_v58, %v3215_v16  ;;  %v8656_v32 = vld [vmem:[#allocation3] sm:$0xff] }
 0x3b1   : > { %3608 = vrot.lane.b32.xlu0 %v8579_v50, %s9859_s11  ;;  %5573 = vmatpush1.bf16.msk.msra.mxu1 %vm8172_vm15, %v5571_v30  ;;  %3227 = vst [vmem:[#allocation3 + $0x18] sm:$0xf0] %v3219_v26  ;;  %4241 = vst [vmem:[#allocation3] sm:$0xf] %v8654_v6  ;;  %v8737_v30 = vcombine.high %v8723_v31, %v8723_v31 }
 0x3b2   : > { %4132 = vmatprep.mubr.f32.mxu0 %v6084_v34 }
 0x3b3   : > { %v3241_v37 = vpop.permute.xlu1 %3240  ;;  %v3239_v63 = vpop.permute.xlu0 %3238 }
 0x3b4   : > { %3635 = vrot.lane.b32.xlu1 %v8528_v11, %s9860_s16  ;;  %5435 = vmatmul.mubr.msk.f32.vlgmr.msra.gmra.mrb[2].mxu1 %vm1250_vm5, %v2942_v45  ;;  %v3246_v41 = vsel %vm1124_vm6, %v3237_v18, %v3239_v63  ;;  %v3247_v19 = vsel %vm1124_vm6, %v3239_v63, %v3241_v37  ;;  %v3992_v3 = vld [vmem:[#allocation3 + $0x8] sm:$0xff]  ;;  %v8673_v47 = vld [vmem:[#allocation3 + $0x10] sm:$0xff] }
 0x3b5   : > { %3633 = vrot.lane.b32.xlu0 %v8541_v52, %s9860_s16  ;;  %4203 = vmatprep.mubr.f32.mxu1 %v6084_v34  ;;  %3254 = vst [vmem:[#allocation3 + $0x20] sm:$0xf] %v3246_v41  ;;  %3255 = vst [vmem:[#allocation3 + $0x28] sm:$0xf] %v3247_v19 }
 0x3b6   : > { %4242 = vst [vmem:[#allocation3 + $0x8] sm:$0xf] %v8665_v36  ;;  %4243 = vst [vmem:[#allocation3 + $0x10] sm:$0xf] %v8671_v42 }
 0x3b7   : > { %v3245_v53 = vpop.permute.xlu1 %3244  ;;  %v3243_v49 = vpop.permute.xlu0 %3242 }
 0x3b8   : > { %3639 = vrot.lane.b32.xlu1 %v8565_v29, %s9860_s16  ;;  %v3248_v23 = vsel %vm1124_vm6, %v3241_v37, %v3243_v49  ;;  %v3249_v48 = vsel %vm1124_vm6, %v3243_v49, %v3245_v53  ;;  %v3994_v7 = vld [vmem:[#allocation3 + $0x18] sm:$0xff]  ;;  %v8745_v37 = vcombine.low %v8716_v17, %v8716_v17 }
 0x3b9   : > { %3637 = vrot.lane.b32.xlu0 %v8593_v62, %s9860_s16  ;;  %3256 = vst [vmem:[#allocation3 + $0x30] sm:$0xf] %v3248_v23  ;;  %3257 = vst [vmem:[#allocation3 + $0x38] sm:$0xf] %v3249_v48 }
 0x3ba   : > { %4244 = vst [vmem:[#allocation3 + $0x18] sm:$0xf] %v8682_v22 }
 0x3bb   : > { %v3270_v0 = vpop.permute.xlu1 %3269  ;;  %v3268_v54 = vpop.permute.xlu0 %3267 }
 0x3bc   : > { %3663 = vrot.lane.b32.xlu1 %v8528_v11, %s9861_s23  ;;  %v3277_v56 = vsel %vm1156_vm13, %v3268_v54, %v3270_v0 }
 0x3bd   : > { %3641 = vrot.lane.b32.xlu0 %v5849_v55, %s9860_s16  ;;  %3285 = vst [vmem:[#allocation3 + $0x20] sm:$0xf0] %v3277_v56 }
 0x3bf   : > { %v3274_v40 = vpop.permute.xlu1 %3273  ;;  %v3272_v5 = vpop.permute.xlu0 %3271 }
 0x3c0   : > { %3667 = vrot.lane.b32.xlu1 %v8565_v29, %s9861_s23  ;;  %v3278_v43 = vsel %vm1156_vm13, %v3270_v0, %v3272_v5  ;;  %v3279_v35 = vsel %vm1156_vm13, %v3272_v5, %v3274_v40 }
 0x3c1   : > { %3665 = vrot.lane.b32.xlu0 %v8569_v8, %s9861_s23  ;;  %3286 = vst [vmem:[#allocation3 + $0x28] sm:$0xf0] %v3278_v43  ;;  %3287 = vst [vmem:[#allocation3 + $0x30] sm:$0xf0] %v3279_v35  ;;  %v3779_v35 = vld [vmem:[#allocation2 + $0x34] sm:$0xf] }
 0x3c3   : > { %v3298_v57 = vpop.permute.xlu1 %3297  ;;  %v3276_v9 = vpop.permute.xlu0 %3275 }
 0x3c4   : > { %3671 = vrot.lane.b32.xlu1 %v3657_v20, %s9861_s23  ;;  %v3280_v44 = vsel %vm1156_vm13, %v3274_v40, %v3276_v9  ;;  %v3995_v2 = vld [vmem:[#allocation3 + $0x20] sm:$0xff] }
 0x3c5   : > { %3669 = vrot.lane.b32.xlu0 %v8579_v50, %s9861_s23  ;;  %3288 = vst [vmem:[#allocation3 + $0x38] sm:$0xf0] %v3280_v44  ;;  %v5576_v50 = vpack.c.bf16 %v3995_v2, %v8656_v32 }
 0x3c7   : > { %v3302_v51 = vpop.permute.xlu1 %3301  ;;  %v3300_v1 = vpop.permute.xlu0 %3299 }
 0x3c8   : > { %3696 = vrot.lane.b32.xlu1 %v8528_v11, %s9862_s24  ;;  %v3307_v8 = vsel %vm1187_vm9, %v3298_v57, %v3300_v1  ;;  %v3308_v13 = vsel %vm1187_vm9, %v3300_v1, %v3302_v51  ;;  %v3996_v25 = vld [vmem:[#allocation3 + $0x28] sm:$0xff]  ;;  %v3997_v38 = vld [vmem:[#allocation3 + $0x30] sm:$0xff] }
 0x3c9   : > { %3694 = vrot.lane.b32.xlu0 %v8541_v52, %s9862_s24  ;;  %3315 = vst [vmem:[#allocation3 + $0x40] sm:$0xf] %v3307_v8  ;;  %3316 = vst [vmem:[#allocation3 + $0x48] sm:$0xf] %v3308_v13  ;;  %v5574_v24 = vpack.c.bf16 %v3996_v25, %v3992_v3  ;;  %v5606_v60 = vpack.c.bf16 %v3997_v38, %v8673_v47  ;;  %v8755_v47 = vcombine.low %v8723_v31, %v8723_v31 }
 0x3cb   : > { %v3306_v15 = vpop.permute.xlu1 %3305  ;;  %v3304_v11 = vpop.permute.xlu0 %3303  ;;  %5575 = vmatprep.subr.bf16.mxu0 %v5574_v24 }
 0x3cc   : > { %3700 = vrot.lane.b32.xlu1 %v8565_v29, %s9862_s24  ;;  %v3309_v58 = vsel %vm1187_vm9, %v3302_v51, %v3304_v11  ;;  %v3310_v61 = vsel %vm1187_vm9, %v3304_v11, %v3306_v15  ;;  %5577 = vmatpush1.bf16.msra.mxu0 %v5576_v50  ;;  %v3998_v52 = vld [vmem:[#allocation3 + $0x38] sm:$0xff] }
 0x3cd   : > { %3698 = vrot.lane.b32.xlu0 %v8593_v62, %s9862_s24  ;;  %3317 = vst [vmem:[#allocation3 + $0x50] sm:$0xf] %v3309_v58  ;;  %3318 = vst [vmem:[#allocation3 + $0x58] sm:$0xf] %v3310_v61  ;;  %v5604_v29 = vpack.c.bf16 %v3998_v52, %v3994_v7  ;;  %v5857_v7 = vld [vmem:[#allocation2 + $0x34] ss:$0 sps:$4 sm:$0xff]  }
 0x3cf   : > { %v3331_v14 = vpop.permute.xlu1 %3330  ;;  %5605 = vmatprep.subr.bf16.mxu1 %v5604_v29  ;;  %v3329_v46 = vpop.permute.xlu0 %3328 }
 0x3d0   : > { %3724 = vrot.lane.b32.xlu1 %v8716_v17, %s9863_s28  ;;  %v3338_v39 = vsel %vm1219_vm7, %v3329_v46, %v3331_v14  ;;  %5607 = vmatpush1.bf16.msra.mxu1 %v5606_v60  ;;  %v5858_v46 = vld [vmem:[#allocation2 + $0x34] ss:$0 sps:$4 sm:$0xff]  }
 0x3d1   : > { %3702 = vrot.lane.b32.xlu0 %v5853_v59, %s9862_s24  ;;  %3346 = vst [vmem:[#allocation3 + $0x40] sm:$0xf0] %v3338_v39 }
 0x3d3   : > { %v3335_v62 = vpop.permute.xlu1 %3334  ;;  %v3333_v45 = vpop.permute.xlu0 %3332 }
 0x3d4   : > { %3728 = vrot.lane.b32.xlu1 %v8723_v31, %s9863_s28  ;;  %v3339_v18 = vsel %vm1219_vm7, %v3331_v14, %v3333_v45  ;;  %v3340_v4 = vsel %vm1219_vm7, %v3333_v45, %v3335_v62 }
 0x3d5   : > { %3726 = vrot.lane.b32.xlu0 %v8727_v28, %s9863_s28  ;;  %3347 = vst [vmem:[#allocation3 + $0x48] sm:$0xf0] %v3339_v18  ;;  %3348 = vst [vmem:[#allocation3 + $0x50] sm:$0xf0] %v3340_v4 }
 0x3d7   : > { %v3359_v10 = vpop.permute.xlu1 %3358  ;;  %v3337_v16 = vpop.permute.xlu0 %3336 }
 0x3d8   : > { %3732 = vrot.lane.b32.xlu1 %v3718_v33, %s9863_s28  ;;  %v3341_v26 = vsel %vm1219_vm7, %v3335_v62, %v3337_v16  ;;  %v3999_v24 = vld [vmem:[#allocation3 + $0x40] sm:$0xff] }
 0x3d9   : > { %3730 = vrot.lane.b32.xlu0 %v8737_v30, %s9863_s28  ;;  %3349 = vst [vmem:[#allocation3 + $0x58] sm:$0xf0] %v3341_v26 }
 0x3db   : > { %v3363_v32 = vpop.permute.xlu1 %3362  ;;  %v3361_v63 = vpop.permute.xlu0 %3360 }
 0x3dc   : > { %3757 = vrot.lane.b32.xlu1 %v8716_v17, %s9864_s17  ;;  %v3368_v41 = vsel %vm1250_vm5, %v3359_v10, %v3361_v63  ;;  %v3369_v19 = vsel %vm1250_vm5, %v3361_v63, %v3363_v32  ;;  %v4000_v8 = vld [vmem:[#allocation3 + $0x48] sm:$0xff]  ;;  %v4001_v60 = vld [vmem:[#allocation3 + $0x50] sm:$0xff] }
 0x3dd   : > { %3755 = vrot.lane.b32.xlu0 %v8745_v37, %s9864_s17  ;;  %3376 = vst [vmem:[#allocation3 + $0x60] sm:$0xf] %v3368_v41  ;;  %3377 = vst [vmem:[#allocation3 + $0x68] sm:$0xf] %v3369_v19 }
 0x3df   : > { %v3367_v3 = vpop.permute.xlu1 %3366  ;;  %v3365_v53 = vpop.permute.xlu0 %3364 }
 0x3e0   : > { %3761 = vrot.lane.b32.xlu1 %v8723_v31, %s9864_s17  ;;  %v3370_v49 = vsel %vm1250_vm5, %v3363_v32, %v3365_v53  ;;  %v3371_v23 = vsel %vm1250_vm5, %v3365_v53, %v3367_v3  ;;  %v4002_v52 = vld [vmem:[#allocation3 + $0x58] sm:$0xff]  ;;  %v3840_v32 = vld [vmem:[#allocation2 + $0x34] sm:$0xf] }
 0x3e1   : > { %3759 = vrot.lane.b32.xlu0 %v8755_v47, %s9864_s17  ;;  %3378 = vst [vmem:[#allocation3 + $0x70] sm:$0xf] %v3370_v49  ;;  %3379 = vst [vmem:[#allocation3 + $0x78] sm:$0xf] %v3371_v23  ;;  %v5859_v23 = vld [vmem:[#allocation2 + $0x34] ss:$0 sps:$4 sm:$0xff]  }
 0x3e3   : > { %v3392_v48 = vpop.permute.xlu1 %3391  ;;  %v3390_v0 = vpop.permute.xlu0 %3389 }
 0x3e4   : > { %3785 = vrot.lane.b32.xlu1 %v8716_v17, %s9865_s14  ;;  %v3399_v55 = vsel %vm1282_vm11, %v3390_v0, %v3392_v48 }
 0x3e5   : > { %3763 = vrot.lane.b32.xlu0 %v5857_v7, %s9864_s17  ;;  %3407 = vst [vmem:[#allocation3 + $0x60] sm:$0xf0] %v3399_v55 }
 0x3e7   : > { %v3396_v54 = vpop.permute.xlu1 %3395  ;;  %v3394_v56 = vpop.permute.xlu0 %3393 }
 0x3e8   : > { %3789 = vrot.lane.b32.xlu1 %v8723_v31, %s9865_s14  ;;  %v3400_v40 = vsel %vm1282_vm11, %v3392_v48, %v3394_v56  ;;  %v3401_v5 = vsel %vm1282_vm11, %v3394_v56, %v3396_v54 }
 0x3e9   : > { %3787 = vrot.lane.b32.xlu0 %v8727_v28, %s9865_s14  ;;  %3408 = vst [vmem:[#allocation3 + $0x68] sm:$0xf0] %v3400_v40  ;;  %3409 = vst [vmem:[#allocation3 + $0x70] sm:$0xf0] %v3401_v5 }
 0x3eb   : > { %v3420_v43 = vpop.permute.xlu1 %3419  ;;  %v3398_v57 = vpop.permute.xlu0 %3397 }
 0x3ec   : > { %3793 = vrot.lane.b32.xlu1 %v3779_v35, %s9865_s14  ;;  %v3402_v20 = vsel %vm1282_vm11, %v3396_v54, %v3398_v57  ;;  %v4003_v51 = vld [vmem:[#allocation3 + $0x60] sm:$0xff] }
 0x3ed   : > { %3791 = vrot.lane.b32.xlu0 %v8737_v30, %s9865_s14  ;;  %3410 = vst [vmem:[#allocation3 + $0x78] sm:$0xf0] %v3402_v20  ;;  %v5580_v50 = vpack.c.bf16 %v4003_v51, %v3999_v24 }
 0x3ef   : > { %v3424_v9 = vpop.permute.xlu1 %3423  ;;  %v3422_v44 = vpop.permute.xlu0 %3421 }
 0x3f0   : > { %3818 = vrot.lane.b32.xlu1 %v8716_v17, %s9866_s21  ;;  %v3429_v1 = vsel %vm1313_vm2, %v3420_v43, %v3422_v44  ;;  %v3430_v2 = vsel %vm1313_vm2, %v3422_v44, %v3424_v9  ;;  %v4004_v13 = vld [vmem:[#allocation3 + $0x68] sm:$0xff]  ;;  %v4005_v38 = vld [vmem:[#allocation3 + $0x70] sm:$0xff] }
 0x3f1   : > { %3816 = vrot.lane.b32.xlu0 %v8745_v37, %s9866_s21  ;;  %3437 = vst [vmem:[#allocation3 + $0x80] sm:$0xf] %v3429_v1  ;;  %3438 = vst [vmem:[#allocation3 + $0x88] sm:$0xf] %v3430_v2  ;;  %v5578_v15 = vpack.c.bf16 %v4004_v13, %v4000_v8  ;;  %v5610_v39 = vpack.c.bf16 %v4005_v38, %v4001_v60  ;;  %v5860_v38 = vld [vmem:[#allocation2 + $0x34] ss:$0 sps:$4 sm:$0xff]  }
 0x3f3   : > { %v3428_v25 = vpop.permute.xlu1 %3427  ;;  %v3426_v11 = vpop.permute.xlu0 %3425  ;;  %5579 = vmatprep.subr.bf16.mxu0 %v5578_v15 }
 0x3f4   : > { %3822 = vrot.lane.b32.xlu1 %v8723_v31, %s9866_s21  ;;  %v3431_v58 = vsel %vm1313_vm2, %v3424_v9, %v3426_v11  ;;  %v3432_v61 = vsel %vm1313_vm2, %v3426_v11, %v3428_v25  ;;  %5581 = vmatpush1.bf16.msra.mxu0 %v5580_v50  ;;  %v4006_v14 = vld [vmem:[#allocation3 + $0x78] sm:$0xff]  ;;  %v3901_v9 = vld [vmem:[#allocation2 + $0x34] sm:$0xf] }
 0x3f5   : > { %3820 = vrot.lane.b32.xlu0 %v8755_v47, %s9866_s21  ;;  %3439 = vst [vmem:[#allocation3 + $0x90] sm:$0xf] %v3431_v58  ;;  %3440 = vst [vmem:[#allocation3 + $0x98] sm:$0xf] %v3432_v61  ;;  %v5608_v59 = vpack.c.bf16 %v4006_v14, %v4002_v52 }
 0x3f7   : > { %v3453_v29 = vpop.permute.xlu1 %3452  ;;  %5609 = vmatprep.subr.bf16.mxu1 %v5608_v59  ;;  %v3451_v62 = vpop.permute.xlu0 %3450 }
 0x3f8   : > { %3848 = vrot.lane.b32.xlu1 %v8727_v28, %s9867_s27  ;;  %v3460_v45 = vsel %vm1345_vm0, %v3451_v62, %v3453_v29  ;;  %5611 = vmatpush1.bf16.msra.mxu1 %v5610_v39 }
 0x3f9   : > { %3824 = vrot.lane.b32.xlu0 %v5858_v46, %s9866_s21  ;;  %3468 = vst [vmem:[#allocation3 + $0x80] sm:$0xf0] %v3460_v45 }
 0x3fb   : > { %v3457_v18 = vpop.permute.xlu1 %3456  ;;  %v3455_v4 = vpop.permute.xlu0 %3454 }
 0x3fc   : > { %3852 = vrot.lane.b32.xlu1 %v8737_v30, %s9867_s27  ;;  %v3461_v10 = vsel %vm1345_vm0, %v3453_v29, %v3455_v4  ;;  %v3462_v33 = vsel %vm1345_vm0, %v3455_v4, %v3457_v18 }
 0x3fd   : > { %3850 = vrot.lane.b32.xlu0 %v8723_v31, %s9867_s27  ;;  %3469 = vst [vmem:[#allocation3 + $0x88] sm:$0xf0] %v3461_v10  ;;  %3470 = vst [vmem:[#allocation3 + $0x90] sm:$0xf0] %v3462_v33  ;;  %v3962_v10 = vld [vmem:[#allocation2 + $0x34] sm:$0xf] }
 0x3ff   : > { %v3481_v16 = vpop.permute.xlu1 %3480  ;;  %v3459_v26 = vpop.permute.xlu0 %3458 }
 0x400   : > { %3879 = vrot.lane.b32.xlu1 %v8716_v17, %s9868_s22  ;;  %v3463_v63 = vsel %vm1345_vm0, %v3457_v18, %v3459_v26  ;;  %v4007_v11 = vld [vmem:[#allocation3 + $0x80] sm:$0xff] }
 0x401   : > { %3854 = vrot.lane.b32.xlu0 %v3840_v32, %s9867_s27  ;;  %3471 = vst [vmem:[#allocation3 + $0x98] sm:$0xf0] %v3463_v63  ;;  %v8857_v32 = vcombine.low %v8671_v42, %v8671_v42 }
 0x403   : > { %v3485_v41 = vpop.permute.xlu1 %3484  ;;  %v3483_v19 = vpop.permute.xlu0 %3482 }
 0x404   : > { %3883 = vrot.lane.b32.xlu1 %v8723_v31, %s9868_s22  ;;  %v3490_v3 = vsel %vm1376_vm14, %v3481_v16, %v3483_v19  ;;  %v3491_v53 = vsel %vm1376_vm14, %v3483_v19, %v3485_v41  ;;  %v4008_v25 = vld [vmem:[#allocation3 + $0x88] sm:$0xff]  ;;  %v4009_v39 = vld [vmem:[#allocation3 + $0x90] sm:$0xff] }
 0x405   : > { %3881 = vrot.lane.b32.xlu0 %v8755_v47, %s9868_s22  ;;  %3498 = vst [vmem:[#allocation3 + $0xa0] sm:$0xf] %v3490_v3  ;;  %3499 = vst [vmem:[#allocation3 + $0xa8] sm:$0xf] %v3491_v53  ;;  %v5863_v3 = vld [vmem:[#allocation2 + $0x40] ss:$0 sps:$4 sm:$0xff]  }
 0x407   : > { %v3489_v49 = vpop.permute.xlu1 %3488  ;;  %v3487_v48 = vpop.permute.xlu0 %3486 }
 0x408   : > { %3846 = vrot.lane.b32.xlu1 %v8716_v17, %s9867_s27  ;;  %v3492_v7 = vsel %vm1376_vm14, %v3485_v41, %v3487_v48  ;;  %v3493_v0 = vsel %vm1376_vm14, %v3487_v48, %v3489_v49 }
 0x409   : > { %3885 = vrot.lane.b32.xlu0 %v5859_v23, %s9868_s22  ;;  %3500 = vst [vmem:[#allocation3 + $0xb0] sm:$0xf] %v3492_v7  ;;  %3501 = vst [vmem:[#allocation3 + $0xb8] sm:$0xf] %v3493_v0 }
 0x40b   : > { %v3514_v55 = vpop.permute.xlu1 %3513  ;;  %v3512_v54 = vpop.permute.xlu0 %3511 }
 0x40c   : > { %3909 = vrot.lane.b32.xlu1 %v8727_v28, %s9869_s25  ;;  %v3521_v56 = vsel %vm9935_vm1, %v3512_v54, %v3514_v55  ;;  %vm9939_vm1 = vcmask 146432   ;;  %v4278_v54 = vld [vmem:[#allocation2 + $0x40] sm:$0xf] }
 0x40d   : > { %3877 = vrot.lane.b32.xlu0 %v8745_v37, %s9868_s22  ;;  %3529 = vst [vmem:[#allocation3 + $0xa0] sm:$0xf0] %v3521_v56 }
 0x40f   : > { %v3518_v40 = vpop.permute.xlu1 %3517  ;;  %v3516_v5 = vpop.permute.xlu0 %3515 }
 0x410   : > { %3913 = vrot.lane.b32.xlu1 %v8737_v30, %s9869_s25  ;;  %v3522_v43 = vsel %vm9936_vm4, %v3514_v55, %v3516_v5  ;;  %v3523_v35 = vsel %vm9937_vm12, %v3516_v5, %v3518_v40  ;;  %vm9940_vm4 = vmmov %vm9939_vm1 }
 0x411   : > { %3911 = vrot.lane.b32.xlu0 %v8723_v31, %s9869_s25  ;;  %3530 = vst [vmem:[#allocation3 + $0xa8] sm:$0xf0] %v3522_v43  ;;  %3531 = vst [vmem:[#allocation3 + $0xb0] sm:$0xf0] %v3523_v35 }
 0x412   : > { %vm9942_vm12 = vmmov %vm9939_vm1 }
 0x413   : > { %v3542_v57 = vpop.permute.xlu1 %3541  ;;  %v3520_v20 = vpop.permute.xlu0 %3519 }
 0x414   : > { %3940 = vrot.lane.b32.xlu1 %v8716_v17, %s9870_s15  ;;  %v3524_v44 = vsel %vm9938_vm10, %v3518_v40, %v3520_v20  ;;  %v4011_v2 = vld [vmem:[#allocation3 + $0xa0] sm:$0xff]  ;;  %vm9943_vm10 = vmmov %vm9939_vm1  ;;  %v5864_v20 = vld [vmem:[#allocation2 + $0x40] ss:$0 sps:$4 sm:$0xff]  }
 0x415   : > { %3915 = vrot.lane.b32.xlu0 %v3901_v9, %s9869_s25  ;;  %3532 = vst [vmem:[#allocation3 + $0xb8] sm:$0xf0] %v3524_v44  ;;  %v5584_v58 = vpack.c.bf16 %v4011_v2, %v4007_v11 }
 0x417   : > { %v3546_v51 = vpop.permute.xlu1 %3545  ;;  %v3544_v1 = vpop.permute.xlu0 %3543 }
 0x418   : > { %3944 = vrot.lane.b32.xlu1 %v8723_v31, %s9870_s15  ;;  %v3551_v8 = vsel %vm9939_vm1, %v3542_v57, %v3544_v1  ;;  %v3552_v13 = vsel %vm9940_vm4, %v3544_v1, %v3546_v51  ;;  %v4012_v15 = vld [vmem:[#allocation3 + $0xa8] sm:$0xff]  ;;  %v4013_v52 = vld [vmem:[#allocation3 + $0xb0] sm:$0xff]  ;;  %vm9944_vm1 = vcmask 138240  }
 0x419   : > { %3942 = vrot.lane.b32.xlu0 %v8755_v47, %s9870_s15  ;;  %3559 = vst [vmem:[#allocation3 + $0xc0] sm:$0xf] %v3551_v8  ;;  %3560 = vst [vmem:[#allocation3 + $0xc8] sm:$0xf] %v3552_v13  ;;  %v5582_v50 = vpack.c.bf16 %v4012_v15, %v4008_v25  ;;  %v4010_v47 = vld [vmem:[#allocation3 + $0x98] sm:$0xff] }
 0x41a   : > { %vm9945_vm4 = vmmov %vm9944_vm1 }
 0x41b   : > { %v3550_v24 = vpop.permute.xlu1 %3549  ;;  %v3548_v61 = vpop.permute.xlu0 %3547  ;;  %5583 = vmatprep.subr.bf16.mxu0 %v5582_v50  ;;  %v8892_v50 = vcombine.low %v8654_v6, %v8654_v6 }
 0x41c   : > { %3970 = vrot.lane.b32.xlu1 %v8727_v28, %s9941_s18  ;;  %v3553_v14 = vsel %vm9942_vm12, %v3546_v51, %v3548_v61  ;;  %v3554_v29 = vsel %vm9943_vm10, %v3548_v61, %v3550_v24  ;;  %5585 = vmatpush1.bf16.msra.mxu0 %v5584_v58  ;;  %v4014_v59 = vld [vmem:[#allocation3 + $0xb8] sm:$0xff]  ;;  %v5614_v28 = vpack.c.bf16 %v4013_v52, %v4009_v39  ;;  %vm9946_vm12 = vmmov %vm9944_vm1 }
 0x41d   : > { %3946 = vrot.lane.b32.xlu0 %v5860_v38, %s9870_s15  ;;  %3561 = vst [vmem:[#allocation3 + $0xd0] sm:$0xf] %v3553_v14  ;;  %3562 = vst [vmem:[#allocation3 + $0xd8] sm:$0xf] %v3554_v29  ;;  %v5612_v46 = vpack.c.bf16 %v4014_v59, %v4010_v47 }
 0x41e   : > { %vm9947_vm10 = vmmov %vm9944_vm1 }
 0x41f   : > { %v3575_v60 = vpop.permute.xlu1 %3574  ;;  %5613 = vmatprep.subr.bf16.mxu1 %v5612_v46  ;;  %v3573_v62 = vpop.permute.xlu0 %3572 }
 0x420   : > { %3974 = vrot.lane.b32.xlu1 %v8737_v30, %s9941_s18  ;;  %v3582_v45 = vsel %vm9944_vm1, %v3573_v62, %v3575_v60  ;;  %5615 = vmatpush1.bf16.msra.mxu1 %v5614_v28  ;;  %vm9948_vm1 = vcmask 130048  }
 0x421   : > { %3972 = vrot.lane.b32.xlu0 %v8723_v31, %s9941_s18  ;;  %3590 = vst [vmem:[#allocation3 + $0xc0] sm:$0xf0] %v3582_v45 }
 0x423   : > { %v3579_v18 = vpop.permute.xlu1 %3578  ;;  %v3577_v4 = vpop.permute.xlu0 %3576 }
 0x424   : > { %3907 = vrot.lane.b32.xlu1 %v8716_v17, %s9869_s25  ;;  %v3583_v33 = vsel %vm9945_vm4, %v3575_v60, %v3577_v4  ;;  %v3584_v30 = vsel %vm9946_vm12, %v3577_v4, %v3579_v18  ;;  %vm9949_vm4 = vmmov %vm9948_vm1 }
 0x425   : > { %3976 = vrot.lane.b32.xlu0 %v3962_v10, %s9941_s18  ;;  %3591 = vst [vmem:[#allocation3 + $0xc8] sm:$0xf0] %v3583_v33  ;;  %3592 = vst [vmem:[#allocation3 + $0xd0] sm:$0xf0] %v3584_v30  ;;  %v4339_v30 = vld [vmem:[#allocation2 + $0x40] sm:$0xf] }
 0x426   : > { %vm9950_vm12 = vmmov %vm9948_vm1 }
 0x427   : > { %v3603_v16 = vpop.permute.xlu1 %3602  ;;  %v3581_v31 = vpop.permute.xlu0 %3580 }
 0x428   : > { %3968 = vrot.lane.b32.xlu1 %v8716_v17, %s9941_s18  ;;  %v3585_v26 = vsel %vm9947_vm10, %v3579_v18, %v3581_v31  ;;  %vm9951_vm10 = vmmov %vm9948_vm1  ;;  %v4015_v24 = vld [vmem:[#allocation3 + $0xc0] sm:$0xff] }
 0x429   : > { %3938 = vrot.lane.b32.xlu0 %v8745_v37, %s9870_s15  ;;  %3593 = vst [vmem:[#allocation3 + $0xd8] sm:$0xf0] %v3585_v26 }
 0x42b   : > { %v3607_v63 = vpop.permute.xlu1 %3606  ;;  %v3605_v41 = vpop.permute.xlu0 %3604 }
 0x42c   : > { %4258 = vrot.lane.b32.xlu1 %v8857_v32, %s9876_s2  ;;  %v3612_v19 = vsel %vm9948_vm1, %v3603_v16, %v3605_v41  ;;  %v3613_v17 = vsel %vm9949_vm4, %v3605_v41, %v3607_v63  ;;  %vm9952_vm1 = vcmask 64512   ;;  %v4016_v8 = vld [vmem:[#allocation3 + $0xc8] sm:$0xff]  ;;  %v4017_v60 = vld [vmem:[#allocation3 + $0xd0] sm:$0xff] }
 0x42d   : > { %4256 = vrot.lane.b32.xlu0 %v8654_v6, %s9876_s2  ;;  %3620 = vst [vmem:[#allocation3 + $0xe0] sm:$0xf] %v3612_v19  ;;  %3621 = vst [vmem:[#allocation3 + $0xe8] sm:$0xf] %v3613_v17  ;;  %v5865_v17 = vld [vmem:[#allocation2 + $0x40] ss:$0 sps:$4 sm:$0xff]  }
 0x42e   : > { %vm9953_vm4 = vmmov %vm9952_vm1 }
 0x42f   : > { %v3611_v37 = vpop.permute.xlu1 %3610  ;;  %v3609_v53 = vpop.permute.xlu0 %3608 }
 0x430   : > { %4262 = vrot.lane.b32.xlu1 %v5863_v3, %s9876_s2  ;;  %v3614_v49 = vsel %vm9950_vm12, %v3607_v63, %v3609_v53  ;;  %v3615_v23 = vsel %vm9951_vm10, %v3609_v53, %v3611_v37  ;;  %vm9954_vm12 = vmmov %vm9952_vm1  ;;  %v4018_v14 = vld [vmem:[#allocation3 + $0xd8] sm:$0xff] }
 0x431   : > { %4260 = vrot.lane.b32.xlu0 %v8671_v42, %s9876_s2  ;;  %3622 = vst [vmem:[#allocation3 + $0xf0] sm:$0xf] %v3614_v49  ;;  %3623 = vst [vmem:[#allocation3 + $0xf8] sm:$0xf] %v3615_v23 }
 0x432   : > { %vm9955_vm10 = vmmov %vm9952_vm1 }
 0x433   : > { %v3636_v48 = vpop.permute.xlu1 %3635  ;;  %v3634_v7 = vpop.permute.xlu0 %3633 }
 0x434   : > { %4288 = vrot.lane.b32.xlu1 %v8671_v42, %s9880_s12  ;;  %v3643_v0 = vsel %vm9952_vm1, %v3634_v7, %v3636_v48  ;;  %vm9956_vm1 = vcmask 56320  }
 0x435   : > { %4286 = vrot.lane.b32.xlu0 %v8665_v36, %s9880_s12  ;;  %3651 = vst [vmem:[#allocation3 + $0xe0] sm:$0xf0] %v3643_v0 }
 0x437   : > { %v3640_v55 = vpop.permute.xlu1 %3639  ;;  %v3638_v56 = vpop.permute.xlu0 %3637 }
 0x438   : > { %4292 = vrot.lane.b32.xlu1 %v4278_v54, %s9880_s12  ;;  %v3644_v40 = vsel %vm9953_vm4, %v3636_v48, %v3638_v56  ;;  %v3645_v5 = vsel %vm9954_vm12, %v3638_v56, %v3640_v55  ;;  %vm9957_vm4 = vmmov %vm9956_vm1 }
 0x439   : > { %4290 = vrot.lane.b32.xlu0 %v8682_v22, %s9880_s12  ;;  %3652 = vst [vmem:[#allocation3 + $0xe8] sm:$0xf0] %v3644_v40  ;;  %3653 = vst [vmem:[#allocation3 + $0xf0] sm:$0xf0] %v3645_v5 }
 0x43a   : > { %vm9958_vm12 = vmmov %vm9956_vm1 }
 0x43b   : > { %v3664_v43 = vpop.permute.xlu1 %3663  ;;  %v3642_v35 = vpop.permute.xlu0 %3641 }
 0x43c   : > { %4319 = vrot.lane.b32.xlu1 %v8857_v32, %s9886_s26  ;;  %v3646_v57 = vsel %vm9955_vm10, %v3640_v55, %v3642_v35  ;;  %v4019_v51 = vld [vmem:[#allocation3 + $0xe0] sm:$0xff]  ;;  %vm9959_vm10 = vmmov %vm9956_vm1  ;;  %v4400_v55 = vld [vmem:[#allocation2 + $0x40] sm:$0xf] }
 0x43d   : > { %4317 = vrot.lane.b32.xlu0 %v8654_v6, %s9886_s26  ;;  %3654 = vst [vmem:[#allocation3 + $0xf8] sm:$0xf0] %v3646_v57  ;;  %v5588_v11 = vpack.c.bf16 %v4019_v51, %v4015_v24  ;;  %v5866_v57 = vld [vmem:[#allocation2 + $0x40] ss:$0 sps:$4 sm:$0xff]  }
 0x43f   : > { %v3668_v9 = vpop.permute.xlu1 %3667  ;;  %v3666_v44 = vpop.permute.xlu0 %3665 }
 0x440   : > { %4323 = vrot.lane.b32.xlu1 %v5864_v20, %s9886_s26  ;;  %v3673_v1 = vsel %vm9956_vm1, %v3664_v43, %v3666_v44  ;;  %v3674_v2 = vsel %vm9957_vm4, %v3666_v44, %v3668_v9  ;;  %v4020_v13 = vld [vmem:[#allocation3 + $0xe8] sm:$0xff]  ;;  %v4021_v58 = vld [vmem:[#allocation3 + $0xf0] sm:$0xff]  ;;  %vm9960_vm1 = vcmask 48128  }
 0x441   : > { %4321 = vrot.lane.b32.xlu0 %v8671_v42, %s9886_s26  ;;  %3681 = vst [vmem:[#allocation3 + $0x100] sm:$0xf] %v3673_v1  ;;  %3682 = vst [vmem:[#allocation3 + $0x108] sm:$0xf] %v3674_v2  ;;  %v5586_v15 = vpack.c.bf16 %v4020_v13, %v4016_v8  ;;  %v5618_v46 = vpack.c.bf16 %v4021_v58, %v4017_v60 }
 0x442   : > { %vm9961_vm4 = vmmov %vm9960_vm1 }
 0x443   : > { %v3672_v25 = vpop.permute.xlu1 %3671  ;;  %v3670_v38 = vpop.permute.xlu0 %3669  ;;  %5587 = vmatprep.subr.bf16.mxu0 %v5586_v15 }
 0x444   : > { %4284 = vrot.lane.b32.xlu1 %v8654_v6, %s9880_s12  ;;  %v3675_v61 = vsel %vm9958_vm12, %v3668_v9, %v3670_v38  ;;  %v3676_v52 = vsel %vm9959_vm10, %v3670_v38, %v3672_v25  ;;  %5589 = vmatpush1.bf16.msra.mxu0 %v5588_v11  ;;  %v4022_v29 = vld [vmem:[#allocation3 + $0xf8] sm:$0xff]  ;;  %vm9962_vm12 = vmmov %vm9960_vm1 }
 0x445   : > { %4254 = vrot.lane.b32.xlu0 %v8892_v50, %s9876_s2  ;;  %3683 = vst [vmem:[#allocation3 + $0x110] sm:$0xf] %v3675_v61  ;;  %3684 = vst [vmem:[#allocation3 + $0x118] sm:$0xf] %v3676_v52  ;;  %v5616_v59 = vpack.c.bf16 %v4022_v29, %v4018_v14 }
 0x446   : > { %vm9963_vm10 = vmmov %vm9960_vm1 }
 0x447   : > { %v3697_v47 = vpop.permute.xlu1 %3696  ;;  %5617 = vmatprep.subr.bf16.mxu1 %v5616_v59  ;;  %v3695_v39 = vpop.permute.xlu0 %3694 }
 0x448   : > { %4347 = vrot.lane.b32.xlu1 %v8665_v36, %s9890_s3  ;;  %v3704_v28 = vsel %vm9960_vm1, %v3695_v39, %v3697_v47  ;;  %5619 = vmatpush1.bf16.msra.mxu1 %v5618_v46  ;;  %vm9964_vm1 = vcmask 457728  }
 0x449   : > { %4315 = vrot.lane.b32.xlu0 %v8892_v50, %s9886_s26  ;;  %3712 = vst [vmem:[#allocation3 + $0x100] sm:$0xf0] %v3704_v28 }
 0x44b   : > { %v3701_v62 = vpop.permute.xlu1 %3700  ;;  %v3699_v45 = vpop.permute.xlu0 %3698 }
 0x44c   : > { %4351 = vrot.lane.b32.xlu1 %v8682_v22, %s9890_s3  ;;  %v3705_v18 = vsel %vm9961_vm4, %v3697_v47, %v3699_v45  ;;  %v3706_v4 = vsel %vm9962_vm12, %v3699_v45, %v3701_v62  ;;  %vm9965_vm4 = vmmov %vm9964_vm1 }
 0x44d   : > { %4349 = vrot.lane.b32.xlu0 %v8671_v42, %s9890_s3  ;;  %3713 = vst [vmem:[#allocation3 + $0x108] sm:$0xf0] %v3705_v18  ;;  %3714 = vst [vmem:[#allocation3 + $0x110] sm:$0xf0] %v3706_v4 }
 0x44e   : > { %vm9966_vm12 = vmmov %vm9964_vm1 }
 0x44f   : > { %v3725_v10 = vpop.permute.xlu1 %3724  ;;  %v3703_v33 = vpop.permute.xlu0 %3702 }
 0x450   : > { %4378 = vrot.lane.b32.xlu1 %v8654_v6, %s9896_s4  ;;  %v3707_v16 = vsel %vm9963_vm10, %v3701_v62, %v3703_v33  ;;  %vm9967_vm10 = vmmov %vm9964_vm1  ;;  %v4023_v25 = vld [vmem:[#allocation3 + $0x100] sm:$0xff] }
 0x451   : > { %4353 = vrot.lane.b32.xlu0 %v4339_v30, %s9890_s3  ;;  %3715 = vst [vmem:[#allocation3 + $0x118] sm:$0xf0] %v3707_v16 }
 0x453   : > { %v3729_v31 = vpop.permute.xlu1 %3728  ;;  %v3727_v26 = vpop.permute.xlu0 %3726 }
 0x454   : > { %4382 = vrot.lane.b32.xlu1 %v8671_v42, %s9896_s4  ;;  %v3734_v63 = vsel %vm9964_vm1, %v3725_v10, %v3727_v26  ;;  %v3735_v41 = vsel %vm9965_vm4, %v3727_v26, %v3729_v31  ;;  %vm9968_vm1 = vcmask 449536   ;;  %v4024_v1 = vld [vmem:[#allocation3 + $0x108] sm:$0xff]  ;;  %v4025_v47 = vld [vmem:[#allocation3 + $0x110] sm:$0xff]  ;;  %v4461_v10 = vld [vmem:[#allocation2 + $0x40] sm:$0xf] }
 0x455   : > { %4380 = vrot.lane.b32.xlu0 %v8857_v32, %s9896_s4  ;;  %3742 = vst [vmem:[#allocation3 + $0x120] sm:$0xf] %v3734_v63  ;;  %3743 = vst [vmem:[#allocation3 + $0x128] sm:$0xf] %v3735_v41  ;;  %v5867_v41 = vld [vmem:[#allocation2 + $0x40] ss:$0 sps:$4 sm:$0xff]  }
 0x456   : > { %vm9969_vm4 = vmmov %vm9968_vm1 }
 0x457   : > { %v3733_v19 = vpop.permute.xlu1 %3732  ;;  %v3731_v3 = vpop.permute.xlu0 %3730 }
 0x458   : > { %4408 = vrot.lane.b32.xlu1 %v8665_v36, %s9900_s9  ;;  %v3736_v37 = vsel %vm9966_vm12, %v3729_v31, %v3731_v3  ;;  %v3737_v53 = vsel %vm9967_vm10, %v3731_v3, %v3733_v19  ;;  %vm9970_vm12 = vmmov %vm9968_vm1  ;;  %v4026_v61 = vld [vmem:[#allocation3 + $0x118] sm:$0xff] }
 0x459   : > { %4384 = vrot.lane.b32.xlu0 %v5865_v17, %s9896_s4  ;;  %3744 = vst [vmem:[#allocation3 + $0x130] sm:$0xf] %v3736_v37  ;;  %3745 = vst [vmem:[#allocation3 + $0x138] sm:$0xf] %v3737_v53 }
 0x45a   : > { %vm9971_vm10 = vmmov %vm9968_vm1 }
 0x45b   : > { %v3758_v49 = vpop.permute.xlu1 %3757  ;;  %v3756_v23 = vpop.permute.xlu0 %3755 }
 0x45c   : > { %4412 = vrot.lane.b32.xlu1 %v8682_v22, %s9900_s9  ;;  %v3765_v48 = vsel %vm9968_vm1, %v3756_v23, %v3758_v49  ;;  %vm9972_vm1 = vcmask 441344  }
 0x45d   : > { %4410 = vrot.lane.b32.xlu0 %v8671_v42, %s9900_s9  ;;  %3773 = vst [vmem:[#allocation3 + $0x120] sm:$0xf0] %v3765_v48 }
 0x45f   : > { %v3762_v7 = vpop.permute.xlu1 %3761  ;;  %v3760_v0 = vpop.permute.xlu0 %3759 }
 0x460   : > { %4439 = vrot.lane.b32.xlu1 %v8654_v6, %s9906_s19  ;;  %v3766_v54 = vsel %vm9969_vm4, %v3758_v49, %v3760_v0  ;;  %v3767_v56 = vsel %vm9970_vm12, %v3760_v0, %v3762_v7  ;;  %vm9973_vm4 = vmmov %vm9972_vm1  ;;  %v8985_v0 = vld [vmem:[#allocation2 + $0x30] sm:$0xff] }
 0x461   : > { %4414 = vrot.lane.b32.xlu0 %v4400_v55, %s9900_s9  ;;  %3774 = vst [vmem:[#allocation3 + $0x128] sm:$0xf0] %v3766_v54  ;;  %3775 = vst [vmem:[#allocation3 + $0x130] sm:$0xf0] %v3767_v56 }
 0x462   : > { %vm9974_vm12 = vmmov %vm9972_vm1 }
 0x463   : > { %v3786_v40 = vpop.permute.xlu1 %3785  ;;  %v3764_v5 = vpop.permute.xlu0 %3763 }
 0x464   : > { %4443 = vrot.lane.b32.xlu1 %v8671_v42, %s9906_s19  ;;  %v3768_v43 = vsel %vm9971_vm10, %v3762_v7, %v3764_v5  ;;  %v4027_v9 = vld [vmem:[#allocation3 + $0x120] sm:$0xff]  ;;  %vm9975_vm10 = vmmov %vm9972_vm1 }
 0x465   : > { %4441 = vrot.lane.b32.xlu0 %v8857_v32, %s9906_s19  ;;  %3776 = vst [vmem:[#allocation3 + $0x138] sm:$0xf0] %v3768_v43  ;;  %v5592_v15 = vpack.c.bf16 %v4027_v9, %v4023_v25  ;;  %v4522_v43 = vld [vmem:[#allocation2 + $0x40] sm:$0xf] }
 0x467   : > { %v3790_v35 = vpop.permute.xlu1 %3789  ;;  %v3788_v20 = vpop.permute.xlu0 %3787 }
 0x468   : > { %4345 = vrot.lane.b32.xlu1 %v8654_v6, %s9890_s3  ;;  %v3795_v44 = vsel %vm9972_vm1, %v3786_v40, %v3788_v20  ;;  %v3796_v51 = vsel %vm9973_vm4, %v3788_v20, %v3790_v35  ;;  %v4028_v2 = vld [vmem:[#allocation3 + $0x128] sm:$0xff]  ;;  %v4029_v11 = vld [vmem:[#allocation3 + $0x130] sm:$0xff]  ;;  %vm9976_vm1 = vcmask 375808  }
 0x469   : > { %4445 = vrot.lane.b32.xlu0 %v5866_v57, %s9906_s19  ;;  %3803 = vst [vmem:[#allocation3 + $0x140] sm:$0xf] %v3795_v44  ;;  %3804 = vst [vmem:[#allocation3 + $0x148] sm:$0xf] %v3796_v51  ;;  %v5590_v13 = vpack.c.bf16 %v4028_v2, %v4024_v1  ;;  %v5622_v59 = vpack.c.bf16 %v4029_v11, %v4025_v47  ;;  %v5870_v11 = vld [vmem:[#allocation2 + $0x40] ss:$0 sps:$4 sm:$0xff]  }
 0x46a   : > { %vm9977_vm4 = vmmov %vm9976_vm1 }
 0x46b   : > { %v3794_v8 = vpop.permute.xlu1 %3793  ;;  %v3792_v24 = vpop.permute.xlu0 %3791  ;;  %5591 = vmatprep.subr.bf16.mxu0 %v5590_v13 }
 0x46c   : > { %4406 = vrot.lane.b32.xlu1 %v8654_v6, %s9900_s9  ;;  %v3797_v38 = vsel %vm9974_vm12, %v3790_v35, %v3792_v24  ;;  %v3798_v58 = vsel %vm9975_vm10, %v3792_v24, %v3794_v8  ;;  %5593 = vmatpush1.bf16.msra.mxu0 %v5592_v15  ;;  %v4030_v52 = vld [vmem:[#allocation3 + $0x138] sm:$0xff]  ;;  %vm9978_vm12 = vmmov %vm9976_vm1  ;;  %v8991_v35 = vld [vmem:[#allocation2 + $0x38] sm:$0xff] }
 0x46d   : > { %4376 = vrot.lane.b32.xlu0 %v8892_v50, %s9896_s4  ;;  %3805 = vst [vmem:[#allocation3 + $0x150] sm:$0xf] %v3797_v38  ;;  %3806 = vst [vmem:[#allocation3 + $0x158] sm:$0xf] %v3798_v58  ;;  %v5620_v29 = vpack.c.bf16 %v4030_v52, %v4026_v61  ;;  %v9000_v44 = vcombine.low %v8991_v35, %v8991_v35 }
 0x46e   : > { %vm9979_vm10 = vmmov %vm9976_vm1 }
 0x46f   : > { %v3819_v14 = vpop.permute.xlu1 %3818  ;;  %5621 = vmatprep.subr.bf16.mxu1 %v5620_v29  ;;  %v3817_v60 = vpop.permute.xlu0 %3816 }
 0x470   : > { %4469 = vrot.lane.b32.xlu1 %v8665_v36, %s9910_s30  ;;  %v3826_v46 = vsel %vm9976_vm1, %v3817_v60, %v3819_v14  ;;  %5623 = vmatpush1.bf16.msra.mxu1 %v5622_v59  ;;  %vm9980_vm1 = vcmask 367616  }
 0x471   : > { %4437 = vrot.lane.b32.xlu0 %v8892_v50, %s9906_s19  ;;  %3834 = vst [vmem:[#allocation3 + $0x140] sm:$0xf0] %v3826_v46 }
 0x473   : > { %v3823_v39 = vpop.permute.xlu1 %3822  ;;  %v3821_v28 = vpop.permute.xlu0 %3820 }
 0x474   : > { %4473 = vrot.lane.b32.xlu1 %v8682_v22, %s9910_s30  ;;  %v3827_v62 = vsel %vm9977_vm4, %v3819_v14, %v3821_v28  ;;  %v3828_v45 = vsel %vm9978_vm12, %v3821_v28, %v3823_v39  ;;  %vm9981_vm4 = vmmov %vm9980_vm1 }
 0x475   : > { %4471 = vrot.lane.b32.xlu0 %v8671_v42, %s9910_s30  ;;  %3835 = vst [vmem:[#allocation3 + $0x148] sm:$0xf0] %v3827_v62  ;;  %3836 = vst [vmem:[#allocation3 + $0x150] sm:$0xf0] %v3828_v45  ;;  %v9023_v62 = vcombine.high %v8985_v0, %v8985_v0 }
 0x476   : > { %vm9982_vm12 = vmmov %vm9980_vm1 }
 0x477   : > { %v3849_v18 = vpop.permute.xlu1 %3848  ;;  %v3825_v4 = vpop.permute.xlu0 %3824 }
 0x478   : > { %4500 = vrot.lane.b32.xlu1 %v8654_v6, %s9916_s10  ;;  %v3829_v33 = vsel %vm9979_vm10, %v3823_v39, %v3825_v4  ;;  %vm9983_vm10 = vcmask 359424   ;;  %v4031_v45 = vld [vmem:[#allocation3 + $0x140] sm:$0xff] }
 0x479   : > { %4475 = vrot.lane.b32.xlu0 %v4461_v10, %s9910_s30  ;;  %3837 = vst [vmem:[#allocation3 + $0x158] sm:$0xf0] %v3829_v33 }
 0x47b   : > { %v3853_v30 = vpop.permute.xlu1 %3852  ;;  %v3851_v16 = vpop.permute.xlu0 %3850 }
 0x47c   : > { %4504 = vrot.lane.b32.xlu1 %v8671_v42, %s9916_s10  ;;  %v3857_v31 = vsel %vm9980_vm1, %v3849_v18, %v3851_v16  ;;  %v3858_v26 = vsel %vm9981_vm4, %v3851_v16, %v3853_v30  ;;  %vm9984_vm1 = vmmov %vm9983_vm10  ;;  %v4032_v8 = vld [vmem:[#allocation3 + $0x148] sm:$0xff]  ;;  %v4033_v60 = vld [vmem:[#allocation3 + $0x150] sm:$0xff]  ;;  %v9037_v16 = vcombine.high %v8991_v35, %v8991_v35 }
 0x47d   : > { %4502 = vrot.lane.b32.xlu0 %v8857_v32, %s9916_s10  ;;  %3865 = vst [vmem:[#allocation3 + $0x168] sm:$0xf] %v3857_v31  ;;  %3866 = vst [vmem:[#allocation3 + $0x170] sm:$0xf] %v3858_v26 }
 0x47f   : > { %v3880_v63 = vpop.permute.xlu1 %3879  ;;  %v3855_v19 = vpop.permute.xlu0 %3854 }
 0x480   : > { %4530 = vrot.lane.b32.xlu1 %v8665_v36, %s9920_s0  ;;  %v3859_v17 = vsel %vm9982_vm12, %v3853_v30, %v3855_v19  ;;  %vm9985_vm12 = vmmov %vm9984_vm1  ;;  %v4034_v14 = vld [vmem:[#allocation3 + $0x158] sm:$0xff] }
 0x481   : > { %4506 = vrot.lane.b32.xlu0 %v5867_v41, %s9916_s10  ;;  %3867 = vst [vmem:[#allocation3 + $0x178] sm:$0xf] %v3859_v17  ;;  %v4583_v17 = vld [vmem:[#allocation2 + $0x40] sm:$0xf] }
 0x483   : > { %v3884_v3 = vpop.permute.xlu1 %3883  ;;  %v3086_v37 = vpop.f32.mrb[2].mxu0 }
 0x484   : > { %4534 = vrot.lane.b32.xlu1 %v8682_v22, %s9920_s0  ;;  %v3087_v32 = vadd.f32 %v3086_v37, %v8621_v21  ;;  %v3882_v53 = vpop.permute.xlu0 %3881  ;;  %v3088_v49 = vpop.f32.mrb[3].mxu0 }
 0x485   : > { %v3888_v23 = vsel %vm9983_vm10, %v3880_v63, %v3882_v53  ;;  %v3889_v36 = vsel %vm9984_vm1, %v3882_v53, %v3884_v3  ;;  %v3089_v48 = vadd.f32 %v3088_v49, %v8621_v21  ;;  %4532 = vrot.lane.b32.xlu0 %v8671_v42, %s9920_s0  ;;  %vm9986_vm10 = vmmov %vm9984_vm1  ;;  %vm9987_vm1 = vcmask 293888  }
 0x486   : > { %3896 = vst [vmem:[#allocation3 + $0x168] sm:$0xf0] %v3888_v23  ;;  %3897 = vst [vmem:[#allocation3 + $0x170] sm:$0xf0] %v3889_v36 }
 0x487   : > { %v3847_v7 = vpop.permute.xlu1 %3846  ;;  %v3166_v22 = vcombine.low %v3087_v32, %v3089_v48  ;;  %v3157_v54 = vpop.f32.mrb[2].mxu1 }
 0x488   : > { %v3856_v55 = vsel %vm9981_vm4, %v3847_v7, %v3849_v18  ;;  %4561 = vrot.lane.b32.xlu1 %v8985_v0, %s9926_s29  ;;  %v3158_v56 = vadd.f32 %v3157_v54, %v8621_v21  ;;  %v3159_v40 = vpop.f32.mrb[3].mxu1  ;;  %v3886_v5 = vpop.permute.xlu0 %3885  ;;  %vm9988_vm4 = vmmov %vm9987_vm1  ;;  %v5873_v7 = vld [vmem:[#allocation2 + $0x40] ss:$0 sps:$4 sm:$0xff]  }
 0x489   : > { %3864 = vst [vmem:[#allocation3 + $0x160] sm:$0xf] %v3856_v55  ;;  %v3160_v42 = vadd.f32 %v3159_v40, %v8621_v21  ;;  %v3890_v57 = vsel %vm9985_vm12, %v3884_v3, %v3886_v5  ;;  %4536 = vrot.lane.b32.xlu0 %v4522_v43, %s9920_s0  ;;  %v3174_v1 = vrot.slane %v3166_v22, %v8531_v12  ;;  %vm9989_vm12 = vmmov %vm9987_vm1 }
 0x48a   : > { %3898 = vst [vmem:[#allocation3 + $0x178] sm:$0xf0] %v3890_v57 }
 0x48b   : > { %v8996_v20 = vpop.permute.xlu1 %3909  ;;  %v3167_v9 = vcombine.low %v3158_v56, %v3160_v42 }
 0x48c   : > { %4565 = vrot.lane.b32.xlu1 %v8991_v35, %s9926_s29  ;;  %v3878_v51 = vpop.permute.xlu0 %3877 }
 0x48d   : > { %v3181_v21 = vrot.slane %v3167_v9, %v8531_v12  ;;  %v3887_v2 = vsel %vm9986_vm10, %v3878_v51, %v3880_v63  ;;  %4563 = vrot.lane.b32.xlu0 %v9000_v44, %s9926_s29  ;;  %v4036_v13 = vld [vmem:[#allocation3 + $0x168] sm:$0xff]  ;;  %v4037_v58 = vld [vmem:[#allocation3 + $0x170] sm:$0xff]  ;;  %vm9990_vm10 = vcmask 285696  }
 0x48e   : > { %3895 = vst [vmem:[#allocation3 + $0x160] sm:$0xf0] %v3887_v2  ;;  %v5594_v15 = vpack.c.bf16 %v4036_v13, %v4032_v8  ;;  %v5626_v46 = vpack.c.bf16 %v4037_v58, %v4033_v60  ;;  %v4644_v13 = vld [vmem:[#allocation2 + $0x40] sm:$0xf] }
 0x48f   : > { %v3914_v25 = vpop.permute.xlu1 %3913  ;;  %v3182_v24 = vcombine.low %v3174_v1, %v3181_v21 }
 0x490   : > { %4467 = vrot.lane.b32.xlu1 %v8654_v6, %s9910_s30  ;;  %v3912_v38 = vpop.permute.xlu0 %3911  ;;  %5595 = vmatprep.subr.bf16.mxu0 %v5594_v15 }
 0x491   : > { %3184 = vst [vmem:[%s8554_s20 + $0x8] sm:$0xff] %v3182_v24  ;;  %v3918_v61 = vsel %vm9987_vm1, %v8996_v20, %v3912_v38  ;;  %v3919_v52 = vsel %vm9988_vm4, %v3912_v38, %v3914_v25  ;;  %4567 = vrot.lane.b32.xlu0 %v5870_v11, %s9926_s29  ;;  %v4038_v29 = vld [vmem:[#allocation3 + $0x178] sm:$0xff]  ;;  %vm9991_vm1 = vmmov %vm9990_vm10 }
 0x492   : > { %3926 = vst [vmem:[#allocation3 + $0x188] sm:$0xf] %v3918_v61  ;;  %3927 = vst [vmem:[#allocation3 + $0x190] sm:$0xf] %v3919_v52  ;;  %v5624_v59 = vpack.c.bf16 %v4038_v29, %v4034_v14  ;;  %v3990_v38 = vld [vmem:[%s9439_s5] sm:$0x3] }
 0x493   : > { %v3941_v47 = vpop.permute.xlu1 %3940  ;;  %vm9992_vm4 = vmmov %vm9991_vm1 }
 0x494   : > { %4528 = vrot.lane.b32.xlu1 %v8654_v6, %s9920_s0  ;;  %5625 = vmatprep.subr.bf16.mxu1 %v5624_v59  ;;  %v3916_v39 = vpop.permute.xlu0 %3915  ;;  %v9027_v6 = vcombine.low %v8985_v0, %v8985_v0 }
 0x495   : > { %v3920_v28 = vsel %vm9989_vm12, %v3914_v25, %v3916_v39  ;;  %4498 = vrot.lane.b32.xlu0 %v8892_v50, %s9916_s10  ;;  %5627 = vmatpush1.bf16.msra.mxu1 %v5626_v46  ;;  %v4035_v18 = vld [vmem:[#allocation3 + $0x160] sm:$0xff] }
 0x496   : > { %3928 = vst [vmem:[#allocation3 + $0x198] sm:$0xf] %v3920_v28  ;;  %v5596_v10 = vpack.c.bf16 %v4035_v18, %v4031_v45 }
 0x497   : > { %v3945_v4 = vpop.permute.xlu1 %3944 }
 0x498   : > { %4591 = vrot.lane.b32.xlu1 %v9023_v62, %s9930_s7  ;;  %v3943_v33 = vpop.permute.xlu0 %3942  ;;  %5597 = vmatpush1.bf16.msra.mxu0 %v5596_v10 }
 0x499   : > { %v3949_v50 = vsel %vm9990_vm10, %v3941_v47, %v3943_v33  ;;  %v3950_v30 = vsel %vm9991_vm1, %v3943_v33, %v3945_v4  ;;  %4559 = vrot.lane.b32.xlu0 %v9027_v6, %s9926_s29  ;;  %vm9993_vm10 = vmmov %vm9991_vm1 }
 0x49a   : > { %3957 = vst [vmem:[#allocation3 + $0x188] sm:$0xf0] %v3949_v50  ;;  %3958 = vst [vmem:[#allocation3 + $0x190] sm:$0xf0] %v3950_v30 }
 0x49b   : > { %v3971_v31 = vpop.permute.xlu1 %3970 }
 0x49c   : > { %4595 = vrot.lane.b32.xlu1 %v9037_v16, %s9930_s7  ;;  %v3947_v26 = vpop.permute.xlu0 %3946 }
 0x49d   : > { %v3951_v63 = vsel %vm9992_vm4, %v3945_v4, %v3947_v26  ;;  %4593 = vrot.lane.b32.xlu0 %v8991_v35, %s9930_s7  ;;  %vm10004_vm4 = vcmask 130048  }
 0x49e   : > { %3959 = vst [vmem:[#allocation3 + $0x198] sm:$0xf0] %v3951_v63 }
 0x49f   : > { %v3975_v41 = vpop.permute.xlu1 %3974 }
 0x4a0   : > { %4622 = vrot.lane.b32.xlu1 %v8985_v0, %s9858_s1  ;;  %v3973_v19 = vpop.permute.xlu0 %3972 }
 0x4a1   : > { %v3979_v3 = vsel %vm1880_vm3, %v3971_v31, %v3973_v19  ;;  %v3980_v37 = vsel %vm1880_vm3, %v3973_v19, %v3975_v41  ;;  %4597 = vrot.lane.b32.xlu0 %v4583_v17, %s9930_s7  ;;  %v4040_v54 = vld [vmem:[#allocation3 + $0x188] sm:$0xff]  ;;  %v4041_v21 = vld [vmem:[#allocation3 + $0x190] sm:$0xff] }
 0x4a2   : > { %3987 = vst [vmem:[#allocation3 + $0x1a8] sm:$0xf] %v3979_v3  ;;  %3988 = vst [vmem:[#allocation3 + $0x1b0] sm:$0xf] %v3980_v37 }
 0x4a3   : > { %v3908_v32 = vpop.permute.xlu1 %3907 }
 0x4a4   : > { %v3917_v53 = vsel %vm9989_vm12, %v3908_v32, %v8996_v20  ;;  %4626 = vrot.lane.b32.xlu1 %v8991_v35, %s9858_s1  ;;  %v3977_v49 = vpop.permute.xlu0 %3976  ;;  %vm10005_vm12 = vmmov %vm10004_vm4 }
 0x4a5   : > { %3925 = vst [vmem:[#allocation3 + $0x180] sm:$0xf] %v3917_v53  ;;  %v3981_v23 = vsel %vm1880_vm3, %v3975_v41, %v3977_v49  ;;  %4624 = vrot.lane.b32.xlu0 %v9000_v44, %s9858_s1  ;;  %v4042_v20 = vld [vmem:[#allocation3 + $0x198] sm:$0xff] }
 0x4a6   : > { %3989 = vst [vmem:[#allocation3 + $0x1b8] sm:$0xf] %v3981_v23 }
 0x4a7   : > { %v3969_v36 = vpop.permute.xlu1 %3968 }
 0x4a8   : > { %v3978_v48 = vsel %vm1880_vm3, %v3969_v36, %v3971_v31  ;;  %4652 = vrot.lane.b32.xlu1 %v9023_v62, %s9859_s11  ;;  %v3939_v22 = vpop.permute.xlu0 %3938 }
 0x4a9   : > { %3986 = vst [vmem:[#allocation3 + $0x1a0] sm:$0xf] %v3978_v48  ;;  %v3948_v55 = vsel %vm9993_vm10, %v3939_v22, %v3941_v47  ;;  %4628 = vrot.lane.b32.xlu0 %v5873_v7, %s9858_s1  ;;  %v4044_v56 = vld [vmem:[#allocation3 + $0x1a8] sm:$0xf]  ;;  %v4045_v42 = vld [vmem:[#allocation3 + $0x1b0] sm:$0xf]  ;;  %vm10006_vm10 = vmmov %vm10004_vm4 }
 0x4aa   : > { %3956 = vst [vmem:[#allocation3 + $0x180] sm:$0xf0] %v3948_v55  ;;  %v5598_v5 = vpack.c.bf16 %v4044_v56, %v4040_v54  ;;  %v5631_v2 = vpack.c.bf16 %v4045_v42, %v4041_v21  ;;  %v5874_v47 = vld [vmem:[#allocation2 + $0x40] ss:$0 sps:$4 sm:$0xff]   ;;  %v9123_v48 = vld [vmem:[#allocation2 + $0x34] sm:$0xff] }
 0x4ab   : > { %v4259_v40 = vpop.permute.xlu1 %4258  ;;  %v9134_v54 = vcombine.high %v9123_v48, %v9123_v48 }
 0x4ac   : > { %4656 = vrot.lane.b32.xlu1 %v9037_v16, %s9859_s11  ;;  %v9063_v43 = vpop.permute.xlu0 %4256  ;;  %5600 = vmatprep.subr.msk.bf16.mxu0 %vm8172_vm15, %v5598_v5 }
 0x4ad   : > { %v4265_v57 = vsel %vm1093_vm8, %v9063_v43, %v4259_v40  ;;  %4654 = vrot.lane.b32.xlu0 %v8991_v35, %s9859_s11  ;;  %v4046_v9 = vld [vmem:[#allocation3 + $0x1b8] sm:$0xf] }
 0x4ae   : > { %4273 = vst [vmem:[#allocation3 + $0x8] sm:$0xf0] %v4265_v57  ;;  %v5628_v1 = vpack.c.bf16 %v4046_v9, %v4042_v20 }
 0x4af   : > { %v4263_v51 = vpop.permute.xlu1 %4262 }
 0x4b0   : > { %4683 = vrot.lane.b32.xlu1 %v8985_v0, %s9860_s16  ;;  %5630 = vmatprep.subr.msk.bf16.mxu1 %vm8172_vm15, %v5628_v1  ;;  %v4261_v8 = vpop.permute.xlu0 %4260  ;;  %v4043_v11 = vld [vmem:[#allocation3 + $0x1a0] sm:$0xf] }
 0x4b1   : > { %v4266_v25 = vsel %vm1093_vm8, %v4259_v40, %v4261_v8  ;;  %v4267_v15 = vsel %vm1093_vm8, %v4261_v8, %v4263_v51  ;;  %4658 = vrot.lane.b32.xlu0 %v4644_v13, %s9859_s11  ;;  %5633 = vmatpush1.bf16.msk.msra.mxu1 %vm8172_vm15, %v5631_v2  ;;  %v4039_v24 = vld [vmem:[#allocation3 + $0x180] sm:$0xff]  ;;  %v5876_v40 = vld [vmem:[#allocation2 + $0x40] ss:$0 sps:$4 sm:$0xff]   ;;  %v4766_v13 = vld [vmem:[#allocation2 + $0x44] sm:$0xf] }
 0x4b2   : > { %4274 = vst [vmem:[#allocation3 + $0x10] sm:$0xf0] %v4266_v25  ;;  %4275 = vst [vmem:[#allocation3 + $0x18] sm:$0xf0] %v4267_v15  ;;  %v5601_v61 = vpack.c.bf16 %v4043_v11, %v4039_v24 }
 0x4b3   : > { %v4289_v58 = vpop.permute.xlu1 %4288 }
 0x4b4   : > { %4687 = vrot.lane.b32.xlu1 %v8991_v35, %s9860_s16  ;;  %v4287_v52 = vpop.permute.xlu0 %4286  ;;  %5603 = vmatpush1.bf16.msk.msra.mxu0 %vm8172_vm15, %v5601_v61 }
 0x4b5   : > { %5441 = vmatmul.mubr.msk.f32.vlgmr.msra.gmra.mrb[4].mxu1 %vm1250_vm5, %v3990_v38  ;;  %v4295_v14 = vsel %vm1124_vm6, %v4287_v52, %v4289_v58  ;;  %4685 = vrot.lane.b32.xlu0 %v9000_v44, %s9860_s16  ;;  %v5040_v31 = vld [vmem:[#allocation3 + $0x8] sm:$0xff] }
 0x4b6   : > { %5251 = vmatprep.mubr.f32.mxu1 %v6084_v34  ;;  %4303 = vst [vmem:[#allocation3 + $0x28] sm:$0xf] %v4295_v14 }
 0x4b7   : > { %v4293_v29 = vpop.permute.xlu1 %4292  ;;  %5438 = vmatmul.mubr.msk.f32.vlgmr.msra.gmra.mrb[4].mxu0 %vm1250_vm5, %v3990_v38 }
 0x4b8   : > { %4589 = vrot.lane.b32.xlu1 %v8985_v0, %s9930_s7  ;;  %v4291_v59 = vpop.permute.xlu0 %4290  ;;  %5180 = vmatprep.mubr.f32.mxu0 %v6084_v34 }
 0x4b9   : > { %v4296_v60 = vsel %vm1124_vm6, %v4289_v58, %v4291_v59  ;;  %v4297_v46 = vsel %vm1124_vm6, %v4291_v59, %v4293_v29  ;;  %4689 = vrot.lane.b32.xlu0 %v5874_v47, %s9860_s16  ;;  %v5042_v17 = vld [vmem:[#allocation3 + $0x18] sm:$0xff]  ;;  %v5041_v32 = vld [vmem:[#allocation3 + $0x10] sm:$0xff] }
 0x4ba   : > { %4304 = vst [vmem:[#allocation3 + $0x30] sm:$0xf] %v4296_v60  ;;  %4305 = vst [vmem:[#allocation3 + $0x38] sm:$0xf] %v4297_v46 }
 0x4bb   : > { %v4320_v39 = vpop.permute.xlu1 %4319 }
 0x4bc   : > { %4650 = vrot.lane.b32.xlu1 %v8985_v0, %s9859_s11  ;;  %v4318_v28 = vpop.permute.xlu0 %4317 }
 0x4bd   : > { %v4326_v45 = vsel %vm1156_vm13, %v4318_v28, %v4320_v39  ;;  %4620 = vrot.lane.b32.xlu0 %v9027_v6, %s9858_s1 }
 0x4be   : > { %4334 = vst [vmem:[#allocation3 + $0x28] sm:$0xf0] %v4326_v45 }
 0x4bf   : > { %v4324_v34 = vpop.permute.xlu1 %4323 }
 0x4c0   : > { %4713 = vrot.lane.b32.xlu1 %v9023_v62, %s9861_s23  ;;  %v4322_v18 = vpop.permute.xlu0 %4321 }
 0x4c1   : > { %v4327_v4 = vsel %vm1156_vm13, %v4320_v39, %v4322_v18  ;;  %v4328_v10 = vsel %vm1156_vm13, %v4322_v18, %v4324_v34  ;;  %4681 = vrot.lane.b32.xlu0 %v9027_v6, %s9860_s16  ;;  %v9181_v39 = vcombine.low %v9123_v48, %v9123_v48 }
 0x4c2   : > { %4335 = vst [vmem:[#allocation3 + $0x30] sm:$0xf0] %v4327_v4  ;;  %4336 = vst [vmem:[#allocation3 + $0x38] sm:$0xf0] %v4328_v10 }
 0x4c3   : > { %v4285_v33 = vpop.permute.xlu1 %4284 }
 0x4c4   : > { %v4294_v50 = vsel %vm1124_vm6, %v4285_v33, %v4287_v52  ;;  %4717 = vrot.lane.b32.xlu1 %v9037_v16, %s9861_s23  ;;  %v4255_v30 = vpop.permute.xlu0 %4254  ;;  %v4705_v16 = vld [vmem:[#allocation2 + $0x40] sm:$0xf]  ;;  %v5880_v52 = vld [vmem:[#allocation2 + $0x44] ss:$0 sps:$4 sm:$0xff]  }
 0x4c5   : > { %4302 = vst [vmem:[#allocation3 + $0x20] sm:$0xf] %v4294_v50  ;;  %v4264_v62 = vsel %vm1093_vm8, %v4255_v30, %v9063_v43  ;;  %4715 = vrot.lane.b32.xlu0 %v8991_v35, %s9861_s23  ;;  %v5044_v26 = vld [vmem:[#allocation3 + $0x28] sm:$0xff]  ;;  %vm9994_vm8 = vcmask 211968  }
 0x4c6   : > { %4272 = vst [vmem:[#allocation3] sm:$0xf0] %v4264_v62  ;;  %v5634_v41 = vpack.c.bf16 %v5044_v26, %v5040_v31  ;;  %v4827_v26 = vld [vmem:[#allocation2 + $0x44] sm:$0xf]  ;;  %vm9995_vm6 = vmmov %vm9994_vm8 }
 0x4c7   : > { %v9117_v63 = vpop.permute.xlu1 %4347 }
 0x4c8   : > { %4744 = vrot.lane.b32.xlu1 %v8985_v0, %s9862_s24  ;;  %v4316_v19 = vpop.permute.xlu0 %4315  ;;  %5635 = vmatprep.subr.bf16.mxu0 %v5634_v41 }
 0x4c9   : > { %v4325_v3 = vsel %vm1156_vm13, %v4316_v19, %v4318_v28  ;;  %4719 = vrot.lane.b32.xlu0 %v4705_v16, %s9861_s23  ;;  %v5046_v37 = vld [vmem:[#allocation3 + $0x38] sm:$0xff]  ;;  %v5045_v53 = vld [vmem:[#allocation3 + $0x30] sm:$0xff]  ;;  %vm9996_vm13 = vmmov %vm9995_vm6 }
 0x4ca   : > { %4333 = vst [vmem:[#allocation3 + $0x20] sm:$0xf0] %v4325_v3  ;;  %v5664_v23 = vpack.c.bf16 %v5046_v37, %v5042_v17  ;;  %v5666_v36 = vpack.c.bf16 %v5045_v53, %v5041_v32 }
 0x4cb   : > { %v4352_v49 = vpop.permute.xlu1 %4351 }
 0x4cc   : > { %4748 = vrot.lane.b32.xlu1 %v8991_v35, %s9862_s24  ;;  %5665 = vmatprep.subr.bf16.mxu1 %v5664_v23  ;;  %v4350_v7 = vpop.permute.xlu0 %4349  ;;  %v9138_v35 = vld [vmem:[#allocation2 + $0x3c] sm:$0xff] }
 0x4cd   : > { %v4356_v22 = vsel %vm1187_vm9, %v9117_v63, %v4350_v7  ;;  %v4357_v55 = vsel %vm1187_vm9, %v4350_v7, %v4352_v49  ;;  %4746 = vrot.lane.b32.xlu0 %v9000_v44, %s9862_s24  ;;  %5667 = vmatpush1.bf16.msra.mxu1 %v5666_v36  ;;  %v9146_v44 = vcombine.high %v9138_v35, %v9138_v35  ;;  %v5039_v42 = vld [vmem:[#allocation3] sm:$0xff]  ;;  %v5881_v7 = vld [vmem:[#allocation2 + $0x44] ss:$0 sps:$4 sm:$0xff]  }
 0x4ce   : > { %4364 = vst [vmem:[#allocation3 + $0x48] sm:$0xf] %v4356_v22  ;;  %4365 = vst [vmem:[#allocation3 + $0x50] sm:$0xf] %v4357_v55  ;;  %v9161_v24 = vcombine.low %v9138_v35, %v9138_v35 }
 0x4cf   : > { %v9136_v56 = vpop.permute.xlu1 %4378 }
 0x4d0   : > { %4774 = vrot.lane.b32.xlu1 %v9134_v54, %s9863_s28  ;;  %v4354_v5 = vpop.permute.xlu0 %4353 }
 0x4d1   : > { %v4358_v43 = vsel %vm1187_vm9, %v4352_v49, %v4354_v5  ;;  %4750 = vrot.lane.b32.xlu0 %v5876_v40, %s9862_s24  ;;  %v5043_v57 = vld [vmem:[#allocation3 + $0x20] sm:$0xff] }
 0x4d2   : > { %4366 = vst [vmem:[#allocation3 + $0x58] sm:$0xf] %v4358_v43  ;;  %v5636_v9 = vpack.c.bf16 %v5043_v57, %v5039_v42 }
 0x4d3   : > { %v4383_v20 = vpop.permute.xlu1 %4382 }
 0x4d4   : > { %4778 = vrot.lane.b32.xlu1 %v9146_v44, %s9863_s28  ;;  %v4381_v51 = vpop.permute.xlu0 %4380  ;;  %5637 = vmatpush1.bf16.msra.mxu0 %v5636_v9 }
 0x4d5   : > { %v4387_v1 = vsel %vm1219_vm7, %v9136_v56, %v4381_v51  ;;  %v4388_v21 = vsel %vm1219_vm7, %v4381_v51, %v4383_v20  ;;  %4776 = vrot.lane.b32.xlu0 %v9138_v35, %s9863_s28 }
 0x4d6   : > { %4395 = vst [vmem:[#allocation3 + $0x48] sm:$0xf0] %v4387_v1  ;;  %4396 = vst [vmem:[#allocation3 + $0x50] sm:$0xf0] %v4388_v21  ;;  %v4888_v1 = vld [vmem:[#allocation2 + $0x44] sm:$0xf] }
 0x4d7   : > { %v4409_v2 = vpop.permute.xlu1 %4408 }
 0x4d8   : > { %4805 = vrot.lane.b32.xlu1 %v9123_v48, %s9864_s17  ;;  %v4385_v8 = vpop.permute.xlu0 %4384 }
 0x4d9   : > { %v4389_v25 = vsel %vm1219_vm7, %v4383_v20, %v4385_v8  ;;  %4780 = vrot.lane.b32.xlu0 %v4766_v13, %s9863_s28 }
 0x4da   : > { %4397 = vst [vmem:[#allocation3 + $0x58] sm:$0xf0] %v4389_v25 }
 0x4db   : > { %v4413_v15 = vpop.permute.xlu1 %4412 }
 0x4dc   : > { %4809 = vrot.lane.b32.xlu1 %v9138_v35, %s9864_s17  ;;  %v4411_v11 = vpop.permute.xlu0 %4410 }
 0x4dd   : > { %v4417_v38 = vsel %vm1250_vm5, %v4409_v2, %v4411_v11  ;;  %v4418_v58 = vsel %vm1250_vm5, %v4411_v11, %v4413_v15  ;;  %4807 = vrot.lane.b32.xlu0 %v9161_v24, %s9864_s17  ;;  %v5048_v33 = vld [vmem:[#allocation3 + $0x48] sm:$0xff]  ;;  %v5049_v37 = vld [vmem:[#allocation3 + $0x50] sm:$0xff]  ;;  %v5882_v11 = vld [vmem:[#allocation2 + $0x44] ss:$0 sps:$4 sm:$0xff]  }
 0x4de   : > { %4425 = vst [vmem:[#allocation3 + $0x68] sm:$0xf] %v4417_v38  ;;  %4426 = vst [vmem:[#allocation3 + $0x70] sm:$0xf] %v4418_v58 }
 0x4df   : > { %v4440_v61 = vpop.permute.xlu1 %4439 }
 0x4e0   : > { %4711 = vrot.lane.b32.xlu1 %v8985_v0, %s9861_s23  ;;  %v4415_v14 = vpop.permute.xlu0 %4414 }
 0x4e1   : > { %v4419_v29 = vsel %vm1250_vm5, %v4413_v15, %v4415_v14  ;;  %4811 = vrot.lane.b32.xlu0 %v5880_v52, %s9864_s17  ;;  %v5050_v19 = vld [vmem:[#allocation3 + $0x58] sm:$0xff] }
 0x4e2   : > { %4427 = vst [vmem:[#allocation3 + $0x78] sm:$0xf] %v4419_v29 }
 0x4e3   : > { %v4444_v47 = vpop.permute.xlu1 %4443 }
 0x4e4   : > { %4772 = vrot.lane.b32.xlu1 %v9123_v48, %s9863_s28  ;;  %v4442_v59 = vpop.permute.xlu0 %4441  ;;  %s5282_s28 = scalar_lea.sflag [#allocation8], %s10054_s13 }
 0x4e5   : > { %v4448_v60 = vsel %vm1282_vm11, %v4440_v61, %v4442_v59  ;;  %v4449_v46 = vsel %vm1282_vm11, %v4442_v59, %v4444_v47  ;;  %4742 = vrot.lane.b32.xlu0 %v9027_v6, %s9862_s24 }
 0x4e6   : > { %4456 = vst [vmem:[#allocation3 + $0x68] sm:$0xf0] %v4448_v60  ;;  %4457 = vst [vmem:[#allocation3 + $0x70] sm:$0xf0] %v4449_v46 }
 0x4e7   : > { %v4346_v0 = vpop.permute.xlu1 %4345 }
 0x4e8   : > { %v4355_v28 = vsel %vm1187_vm9, %v4346_v0, %v9117_v63  ;;  %4835 = vrot.lane.b32.xlu1 %v9134_v54, %s9865_s14  ;;  %v4446_v45 = vpop.permute.xlu0 %4445  ;;  %vm9997_vm9 = vmmov %vm9995_vm6 }
 0x4e9   : > { %4363 = vst [vmem:[#allocation3 + $0x40] sm:$0xf] %v4355_v28  ;;  %v4450_v34 = vsel %vm1282_vm11, %v4444_v47, %v4446_v45  ;;  %4803 = vrot.lane.b32.xlu0 %v9181_v39, %s9864_s17 }
 0x4ea   : > { %4458 = vst [vmem:[#allocation3 + $0x78] sm:$0xf0] %v4450_v34 }
 0x4eb   : > { %v4407_v6 = vpop.permute.xlu1 %4406 }
 0x4ec   : > { %v4416_v18 = vsel %vm1250_vm5, %v4407_v6, %v4409_v2  ;;  %4839 = vrot.lane.b32.xlu1 %v9146_v44, %s9865_s14  ;;  %v4377_v4 = vpop.permute.xlu0 %4376 }
 0x4ed   : > { %4424 = vst [vmem:[#allocation3 + $0x60] sm:$0xf] %v4416_v18  ;;  %v4386_v10 = vsel %vm1219_vm7, %v4377_v4, %v9136_v56  ;;  %4837 = vrot.lane.b32.xlu0 %v9138_v35, %s9865_s14  ;;  %v5052_v50 = vld [vmem:[#allocation3 + $0x68] sm:$0xff]  ;;  %v5053_v63 = vld [vmem:[#allocation3 + $0x70] sm:$0xff]  ;;  %vm9998_vm7 = vcmask 146432  }
 0x4ee   : > { %4394 = vst [vmem:[#allocation3 + $0x40] sm:$0xf0] %v4386_v10  ;;  %v5638_v62 = vpack.c.bf16 %v5052_v50, %v5048_v33  ;;  %v5670_v32 = vpack.c.bf16 %v5053_v63, %v5049_v37  ;;  %v4949_v50 = vld [vmem:[#allocation2 + $0x44] sm:$0xf] }
 0x4ef   : > { %v9197_v30 = vpop.permute.xlu1 %4469 }
 0x4f0   : > { %4866 = vrot.lane.b32.xlu1 %v9123_v48, %s9866_s21  ;;  %v4438_v31 = vpop.permute.xlu0 %4437  ;;  %5639 = vmatprep.subr.bf16.mxu0 %v5638_v62 }
 0x4f1   : > { %v4447_v41 = vsel %vm1282_vm11, %v4438_v31, %v4440_v61  ;;  %4841 = vrot.lane.b32.xlu0 %v4827_v26, %s9865_s14  ;;  %v5054_v16 = vld [vmem:[#allocation3 + $0x78] sm:$0xff]  ;;  %vm9999_vm11 = vmmov %vm9998_vm7 }
 0x4f2   : > { %4455 = vst [vmem:[#allocation3 + $0x60] sm:$0xf0] %v4447_v41  ;;  %v5668_v3 = vpack.c.bf16 %v5054_v16, %v5050_v19 }
 0x4f3   : > { %v4474_v17 = vpop.permute.xlu1 %4473 }
 0x4f4   : > { %4870 = vrot.lane.b32.xlu1 %v9138_v35, %s9866_s21  ;;  %5669 = vmatprep.subr.bf16.mxu1 %v5668_v3  ;;  %v4472_v53 = vpop.permute.xlu0 %4471 }
 0x4f5   : > { %v4478_v49 = vsel %vm1313_vm2, %v9197_v30, %v4472_v53  ;;  %v4479_v23 = vsel %vm1313_vm2, %v4472_v53, %v4474_v17  ;;  %4868 = vrot.lane.b32.xlu0 %v9161_v24, %s9866_s21  ;;  %5671 = vmatpush1.bf16.msra.mxu1 %v5670_v32  ;;  %v5047_v56 = vld [vmem:[#allocation3 + $0x40] sm:$0xff]  ;;  %v5883_v53 = vld [vmem:[#allocation2 + $0x44] ss:$0 sps:$4 sm:$0xff]  }
 0x4f6   : > { %4486 = vst [vmem:[#allocation3 + $0x88] sm:$0xf] %v4478_v49  ;;  %4487 = vst [vmem:[#allocation3 + $0x90] sm:$0xf] %v4479_v23 }
 0x4f7   : > { %v9210_v36 = vpop.permute.xlu1 %4500 }
 0x4f8   : > { %4896 = vrot.lane.b32.xlu1 %v9134_v54, %s9867_s27  ;;  %v4476_v22 = vpop.permute.xlu0 %4475 }
 0x4f9   : > { %v4480_v55 = vsel %vm1313_vm2, %v4474_v17, %v4476_v22  ;;  %4872 = vrot.lane.b32.xlu0 %v5881_v7, %s9866_s21  ;;  %v5051_v40 = vld [vmem:[#allocation3 + $0x60] sm:$0xff] }
 0x4fa   : > { %4488 = vst [vmem:[#allocation3 + $0x98] sm:$0xf] %v4480_v55  ;;  %v5640_v43 = vpack.c.bf16 %v5051_v40, %v5047_v56 }
 0x4fb   : > { %v4505_v5 = vpop.permute.xlu1 %4504 }
 0x4fc   : > { %4900 = vrot.lane.b32.xlu1 %v9146_v44, %s9867_s27  ;;  %v4503_v42 = vpop.permute.xlu0 %4502  ;;  %5641 = vmatpush1.bf16.msra.mxu0 %v5640_v43  ;;  %v5010_v43 = vld [vmem:[#allocation2 + $0x44] sm:$0xf] }
 0x4fd   : > { %v4509_v57 = vsel %vm1345_vm0, %v9210_v36, %v4503_v42  ;;  %v4510_v20 = vsel %vm1345_vm0, %v4503_v42, %v4505_v5  ;;  %4898 = vrot.lane.b32.xlu0 %v9138_v35, %s9867_s27 }
 0x4fe   : > { %4517 = vst [vmem:[#allocation3 + $0x88] sm:$0xf0] %v4509_v57  ;;  %4518 = vst [vmem:[#allocation3 + $0x90] sm:$0xf0] %v4510_v20 }
 0x4ff   : > { %v4531_v9 = vpop.permute.xlu1 %4530 }
 0x500   : > { %4927 = vrot.lane.b32.xlu1 %v9123_v48, %s9868_s22  ;;  %v4507_v51 = vpop.permute.xlu0 %4506 }
 0x501   : > { %v4511_v21 = vsel %vm1345_vm0, %v4505_v5, %v4507_v51  ;;  %4902 = vrot.lane.b32.xlu0 %v4888_v1, %s9867_s27  ;;  %v4047_v1 = vld [vmem:[%s9440_s6] sm:$0x3] }
 0x502   : > { %4519 = vst [vmem:[#allocation3 + $0x98] sm:$0xf0] %v4511_v21 }
 0x503   : > { %v4535_v2 = vpop.permute.xlu1 %4534 }
 0x504   : > { %4931 = vrot.lane.b32.xlu1 %v9138_v35, %s9868_s22  ;;  %v4533_v8 = vpop.permute.xlu0 %4532 }
 0x505   : > { %v4539_v13 = vsel %vm1376_vm14, %v4531_v9, %v4533_v8  ;;  %v4540_v25 = vsel %vm1376_vm14, %v4533_v8, %v4535_v2  ;;  %4929 = vrot.lane.b32.xlu0 %v9161_v24, %s9868_s22  ;;  %v5056_v6 = vld [vmem:[#allocation3 + $0x88] sm:$0xff]  ;;  %v5057_v19 = vld [vmem:[#allocation3 + $0x90] sm:$0xff] }
 0x506   : > { %4547 = vst [vmem:[#allocation3 + $0xa8] sm:$0xf] %v4539_v13  ;;  %4548 = vst [vmem:[#allocation3 + $0xb0] sm:$0xf] %v4540_v25 }
 0x507   : > { %v4562_v15 = vpop.permute.xlu1 %4561 }
 0x508   : > { %4833 = vrot.lane.b32.xlu1 %v9123_v48, %s9865_s14  ;;  %v4537_v38 = vpop.permute.xlu0 %4536  ;;  %s10056_s14 = sld [smem:[#allocation31_spill]] }
 0x509   : > { %v4541_v58 = vsel %vm1376_vm14, %v4535_v2, %v4537_v38  ;;  %4933 = vrot.lane.b32.xlu0 %v5882_v11, %s9868_s22  ;;  %v5058_v31 = vld [vmem:[#allocation3 + $0x98] sm:$0xff] }
 0x50a   : > { %4549 = vst [vmem:[#allocation3 + $0xb8] sm:$0xf] %v4541_v58 }
 0x50b   : > { %v4566_v61 = vpop.permute.xlu1 %4565 }
 0x50c   : > { %4894 = vrot.lane.b32.xlu1 %v9123_v48, %s9867_s27  ;;  %v4564_v52 = vpop.permute.xlu0 %4563 }
 0x50d   : > { %v4570_v14 = vsel %vm9994_vm8, %v4562_v15, %v4564_v52  ;;  %v4571_v29 = vsel %vm9995_vm6, %v4564_v52, %v4566_v61  ;;  %4864 = vrot.lane.b32.xlu0 %v9181_v39, %s9866_s21  ;;  %vm10007_vm8 = vcmask 64512  }
 0x50e   : > { %4578 = vst [vmem:[#allocation3 + $0xa8] sm:$0xf0] %v4570_v14  ;;  %4579 = vst [vmem:[#allocation3 + $0xb0] sm:$0xf0] %v4571_v29 }
 0x50f   : > { %v4468_v47 = vpop.permute.xlu1 %4467  ;;  %vm10008_vm6 = vmmov %vm10007_vm8 }
 0x510   : > { %v4477_v59 = vsel %vm1313_vm2, %v4468_v47, %v9197_v30  ;;  %4957 = vrot.lane.b32.xlu1 %v9134_v54, %s9869_s25  ;;  %v4568_v60 = vpop.permute.xlu0 %4567  ;;  %vm10000_vm2 = vmmov %vm9998_vm7 }
 0x511   : > { %4485 = vst [vmem:[#allocation3 + $0x80] sm:$0xf] %v4477_v59  ;;  %v4572_v46 = vsel %vm9996_vm13, %v4566_v61, %v4568_v60  ;;  %4925 = vrot.lane.b32.xlu0 %v9181_v39, %s9868_s22  ;;  %vm10009_vm13 = vmmov %vm10000_vm2  ;;  %s5298_s22 = sshll.u32 %s8554_s20, 4  ;;  %s9386_s22 = int_to_ptr.vmem [resolvable:$true] %s5298_s22 }
 0x512   : > { %4580 = vst [vmem:[#allocation3 + $0xb8] sm:$0xf0] %v4572_v46  ;;  %s5963_s24 = scalar_lea.vmem %s9386_s22, 512 }
 0x513   : > { %v4529_v0 = vpop.permute.xlu1 %4528  ;;  %p5964_p5 = scmp.ne.s32.totalorder %s9386_s22, %s5963_s24 }
 0x514   : > { %v4538_v28 = vsel %vm1376_vm14, %v4529_v0, %v4531_v9  ;;  %4961 = vrot.lane.b32.xlu1 %v9146_v44, %s9869_s25  ;;  %v4499_v45 = vpop.permute.xlu0 %4498 }
 0x515   : > { %4546 = vst [vmem:[#allocation3 + $0xa0] sm:$0xf] %v4538_v28  ;;  %v4508_v34 = vsel %vm1345_vm0, %v4499_v45, %v9210_v36  ;;  %4959 = vrot.lane.b32.xlu0 %v9138_v35, %s9869_s25  ;;  %v5060_v18 = vld [vmem:[#allocation3 + $0xa8] sm:$0xff]  ;;  %v5061_v30 = vld [vmem:[#allocation3 + $0xb0] sm:$0xff]  ;;  %vm10001_vm0 = vcmask 138240  }
 0x516   : > { %4516 = vst [vmem:[#allocation3 + $0x80] sm:$0xf0] %v4508_v34  ;;  %v5642_v10 = vpack.c.bf16 %v5060_v18, %v5056_v6  ;;  %v5674_v16 = vpack.c.bf16 %v5061_v30, %v5057_v19  ;;  %vm10002_vm14 = vmmov %vm10001_vm0 }
 0x517   : > { %v9257_v4 = vpop.permute.xlu1 %4591  ;;  %vm10003_vm1 = vmmov %vm10001_vm0 }
 0x518   : > { %4988 = vrot.lane.b32.xlu1 %v9123_v48, %s9870_s15  ;;  %v4560_v33 = vpop.permute.xlu0 %4559  ;;  %5643 = vmatprep.subr.bf16.mxu0 %v5642_v10 }
 0x519   : > { %v4569_v62 = vsel %vm9997_vm9, %v4560_v33, %v4562_v15  ;;  %4963 = vrot.lane.b32.xlu0 %v4949_v50, %s9869_s25  ;;  %v5062_v26 = vld [vmem:[#allocation3 + $0xb8] sm:$0xff]  ;;  %vm10010_vm9 = vmmov %vm10008_vm6 }
 0x51a   : > { %4577 = vst [vmem:[#allocation3 + $0xa0] sm:$0xf0] %v4569_v62  ;;  %v5672_v41 = vpack.c.bf16 %v5062_v26, %v5058_v31 }
 0x51b   : > { %v4596_v63 = vpop.permute.xlu1 %4595 }
 0x51c   : > { %4992 = vrot.lane.b32.xlu1 %v9138_v35, %s9870_s15  ;;  %5673 = vmatprep.subr.bf16.mxu1 %v5672_v41  ;;  %v4594_v17 = vpop.permute.xlu0 %4593 }
 0x51d   : > { %v4600_v3 = vsel %vm9998_vm7, %v9257_v4, %v4594_v17  ;;  %v4601_v37 = vsel %vm9999_vm11, %v4594_v17, %v4596_v63  ;;  %4990 = vrot.lane.b32.xlu0 %v9161_v24, %s9870_s15  ;;  %5675 = vmatpush1.bf16.msra.mxu1 %v5674_v16  ;;  %v5055_v36 = vld [vmem:[#allocation3 + $0x80] sm:$0xff]  ;;  %vm10011_vm7 = vmmov %vm10004_vm4 }
 0x51e   : > { %4608 = vst [vmem:[#allocation3 + $0xc8] sm:$0xf] %v4600_v3  ;;  %4609 = vst [vmem:[#allocation3 + $0xd0] sm:$0xf] %v4601_v37 }
 0x51f   : > { %v4623_v32 = vpop.permute.xlu1 %4622  ;;  %vm10012_vm11 = vmmov %vm10001_vm0 }
 0x520   : > { %5018 = vrot.lane.b32.xlu1 %v9134_v54, %s9941_s18  ;;  %v4598_v49 = vpop.permute.xlu0 %4597 }
 0x521   : > { %v4602_v23 = vsel %vm10000_vm2, %v4596_v63, %v4598_v49  ;;  %4994 = vrot.lane.b32.xlu0 %v5883_v53, %s9870_s15  ;;  %v5059_v7 = vld [vmem:[#allocation3 + $0xa0] sm:$0xff]  ;;  %vm10013_vm2 = vmmov %vm10008_vm6 }
 0x522   : > { %4610 = vst [vmem:[#allocation3 + $0xd8] sm:$0xf] %v4602_v23  ;;  %v5644_v55 = vpack.c.bf16 %v5059_v7, %v5055_v36 }
 0x523   : > { %v4627_v22 = vpop.permute.xlu1 %4626 }
 0x524   : > { %5022 = vrot.lane.b32.xlu1 %v9146_v44, %s9941_s18  ;;  %v4625_v24 = vpop.permute.xlu0 %4624  ;;  %5645 = vmatpush1.bf16.msra.mxu0 %v5644_v55 }
 0x525   : > { %v4631_v56 = vsel %vm10001_vm0, %v4623_v32, %v4625_v24  ;;  %v4632_v54 = vsel %vm10002_vm14, %v4625_v24, %v4627_v22  ;;  %5020 = vrot.lane.b32.xlu0 %v9138_v35, %s9941_s18  ;;  %v5095_v35 = vld [vmem:[%s9440_s6] sm:$0x3]  ;;  %vm10014_vm0 = vcmask 56320  }
 0x526   : > { %4639 = vst [vmem:[#allocation3 + $0xc8] sm:$0xf0] %v4631_v56  ;;  %4640 = vst [vmem:[#allocation3 + $0xd0] sm:$0xf0] %v4632_v54 }
 0x527   : > { %v4653_v40 = vpop.permute.xlu1 %4652  ;;  %vm10015_vm14 = vmmov %vm10014_vm0 }
 0x528   : > { %4955 = vrot.lane.b32.xlu1 %v9123_v48, %s9869_s25  ;;  %v4629_v5 = vpop.permute.xlu0 %4628  ;;  %s5453_s25 = sshll.u32 %s6043_s8, 9  ;;  %s6087_s8 = smov [#allocation11]  }
 0x529   : > { %v4633_v42 = vsel %vm10003_vm1, %v4627_v22, %v4629_v5  ;;  %5024 = vrot.lane.b32.xlu0 %v5010_v43, %s9941_s18  ;;  %vm10016_vm1 = vmmov %vm10014_vm0  ;;  %s9384_s17 = scalar_lea.hbm %s10056_s14, %s5453_s25  ;;  %s5967_s23 = sshll.u32 %s6087_s8, 4  ;;  %s5968_s23 = int_to_ptr.vmem [resolvable:$false] %s5967_s23 }
 0x52a   : > { %4641 = vst [vmem:[#allocation3 + $0xd8] sm:$0xf0] %v4633_v42  ;;  %s5969_s26 = scalar_lea.vmem %s5968_s23, 1024  ;;  %p5970_p12 = scmp.lt.s32.totalorder %s9386_s22, %s5968_s23 }
 0x52b   : > { %v4657_v44 = vpop.permute.xlu1 %4656  ;;  %p5971_p1 = scmp.lt.s32.totalorder %s5969_s26, %s5963_s24 }
 0x52c   : > { %5016 = vrot.lane.b32.xlu1 %v9123_v48, %s9941_s18  ;;  %v4655_v57 = vpop.permute.xlu0 %4654 }
 0x52d   : > { %v4661_v20 = vsel %vm10004_vm4, %v4653_v40, %v4655_v57  ;;  %v4662_v9 = vsel %vm10005_vm12, %v4655_v57, %v4657_v44  ;;  %4986 = vrot.lane.b32.xlu0 %v9181_v39, %s9870_s15  ;;  %v5064_v29 = vld [vmem:[#allocation3 + $0xc8] sm:$0xff]  ;;  %vm10017_vm4 = vcmask 48128   ;;  %s10055_s15 = sld [smem:[#allocation22_spill]]  ;;  %p5972_p3 = por %p5971_p1, %p5970_p12 }
 0x52e   : > { %4669 = vst [vmem:[#allocation3 + $0xe8] sm:$0xf] %v4661_v20  ;;  %4670 = vst [vmem:[#allocation3 + $0xf0] sm:$0xf] %v4662_v9 }
 0x52f   : > { %v4684_v51 = vpop.permute.xlu1 %4683  ;;  %vm10018_vm12 = vmmov %vm10017_vm4 }
 0x530   : > { %5098 = vperm.xlu1 %5795, %v5095_v35   ;;  %v4659_v48 = vpop.permute.xlu0 %4658 }
 0x531   : > { %v4663_v21 = vsel %vm10006_vm10, %v4657_v44, %v4659_v48  ;;  %4050 = vperm.xlu0 %5794, %v4047_v1   ;;  %v5066_v45 = vld [vmem:[#allocation3 + $0xd8] sm:$0xff]  ;;  %vm10019_vm10 = vmmov %vm10017_vm4 }
 0x532   : > { %4671 = vst [vmem:[#allocation3 + $0xf8] sm:$0xf] %v4663_v21 }
 0x533   : > { %v4688_v2 = vpop.permute.xlu1 %4687  ;;  %p10057_p8 = scmp.ne.s32.totalorder %s10055_s15, 0 }
 0x534   : > { %v4686_v8 = vpop.permute.xlu0 %4685 }
 0x535   : > { %v4692_v13 = vsel %vm10007_vm8, %v4684_v51, %v4686_v8  ;;  %v4693_v25 = vsel %vm10008_vm6, %v4686_v8, %v4688_v2  ;;  %vm10020_vm8 = vcmask 457728   ;;  %p5965_p2 = pnand %p5964_p5, %p10057_p8 }
 0x536   : > { %4700 = vst [vmem:[#allocation3 + $0xe8] sm:$0xf0] %v4692_v13  ;;  %4701 = vst [vmem:[#allocation3 + $0xf0] sm:$0xf0] %v4693_v25 }
 0x537   : > { %v4590_v39 = vpop.permute.xlu1 %4589  ;;  %vm10021_vm6 = vmmov %vm10020_vm8  ;;  %p5966_p11 = pneg %p5965_p2 }
 0x538   : > { %v4599_v15 = vsel %vm10009_vm13, %v4590_v39, %v9257_v4  ;;  %v4690_v11 = vpop.permute.xlu0 %4689  ;;  %v5065_v4 = vld [vmem:[#allocation3 + $0xd0] sm:$0xff]  ;;  %vm10022_vm13 = vmmov %vm10021_vm6 }
 0x539   : > { %4607 = vst [vmem:[#allocation3 + $0xc0] sm:$0xf] %v4599_v15  ;;  %v4694_v38 = vsel %vm10010_vm9, %v4688_v2, %v4690_v11  ;;  %vm10023_vm9 = vcmask 449536   ;;  %p5973_p0 = pnand %p5972_p3, %p5966_p11 }
 0x53a   : > { %4702 = vst [vmem:[#allocation3 + $0xf8] sm:$0xf0] %v4694_v38 }
 0x53b   : > { %v4651_v58 = vpop.permute.xlu1 %4650 }
 0x53c   : > { %v4660_v61 = vsel %vm10011_vm7, %v4651_v58, %v4653_v40  ;;  %v4621_v52 = vpop.permute.xlu0 %4620  ;;  %vm10024_vm7 = vmmov %vm10023_vm9 }
 0x53d   : > { %4668 = vst [vmem:[#allocation3 + $0xe0] sm:$0xf] %v4660_v61  ;;  %v4630_v14 = vsel %vm10012_vm11, %v4621_v52, %v4623_v32  ;;  %v5068_v47 = vld [vmem:[#allocation3 + $0xe8] sm:$0xff]  ;;  %v5069_v0 = vld [vmem:[#allocation3 + $0xf0] sm:$0xff]  ;;  %vm10025_vm11 = vmmov %vm10014_vm0 }
 0x53e   : > { %4638 = vst [vmem:[#allocation3 + $0xc0] sm:$0xf0] %v4630_v14  ;;  %v5646_v60 = vpack.c.bf16 %v5068_v47, %v5064_v29  ;;  %v5678_v10 = vpack.c.bf16 %v5069_v0, %v5065_v4 }
 0x53f   : > { %v4714_v59 = vpop.permute.xlu1 %4713 }
 0x540   : > { %v4682_v46 = vpop.permute.xlu0 %4681  ;;  %5647 = vmatprep.subr.bf16.mxu0 %v5646_v60 }
 0x541   : > { %v4691_v28 = vsel %vm10013_vm2, %v4682_v46, %v4684_v51  ;;  %v5070_v34 = vld [vmem:[#allocation3 + $0xf8] sm:$0xff]  ;;  %vm10026_vm2 = vmmov %vm10024_vm7 }
 0x542   : > { %4699 = vst [vmem:[#allocation3 + $0xe0] sm:$0xf0] %v4691_v28  ;;  %v5676_v18 = vpack.c.bf16 %v5070_v34, %v5066_v45 }
 0x543   : > { %v4718_v6 = vpop.permute.xlu1 %4717 }
 0x544   : > { %5677 = vmatprep.subr.bf16.mxu1 %v5676_v18  ;;  %v4716_v33 = vpop.permute.xlu0 %4715 }
 0x545   : > { %v4722_v50 = vsel %vm10014_vm0, %v4714_v59, %v4716_v33  ;;  %v4723_v30 = vsel %vm10015_vm14, %v4716_v33, %v4718_v6  ;;  %5679 = vmatpush1.bf16.msra.mxu1 %v5678_v10  ;;  %v5063_v63 = vld [vmem:[#allocation3 + $0xc0] sm:$0xff]  ;;  %vm10027_vm0 = vmmov %vm10021_vm6 }
 0x546   : > { %4730 = vst [vmem:[#allocation3 + $0x108] sm:$0xf] %v4722_v50  ;;  %4731 = vst [vmem:[#allocation3 + $0x110] sm:$0xf] %v4723_v30 }
 0x547   : > { %v4745_v62 = vpop.permute.xlu1 %4744  ;;  %vm10028_vm14 = vmmov %vm10017_vm4 }
 0x548   : > { %v4720_v31 = vpop.permute.xlu0 %4719 }
 0x549   : > { %v4724_v26 = vsel %vm10016_vm1, %v4718_v6, %v4720_v31  ;;  %v5067_v41 = vld [vmem:[#allocation3 + $0xe0] sm:$0xff]  ;;  %vm10029_vm1 = vmmov %vm10026_vm2 }
 0x54a   : > { %4732 = vst [vmem:[#allocation3 + $0x118] sm:$0xf] %v4724_v26  ;;  %v5648_v16 = vpack.c.bf16 %v5067_v41, %v5063_v63 }
 0x54b   : > { %v4749_v19 = vpop.permute.xlu1 %4748 }
 0x54c   : > { %v4747_v17 = vpop.permute.xlu0 %4746  ;;  %5649 = vmatpush1.bf16.msra.mxu0 %v5648_v16 }
 0x54d   : > { %v4753_v3 = vsel %vm10017_vm4, %v4745_v62, %v4747_v17  ;;  %v4754_v37 = vsel %vm10018_vm12, %v4747_v17, %v4749_v19  ;;  %vm10030_vm4 = vcmask 441344  }
 0x54e   : > { %4761 = vst [vmem:[#allocation3 + $0x108] sm:$0xf0] %v4753_v3  ;;  %4762 = vst [vmem:[#allocation3 + $0x110] sm:$0xf0] %v4754_v37 }
 0x54f   : > { %v4775_v32 = vpop.permute.xlu1 %4774  ;;  %vm10031_vm12 = vmmov %vm10030_vm4 }
 0x550   : > { %v4751_v53 = vpop.permute.xlu0 %4750 }
 0x551   : > { %v4755_v49 = vsel %vm10019_vm10, %v4749_v19, %v4751_v53  ;;  %vm10032_vm10 = vmmov %vm10030_vm4 }
 0x552   : > { %4763 = vst [vmem:[#allocation3 + $0x118] sm:$0xf0] %v4755_v49 }
 0x553   : > { %v4779_v23 = vpop.permute.xlu1 %4778 }
 0x554   : > { %v4777_v36 = vpop.permute.xlu0 %4776 }
 0x555   : > { %v4783_v7 = vsel %vm10020_vm8, %v4775_v32, %v4777_v36  ;;  %v4784_v22 = vsel %vm10021_vm6, %v4777_v36, %v4779_v23  ;;  %v5072_v48 = vld [vmem:[#allocation3 + $0x108] sm:$0xff]  ;;  %v5073_v61 = vld [vmem:[#allocation3 + $0x110] sm:$0xff]  ;;  %vm10033_vm8 = vcmask 375808  }
 0x556   : > { %4791 = vst [vmem:[#allocation3 + $0x128] sm:$0xf] %v4783_v7  ;;  %4792 = vst [vmem:[#allocation3 + $0x130] sm:$0xf] %v4784_v22 }
 0x557   : > { %v4806_v55 = vpop.permute.xlu1 %4805  ;;  %vm10034_vm6 = vmmov %vm10033_vm8 }
 0x558   : > { %v4781_v24 = vpop.permute.xlu0 %4780 }
 0x559   : > { %v4785_v56 = vsel %vm10022_vm13, %v4779_v23, %v4781_v24  ;;  %v5074_v15 = vld [vmem:[#allocation3 + $0x118] sm:$0xff]  ;;  %vm10035_vm13 = vmmov %vm10034_vm6 }
 0x55a   : > { %4793 = vst [vmem:[#allocation3 + $0x138] sm:$0xf] %v4785_v56 }
 0x55b   : > { %v4810_v54 = vpop.permute.xlu1 %4809 }
 0x55c   : > { %v4808_v40 = vpop.permute.xlu0 %4807 }
 0x55d   : > { %v4814_v5 = vsel %vm10023_vm9, %v4806_v55, %v4808_v40  ;;  %v4815_v43 = vsel %vm10024_vm7, %v4808_v40, %v4810_v54  ;;  %vm10036_vm9 = vcmask 367616  }
 0x55e   : > { %4822 = vst [vmem:[#allocation3 + $0x128] sm:$0xf0] %v4814_v5  ;;  %4823 = vst [vmem:[#allocation3 + $0x130] sm:$0xf0] %v4815_v43 }
 0x55f   : > { %v4712_v42 = vpop.permute.xlu1 %4711  ;;  %vm10037_vm7 = vmmov %vm10036_vm9 }
 0x560   : > { %v4721_v44 = vsel %vm10025_vm11, %v4712_v42, %v4714_v59  ;;  %v4812_v57 = vpop.permute.xlu0 %4811  ;;  %vm10038_vm11 = vmmov %vm10037_vm7 }
 0x561   : > { %4729 = vst [vmem:[#allocation3 + $0x100] sm:$0xf] %v4721_v44  ;;  %v4816_v35 = vsel %vm10026_vm2, %v4810_v54, %v4812_v57  ;;  %vm10039_vm2 = vcmask 359424  }
 0x562   : > { %4824 = vst [vmem:[#allocation3 + $0x138] sm:$0xf0] %v4816_v35 }
 0x563   : > { %v4773_v20 = vpop.permute.xlu1 %4772 }
 0x564   : > { %v4782_v9 = vsel %vm10027_vm0, %v4773_v20, %v4775_v32  ;;  %v4743_v51 = vpop.permute.xlu0 %4742  ;;  %vm10040_vm0 = vmmov %vm10039_vm2 }
 0x565   : > { %4790 = vst [vmem:[#allocation3 + $0x120] sm:$0xf] %v4782_v9  ;;  %v4752_v1 = vsel %vm10028_vm14, %v4743_v51, %v4745_v62  ;;  %v5076_v21 = vld [vmem:[#allocation3 + $0x128] sm:$0xff]  ;;  %v5077_v25 = vld [vmem:[#allocation3 + $0x130] sm:$0xff]  ;;  %vm10041_vm14 = vmmov %vm10030_vm4 }
 0x566   : > { %4760 = vst [vmem:[#allocation3 + $0x100] sm:$0xf0] %v4752_v1  ;;  %v5650_v8 = vpack.c.bf16 %v5076_v21, %v5072_v48  ;;  %v5682_v52 = vpack.c.bf16 %v5077_v25, %v5073_v61 }
 0x567   : > { %v4836_v2 = vpop.permute.xlu1 %4835 }
 0x568   : > { %v4804_v13 = vpop.permute.xlu0 %4803  ;;  %5651 = vmatprep.subr.bf16.mxu0 %v5650_v8 }
 0x569   : > { %v4813_v39 = vsel %vm10029_vm1, %v4804_v13, %v4806_v55  ;;  %v5078_v11 = vld [vmem:[#allocation3 + $0x138] sm:$0xff]  ;;  %vm10042_vm1 = vmmov %vm10040_vm0 }
 0x56a   : > { %4821 = vst [vmem:[#allocation3 + $0x120] sm:$0xf0] %v4813_v39  ;;  %v5680_v58 = vpack.c.bf16 %v5078_v11, %v5074_v15 }
 0x56b   : > { %v4840_v38 = vpop.permute.xlu1 %4839 }
 0x56c   : > { %5681 = vmatprep.subr.bf16.mxu1 %v5680_v58  ;;  %v4838_v14 = vpop.permute.xlu0 %4837 }
 0x56d   : > { %v4844_v29 = vsel %vm10030_vm4, %v4836_v2, %v4838_v14  ;;  %v4845_v47 = vsel %vm10031_vm12, %v4838_v14, %v4840_v38  ;;  %5683 = vmatpush1.bf16.msra.mxu1 %v5682_v52  ;;  %v5071_v0 = vld [vmem:[#allocation3 + $0x100] sm:$0xff]  ;;  %vm10043_vm4 = vmmov %vm10037_vm7 }
 0x56e   : > { %4852 = vst [vmem:[#allocation3 + $0x148] sm:$0xf] %v4844_v29  ;;  %4853 = vst [vmem:[#allocation3 + $0x150] sm:$0xf] %v4845_v47 }
 0x56f   : > { %v4867_v59 = vpop.permute.xlu1 %4866  ;;  %vm10044_vm12 = vmmov %vm10034_vm6 }
 0x570   : > { %v4842_v60 = vpop.permute.xlu0 %4841 }
 0x571   : > { %v4846_v46 = vsel %vm10032_vm10, %v4840_v38, %v4842_v60  ;;  %v5075_v28 = vld [vmem:[#allocation3 + $0x120] sm:$0xff]  ;;  %vm10045_vm10 = vmmov %vm10040_vm0 }
 0x572   : > { %4854 = vst [vmem:[#allocation3 + $0x158] sm:$0xf] %v4846_v46  ;;  %v5652_v34 = vpack.c.bf16 %v5075_v28, %v5071_v0 }
 0x573   : > { %v4871_v45 = vpop.permute.xlu1 %4870 }
 0x574   : > { %v4869_v6 = vpop.permute.xlu0 %4868  ;;  %5653 = vmatpush1.bf16.msra.mxu0 %v5652_v34 }
 0x575   : > { %v4875_v18 = vsel %vm10033_vm8, %v4867_v59, %v4869_v6  ;;  %v4876_v4 = vsel %vm10034_vm6, %v4869_v6, %v4871_v45  ;;  %vm10046_vm8 = vcmask 293888  }
 0x576   : > { %4883 = vst [vmem:[#allocation3 + $0x148] sm:$0xf0] %v4875_v18  ;;  %4884 = vst [vmem:[#allocation3 + $0x150] sm:$0xf0] %v4876_v4 }
 0x577   : > { %v4897_v10 = vpop.permute.xlu1 %4896  ;;  %vm10047_vm6 = vmmov %vm10046_vm8 }
 0x578   : > { %v4873_v33 = vpop.permute.xlu0 %4872 }
 0x579   : > { %v4877_v50 = vsel %vm10035_vm13, %v4871_v45, %v4873_v33  ;;  %vm10048_vm13 = vmmov %vm10047_vm6 }
 0x57a   : > { %4885 = vst [vmem:[#allocation3 + $0x158] sm:$0xf0] %v4877_v50 }
 0x57b   : > { %v4901_v30 = vpop.permute.xlu1 %4900 }
 0x57c   : > { %v4899_v62 = vpop.permute.xlu0 %4898 }
 0x57d   : > { %v4905_v31 = vsel %vm10036_vm9, %v4897_v10, %v4899_v62  ;;  %v4906_v26 = vsel %vm10037_vm7, %v4899_v62, %v4901_v30  ;;  %v5080_v5 = vld [vmem:[#allocation3 + $0x148] sm:$0xff]  ;;  %v5081_v21 = vld [vmem:[#allocation3 + $0x150] sm:$0xff]  ;;  %vm10049_vm9 = vcmask 285696  }
 0x57e   : > { %4913 = vst [vmem:[#allocation3 + $0x168] sm:$0xf] %v4905_v31  ;;  %4914 = vst [vmem:[#allocation3 + $0x170] sm:$0xf] %v4906_v26 }
 0x57f   : > { %v4928_v63 = vpop.permute.xlu1 %4927  ;;  %vm10050_vm7 = vmmov %vm10049_vm9 }
 0x580   : > { %v4903_v41 = vpop.permute.xlu0 %4902 }
 0x581   : > { %v4907_v19 = vsel %vm10038_vm11, %v4901_v30, %v4903_v41  ;;  %v5082_v9 = vld [vmem:[#allocation3 + $0x158] sm:$0xff]  ;;  %vm10051_vm11 = vmmov %vm10050_vm7 }
 0x582   : > { %4915 = vst [vmem:[#allocation3 + $0x178] sm:$0xf] %v4907_v19 }
 0x583   : > { %v4932_v16 = vpop.permute.xlu1 %4931 }
 0x584   : > { %v4930_v17 = vpop.permute.xlu0 %4929 }
 0x585   : > { %v4936_v3 = vsel %vm10039_vm2, %v4928_v63, %v4930_v17  ;;  %v4937_v37 = vsel %vm10040_vm0, %v4930_v17, %v4932_v16  ;;  %vm10052_vm2 = vmmov %vm10047_vm6 }
 0x586   : > { %4944 = vst [vmem:[#allocation3 + $0x168] sm:$0xf0] %v4936_v3  ;;  %4945 = vst [vmem:[#allocation3 + $0x170] sm:$0xf0] %v4937_v37 }
 0x587   : > { %v4834_v32 = vpop.permute.xlu1 %4833  ;;  %vm10053_vm0 = vmmov %vm10050_vm7 }
 0x588   : > { %v4843_v53 = vsel %vm10041_vm14, %v4834_v32, %v4836_v2  ;;  %v9333_v49 = vpop.f32.mrb[4].mxu1  ;;  %v4934_v23 = vpop.permute.xlu0 %4933 }
 0x589   : > { %4851 = vst [vmem:[#allocation3 + $0x140] sm:$0xf] %v4843_v53  ;;  %v9335_v36 = vpop.f32.mrb[5].mxu1  ;;  %v4938_v7 = vsel %vm10042_vm1, %v4932_v16, %v4934_v23 }
 0x58a   : > { %4946 = vst [vmem:[#allocation3 + $0x178] sm:$0xf0] %v4938_v7  ;;  %v9338_v55 = vpop.f32.mrb[4].mxu0 }
 0x58b   : > { %v4895_v22 = vpop.permute.xlu1 %4894  ;;  %v9341_v56 = vpop.f32.mrb[5].mxu0 }
 0x58c   : > { %v4904_v24 = vsel %vm10043_vm4, %v4895_v22, %v4897_v10  ;;  %v4865_v54 = vpop.permute.xlu0 %4864 }
 0x58d   : > { %4912 = vst [vmem:[#allocation3 + $0x160] sm:$0xf] %v4904_v24  ;;  %v4874_v40 = vsel %vm10044_vm12, %v4865_v54, %v4867_v59  ;;  %v5084_v43 = vld [vmem:[#allocation3 + $0x168] sm:$0xff]  ;;  %v5085_v35 = vld [vmem:[#allocation3 + $0x170] sm:$0xff] }
 0x58e   : > { %4882 = vst [vmem:[#allocation3 + $0x140] sm:$0xf0] %v4874_v40  ;;  %v5654_v44 = vpack.c.bf16 %v5084_v43, %v5080_v5  ;;  %v5686_v2 = vpack.c.bf16 %v5085_v35, %v5081_v21 }
 0x58f   : > { %v4958_v42 = vpop.permute.xlu1 %4957 }
 0x590   : > { %v4926_v57 = vpop.permute.xlu0 %4925  ;;  %5655 = vmatprep.subr.bf16.mxu0 %v5654_v44 }
 0x591   : > { %v4935_v20 = vsel %vm10045_vm10, %v4926_v57, %v4928_v63  ;;  %v5086_v51 = vld [vmem:[#allocation3 + $0x178] sm:$0xff] }
 0x592   : > { %4943 = vst [vmem:[#allocation3 + $0x160] sm:$0xf0] %v4935_v20  ;;  %v5684_v48 = vpack.c.bf16 %v5086_v51, %v5082_v9 }
 0x593   : > { %v4962_v1 = vpop.permute.xlu1 %4961 }
 0x594   : > { %5685 = vmatprep.subr.bf16.mxu1 %v5684_v48  ;;  %v4960_v8 = vpop.permute.xlu0 %4959 }
 0x595   : > { %v4966_v13 = vsel %vm10046_vm8, %v4958_v42, %v4960_v8  ;;  %v4967_v25 = vsel %vm10047_vm6, %v4960_v8, %v4962_v1  ;;  %5687 = vmatpush1.bf16.msra.mxu1 %v5686_v2  ;;  %v5079_v38 = vld [vmem:[#allocation3 + $0x140] sm:$0xff] }
 0x596   : > { %4974 = vst [vmem:[#allocation3 + $0x188] sm:$0xf] %v4966_v13  ;;  %4975 = vst [vmem:[#allocation3 + $0x190] sm:$0xf] %v4967_v25 }
 0x597   : > { %v4989_v39 = vpop.permute.xlu1 %4988 }
 0x598   : > { %v4964_v15 = vpop.permute.xlu0 %4963 }
 0x599   : > { %v4968_v11 = vsel %vm10048_vm13, %v4962_v1, %v4964_v15  ;;  %v5083_v58 = vld [vmem:[#allocation3 + $0x160] sm:$0xff] }
 0x59a   : > { %4976 = vst [vmem:[#allocation3 + $0x198] sm:$0xf] %v4968_v11  ;;  %v5656_v52 = vpack.c.bf16 %v5083_v58, %v5079_v38 }
 0x59b   : > { %v4993_v61 = vpop.permute.xlu1 %4992 }
 0x59c   : > { %v4991_v14 = vpop.permute.xlu0 %4990  ;;  %5657 = vmatpush1.bf16.msra.mxu0 %v5656_v52 }
 0x59d   : > { %v4997_v29 = vsel %vm10049_vm9, %v4989_v39, %v4991_v14  ;;  %v4998_v47 = vsel %vm10050_vm7, %v4991_v14, %v4993_v61 }
 0x59e   : > { %5005 = vst [vmem:[#allocation3 + $0x188] sm:$0xf0] %v4997_v29  ;;  %5006 = vst [vmem:[#allocation3 + $0x190] sm:$0xf0] %v4998_v47 }
 0x59f   : > { %v5019_v59 = vpop.permute.xlu1 %5018 }
 0x5a0   : > { %v4995_v60 = vpop.permute.xlu0 %4994 }
 0x5a1   : > { %v4999_v46 = vsel %vm10051_vm11, %v4993_v61, %v4995_v60 }
 0x5a2   : > { %5007 = vst [vmem:[#allocation3 + $0x198] sm:$0xf0] %v4999_v46 }
 0x5a3   : > { %v5023_v0 = vpop.permute.xlu1 %5022 }
 0x5a4   : > { %v5021_v28 = vpop.permute.xlu0 %5020 }
 0x5a5   : > { %v5027_v45 = vsel %vm1880_vm3, %v5019_v59, %v5021_v28  ;;  %v5028_v34 = vsel %vm1880_vm3, %v5021_v28, %v5023_v0  ;;  %v5088_v31 = vld [vmem:[#allocation3 + $0x188] sm:$0xff]  ;;  %v5089_v7 = vld [vmem:[#allocation3 + $0x190] sm:$0xff] }
 0x5a6   : > { %5035 = vst [vmem:[#allocation3 + $0x1a8] sm:$0xf] %v5027_v45  ;;  %5036 = vst [vmem:[#allocation3 + $0x1b0] sm:$0xf] %v5028_v34 }
 0x5a7   : > { %v4956_v6 = vpop.permute.xlu1 %4955 }
 0x5a8   : > { %v4965_v18 = vsel %vm10052_vm2, %v4956_v6, %v4958_v42  ;;  %v5025_v4 = vpop.permute.xlu0 %5024 }
 0x5a9   : > { %4973 = vst [vmem:[#allocation3 + $0x180] sm:$0xf] %v4965_v18  ;;  %v5029_v10 = vsel %vm1880_vm3, %v5023_v0, %v5025_v4  ;;  %v5090_v32 = vld [vmem:[#allocation3 + $0x198] sm:$0xff] }
 0x5aa   : > { %5037 = vst [vmem:[#allocation3 + $0x1b8] sm:$0xf] %v5029_v10 }
 0x5ab   : > { %v5017_v33 = vpop.permute.xlu1 %5016 }
 0x5ac   : > { %v5026_v50 = vsel %vm1880_vm3, %v5017_v33, %v5019_v59  ;;  %v4987_v30 = vpop.permute.xlu0 %4986 }
 0x5ad   : > { %5034 = vst [vmem:[#allocation3 + $0x1a0] sm:$0xf] %v5026_v50  ;;  %v4996_v62 = vsel %vm10053_vm0, %v4987_v30, %v4989_v39  ;;  %v5092_v26 = vld [vmem:[#allocation3 + $0x1a8] sm:$0xf]  ;;  %v5093_v19 = vld [vmem:[#allocation3 + $0x1b0] sm:$0xf] }
 0x5ae   : > { %5004 = vst [vmem:[#allocation3 + $0x180] sm:$0xf0] %v4996_v62  ;;  %v5658_v63 = vpack.c.bf16 %v5092_v26, %v5088_v31  ;;  %v5691_v54 = vpack.c.bf16 %v5093_v19, %v5089_v7 }
 0x5af   : > { %v5099_v42 = vpop.permute.xlu1 %5098 }
 0x5b0   : > { %v4051_v41 = vpop.permute.xlu0 %4050  ;;  %5660 = vmatprep.subr.msk.bf16.mxu0 %vm8172_vm15, %v5658_v63 }
 0x5b1   : > { %v4135_v16 = vadd.f32 %v9338_v55, %v4051_v41  ;;  %v4206_v17 = vadd.f32 %v9333_v49, %v4051_v41  ;;  %v4208_v3 = vadd.f32 %v9335_v36, %v4051_v41  ;;  %v4137_v37 = vadd.f32 %v9341_v56, %v4051_v41  ;;  %v5094_v53 = vld [vmem:[#allocation3 + $0x1b8] sm:$0xf] }
 0x5b2   : > { %v5688_v23 = vpack.c.bf16 %v5094_v53, %v5090_v32  ;;  %v5038_v56 = vld [vmem:[%s9439_s5] sm:$0x3] }
 0x5b3   : > { %v4215_v22 = vcombine.low %v4206_v17, %v4208_v3  ;;  %v4214_v24 = vcombine.low %v4135_v16, %v4137_v37 }
 0x5b4   : > { %5690 = vmatprep.subr.msk.bf16.mxu1 %vm8172_vm15, %v5688_v23  ;;  %v5091_v36 = vld [vmem:[#allocation3 + $0x1a0] sm:$0xf] }
 0x5b5   : > { %v4229_v40 = vrot.slane %v4215_v22, %v8531_v12  ;;  %v4222_v55 = vrot.slane %v4214_v24, %v8531_v12  ;;  %5693 = vmatpush1.bf16.msk.msra.mxu1 %vm8172_vm15, %v5691_v54  ;;  %v5087_v49 = vld [vmem:[#allocation3 + $0x180] sm:$0xff] }
 0x5b6   : > { %v5661_v5 = vpack.c.bf16 %v5091_v36, %v5087_v49 }
 0x5b7   : > { %v4230_v43 = vcombine.low %v4222_v55, %v4229_v40 }
 0x5b8   : > { %5663 = vmatpush1.bf16.msk.msra.mxu0 %vm8172_vm15, %v5661_v5  ;;  %5447 = vmatmul.mubr.msk.f32.vlgmr.msra.gmra.mrb[6].mxu1 %vm1250_vm5, %v5038_v56 }
 0x5b9   : > { %4232 = vst [vmem:[%s8554_s20 + $0x10] sm:$0xff] %v4230_v43 }
 0x5bb   : > { %5444 = vmatmul.mubr.msk.f32.vlgmr.msra.gmra.mrb[6].mxu0 %vm1250_vm5, %v5038_v56 }
 0x68b   : > { %v5253_v44 = vpop.f32.mrb[6].mxu1 }
 0x68c   : > { %v5254_v57 = vadd.f32 %v5253_v44, %v5099_v42  ;;  %v5255_v35 = vpop.f32.mrb[7].mxu1 }
 0x68d   : > { %v5256_v20 = vadd.f32 %v5255_v35, %v5099_v42 }
 0x68e   : > { %v5182_v9 = vpop.f32.mrb[6].mxu0 }
 0x68f   : > { %v5263_v51 = vcombine.low %v5254_v57, %v5256_v20  ;;  %v5183_v1 = vadd.f32 %v5182_v9, %v5099_v42  ;;  %v5184_v27 = vpop.f32.mrb[7].mxu0 }
 0x690   : > { %v5185_v48 = vadd.f32 %v5184_v27, %v5099_v42 }
 0x691   : > { %v5277_v2 = vrot.slane %v5263_v51, %v8531_v12 }
 0x692   : > { %v5262_v21 = vcombine.low %v5183_v1, %v5185_v48 }
 0x694   : > { %v5270_v8 = vrot.slane %v5262_v21, %v8531_v12 }
 0x696   : > { %v5278_v13 = vcombine.low %v5270_v8, %v5277_v2 }
 0x698   : > { %5280 = vst [vmem:[%s8554_s20 + $0x18] sm:$0xff] %v5278_v13 }
 0x699   : > { %5976 = shalt.err (!%p5973_p0)
}
 0x69a   : > { %s5977_s20 = scalar_lea.hbm %s9384_s17, 512  ;;  %s5981_s16 = scalar_lea.hbm %s10056_s14, 1024 }
 0x69b   : > { %p5978_p6 = scmp.ne.s32.totalorder %s9384_s17, %s5977_s20  ;;  %p5982_p9 = scmp.lt.u32.totalorder %s9384_s17, %s10056_s14 }
 0x69c   : > { %p5983_p4 = scmp.lt.u32.totalorder %s5981_s16, %s5977_s20  ;;  %p5985_p5 = scmp.lt.u32.totalorder %s5977_s20, %s9384_s17 }
 0x69d   : > { %p5979_p10 = pnand %p5978_p6, %p10057_p8 }
 0x69e   : > { %p5984_p13 = por %p5983_p4, %p5982_p9 }
 0x69f   : > { %p5980_p7 = pneg %p5979_p10 }
 0x6a0   : > { %p5986_p2 = por %p5985_p5, %p5984_p13 }
 0x6a2   : > { %p5987_p11 = pnand %p5986_p2, %p5980_p7 }
 0x6a4   : > { %5990 = shalt.err (!%p5987_p11)
}
 0x6a5   : > { %5699 = dma.vmem_to_hbm [thread:$0]  (%p10057_p8), %s9386_s22, 512, %s9384_s17, %s5282_s28  }
 0x6a6 PF: > { %s10058_s29 = sld [smem:[#allocation16_spill]]  ;;  %s10059_s18 = sld [smem:[#allocation24_spill]] }
 0x6a7   : > { %s10060_s3 = sld [smem:[#allocation20_spill]] }
 0x6ac   : > { %s5310_s4 = sand.u32 1, %s10058_s29   ;;  %p10061_p12 = scmp.ne.s32.totalorder %s10059_s18, 0 }
 0x6ad   : > { %p10062_p1 = scmp.ge.s32.totalorder %s10060_s3, 2  ;;  %s5311_s7 = scalar_lea.sflag [#allocation8], %s5310_s4 }
 0x6af   : > { %p5709_p3 = pnand %p10062_p1, %p10061_p12 }
 0x6b1   : > { %6026 = dma.done.wait (!%p5709_p3), %s5311_s7, 512  }
 0x6b2   : > { %6028 = vsyncadd (!%p5709_p3), %s5311_s7, 4294966784  ;;  %s32_s10 = sadd.s32 1, %s10060_s3   ;;  %s10063_s0 = sld [smem:[#allocation17_spill]] }
 0x6b3   : > { %p29_p0 = scmp.ge.s32.totalorder %s32_s10, 4   ;;  %s10064_s29 = sld [smem:[#allocation18_spill]] }
 0x6b4   : > { %s10065_s30 = sld [smem:[#allocation23_spill]]  ;;  %s10066_s8 = sld [smem:[#allocation19_spill]] }
 0x6b5   : > { %s10067_s9 = sld [smem:[#allocation21_spill]]  ;;  %31 = sbr.rel (!%p29_p0) target bundleno = 25 (0x19), region = 102 }
 0x6bc   :  { %5316 = vsyncpa [#allocation7], 1 }
 0x6bd   :  { %5318 = vsyncpa [#allocation7 + $0x1], 1 }
 0x6be   :  { %5319 = vsyncpa [#allocation10], 1 }
 0x6bf   :  { %5321 = vsyncpa [#allocation10 + $0x1], 1 }
 0x6c0   :  { %5322 = vsyncpa [#allocation8], 1 }
 0x6c1   :  { %5324 = vsyncpa [#allocation8 + $0x1], 1 }

</bundles_post_ra>
